<compile_context>
chip_gen: v7x
topology: tpu7x:2x2x1
jax: 0.10.0
libtpu: 0.0.40
codegen_flags: <defaults>
</compile_context>

<pallas_src>
import math

import jax
import jax.numpy as jnp
from jax import lax
from jax.experimental import pallas as pl
from jax.experimental.pallas import tpu as pltpu


_LN_EPS = 1e-6          # LayerNorm2d eps
_L2_EPS = 1e-12         # F.normalize eps
_HI = lax.Precision.HIGHEST
_SQRT_2_OVER_PI = 0.7978845608028654


# ----------------------------------------------------------- small helpers --

def _round_up(x, m):
    return ((x + m - 1) // m) * m


def _vmem_limit_bytes():
    try:
        cap = int(pltpu.get_tpu_info().vmem_capacity_bytes)
    except Exception:
        cap = 64 * 1024 * 1024  # conservative (v7x-sized) fallback
    return min(max(int(cap * 0.55), 16 * 1024 * 1024), 100 * 1024 * 1024)


_VMEM_LIMIT = _vmem_limit_bytes()


def _pick_bm(m, k, n_out, extra_cols=0):
    """Largest power-of-two row tile that fits the VMEM budget (double-buffered),
    capped so the grid has >= 2 steps (keeps both v7x TensorCores busy)."""
    budget = int(_VMEM_LIMIT * 0.75)
    weight_bytes = 2 * 4 * (k * n_out + n_out)
    bm = 1024
    while bm > 8 and 2 * 4 * bm * (k + n_out + extra_cols) + weight_bytes > budget:
        bm //= 2
    half = _round_up(max(-(-m // 2), 8), 8)
    return max(8, min(bm, half))


def _gelu_tanh(x):
    # TODO(synk): nn.GELU() default is exact erf; tanh approximation used here
    # (and in the pure-JAX reference) since erf lowering in Mosaic is not guaranteed.
    return 0.5 * x * (1.0 + jnp.tanh(_SQRT_2_OVER_PI * (x + 0.044715 * x * x * x)))


def _softmax_last(x):
    m = jnp.max(x, axis=-1, keepdims=True)
    e = jnp.exp(x - m)
    return e / jnp.sum(e, axis=-1, keepdims=True)


def _l2_normalize_rows(m):
    # F.normalize(p=2, dim=-1): x / max(||x||_2, eps)
    n = jnp.sqrt(jnp.sum(m * m, axis=-1, keepdims=True))
    return m / jnp.maximum(n, _L2_EPS)


# ---------------------------------------------------------------- kernels ---

def _ln_matmul_kernel(x_ref, w_ref, b_ref, o_ref):
    # Fused LayerNorm2d + 1x1 projection. gamma is folded into w, beta@w into b.
    x = x_ref[...]                                            # (bm, C)
    mu = jnp.mean(x, axis=1, keepdims=True)
    xc = x - mu
    var = jnp.mean(xc * xc, axis=1, keepdims=True)
    xn = xc * lax.rsqrt(var + _LN_EPS)
    o_ref[...] = (jnp.dot(xn, w_ref[...], preferred_element_type=jnp.float32)
                  + b_ref[...])


def _matmul_bias_res_kernel(x_ref, w_ref, b_ref, r_ref, o_ref):
    # o_proj (+bias) fused with the residual add.
    o_ref[...] = (jnp.dot(x_ref[...], w_ref[...], preferred_element_type=jnp.float32)
                  + b_ref[...] + r_ref[...])


def _matmul_res_kernel(x_ref, w_ref, r_ref, o_ref):
    # fc2 (no bias) fused with the residual add.
    o_ref[...] = (jnp.dot(x_ref[...], w_ref[...], preferred_element_type=jnp.float32)
                  + r_ref[...])


def _attn_core(qn, k, v):
    kn = _l2_normalize_rows(k)                                # (hd, HW)
    logits = lax.dot_general(qn, kn, (((1,), (1,)), ((), ())),
                             preferred_element_type=jnp.float32)   # (hd, hd)
    p = _softmax_last(logits)
    return jnp.dot(p, v, preferred_element_type=jnp.float32)       # (hd, HW)


def _attn_single_kernel(q_ref, k_ref, v_ref, o_ref):
    qn = _l2_normalize_rows(q_ref[0])
    o_ref[0] = _attn_core(qn, k_ref[0], v_ref[0])


def _attn_dual_kernel(q_ref, kt_ref, kd_ref, vt_ref, vd_ref, s_ref, o_ref):
    qn = _l2_normalize_rows(q_ref[0])
    o_t = _attn_core(qn, kt_ref[0], vt_ref[0])
    o_d = _attn_core(qn, kd_ref[0], vd_ref[0])
    s = s_ref[0]                                              # (1, 1), broadcasts
    o_ref[0] = s * o_t + (1.0 - s) * o_d


def _dwconv_gelu_kernel(zp_ref, wdw_ref, o_ref):
    # Depthwise 3x3 conv: 9 taps accumulated directly from the padded NHWC tile
    # (no im2col in HBM), fused with GELU.
    _, hout, wout, ch = o_ref.shape
    zp = zp_ref[0]                                            # (H+2, W+2, Ch)
    wdw = wdw_ref[...]                                        # (9, Ch)
    acc = jnp.zeros((hout, wout, ch), jnp.float32)
    for i in range(3):
        for j in range(3):
            tap = zp[i:i + hout, j:j + wout, :]
            acc = acc + tap * wdw[3 * i + j:3 * i + j + 1, :].reshape(1, 1, ch)
    o_ref[0] = _gelu_tanh(acc)


# ----------------------------------------------------------- pallas wrappers

def _row_matmul(kernel, x2d, w, *, bias=None, residual=None):
    m, k = x2d.shape
    n = w.shape[1]
    extra = n if residual is not None else 0
    bm = _pick_bm(m, k, n, extra_cols=extra)
    mp = _round_up(m, bm)
    if mp != m:
        x2d = jnp.pad(x2d, ((0, mp - m), (0, 0)))
        if residual is not None:
            residual = jnp.pad(residual, ((0, mp - m), (0, 0)))

    args = [x2d, w]
    in_specs = [pl.BlockSpec((bm, k), lambda i: (i, 0)),
                pl.BlockSpec((k, n), lambda i: (0, 0))]
    if bias is not None:
        args.append(bias)
        in_specs.append(pl.BlockSpec((1, n), lambda i: (0, 0)))
    if residual is not None:
        args.append(residual)
        in_specs.append(pl.BlockSpec((bm, n), lambda i: (i, 0)))

    out = pl.pallas_call(
        kernel,
        out_shape=jax.ShapeDtypeStruct((mp, n), jnp.float32),
        grid=(mp // bm,),
        in_specs=in_specs,
        out_specs=pl.BlockSpec((bm, n), lambda i: (i, 0)),
        compiler_params=pltpu.CompilerParams(
            dimension_semantics=("parallel",),
            vmem_limit_bytes=_VMEM_LIMIT),
        cost_estimate=pl.CostEstimate(
            flops=2 * mp * k * n,
            transcendentals=mp,
            bytes_accessed=4 * (mp * k + k * n
                                + (2 if residual is not None else 1) * mp * n)),
    )(*args)
    return out[:m] if mp != m else out


def _attention_single(q_h, k_h, v_h):
    g, hd, hw = q_h.shape
    spec = pl.BlockSpec((1, hd, hw), lambda i: (i, 0, 0))
    return pl.pallas_call(
        _attn_single_kernel,
        out_shape=jax.ShapeDtypeStruct((g, hd, hw), jnp.float32),
        grid=(g,),
        in_specs=[spec, spec, spec],
        out_specs=spec,
        compiler_params=pltpu.CompilerParams(
            dimension_semantics=("parallel",),
            vmem_limit_bytes=_VMEM_LIMIT),
        cost_estimate=pl.CostEstimate(
            flops=4 * g * hd * hd * hw,
            transcendentals=g * (hd * hd + 2 * hd),
            bytes_accessed=4 * 4 * g * hd * hw),
    )(q_h, k_h, v_h)


def _attention_dual(q_h, kt, kd, vt, vd, s_full):
    g, hd, hw = q_h.shape
    spec = pl.BlockSpec((1, hd, hw), lambda i: (i, 0, 0))
    sspec = pl.BlockSpec((1, 1, 1), lambda i: (i, 0, 0))
    return pl.pallas_call(
        _attn_dual_kernel,
        out_shape=jax.ShapeDtypeStruct((g, hd, hw), jnp.float32),
        grid=(g,),
        in_specs=[spec, spec, spec, spec, spec, sspec],
        out_specs=spec,
        compiler_params=pltpu.CompilerParams(
            dimension_semantics=("parallel",),
            vmem_limit_bytes=_VMEM_LIMIT),
        cost_estimate=pl.CostEstimate(
            flops=8 * g * hd * hd * hw,
            transcendentals=g * (2 * hd * hd + 3 * hd),
            bytes_accessed=4 * 7 * g * hd * hw),
    )(q_h, kt, kd, vt, vd, s_full)


def _dwconv3x3_gelu(z_nhwc, w_dw9):
    b, h, w, ch = z_nhwc.shape
    zp = jnp.pad(z_nhwc, ((0, 0), (1, 1), (1, 1), (0, 0)))
    return pl.pallas_call(
        _dwconv_gelu_kernel,
        out_shape=jax.ShapeDtypeStruct((b, h, w, ch), jnp.float32),
        grid=(b,),
        in_specs=[pl.BlockSpec((1, h + 2, w + 2, ch), lambda i: (i, 0, 0, 0)),
                  pl.BlockSpec((9, ch), lambda i: (0, 0))],
        out_specs=pl.BlockSpec((1, h, w, ch), lambda i: (i, 0, 0, 0)),
        compiler_params=pltpu.CompilerParams(
            dimension_semantics=("parallel",),
            vmem_limit_bytes=_VMEM_LIMIT),
        cost_estimate=pl.CostEstimate(
            flops=2 * 9 * b * h * w * ch,
            transcendentals=b * h * w * ch,
            bytes_accessed=4 * (b * (h + 2) * (w + 2) * ch + 9 * ch + b * h * w * ch)),
    )(zp, w_dw9)


# ------------------------------------------------------------------- layout --

def _nchw_to_rows(x):                     # (B,C,H,W) -> (B*H*W, C)
    b, c, h, w = x.shape
    return jnp.transpose(x, (0, 2, 3, 1)).reshape(b * h * w, c)


def _rows_to_heads(x2d, b, hw, nh):       # (B*HW, nh*hd) -> (B*nh, hd, HW)
    hd = x2d.shape[1] // nh
    t = x2d.reshape(b, hw, nh, hd)
    return jnp.transpose(t, (0, 2, 3, 1)).reshape(b * nh, hd, hw)


def _heads_to_rows(xh, b, hw, nh):        # (B*nh, hd, HW) -> (B*HW, nh*hd)
    hd = xh.shape[1]
    t = xh.reshape(b, nh, hd, hw)
    return jnp.transpose(t, (0, 3, 1, 2)).reshape(b * hw, nh * hd)


# ------------------------------------------------------------------ forward --

def structure_enhancement_forward(img_feat, aux_feats, params, num_heads):
    b, c, h, w = img_feat.shape
    hw = h * w
    nh = num_heads
    hd = c // nh

    x_rows = _nchw_to_rows(img_feat)                                     # (B*HW, C)

    # ---- cross-covariance attention branch --------------------------------
    q2d = _row_matmul(_ln_matmul_kernel, x_rows,
                      params["wq_fold"], bias=params["bq_fold"])         # (B*HW, C)
    kv_in = jnp.concatenate(list(aux_feats), axis=0)                     # (A*B,C,H,W)
    a = kv_in.shape[0] // b
    assert a in (1, 2), a
    kv_rows = _nchw_to_rows(kv_in)
    kv2d = _row_matmul(_ln_matmul_kernel, kv_rows,
                       params["wkv_fold"], bias=params["bkv_fold"])      # (A*B*HW,2C)

    q_h = _rows_to_heads(q2d, b, hw, nh)                                 # (B*nh,hd,HW)
    kv5 = jnp.transpose(kv2d.reshape(a * b, hw, 2, nh, hd), (2, 0, 3, 4, 1))
    k_all, v_all = kv5[0], kv5[1]                                        # (A*B,nh,hd,HW)

    if a == 1:
        qkv_h = _attention_single(q_h,
                                  k_all.reshape(b * nh, hd, hw),
                                  v_all.reshape(b * nh, hd, hw))
    else:
        s = jax.nn.sigmoid(params["attn_scale"].reshape(nh))
        s_full = jnp.tile(s, (b,)).reshape(b * nh, 1, 1)
        qkv_h = _attention_dual(q_h,
                                k_all[:b].reshape(b * nh, hd, hw),
                                k_all[b:].reshape(b * nh, hd, hw),
                                v_all[:b].reshape(b * nh, hd, hw),
                                v_all[b:].reshape(b * nh, hd, hw),
                                s_full)

    qkv_rows = _heads_to_rows(qkv_h, b, hw, nh)
    y_rows = _row_matmul(_matmul_bias_res_kernel, qkv_rows, params["wo"],
                         bias=params["bo2d"], residual=x_rows)           # (B*HW, C)

    # ---- ConvMlp: LN folded into fc1; dwconv+GELU fused; fc2 fused w/ residual
    z2d = _row_matmul(_ln_matmul_kernel, y_rows,
                      params["w1_fold"], bias=params["b1_fold"])         # (B*HW, hid)
    hid = z2d.shape[1]
    act = _dwconv3x3_gelu(z2d.reshape(b, h, w, hid), params["w_dw9"])    # (B,H,W,hid)
    out_rows = _row_matmul(_matmul_res_kernel, act.reshape(b * hw, hid),
                           params["w2"], residual=y_rows)                # (B*HW, C)

    return jnp.transpose(out_rows.reshape(b, h, w, c), (0, 3, 1, 2))     # NCHW


# ------------------------------------------------------------------- params --

def make_params(key, dim, num_heads):
    ks = jax.random.split(key, 14)
    it = iter(ks)

    def normal(shape, scale):
        return jax.random.normal(next(it), shape, jnp.float32) * scale

    def ln_pair():
        g = jax.random.uniform(next(it), (dim,), jnp.float32, 0.5, 1.5)
        bta = normal((dim,), 0.1)
        return g, bta

    g_q, b_q = ln_pair()
    g_kv, b_kv = ln_pair()
    g_f, b_f = ln_pair()
    sc = 1.0 / math.sqrt(dim)
    wq = normal((dim, dim), sc)            # stored (Cin, Cout)
    wkv = normal((dim, 2 * dim), sc)
    wo = normal((dim, dim), sc)
    bo = normal((dim,), 0.1)
    attn_scale = normal((num_heads, 1, 1), 1.0)
    w1 = normal((dim, dim), sc)
    w_dw = normal((3, 3, dim), 1.0 / 3.0)  # depthwise 3x3, per-channel taps
    w2 = normal((dim, dim), sc)

    return dict(
        # raw parameters (used by the pure-JAX reference)
        g_q=g_q, b_q=b_q, g_kv=g_kv, b_kv=b_kv, g_f=g_f, b_f=b_f,
        wq=wq, wkv=wkv, wo=wo, bo=bo, attn_scale=attn_scale,
        w1=w1, w_dw=w_dw, w2=w2,
        # LayerNorm2d affine folded into the following 1x1 projections
        wq_fold=g_q[:, None] * wq,
        bq_fold=jnp.dot(b_q, wq, precision=_HI).reshape(1, dim),
        wkv_fold=g_kv[:, None] * wkv,
        bkv_fold=jnp.dot(b_kv, wkv, precision=_HI).reshape(1, 2 * dim),
        w1_fold=g_f[:, None] * w1,
        b1_fold=jnp.dot(b_f, w1, precision=_HI).reshape(1, dim),
        bo2d=bo.reshape(1, dim),
        w_dw9=w_dw.reshape(9, dim),
    )


# -------------------------------------------------------- pure-JAX reference

def _ref_layernorm2d(x, gamma, beta, eps=_LN_EPS):
    u = jnp.mean(x, axis=1, keepdims=True)
    s = jnp.mean((x - u) ** 2, axis=1, keepdims=True)
    xn = (x - u) / jnp.sqrt(s + eps)
    return gamma[None, :, None, None] * xn + beta[None, :, None, None]


def _ref_conv1x1(x, w_io, bias=None):
    y = jnp.einsum("bchw,cd->bdhw", x, w_io, precision=_HI)
    if bias is not None:
        y = y + bias[None, :, None, None]
    return y


def _ref_forward(img_feat, aux_feats, p, num_heads):
    b, c, h, w = img_feat.shape
    nh, hd, hw = num_heads, c // num_heads, h * w

    q = _ref_layernorm2d(img_feat, p["g_q"], p["b_q"])
    kv_in = jnp.concatenate(list(aux_feats), axis=0)
    kv = _ref_layernorm2d(kv_in, p["g_kv"], p["b_kv"])
    q = _ref_conv1x1(q, p["wq"]).reshape(b, nh, hd, hw)
    kv = _ref_conv1x1(kv, p["wkv"])
    a = kv_in.shape[0] // b
    kv = jnp.transpose(kv.reshape(a * b, 2, nh, hd, hw), (1, 0, 2, 3, 4))
    k, v = kv[0], kv[1]

    def l2n(m):
        n = jnp.sqrt(jnp.sum(m * m, axis=-1, keepdims=True))
        return m / jnp.maximum(n, _L2_EPS)

    qn, kn = l2n(q), l2n(k)

    def attend(kk, vv):
        logits = jnp.einsum("bnij,bnkj->bnik", qn, kk, precision=_HI)
        return jnp.einsum("bnik,bnkj->bnij", jax.nn.softmax(logits, axis=-1), vv,
                          precision=_HI)

    if a == 1:
        qkv = attend(kn, v)
    else:
        s = jax.nn.sigmoid(p["attn_scale"])[None]            # (1, nh, 1, 1)
        qkv = s * attend(kn[:b], v[:b]) + (1.0 - s) * attend(kn[b:], v[b:])

    y = img_feat + _ref_conv1x1(qkv.reshape(b, c, h, w), p["wo"], p["bo"])

    z = _ref_conv1x1(_ref_layernorm2d(y, p["g_f"], p["b_f"]), p["w1"])
    z_nhwc = jnp.transpose(z, (0, 2, 3, 1))
    dw = lax.conv_general_dilated(
        z_nhwc, p["w_dw"].reshape(3, 3, 1, z.shape[1]),
        window_strides=(1, 1), padding=((1, 1), (1, 1)),
        dimension_numbers=("NHWC", "HWIO", "NHWC"),
        feature_group_count=z.shape[1], precision=_HI)
    ffn = _ref_conv1x1(_gelu_tanh(jnp.transpose(dw, (0, 3, 1, 2))), p["w2"])
    return y + ffn


# ---------------------------------------------------------------------- main

if __name__ == "__main__":
    dim, num_heads, batch, height, width = 32, 4, 2, 16, 16
    key = jax.random.PRNGKey(0)
    k_img, k_tex, k_dep, k_par = jax.random.split(key, 4)
    img = jax.random.normal(k_img, (batch, dim, height, width), jnp.float32)
    aux_tex = jax.random.normal(k_tex, (batch, dim, height, width), jnp.float32)
    aux_dep = jax.random.normal(k_dep, (batch, dim, height, width), jnp.float32)
    params = make_params(k_par, dim, num_heads)

    fwd = jax.jit(structure_enhancement_forward, static_argnums=(3,))

    # two-aux path (texture + depth), exercising the attn_scale blend
    out2 = jax.block_until_ready(fwd(img, [aux_tex, aux_dep], params, num_heads))
    ref2 = jax.block_until_ready(
        _ref_forward(img, [aux_tex, aux_dep], params, num_heads))
    assert out2.shape == (batch, dim, height, width), out2.shape
    err2 = float(jnp.max(jnp.abs(out2 - ref2)))
    assert err2 < 2e-3, f"two-aux mismatch vs reference: {err2}"

    # single-aux path
    out1 = jax.block_until_ready(fwd(img, [aux_tex], params, num_heads))
    ref1 = jax.block_until_ready(_ref_forward(img, [aux_tex], params, num_heads))
    err1 = float(jnp.max(jnp.abs(out1 - ref1)))
    assert err1 < 2e-3, f"single-aux mismatch vs reference: {err1}"

    print("KERNEL_OK")
</pallas_src>

<mosaic_0001>
module attributes {stable_mosaic.version = 11 : i64} {
  func.func @_ln_matmul_kernel(%arg0: i32, %arg1: memref<512x32xf32, #tpu.memory_space<vmem>>, %arg2: memref<32x64xf32, #tpu.memory_space<vmem>>, %arg3: memref<1x64xf32, #tpu.memory_space<vmem>>, %arg4: memref<512x64xf32, #tpu.memory_space<vmem>>) attributes {dimension_semantics = [#tpu.dimension_semantics<parallel>], iteration_bounds = array<i64: 2>, scalar_prefetch = 0 : i64, scratch_operands = 0 : i64, tpu.core_type = #tpu.core_type<tc>, window_params = [{transform_indices = @transform_0, window_bounds = array<i64: 512, 32>}, {pipeline_mode = #tpu.pipeline_mode<synchronous>, transform_indices = @transform_1, window_bounds = array<i64: 32, 64>}, {pipeline_mode = #tpu.pipeline_mode<synchronous>, transform_indices = @transform_2, window_bounds = array<i64: 1, 64>}, {transform_indices = @transform_3, window_bounds = array<i64: 512, 64>}]} {
    %c0 = arith.constant 0 : index
    %c0_0 = arith.constant 0 : index
    %0 = vector.load %arg1[%c0, %c0_0] : memref<512x32xf32, #tpu.memory_space<vmem>>, vector<512x32xf32>
    %cst = arith.constant dense<0.000000e+00> : vector<512xf32>
    %1 = vector.multi_reduction <add>, %0, %cst [1] : vector<512x32xf32> to vector<512xf32>
    %2 = vector.shape_cast %1 : vector<512xf32> to vector<512x1xf32>
    %cst_1 = arith.constant 3.200000e+01 : f32
    %3 = vector.broadcast %cst_1 : f32 to vector<512x1xf32>
    %4 = arith.divf %2, %3 : vector<512x1xf32>
    %5 = vector.broadcast %4 : vector<512x1xf32> to vector<512x32xf32>
    %6 = arith.subf %0, %5 : vector<512x32xf32>
    %7 = arith.mulf %6, %6 : vector<512x32xf32>
    %cst_2 = arith.constant dense<0.000000e+00> : vector<512xf32>
    %8 = vector.multi_reduction <add>, %7, %cst_2 [1] : vector<512x32xf32> to vector<512xf32>
    %9 = vector.shape_cast %8 : vector<512xf32> to vector<512x1xf32>
    %cst_3 = arith.constant 3.200000e+01 : f32
    %10 = vector.broadcast %cst_3 : f32 to vector<512x1xf32>
    %11 = arith.divf %9, %10 : vector<512x1xf32>
    %cst_4 = arith.constant 9.99999997E-7 : f32
    %12 = vector.broadcast %cst_4 : f32 to vector<512x1xf32>
    %13 = arith.addf %11, %12 : vector<512x1xf32>
    %14 = math.rsqrt %13 : vector<512x1xf32>
    %15 = vector.broadcast %14 : vector<512x1xf32> to vector<512x32xf32>
    %16 = arith.mulf %6, %15 : vector<512x32xf32>
    %c0_5 = arith.constant 0 : index
    %c0_6 = arith.constant 0 : index
    %17 = vector.load %arg2[%c0_5, %c0_6] : memref<32x64xf32, #tpu.memory_space<vmem>>, vector<32x64xf32>
    %cst_7 = arith.constant dense<0.000000e+00> : vector<512x64xf32>
    %18 = tpu.matmul %16, %17, %cst_7 {dimension_numbers = #tpu.dot_dimension_numbers<[1], [0], [0], [1], [0, 0, 1, 1], [], []>} : vector<512x32xf32>, vector<32x64xf32>, vector<512x64xf32> -> vector<512x64xf32>
    %c0_8 = arith.constant 0 : index
    %c0_9 = arith.constant 0 : index
    %19 = vector.load %arg3[%c0_8, %c0_9] : memref<1x64xf32, #tpu.memory_space<vmem>>, vector<1x64xf32>
    %20 = vector.broadcast %19 : vector<1x64xf32> to vector<512x64xf32>
    %21 = arith.addf %18, %20 : vector<512x64xf32>
    %c0_10 = arith.constant 0 : index
    %c0_11 = arith.constant 0 : index
    %22 = vector.load %arg4[%c0_10, %c0_11] : memref<512x64xf32, #tpu.memory_space<vmem>>, vector<512x64xf32>
    tpu.vector_store %arg4[%c0_10, %c0_11], %21 {strides = array<i32>} : memref<512x64xf32, #tpu.memory_space<vmem>>, vector<512x64xf32>,
    return
  }
  func.func @transform_0(%arg0: i32) -> (i32, i32) {
    %c0_i32 = arith.constant 0 : i32
    %c0_i32_0 = arith.constant 0 : i32
    return %arg0, %c0_i32 : i32, i32
  }
  func.func @transform_1(%arg0: i32) -> (i32, i32) {
    %c0_i32 = arith.constant 0 : i32
    %c0_i32_0 = arith.constant 0 : i32
    %c0_i32_1 = arith.constant 0 : i32
    return %c0_i32, %c0_i32_0 : i32, i32
  }
  func.func @transform_2(%arg0: i32) -> (i32, i32) {
    %c0_i32 = arith.constant 0 : i32
    %c0_i32_0 = arith.constant 0 : i32
    %c0_i32_1 = arith.constant 0 : i32
    return %c0_i32, %c0_i32_0 : i32, i32
  }
  func.func @transform_3(%arg0: i32) -> (i32, i32) {
    %c0_i32 = arith.constant 0 : i32
    %c0_i32_0 = arith.constant 0 : i32
    return %arg0, %c0_i32 : i32, i32
  }
}

module attributes {stable_mosaic.version = 11 : i64} {
  func.func @_ln_matmul_kernel(%arg0: i32, %arg1: memref<256x32xf32, #tpu.memory_space<vmem>>, %arg2: memref<32x32xf32, #tpu.memory_space<vmem>>, %arg3: memref<1x32xf32, #tpu.memory_space<vmem>>, %arg4: memref<256x32xf32, #tpu.memory_space<vmem>>) attributes {dimension_semantics = [#tpu.dimension_semantics<parallel>], iteration_bounds = array<i64: 2>, scalar_prefetch = 0 : i64, scratch_operands = 0 : i64, tpu.core_type = #tpu.core_type<tc>, window_params = [{transform_indices = @transform_0, window_bounds = array<i64: 256, 32>}, {pipeline_mode = #tpu.pipeline_mode<synchronous>, transform_indices = @transform_1, window_bounds = array<i64: 32, 32>}, {pipeline_mode = #tpu.pipeline_mode<synchronous>, transform_indices = @transform_2, window_bounds = array<i64: 1, 32>}, {transform_indices = @transform_3, window_bounds = array<i64: 256, 32>}]} {
    %c0 = arith.constant 0 : index
    %c0_0 = arith.constant 0 : index
    %0 = vector.load %arg1[%c0, %c0_0] : memref<256x32xf32, #tpu.memory_space<vmem>>, vector<256x32xf32>
    %cst = arith.constant dense<0.000000e+00> : vector<256xf32>
    %1 = vector.multi_reduction <add>, %0, %cst [1] : vector<256x32xf32> to vector<256xf32>
    %2 = vector.shape_cast %1 : vector<256xf32> to vector<256x1xf32>
    %cst_1 = arith.constant 3.200000e+01 : f32
    %3 = vector.broadcast %cst_1 : f32 to vector<256x1xf32>
    %4 = arith.divf %2, %3 : vector<256x1xf32>
    %5 = vector.broadcast %4 : vector<256x1xf32> to vector<256x32xf32>
    %6 = arith.subf %0, %5 : vector<256x32xf32>
    %7 = arith.mulf %6, %6 : vector<256x32xf32>
    %cst_2 = arith.constant dense<0.000000e+00> : vector<256xf32>
    %8 = vector.multi_reduction <add>, %7, %cst_2 [1] : vector<256x32xf32> to vector<256xf32>
    %9 = vector.shape_cast %8 : vector<256xf32> to vector<256x1xf32>
    %cst_3 = arith.constant 3.200000e+01 : f32
    %10 = vector.broadcast %cst_3 : f32 to vector<256x1xf32>
    %11 = arith.divf %9, %10 : vector<256x1xf32>
    %cst_4 = arith.constant 9.99999997E-7 : f32
    %12 = vector.broadcast %cst_4 : f32 to vector<256x1xf32>
    %13 = arith.addf %11, %12 : vector<256x1xf32>
    %14 = math.rsqrt %13 : vector<256x1xf32>
    %15 = vector.broadcast %14 : vector<256x1xf32> to vector<256x32xf32>
    %16 = arith.mulf %6, %15 : vector<256x32xf32>
    %c0_5 = arith.constant 0 : index
    %c0_6 = arith.constant 0 : index
    %17 = vector.load %arg2[%c0_5, %c0_6] : memref<32x32xf32, #tpu.memory_space<vmem>>, vector<32x32xf32>
    %cst_7 = arith.constant dense<0.000000e+00> : vector<256x32xf32>
    %18 = tpu.matmul %16, %17, %cst_7 {dimension_numbers = #tpu.dot_dimension_numbers<[1], [0], [0], [1], [0, 0, 1, 1], [], []>} : vector<256x32xf32>, vector<32x32xf32>, vector<256x32xf32> -> vector<256x32xf32>
    %c0_8 = arith.constant 0 : index
    %c0_9 = arith.constant 0 : index
    %19 = vector.load %arg3[%c0_8, %c0_9] : memref<1x32xf32, #tpu.memory_space<vmem>>, vector<1x32xf32>
    %20 = vector.broadcast %19 : vector<1x32xf32> to vector<256x32xf32>
    %21 = arith.addf %18, %20 : vector<256x32xf32>
    %c0_10 = arith.constant 0 : index
    %c0_11 = arith.constant 0 : index
    %22 = vector.load %arg4[%c0_10, %c0_11] : memref<256x32xf32, #tpu.memory_space<vmem>>, vector<256x32xf32>
    tpu.vector_store %arg4[%c0_10, %c0_11], %21 {strides = array<i32>} : memref<256x32xf32, #tpu.memory_space<vmem>>, vector<256x32xf32>,
    return
  }
  func.func @transform_0(%arg0: i32) -> (i32, i32) {
    %c0_i32 = arith.constant 0 : i32
    %c0_i32_0 = arith.constant 0 : i32
    return %arg0, %c0_i32 : i32, i32
  }
  func.func @transform_1(%arg0: i32) -> (i32, i32) {
    %c0_i32 = arith.constant 0 : i32
    %c0_i32_0 = arith.constant 0 : i32
    %c0_i32_1 = arith.constant 0 : i32
    return %c0_i32, %c0_i32_0 : i32, i32
  }
  func.func @transform_2(%arg0: i32) -> (i32, i32) {
    %c0_i32 = arith.constant 0 : i32
    %c0_i32_0 = arith.constant 0 : i32
    %c0_i32_1 = arith.constant 0 : i32
    return %c0_i32, %c0_i32_0 : i32, i32
  }
  func.func @transform_3(%arg0: i32) -> (i32, i32) {
    %c0_i32 = arith.constant 0 : i32
    %c0_i32_0 = arith.constant 0 : i32
    return %arg0, %c0_i32 : i32, i32
  }
}

module attributes {stable_mosaic.version = 11 : i64} {
  func.func @_attn_dual_kernel(%arg0: i32, %arg1: memref<1x8x256xf32, #tpu.memory_space<vmem>>, %arg2: memref<1x8x256xf32, #tpu.memory_space<vmem>>, %arg3: memref<1x8x256xf32, #tpu.memory_space<vmem>>, %arg4: memref<1x8x256xf32, #tpu.memory_space<vmem>>, %arg5: memref<1x8x256xf32, #tpu.memory_space<vmem>>, %arg6: memref<1x1x1xf32, #tpu.memory_space<vmem>>, %arg7: memref<1x8x256xf32, #tpu.memory_space<vmem>>) attributes {dimension_semantics = [#tpu.dimension_semantics<parallel>], iteration_bounds = array<i64: 8>, scalar_prefetch = 0 : i64, scratch_operands = 0 : i64, tpu.core_type = #tpu.core_type<tc>, window_params = [{transform_indices = @transform_0, window_bounds = array<i64: 1, 8, 256>}, {transform_indices = @transform_1, window_bounds = array<i64: 1, 8, 256>}, {transform_indices = @transform_2, window_bounds = array<i64: 1, 8, 256>}, {transform_indices = @transform_3, window_bounds = array<i64: 1, 8, 256>}, {transform_indices = @transform_4, window_bounds = array<i64: 1, 8, 256>}, {transform_indices = @transform_5, window_bounds = array<i64: 1, 1, 1>}, {transform_indices = @transform_6, window_bounds = array<i64: 1, 8, 256>}]} {
    %c0 = arith.constant 0 : index
    %c0_0 = arith.constant 0 : index
    %c0_1 = arith.constant 0 : index
    %0 = vector.load %arg1[%c0, %c0_0, %c0_1] : memref<1x8x256xf32, #tpu.memory_space<vmem>>, vector<1x8x256xf32>
    %1 = vector.shape_cast %0 : vector<1x8x256xf32> to vector<8x256xf32>
    %2 = arith.mulf %1, %1 : vector<8x256xf32>
    %cst = arith.constant dense<0.000000e+00> : vector<8xf32>
    %3 = vector.multi_reduction <add>, %2, %cst [1] : vector<8x256xf32> to vector<8xf32>
    %4 = vector.shape_cast %3 : vector<8xf32> to vector<8x1xf32>
    %5 = math.sqrt %4 : vector<8x1xf32>
    %cst_2 = arith.constant 9.99999996E-13 : f32
    %6 = vector.broadcast %cst_2 : f32 to vector<8x1xf32>
    %7 = arith.maximumf %5, %6 : vector<8x1xf32>
    %8 = vector.broadcast %7 : vector<8x1xf32> to vector<8x256xf32>
    %9 = arith.divf %1, %8 : vector<8x256xf32>
    %c0_3 = arith.constant 0 : index
    %c0_4 = arith.constant 0 : index
    %c0_5 = arith.constant 0 : index
    %10 = vector.load %arg2[%c0_3, %c0_4, %c0_5] : memref<1x8x256xf32, #tpu.memory_space<vmem>>, vector<1x8x256xf32>
    %11 = vector.shape_cast %10 : vector<1x8x256xf32> to vector<8x256xf32>
    %c0_6 = arith.constant 0 : index
    %c0_7 = arith.constant 0 : index
    %c0_8 = arith.constant 0 : index
    %12 = vector.load %arg4[%c0_6, %c0_7, %c0_8] : memref<1x8x256xf32, #tpu.memory_space<vmem>>, vector<1x8x256xf32>
    %13 = vector.shape_cast %12 : vector<1x8x256xf32> to vector<8x256xf32>
    %14 = arith.mulf %11, %11 : vector<8x256xf32>
    %cst_9 = arith.constant dense<0.000000e+00> : vector<8xf32>
    %15 = vector.multi_reduction <add>, %14, %cst_9 [1] : vector<8x256xf32> to vector<8xf32>
    %16 = vector.shape_cast %15 : vector<8xf32> to vector<8x1xf32>
    %17 = math.sqrt %16 : vector<8x1xf32>
    %cst_10 = arith.constant 9.99999996E-13 : f32
    %18 = vector.broadcast %cst_10 : f32 to vector<8x1xf32>
    %19 = arith.maximumf %17, %18 : vector<8x1xf32>
    %20 = vector.broadcast %19 : vector<8x1xf32> to vector<8x256xf32>
    %21 = arith.divf %11, %20 : vector<8x256xf32>
    %cst_11 = arith.constant dense<0.000000e+00> : vector<8x8xf32>
    %22 = tpu.matmul %9, %21, %cst_11 {dimension_numbers = #tpu.dot_dimension_numbers<[1], [1], [0], [0], [0, 0, 1, 0], [], []>} : vector<8x256xf32>, vector<8x256xf32>, vector<8x8xf32> -> vector<8x8xf32>
    %cst_12 = arith.constant dense<0xFF800000> : vector<8xf32>
    %23 = vector.multi_reduction <maximumf>, %22, %cst_12 [1] : vector<8x8xf32> to vector<8xf32>
    %24 = vector.shape_cast %23 : vector<8xf32> to vector<8x1xf32>
    %25 = vector.broadcast %24 : vector<8x1xf32> to vector<8x8xf32>
    %26 = arith.subf %22, %25 : vector<8x8xf32>
    %27 = math.exp %26 : vector<8x8xf32>
    %cst_13 = arith.constant dense<0.000000e+00> : vector<8xf32>
    %28 = vector.multi_reduction <add>, %27, %cst_13 [1] : vector<8x8xf32> to vector<8xf32>
    %29 = vector.shape_cast %28 : vector<8xf32> to vector<8x1xf32>
    %30 = vector.broadcast %29 : vector<8x1xf32> to vector<8x8xf32>
    %31 = arith.divf %27, %30 : vector<8x8xf32>
    %cst_14 = arith.constant dense<0.000000e+00> : vector<8x256xf32>
    %32 = tpu.matmul %31, %13, %cst_14 {dimension_numbers = #tpu.dot_dimension_numbers<[1], [0], [0], [1], [0, 0, 1, 1], [], []>} : vector<8x8xf32>, vector<8x256xf32>, vector<8x256xf32> -> vector<8x256xf32>
    %c0_15 = arith.constant 0 : index
    %c0_16 = arith.constant 0 : index
    %c0_17 = arith.constant 0 : index
    %33 = vector.load %arg3[%c0_15, %c0_16, %c0_17] : memref<1x8x256xf32, #tpu.memory_space<vmem>>, vector<1x8x256xf32>
    %34 = vector.shape_cast %33 : vector<1x8x256xf32> to vector<8x256xf32>
    %c0_18 = arith.constant 0 : index
    %c0_19 = arith.constant 0 : index
    %c0_20 = arith.constant 0 : index
    %35 = vector.load %arg5[%c0_18, %c0_19, %c0_20] : memref<1x8x256xf32, #tpu.memory_space<vmem>>, vector<1x8x256xf32>
    %36 = vector.shape_cast %35 : vector<1x8x256xf32> to vector<8x256xf32>
    %37 = arith.mulf %34, %34 : vector<8x256xf32>
    %cst_21 = arith.constant dense<0.000000e+00> : vector<8xf32>
    %38 = vector.multi_reduction <add>, %37, %cst_21 [1] : vector<8x256xf32> to vector<8xf32>
    %39 = vector.shape_cast %38 : vector<8xf32> to vector<8x1xf32>
    %40 = math.sqrt %39 : vector<8x1xf32>
    %cst_22 = arith.constant 9.99999996E-13 : f32
    %41 = vector.broadcast %cst_22 : f32 to vector<8x1xf32>
    %42 = arith.maximumf %40, %41 : vector<8x1xf32>
    %43 = vector.broadcast %42 : vector<8x1xf32> to vector<8x256xf32>
    %44 = arith.divf %34, %43 : vector<8x256xf32>
    %cst_23 = arith.constant dense<0.000000e+00> : vector<8x8xf32>
    %45 = tpu.matmul %9, %44, %cst_23 {dimension_numbers = #tpu.dot_dimension_numbers<[1], [1], [0], [0], [0, 0, 1, 0], [], []>} : vector<8x256xf32>, vector<8x256xf32>, vector<8x8xf32> -> vector<8x8xf32>
    %cst_24 = arith.constant dense<0xFF800000> : vector<8xf32>
    %46 = vector.multi_reduction <maximumf>, %45, %cst_24 [1] : vector<8x8xf32> to vector<8xf32>
    %47 = vector.shape_cast %46 : vector<8xf32> to vector<8x1xf32>
    %48 = vector.broadcast %47 : vector<8x1xf32> to vector<8x8xf32>
    %49 = arith.subf %45, %48 : vector<8x8xf32>
    %50 = math.exp %49 : vector<8x8xf32>
    %cst_25 = arith.constant dense<0.000000e+00> : vector<8xf32>
    %51 = vector.multi_reduction <add>, %50, %cst_25 [1] : vector<8x8xf32> to vector<8xf32>
    %52 = vector.shape_cast %51 : vector<8xf32> to vector<8x1xf32>
    %53 = vector.broadcast %52 : vector<8x1xf32> to vector<8x8xf32>
    %54 = arith.divf %50, %53 : vector<8x8xf32>
    %cst_26 = arith.constant dense<0.000000e+00> : vector<8x256xf32>
    %55 = tpu.matmul %54, %36, %cst_26 {dimension_numbers = #tpu.dot_dimension_numbers<[1], [0], [0], [1], [0, 0, 1, 1], [], []>} : vector<8x8xf32>, vector<8x256xf32>, vector<8x256xf32> -> vector<8x256xf32>
    %c0_27 = arith.constant 0 : index
    %c0_28 = arith.constant 0 : index
    %c0_29 = arith.constant 0 : index
    %56 = vector.load %arg6[%c0_27, %c0_28, %c0_29] : memref<1x1x1xf32, #tpu.memory_space<vmem>>, vector<1x1x1xf32>
    %57 = vector.shape_cast %56 : vector<1x1x1xf32> to vector<1x1xf32>
    %58 = vector.broadcast %57 : vector<1x1xf32> to vector<8x256xf32>
    %59 = arith.mulf %58, %32 : vector<8x256xf32>
    %cst_30 = arith.constant 1.000000e+00 : f32
    %60 = vector.broadcast %cst_30 : f32 to vector<1x1xf32>
    %61 = arith.subf %60, %57 : vector<1x1xf32>
    %62 = vector.broadcast %61 : vector<1x1xf32> to vector<8x256xf32>
    %63 = arith.mulf %62, %55 : vector<8x256xf32>
    %64 = arith.addf %59, %63 : vector<8x256xf32>
    %c0_31 = arith.constant 0 : index
    %c0_32 = arith.constant 0 : index
    %c0_33 = arith.constant 0 : index
    %65 = vector.load %arg7[%c0_31, %c0_32, %c0_33] : memref<1x8x256xf32, #tpu.memory_space<vmem>>, vector<1x8x256xf32>
    %66 = vector.shape_cast %65 : vector<1x8x256xf32> to vector<8x256xf32>
    %67 = vector.shape_cast %64 : vector<8x256xf32> to vector<1x8x256xf32>
    tpu.vector_store %arg7[%c0_31, %c0_32, %c0_33], %67 {strides = array<i32>} : memref<1x8x256xf32, #tpu.memory_space<vmem>>, vector<1x8x256xf32>,
    return
  }
  func.func @transform_0(%arg0: i32) -> (i32, i32, i32) {
    %c0_i32 = arith.constant 0 : i32
    %c0_i32_0 = arith.constant 0 : i32
    %c0_i32_1 = arith.constant 0 : i32
    return %arg0, %c0_i32, %c0_i32_0 : i32, i32, i32
  }
  func.func @transform_1(%arg0: i32) -> (i32, i32, i32) {
    %c0_i32 = arith.constant 0 : i32
    %c0_i32_0 = arith.constant 0 : i32
    %c0_i32_1 = arith.constant 0 : i32
    return %arg0, %c0_i32, %c0_i32_0 : i32, i32, i32
  }
  func.func @transform_2(%arg0: i32) -> (i32, i32, i32) {
    %c0_i32 = arith.constant 0 : i32
    %c0_i32_0 = arith.constant 0 : i32
    %c0_i32_1 = arith.constant 0 : i32
    return %arg0, %c0_i32, %c0_i32_0 : i32, i32, i32
  }
  func.func @transform_3(%arg0: i32) -> (i32, i32, i32) {
    %c0_i32 = arith.constant 0 : i32
    %c0_i32_0 = arith.constant 0 : i32
    %c0_i32_1 = arith.constant 0 : i32
    return %arg0, %c0_i32, %c0_i32_0 : i32, i32, i32
  }
  func.func @transform_4(%arg0: i32) -> (i32, i32, i32) {
    %c0_i32 = arith.constant 0 : i32
    %c0_i32_0 = arith.constant 0 : i32
    %c0_i32_1 = arith.constant 0 : i32
    return %arg0, %c0_i32, %c0_i32_0 : i32, i32, i32
  }
  func.func @transform_5(%arg0: i32) -> (i32, i32, i32) {
    %c0_i32 = arith.constant 0 : i32
    %c0_i32_0 = arith.constant 0 : i32
    %c0_i32_1 = arith.constant 0 : i32
    return %arg0, %c0_i32, %c0_i32_0 : i32, i32, i32
  }
  func.func @transform_6(%arg0: i32) -> (i32, i32, i32) {
    %c0_i32 = arith.constant 0 : i32
    %c0_i32_0 = arith.constant 0 : i32
    %c0_i32_1 = arith.constant 0 : i32
    return %arg0, %c0_i32, %c0_i32_0 : i32, i32, i32
  }
}

module attributes {stable_mosaic.version = 11 : i64} {
  func.func @_matmul_bias_res_kernel(%arg0: i32, %arg1: memref<256x32xf32, #tpu.memory_space<vmem>>, %arg2: memref<32x32xf32, #tpu.memory_space<vmem>>, %arg3: memref<1x32xf32, #tpu.memory_space<vmem>>, %arg4: memref<256x32xf32, #tpu.memory_space<vmem>>, %arg5: memref<256x32xf32, #tpu.memory_space<vmem>>) attributes {dimension_semantics = [#tpu.dimension_semantics<parallel>], iteration_bounds = array<i64: 2>, scalar_prefetch = 0 : i64, scratch_operands = 0 : i64, tpu.core_type = #tpu.core_type<tc>, window_params = [{transform_indices = @transform_0, window_bounds = array<i64: 256, 32>}, {pipeline_mode = #tpu.pipeline_mode<synchronous>, transform_indices = @transform_1, window_bounds = array<i64: 32, 32>}, {pipeline_mode = #tpu.pipeline_mode<synchronous>, transform_indices = @transform_2, window_bounds = array<i64: 1, 32>}, {transform_indices = @transform_3, window_bounds = array<i64: 256, 32>}, {transform_indices = @transform_4, window_bounds = array<i64: 256, 32>}]} {
    %c0 = arith.constant 0 : index
    %c0_0 = arith.constant 0 : index
    %0 = vector.load %arg1[%c0, %c0_0] : memref<256x32xf32, #tpu.memory_space<vmem>>, vector<256x32xf32>
    %c0_1 = arith.constant 0 : index
    %c0_2 = arith.constant 0 : index
    %1 = vector.load %arg2[%c0_1, %c0_2] : memref<32x32xf32, #tpu.memory_space<vmem>>, vector<32x32xf32>
    %cst = arith.constant dense<0.000000e+00> : vector<256x32xf32>
    %2 = tpu.matmul %0, %1, %cst {dimension_numbers = #tpu.dot_dimension_numbers<[1], [0], [0], [1], [0, 0, 1, 1], [], []>} : vector<256x32xf32>, vector<32x32xf32>, vector<256x32xf32> -> vector<256x32xf32>
    %c0_3 = arith.constant 0 : index
    %c0_4 = arith.constant 0 : index
    %3 = vector.load %arg3[%c0_3, %c0_4] : memref<1x32xf32, #tpu.memory_space<vmem>>, vector<1x32xf32>
    %4 = vector.broadcast %3 : vector<1x32xf32> to vector<256x32xf32>
    %5 = arith.addf %2, %4 : vector<256x32xf32>
    %c0_5 = arith.constant 0 : index
    %c0_6 = arith.constant 0 : index
    %6 = vector.load %arg4[%c0_5, %c0_6] : memref<256x32xf32, #tpu.memory_space<vmem>>, vector<256x32xf32>
    %7 = arith.addf %5, %6 : vector<256x32xf32>
    %c0_7 = arith.constant 0 : index
    %c0_8 = arith.constant 0 : index
    %8 = vector.load %arg5[%c0_7, %c0_8] : memref<256x32xf32, #tpu.memory_space<vmem>>, vector<256x32xf32>
    tpu.vector_store %arg5[%c0_7, %c0_8], %7 {strides = array<i32>} : memref<256x32xf32, #tpu.memory_space<vmem>>, vector<256x32xf32>,
    return
  }
  func.func @transform_0(%arg0: i32) -> (i32, i32) {
    %c0_i32 = arith.constant 0 : i32
    %c0_i32_0 = arith.constant 0 : i32
    return %arg0, %c0_i32 : i32, i32
  }
  func.func @transform_1(%arg0: i32) -> (i32, i32) {
    %c0_i32 = arith.constant 0 : i32
    %c0_i32_0 = arith.constant 0 : i32
    %c0_i32_1 = arith.constant 0 : i32
    return %c0_i32, %c0_i32_0 : i32, i32
  }
  func.func @transform_2(%arg0: i32) -> (i32, i32) {
    %c0_i32 = arith.constant 0 : i32
    %c0_i32_0 = arith.constant 0 : i32
    %c0_i32_1 = arith.constant 0 : i32
    return %c0_i32, %c0_i32_0 : i32, i32
  }
  func.func @transform_3(%arg0: i32) -> (i32, i32) {
    %c0_i32 = arith.constant 0 : i32
    %c0_i32_0 = arith.constant 0 : i32
    return %arg0, %c0_i32 : i32, i32
  }
  func.func @transform_4(%arg0: i32) -> (i32, i32) {
    %c0_i32 = arith.constant 0 : i32
    %c0_i32_0 = arith.constant 0 : i32
    return %arg0, %c0_i32 : i32, i32
  }
}

module attributes {stable_mosaic.version = 11 : i64} {
  func.func @_dwconv_gelu_kernel(%arg0: i32, %arg1: memref<1x18x18x32xf32, #tpu.memory_space<vmem>>, %arg2: memref<9x32xf32, #tpu.memory_space<vmem>>, %arg3: memref<1x16x16x32xf32, #tpu.memory_space<vmem>>) attributes {dimension_semantics = [#tpu.dimension_semantics<parallel>], iteration_bounds = array<i64: 2>, scalar_prefetch = 0 : i64, scratch_operands = 0 : i64, tpu.core_type = #tpu.core_type<tc>, window_params = [{transform_indices = @transform_0, window_bounds = array<i64: 1, 18, 18, 32>}, {pipeline_mode = #tpu.pipeline_mode<synchronous>, transform_indices = @transform_1, window_bounds = array<i64: 9, 32>}, {transform_indices = @transform_2, window_bounds = array<i64: 1, 16, 16, 32>}]} {
    %c0 = arith.constant 0 : index
    %c0_0 = arith.constant 0 : index
    %c0_1 = arith.constant 0 : index
    %c0_2 = arith.constant 0 : index
    %0 = vector.load %arg1[%c0, %c0_0, %c0_1, %c0_2] : memref<1x18x18x32xf32, #tpu.memory_space<vmem>>, vector<1x18x18x32xf32>
    %1 = vector.shape_cast %0 : vector<1x18x18x32xf32> to vector<18x18x32xf32>
    %c0_3 = arith.constant 0 : index
    %c0_4 = arith.constant 0 : index
    %2 = vector.load %arg2[%c0_3, %c0_4] : memref<9x32xf32, #tpu.memory_space<vmem>>, vector<9x32xf32>
    %cst = arith.constant 0.000000e+00 : f32
    %3 = vector.broadcast %cst : f32 to vector<16x16x32xf32>
    %4 = vector.extract_strided_slice %1 {offsets = [0, 0, 0], sizes = [16, 16, 32], strides = [1, 1, 1]} : vector<18x18x32xf32> to vector<16x16x32xf32>
    %5 = vector.extract_strided_slice %2 {offsets = [0, 0], sizes = [1, 32], strides = [1, 1]} : vector<9x32xf32> to vector<1x32xf32>
    %6 = vector.shape_cast %5 : vector<1x32xf32> to vector<1x1x32xf32>
    %7 = vector.broadcast %6 : vector<1x1x32xf32> to vector<16x16x32xf32>
    %8 = arith.mulf %4, %7 : vector<16x16x32xf32>
    %9 = arith.addf %3, %8 : vector<16x16x32xf32>
    %10 = vector.extract_strided_slice %1 {offsets = [0, 1, 0], sizes = [16, 16, 32], strides = [1, 1, 1]} : vector<18x18x32xf32> to vector<16x16x32xf32>
    %11 = vector.extract_strided_slice %2 {offsets = [1, 0], sizes = [1, 32], strides = [1, 1]} : vector<9x32xf32> to vector<1x32xf32>
    %12 = vector.shape_cast %11 : vector<1x32xf32> to vector<1x1x32xf32>
    %13 = vector.broadcast %12 : vector<1x1x32xf32> to vector<16x16x32xf32>
    %14 = arith.mulf %10, %13 : vector<16x16x32xf32>
    %15 = arith.addf %9, %14 : vector<16x16x32xf32>
    %16 = vector.extract_strided_slice %1 {offsets = [0, 2, 0], sizes = [16, 16, 32], strides = [1, 1, 1]} : vector<18x18x32xf32> to vector<16x16x32xf32>
    %17 = vector.extract_strided_slice %2 {offsets = [2, 0], sizes = [1, 32], strides = [1, 1]} : vector<9x32xf32> to vector<1x32xf32>
    %18 = vector.shape_cast %17 : vector<1x32xf32> to vector<1x1x32xf32>
    %19 = vector.broadcast %18 : vector<1x1x32xf32> to vector<16x16x32xf32>
    %20 = arith.mulf %16, %19 : vector<16x16x32xf32>
    %21 = arith.addf %15, %20 : vector<16x16x32xf32>
    %22 = vector.extract_strided_slice %1 {offsets = [1, 0, 0], sizes = [16, 16, 32], strides = [1, 1, 1]} : vector<18x18x32xf32> to vector<16x16x32xf32>
    %23 = vector.extract_strided_slice %2 {offsets = [3, 0], sizes = [1, 32], strides = [1, 1]} : vector<9x32xf32> to vector<1x32xf32>
    %24 = vector.shape_cast %23 : vector<1x32xf32> to vector<1x1x32xf32>
    %25 = vector.broadcast %24 : vector<1x1x32xf32> to vector<16x16x32xf32>
    %26 = arith.mulf %22, %25 : vector<16x16x32xf32>
    %27 = arith.addf %21, %26 : vector<16x16x32xf32>
    %28 = vector.extract_strided_slice %1 {offsets = [1, 1, 0], sizes = [16, 16, 32], strides = [1, 1, 1]} : vector<18x18x32xf32> to vector<16x16x32xf32>
    %29 = vector.extract_strided_slice %2 {offsets = [4, 0], sizes = [1, 32], strides = [1, 1]} : vector<9x32xf32> to vector<1x32xf32>
    %30 = vector.shape_cast %29 : vector<1x32xf32> to vector<1x1x32xf32>
    %31 = vector.broadcast %30 : vector<1x1x32xf32> to vector<16x16x32xf32>
    %32 = arith.mulf %28, %31 : vector<16x16x32xf32>
    %33 = arith.addf %27, %32 : vector<16x16x32xf32>
    %34 = vector.extract_strided_slice %1 {offsets = [1, 2, 0], sizes = [16, 16, 32], strides = [1, 1, 1]} : vector<18x18x32xf32> to vector<16x16x32xf32>
    %35 = vector.extract_strided_slice %2 {offsets = [5, 0], sizes = [1, 32], strides = [1, 1]} : vector<9x32xf32> to vector<1x32xf32>
    %36 = vector.shape_cast %35 : vector<1x32xf32> to vector<1x1x32xf32>
    %37 = vector.broadcast %36 : vector<1x1x32xf32> to vector<16x16x32xf32>
    %38 = arith.mulf %34, %37 : vector<16x16x32xf32>
    %39 = arith.addf %33, %38 : vector<16x16x32xf32>
    %40 = vector.extract_strided_slice %1 {offsets = [2, 0, 0], sizes = [16, 16, 32], strides = [1, 1, 1]} : vector<18x18x32xf32> to vector<16x16x32xf32>
    %41 = vector.extract_strided_slice %2 {offsets = [6, 0], sizes = [1, 32], strides = [1, 1]} : vector<9x32xf32> to vector<1x32xf32>
    %42 = vector.shape_cast %41 : vector<1x32xf32> to vector<1x1x32xf32>
    %43 = vector.broadcast %42 : vector<1x1x32xf32> to vector<16x16x32xf32>
    %44 = arith.mulf %40, %43 : vector<16x16x32xf32>
    %45 = arith.addf %39, %44 : vector<16x16x32xf32>
    %46 = vector.extract_strided_slice %1 {offsets = [2, 1, 0], sizes = [16, 16, 32], strides = [1, 1, 1]} : vector<18x18x32xf32> to vector<16x16x32xf32>
    %47 = vector.extract_strided_slice %2 {offsets = [7, 0], sizes = [1, 32], strides = [1, 1]} : vector<9x32xf32> to vector<1x32xf32>
    %48 = vector.shape_cast %47 : vector<1x32xf32> to vector<1x1x32xf32>
    %49 = vector.broadcast %48 : vector<1x1x32xf32> to vector<16x16x32xf32>
    %50 = arith.mulf %46, %49 : vector<16x16x32xf32>
    %51 = arith.addf %45, %50 : vector<16x16x32xf32>
    %52 = vector.extract_strided_slice %1 {offsets = [2, 2, 0], sizes = [16, 16, 32], strides = [1, 1, 1]} : vector<18x18x32xf32> to vector<16x16x32xf32>
    %53 = vector.extract_strided_slice %2 {offsets = [8, 0], sizes = [1, 32], strides = [1, 1]} : vector<9x32xf32> to vector<1x32xf32>
    %54 = vector.shape_cast %53 : vector<1x32xf32> to vector<1x1x32xf32>
    %55 = vector.broadcast %54 : vector<1x1x32xf32> to vector<16x16x32xf32>
    %56 = arith.mulf %52, %55 : vector<16x16x32xf32>
    %57 = arith.addf %51, %56 : vector<16x16x32xf32>
    %cst_5 = arith.constant 5.000000e-01 : f32
    %58 = vector.broadcast %cst_5 : f32 to vector<16x16x32xf32>
    %59 = arith.mulf %58, %57 : vector<16x16x32xf32>
    %cst_6 = arith.constant 4.471500e-02 : f32
    %60 = vector.broadcast %cst_6 : f32 to vector<16x16x32xf32>
    %61 = arith.mulf %60, %57 : vector<16x16x32xf32>
    %62 = arith.mulf %61, %57 : vector<16x16x32xf32>
    %63 = arith.mulf %62, %57 : vector<16x16x32xf32>
    %64 = arith.addf %57, %63 : vector<16x16x32xf32>
    %cst_7 = arith.constant 0.797884583 : f32
    %65 = vector.broadcast %cst_7 : f32 to vector<16x16x32xf32>
    %66 = arith.mulf %65, %64 : vector<16x16x32xf32>
    %67 = math.tanh %66 : vector<16x16x32xf32>
    %cst_8 = arith.constant 1.000000e+00 : f32
    %68 = vector.broadcast %cst_8 : f32 to vector<16x16x32xf32>
    %69 = arith.addf %68, %67 : vector<16x16x32xf32>
    %70 = arith.mulf %59, %69 : vector<16x16x32xf32>
    %c0_9 = arith.constant 0 : index
    %c0_10 = arith.constant 0 : index
    %c0_11 = arith.constant 0 : index
    %c0_12 = arith.constant 0 : index
    %71 = vector.load %arg3[%c0_9, %c0_10, %c0_11, %c0_12] : memref<1x16x16x32xf32, #tpu.memory_space<vmem>>, vector<1x16x16x32xf32>
    %72 = vector.shape_cast %71 : vector<1x16x16x32xf32> to vector<16x16x32xf32>
    %73 = vector.shape_cast %70 : vector<16x16x32xf32> to vector<1x16x16x32xf32>
    tpu.vector_store %arg3[%c0_9, %c0_10, %c0_11, %c0_12], %73 {strides = array<i32>} : memref<1x16x16x32xf32, #tpu.memory_space<vmem>>, vector<1x16x16x32xf32>,
    return
  }
  func.func @transform_0(%arg0: i32) -> (i32, i32, i32, i32) {
    %c0_i32 = arith.constant 0 : i32
    %c0_i32_0 = arith.constant 0 : i32
    %c0_i32_1 = arith.constant 0 : i32
    %c0_i32_2 = arith.constant 0 : i32
    return %arg0, %c0_i32, %c0_i32_0, %c0_i32_1 : i32, i32, i32, i32
  }
  func.func @transform_1(%arg0: i32) -> (i32, i32) {
    %c0_i32 = arith.constant 0 : i32
    %c0_i32_0 = arith.constant 0 : i32
    %c0_i32_1 = arith.constant 0 : i32
    return %c0_i32, %c0_i32_0 : i32, i32
  }
  func.func @transform_2(%arg0: i32) -> (i32, i32, i32, i32) {
    %c0_i32 = arith.constant 0 : i32
    %c0_i32_0 = arith.constant 0 : i32
    %c0_i32_1 = arith.constant 0 : i32
    %c0_i32_2 = arith.constant 0 : i32
    return %arg0, %c0_i32, %c0_i32_0, %c0_i32_1 : i32, i32, i32, i32
  }
}

module attributes {stable_mosaic.version = 11 : i64} {
  func.func @_matmul_res_kernel(%arg0: i32, %arg1: memref<256x32xf32, #tpu.memory_space<vmem>>, %arg2: memref<32x32xf32, #tpu.memory_space<vmem>>, %arg3: memref<256x32xf32, #tpu.memory_space<vmem>>, %arg4: memref<256x32xf32, #tpu.memory_space<vmem>>) attributes {dimension_semantics = [#tpu.dimension_semantics<parallel>], iteration_bounds = array<i64: 2>, scalar_prefetch = 0 : i64, scratch_operands = 0 : i64, tpu.core_type = #tpu.core_type<tc>, window_params = [{transform_indices = @transform_0, window_bounds = array<i64: 256, 32>}, {pipeline_mode = #tpu.pipeline_mode<synchronous>, transform_indices = @transform_1, window_bounds = array<i64: 32, 32>}, {transform_indices = @transform_2, window_bounds = array<i64: 256, 32>}, {transform_indices = @transform_3, window_bounds = array<i64: 256, 32>}]} {
    %c0 = arith.constant 0 : index
    %c0_0 = arith.constant 0 : index
    %0 = vector.load %arg1[%c0, %c0_0] : memref<256x32xf32, #tpu.memory_space<vmem>>, vector<256x32xf32>
    %c0_1 = arith.constant 0 : index
    %c0_2 = arith.constant 0 : index
    %1 = vector.load %arg2[%c0_1, %c0_2] : memref<32x32xf32, #tpu.memory_space<vmem>>, vector<32x32xf32>
    %cst = arith.constant dense<0.000000e+00> : vector<256x32xf32>
    %2 = tpu.matmul %0, %1, %cst {dimension_numbers = #tpu.dot_dimension_numbers<[1], [0], [0], [1], [0, 0, 1, 1], [], []>} : vector<256x32xf32>, vector<32x32xf32>, vector<256x32xf32> -> vector<256x32xf32>
    %c0_3 = arith.constant 0 : index
    %c0_4 = arith.constant 0 : index
    %3 = vector.load %arg3[%c0_3, %c0_4] : memref<256x32xf32, #tpu.memory_space<vmem>>, vector<256x32xf32>
    %4 = arith.addf %2, %3 : vector<256x32xf32>
    %c0_5 = arith.constant 0 : index
    %c0_6 = arith.constant 0 : index
    %5 = vector.load %arg4[%c0_5, %c0_6] : memref<256x32xf32, #tpu.memory_space<vmem>>, vector<256x32xf32>
    tpu.vector_store %arg4[%c0_5, %c0_6], %4 {strides = array<i32>} : memref<256x32xf32, #tpu.memory_space<vmem>>, vector<256x32xf32>,
    return
  }
  func.func @transform_0(%arg0: i32) -> (i32, i32) {
    %c0_i32 = arith.constant 0 : i32
    %c0_i32_0 = arith.constant 0 : i32
    return %arg0, %c0_i32 : i32, i32
  }
  func.func @transform_1(%arg0: i32) -> (i32, i32) {
    %c0_i32 = arith.constant 0 : i32
    %c0_i32_0 = arith.constant 0 : i32
    %c0_i32_1 = arith.constant 0 : i32
    return %c0_i32, %c0_i32_0 : i32, i32
  }
  func.func @transform_2(%arg0: i32) -> (i32, i32) {
    %c0_i32 = arith.constant 0 : i32
    %c0_i32_0 = arith.constant 0 : i32
    return %arg0, %c0_i32 : i32, i32
  }
  func.func @transform_3(%arg0: i32) -> (i32, i32) {
    %c0_i32 = arith.constant 0 : i32
    %c0_i32_0 = arith.constant 0 : i32
    return %arg0, %c0_i32 : i32, i32
  }
}

</mosaic_0001>

<bundles_post_ra>
// kernel: tile.8
= control target key start
LH: loop header
LB: loop body
LE: loop exit
PB: predicated region body
PF: predicated region fallthrough
CT: control target
= control target key end

     0   :  { %s22_s0 = inlined_call_operand.vmem [shape: f32[4], index: 0, kind: input, shape index: {}]   ;;  %s23_s1 = inlined_call_operand.vmem [shape: f32[2,4], index: 1, kind: output, shape index: {}]  }
   0x1   :  { %v4_v0 = vld [vmem:[%s22_s0] ss:$0 sm:$0xff] }
   0x2   :  { %5 = vst [vmem:[%s23_s1] sm:$0x3] %v4_v0 }

// kernel: tile.0
= control target key start
LH: loop header
LB: loop body
LE: loop exit
PB: predicated region body
PF: predicated region fallthrough
CT: control target
= control target key end

     0   :  { %vm7_vm0 = vcmask 7168   ;;  %s99_s8 = smov 125   ;;  %s100_s9 = smov 126   ;;  %s146_s0 = inlined_call_operand.vmem [shape: f32[2,4], index: 0, kind: input, shape index: {}]   ;;  %s147_s1 = inlined_call_operand.vmem [shape: f32[8,1,1], index: 1, kind: output, shape index: {}]  }
   0x1   :  { %v4_v0 = vld [vmem:[%s146_s0] sm:$0x3]  ;;  %s98_s0 = smov 127  }
   0x2   :  { %5 = vst [vmem:[#allocation1] sm:$0x3] %v4_v0 }
   0x9   :  { %v11_v1 = vld [vmem:[#allocation1] sm:$0x3]  }
   0xa   :  { %v6_v2 = vld [vmem:[#allocation1] sm:$0x3]   ;;  %12 = vrot.lane.b32.xlu0 %v11_v1, %s98_s0 }
   0xb   :  { %v27_v3 = vld [vmem:[#allocation1] sm:$0x3]   ;;  %8 = vst.msk [vmem:[#allocation0] sm:$0x1] %vm7_vm0, %v6_v2   ;;  %10 = vst.msk [vmem:[#allocation0 + $0x1f] sm:$0x2] %vm7_vm0, %v6_v2  }
   0xc   :  { %28 = vrot.lane.b32.xlu1 %v27_v3, %s99_s8  ;;  %v19_v4 = vld [vmem:[#allocation1] sm:$0x3]  }
   0xe   :  { %20 = vrot.lane.b32.xlu0 %v19_v4, %s100_s9 }
  0x12   :  { %v38_v5 = vld [vmem:[#allocation0] sm:$0x1] }
  0x13   :  { %v59_v6 = vld [vmem:[#allocation0 + $0x20] sm:$0x1]  ;;  %40 = vst [vmem:[%s147_s1] sm:$0x1] %v38_v5 }
  0x14   :  { %91 = vst [vmem:[%s147_s1 + $0x4] sm:$0x1] %v59_v6 }
  0x7c   :  { %v13_v7 = vpop.permute.xlu0 %12  }
  0x7d   :  { %16 = vst.msk [vmem:[#allocation0 + $0x8] sm:$0x1] %vm7_vm0, %v13_v7   ;;  %18 = vst.msk [vmem:[#allocation0 + $0x27] sm:$0x2] %vm7_vm0, %v13_v7  }
  0x7e   :  { %v29_v8 = vpop.permute.xlu1 %28  }
  0x7f   :  { %32 = vst.msk [vmem:[#allocation0 + $0x18] sm:$0x1] %vm7_vm0, %v29_v8   ;;  %34 = vst.msk [vmem:[#allocation0 + $0x37] sm:$0x2] %vm7_vm0, %v29_v8  }
  0x80   :  { %v21_v9 = vpop.permute.xlu0 %20  }
  0x81   :  { %24 = vst.msk [vmem:[#allocation0 + $0x10] sm:$0x1] %vm7_vm0, %v21_v9   ;;  %26 = vst.msk [vmem:[#allocation0 + $0x2f] sm:$0x2] %vm7_vm0, %v21_v9  }
  0x84   :  { %v42_v10 = vld [vmem:[#allocation0 + $0x8] sm:$0x1] }
  0x85   :  { %v65_v11 = vld [vmem:[#allocation0 + $0x28] sm:$0x1]  ;;  %88 = vst [vmem:[%s147_s1 + $0x1] sm:$0x1] %v42_v10 }
  0x86   :  { %v53_v12 = vld [vmem:[#allocation0 + $0x18] sm:$0x1]  ;;  %92 = vst [vmem:[%s147_s1 + $0x5] sm:$0x1] %v65_v11 }
  0x87   :  { %90 = vst [vmem:[%s147_s1 + $0x3] sm:$0x1] %v53_v12  ;;  %v77_v13 = vld [vmem:[#allocation0 + $0x38] sm:$0x1] }
  0x88   :  { %94 = vst [vmem:[%s147_s1 + $0x7] sm:$0x1] %v77_v13  ;;  %v47_v14 = vld [vmem:[#allocation0 + $0x10] sm:$0x1] }
  0x89   :  { %v71_v15 = vld [vmem:[#allocation0 + $0x30] sm:$0x1]  ;;  %89 = vst [vmem:[%s147_s1 + $0x2] sm:$0x1] %v47_v14 }
  0x8a   :  { %93 = vst [vmem:[%s147_s1 + $0x6] sm:$0x1] %v71_v15 }

// kernel: structure_enhancement_forward.7
= control target key start
LH: loop header
LB: loop body
LE: loop exit
PB: predicated region body
PF: predicated region fallthrough
CT: control target
= control target key end

     0   :  { %s1292_s12 = smov 0   ;;  %s1849_s0 = inlined_call_operand.vmem [shape: f32[512,32], index: 0, kind: input, shape index: {}]   ;;  %s1850_s1 = inlined_call_operand.vmem [shape: f32[32,32], index: 1, kind: input, shape index: {}]   ;;  %s1851_s2 = inlined_call_operand.vmem [shape: f32[1,32], index: 2, kind: input, shape index: {}]   ;;  %s1852_s3 = inlined_call_operand.vmem [shape: f32[512,32], index: 3, kind: output, shape index: {}]  }
   0x1 LB: > { %s1044_s13 = sadd.s32 4294967295, %s1270_s12   ;;  %p1048_p0 = scmp.ge.s32.totalorder %s1270_s12, 1  ;;  %s1270_s12 = sphi %s1292_s12, %s13_s12  }
   0x2   : > { %p138_p1 = scmp.lt.s32.totalorder %s1270_s12, 3 }
   0x4   : > { %p139_p2 = pnand %p1048_p0, %p138_p1 }
   0x5   : > { %s1049_s14 = sshll.u32 (!%p139_p2), %s1044_s13, 5  ;;  %vm206_vm0 = vcmask (!%p139_p2), 261120  }
   0x6   : > { %142 = sbr.rel (%p139_p2) target bundleno = 606 (0x25e), region = 32  ;;  %p163_p3 = scmp.lt.s32.totalorder (!%p139_p2), %s1049_s14, 63 }
   0xd   : > { %s1854_s14 = smov (!%p163_p3, %s1049_s14), 63 }
   0xe   : > { %s1050_s15 = sshll.u32 %s1854_s14, 3 }
   0xf   : > { %s1308_s18 = scalar_lea.vmem %s1849_s0, %s1050_s15  ;;  %s1748_s4 = scalar_lea.vmem %s1852_s3, %s1050_s15 }
  0x10   : > { %v1311_v0 = vld [vmem:[%s1308_s18] sm:$0xff]  ;;  %v1314_v1 = vld [vmem:[%s1308_s18 + $0x8] sm:$0xff]  ;;  %v1331_v8 = vld [vmem:[%s1308_s18 + $0x10] sm:$0xff] }
  0x11   : > { %v1317_v2 = vld [vmem:[%s1308_s18 + $0x80] sm:$0xff]  ;;  %v207_v3 = vsel %vm206_vm0, %v1311_v0, 0.0  ;;  %v210_v4 = vsel %vm206_vm0, %v1314_v1, 0.0  ;;  %v1324_v5 = vld [vmem:[%s1308_s18 + $0x88] sm:$0xff]  ;;  %v1334_v9 = vld [vmem:[%s1308_s18 + $0x90] sm:$0xff]  ;;  %v213_v10 = vsel %vm206_vm0, %v1331_v8, 0.0 }
  0x12   : > { %208 = vadd.xlane.f32.xlu0 %v207_v3  ;;  %211 = vadd.xlane.f32.xlu1 %v210_v4  ;;  %v255_v6 = vsel %vm206_vm0, %v1317_v2, 0.0  ;;  %v258_v7 = vsel %vm206_vm0, %v1324_v5, 0.0  ;;  %v261_v11 = vsel %vm206_vm0, %v1334_v9, 0.0  ;;  %v1341_v12 = vld [vmem:[%s1308_s18 + $0x18] sm:$0xff]  ;;  %v1351_v16 = vld [vmem:[%s1308_s18 + $0x20] sm:$0xff]  ;;  %v1361_v20 = vld [vmem:[%s1308_s18 + $0x28] sm:$0xff] }
  0x13   : > { %v1344_v13 = vld [vmem:[%s1308_s18 + $0x98] sm:$0xff]  ;;  %v216_v14 = vsel %vm206_vm0, %v1341_v12, 0.0  ;;  %v1354_v17 = vld [vmem:[%s1308_s18 + $0xa0] sm:$0xff]  ;;  %v219_v18 = vsel %vm206_vm0, %v1351_v16, 0.0  ;;  %v1364_v21 = vld [vmem:[%s1308_s18 + $0xa8] sm:$0xff]  ;;  %v222_v22 = vsel %vm206_vm0, %v1361_v20, 0.0 }
  0x14   : > { %v264_v15 = vsel %vm206_vm0, %v1344_v13, 0.0  ;;  %v267_v19 = vsel %vm206_vm0, %v1354_v17, 0.0  ;;  %v270_v23 = vsel %vm206_vm0, %v1364_v21, 0.0  ;;  %v1371_v24 = vld [vmem:[%s1308_s18 + $0x30] sm:$0xff]  ;;  %v1381_v28 = vld [vmem:[%s1308_s18 + $0x38] sm:$0xff]  ;;  %v1391_v32 = vld [vmem:[%s1308_s18 + $0x40] sm:$0xff] }
  0x15   : > { %v1374_v25 = vld [vmem:[%s1308_s18 + $0xb0] sm:$0xff]  ;;  %v225_v26 = vsel %vm206_vm0, %v1371_v24, 0.0  ;;  %v1384_v29 = vld [vmem:[%s1308_s18 + $0xb8] sm:$0xff]  ;;  %v228_v30 = vsel %vm206_vm0, %v1381_v28, 0.0  ;;  %v1394_v33 = vld [vmem:[%s1308_s18 + $0xc0] sm:$0xff]  ;;  %v231_v34 = vsel %vm206_vm0, %v1391_v32, 0.0 }
  0x16   : > { %256 = vadd.xlane.f32.xlu0 %v255_v6  ;;  %259 = vadd.xlane.f32.xlu1 %v258_v7  ;;  %v273_v27 = vsel %vm206_vm0, %v1374_v25, 0.0  ;;  %v276_v31 = vsel %vm206_vm0, %v1384_v29, 0.0  ;;  %v279_v35 = vsel %vm206_vm0, %v1394_v33, 0.0  ;;  %v1401_v36 = vld [vmem:[%s1308_s18 + $0x48] sm:$0xff]  ;;  %v1411_v40 = vld [vmem:[%s1308_s18 + $0x50] sm:$0xff]  ;;  %v1421_v44 = vld [vmem:[%s1308_s18 + $0x58] sm:$0xff] }
  0x17   : > { %v1404_v37 = vld [vmem:[%s1308_s18 + $0xc8] sm:$0xff]  ;;  %v234_v38 = vsel %vm206_vm0, %v1401_v36, 0.0  ;;  %v1414_v41 = vld [vmem:[%s1308_s18 + $0xd0] sm:$0xff]  ;;  %v237_v42 = vsel %vm206_vm0, %v1411_v40, 0.0  ;;  %v1424_v45 = vld [vmem:[%s1308_s18 + $0xd8] sm:$0xff]  ;;  %v240_v46 = vsel %vm206_vm0, %v1421_v44, 0.0 }
  0x18   : > { %v282_v39 = vsel %vm206_vm0, %v1404_v37, 0.0  ;;  %v285_v43 = vsel %vm206_vm0, %v1414_v41, 0.0  ;;  %v288_v47 = vsel %vm206_vm0, %v1424_v45, 0.0  ;;  %v1431_v48 = vld [vmem:[%s1308_s18 + $0x60] sm:$0xff]  ;;  %v1441_v52 = vld [vmem:[%s1308_s18 + $0x68] sm:$0xff]  ;;  %v1451_v56 = vld [vmem:[%s1308_s18 + $0x70] sm:$0xff] }
  0x19   : > { %v1434_v49 = vld [vmem:[%s1308_s18 + $0xe0] sm:$0xff]  ;;  %v243_v50 = vsel %vm206_vm0, %v1431_v48, 0.0  ;;  %v1444_v53 = vld [vmem:[%s1308_s18 + $0xe8] sm:$0xff]  ;;  %v246_v54 = vsel %vm206_vm0, %v1441_v52, 0.0  ;;  %v1454_v57 = vld [vmem:[%s1308_s18 + $0xf0] sm:$0xff]  ;;  %v249_v58 = vsel %vm206_vm0, %v1451_v56, 0.0 }
  0x1a   : > { %214 = vadd.xlane.f32.xlu0 %v213_v10  ;;  %262 = vadd.xlane.f32.xlu1 %v261_v11  ;;  %v291_v51 = vsel %vm206_vm0, %v1434_v49, 0.0  ;;  %v294_v55 = vsel %vm206_vm0, %v1444_v53, 0.0  ;;  %v297_v59 = vsel %vm206_vm0, %v1454_v57, 0.0  ;;  %v1461_v60 = vld [vmem:[%s1308_s18 + $0x78] sm:$0xff] }
  0x1b   : > { %v1464_v61 = vld [vmem:[%s1308_s18 + $0xf8] sm:$0xff]  ;;  %v252_v62 = vsel %vm206_vm0, %v1461_v60, 0.0 }
  0x1c   : > { %v300_v63 = vsel %vm206_vm0, %v1464_v61, 0.0 }
  0x1e   : > { %217 = vadd.xlane.f32.xlu0 %v216_v14  ;;  %265 = vadd.xlane.f32.xlu1 %v264_v15 }
  0x22   : > { %220 = vadd.xlane.f32.xlu0 %v219_v18  ;;  %268 = vadd.xlane.f32.xlu1 %v267_v19 }
  0x26   : > { %223 = vadd.xlane.f32.xlu0 %v222_v22  ;;  %271 = vadd.xlane.f32.xlu1 %v270_v23 }
  0x2a   : > { %226 = vadd.xlane.f32.xlu0 %v225_v26  ;;  %274 = vadd.xlane.f32.xlu1 %v273_v27 }
  0x2e   : > { %229 = vadd.xlane.f32.xlu0 %v228_v30  ;;  %277 = vadd.xlane.f32.xlu1 %v276_v31 }
  0x32   : > { %232 = vadd.xlane.f32.xlu0 %v231_v34  ;;  %280 = vadd.xlane.f32.xlu1 %v279_v35 }
  0x36   : > { %235 = vadd.xlane.f32.xlu0 %v234_v38  ;;  %283 = vadd.xlane.f32.xlu1 %v282_v39 }
  0x3a   : > { %238 = vadd.xlane.f32.xlu0 %v237_v42  ;;  %286 = vadd.xlane.f32.xlu1 %v285_v43 }
  0x3e   : > { %241 = vadd.xlane.f32.xlu0 %v240_v46  ;;  %289 = vadd.xlane.f32.xlu1 %v288_v47 }
  0x42   : > { %244 = vadd.xlane.f32.xlu0 %v243_v50  ;;  %292 = vadd.xlane.f32.xlu1 %v291_v51 }
  0x46   : > { %247 = vadd.xlane.f32.xlu0 %v246_v54  ;;  %295 = vadd.xlane.f32.xlu1 %v294_v55 }
  0x4a   : > { %250 = vadd.xlane.f32.xlu0 %v249_v58  ;;  %298 = vadd.xlane.f32.xlu1 %v297_v59 }
  0x4e   : > { %253 = vadd.xlane.f32.xlu0 %v252_v62  ;;  %301 = vadd.xlane.f32.xlu1 %v300_v63 }
  0x9f   : > { %v209_v3 = vpop.xlane.xlu0 %208  ;;  %v212_v4 = vpop.xlane.xlu1 %211 }
  0xa0   : > { %v304_v6 = vmul.f32 0.03125, %v209_v3  ;;  %v305_v7 = vmul.f32 0.03125, %v212_v4 }
  0xa2   : > { %v1471_v10 = vsub.f32 %v1311_v0, %v304_v6  ;;  %v1474_v11 = vsub.f32 %v1314_v1, %v305_v7 }
  0xa3   : > { %v257_v14 = vpop.xlane.xlu0 %256  ;;  %v260_v15 = vpop.xlane.xlu1 %259 }
  0xa4   : > { %v320_v18 = vmul.f32 0.03125, %v257_v14  ;;  %v321_v19 = vmul.f32 0.03125, %v260_v15  ;;  %v368_v22 = vmul.f32 %v1471_v10, %v1471_v10  ;;  %v369_v23 = vmul.f32 %v1474_v11, %v1474_v11 }
  0xa6   : > { %v1481_v26 = vsub.f32 %v1317_v2, %v320_v18  ;;  %v1484_v27 = vsub.f32 %v1324_v5, %v321_v19  ;;  %v400_v0 = vsel %vm206_vm0, %v368_v22, 0.0  ;;  %v403_v31 = vsel %vm206_vm0, %v369_v23, 0.0 }
  0xa7   : > { %401 = vadd.xlane.f32.xlu0 %v400_v0  ;;  %v215_v1 = vpop.xlane.xlu0 %214  ;;  %v263_v30 = vpop.xlane.xlu1 %262 }
  0xa8   : > { %v306_v34 = vmul.f32 0.03125, %v215_v1  ;;  %v322_v35 = vmul.f32 0.03125, %v263_v30  ;;  %v384_v38 = vmul.f32 %v1481_v26, %v1481_v26  ;;  %v385_v39 = vmul.f32 %v1484_v27, %v1484_v27 }
  0xaa   : > { %v1493_v2 = vsub.f32 %v1331_v8, %v306_v34  ;;  %v1496_v5 = vsub.f32 %v1334_v9, %v322_v35  ;;  %v448_v42 = vsel %vm206_vm0, %v384_v38, 0.0  ;;  %v451_v47 = vsel %vm206_vm0, %v385_v39, 0.0 }
  0xab   : > { %404 = vadd.xlane.f32.xlu0 %v403_v31  ;;  %449 = vadd.xlane.f32.xlu1 %v448_v42  ;;  %v218_v43 = vpop.xlane.xlu0 %217  ;;  %v266_v46 = vpop.xlane.xlu1 %265 }
  0xac   : > { %v307_v50 = vmul.f32 0.03125, %v218_v43  ;;  %v323_v51 = vmul.f32 0.03125, %v266_v46  ;;  %v370_v54 = vmul.f32 %v1493_v2, %v1493_v2  ;;  %v386_v8 = vmul.f32 %v1496_v5, %v1496_v5 }
  0xae   : > { %v1505_v55 = vsub.f32 %v1341_v12, %v307_v50  ;;  %v1508_v9 = vsub.f32 %v1344_v13, %v323_v51  ;;  %v406_v58 = vsel %vm206_vm0, %v370_v54, 0.0  ;;  %v454_v63 = vsel %vm206_vm0, %v386_v8, 0.0 }
  0xaf   : > { %452 = vadd.xlane.f32.xlu1 %v451_v47  ;;  %407 = vadd.xlane.f32.xlu0 %v406_v58  ;;  %v221_v59 = vpop.xlane.xlu0 %220  ;;  %v269_v62 = vpop.xlane.xlu1 %268 }
  0xb0   : > { %v308_v3 = vmul.f32 0.03125, %v221_v59  ;;  %v324_v4 = vmul.f32 0.03125, %v269_v62  ;;  %v371_v6 = vmul.f32 %v1505_v55, %v1505_v55  ;;  %v387_v12 = vmul.f32 %v1508_v9, %v1508_v9 }
  0xb2   : > { %v1517_v7 = vsub.f32 %v1351_v16, %v308_v3  ;;  %v1520_v13 = vsub.f32 %v1354_v17, %v324_v4  ;;  %v409_v14 = vsel %vm206_vm0, %v371_v6, 0.0  ;;  %v457_v19 = vsel %vm206_vm0, %v387_v12, 0.0 }
  0xb3   : > { %455 = vadd.xlane.f32.xlu1 %v454_v63  ;;  %410 = vadd.xlane.f32.xlu0 %v409_v14  ;;  %v224_v15 = vpop.xlane.xlu0 %223  ;;  %v272_v18 = vpop.xlane.xlu1 %271 }
  0xb4   : > { %v309_v22 = vmul.f32 0.03125, %v224_v15  ;;  %v325_v23 = vmul.f32 0.03125, %v272_v18  ;;  %v372_v0 = vmul.f32 %v1517_v7, %v1517_v7  ;;  %v388_v16 = vmul.f32 %v1520_v13, %v1520_v13  ;;  %v625_v15 = vld [vmem:[%s1850_s1 + $0x8] sm:$0xff] }
  0xb6   : > { %v1529_v1 = vsub.f32 %v1361_v20, %v309_v22  ;;  %v1532_v17 = vsub.f32 %v1364_v21, %v325_v23  ;;  %v412_v30 = vsel %vm206_vm0, %v372_v0, 0.0  ;;  %v460_v35 = vsel %vm206_vm0, %v388_v16, 0.0 }
  0xb7   : > { %458 = vadd.xlane.f32.xlu1 %v457_v19  ;;  %413 = vadd.xlane.f32.xlu0 %v412_v30  ;;  %v227_v31 = vpop.xlane.xlu0 %226  ;;  %v275_v34 = vpop.xlane.xlu1 %274 }
  0xb8   : > { %v310_v38 = vmul.f32 0.03125, %v227_v31  ;;  %v326_v39 = vmul.f32 0.03125, %v275_v34  ;;  %v373_v42 = vmul.f32 %v1529_v1, %v1529_v1  ;;  %v389_v20 = vmul.f32 %v1532_v17, %v1532_v17 }
  0xba   : > { %v1541_v43 = vsub.f32 %v1371_v24, %v310_v38  ;;  %v1544_v21 = vsub.f32 %v1374_v25, %v326_v39  ;;  %v415_v46 = vsel %vm206_vm0, %v373_v42, 0.0  ;;  %v463_v51 = vsel %vm206_vm0, %v389_v20, 0.0  ;;  %v627_v38 = vld [vmem:[%s1850_s1 + $0x18] sm:$0xff] }
  0xbb   : > { %461 = vadd.xlane.f32.xlu1 %v460_v35  ;;  %416 = vadd.xlane.f32.xlu0 %v415_v46  ;;  %v230_v47 = vpop.xlane.xlu0 %229  ;;  %v278_v50 = vpop.xlane.xlu1 %277 }
  0xbc   : > { %v311_v54 = vmul.f32 0.03125, %v230_v47  ;;  %v327_v8 = vmul.f32 0.03125, %v278_v50  ;;  %v374_v58 = vmul.f32 %v1541_v43, %v1541_v43  ;;  %v390_v24 = vmul.f32 %v1544_v21, %v1544_v21 }
  0xbe   : > { %v1553_v59 = vsub.f32 %v1381_v28, %v311_v54  ;;  %v1556_v25 = vsub.f32 %v1384_v29, %v327_v8  ;;  %v418_v62 = vsel %vm206_vm0, %v374_v58, 0.0  ;;  %v466_v4 = vsel %vm206_vm0, %v390_v24, 0.0  ;;  %v624_v29 = vld [vmem:[%s1850_s1] sm:$0xff] }
  0xbf   : > { %464 = vadd.xlane.f32.xlu1 %v463_v51  ;;  %419 = vadd.xlane.f32.xlu0 %v418_v62  ;;  %v233_v63 = vpop.xlane.xlu0 %232  ;;  %v281_v3 = vpop.xlane.xlu1 %280  ;;  %v1180_v18 = vpack.c.bf16 %v625_v15, %v624_v29 }
  0xc0   : > { %v312_v6 = vmul.f32 0.03125, %v233_v63  ;;  %v328_v12 = vmul.f32 0.03125, %v281_v3  ;;  %v375_v14 = vmul.f32 %v1553_v59, %v1553_v59  ;;  %v391_v28 = vmul.f32 %v1556_v25, %v1556_v25 }
  0xc1   : > { %1181 = vmatprep.subr.bf16.mxu0 %v1180_v18  ;;  %1188 = vmatprep.subr.bf16.mxu1 %v1180_v18 }
  0xc2   : > { %v1571_v19 = vsub.f32 %v1391_v32, %v312_v6  ;;  %v1574_v22 = vsub.f32 %v1394_v33, %v328_v12  ;;  %v421_v23 = vsel %vm206_vm0, %v375_v14, 0.0  ;;  %v469_v30 = vsel %vm206_vm0, %v391_v28, 0.0  ;;  %v626_v33 = vld [vmem:[%s1850_s1 + $0x10] sm:$0xff]  ;;  %1183 = vmatpush3.bf16.msra.mxu0 %v1180_v18  ;;  %1190 = vmatpush3.bf16.msra.mxu1 %v1180_v18 }
  0xc3   : > { %467 = vadd.xlane.f32.xlu1 %v466_v4  ;;  %422 = vadd.xlane.f32.xlu0 %v421_v23  ;;  %v236_v0 = vpop.xlane.xlu0 %235  ;;  %v284_v16 = vpop.xlane.xlu1 %283  ;;  %v1184_v39 = vpack.c.bf16 %v627_v38, %v626_v33 }
  0xc4   : > { %v313_v31 = vmul.f32 0.03125, %v236_v0  ;;  %v329_v34 = vmul.f32 0.03125, %v284_v16  ;;  %v376_v35 = vmul.f32 %v1571_v19, %v1571_v19  ;;  %v392_v32 = vmul.f32 %v1574_v22, %v1574_v22 }
  0xc5   : > { %1185 = vmatprep.subr.bf16.mxu0 %v1184_v39  ;;  %1189 = vmatprep.subr.bf16.mxu1 %v1184_v39 }
  0xc6   : > { %v1589_v42 = vsub.f32 %v1401_v36, %v313_v31  ;;  %v1592_v20 = vsub.f32 %v1404_v37, %v329_v34  ;;  %v424_v46 = vsel %vm206_vm0, %v376_v35, 0.0  ;;  %v472_v51 = vsel %vm206_vm0, %v392_v32, 0.0  ;;  %1187 = vmatpush3.bf16.msra.mxu0 %v1184_v39  ;;  %1191 = vmatpush3.bf16.msra.mxu1 %v1184_v39 }
  0xc7   : > { %470 = vadd.xlane.f32.xlu1 %v469_v30  ;;  %425 = vadd.xlane.f32.xlu0 %v424_v46  ;;  %v239_v47 = vpop.xlane.xlu0 %238  ;;  %v287_v50 = vpop.xlane.xlu1 %286 }
  0xc8   : > { %v314_v54 = vmul.f32 0.03125, %v239_v47  ;;  %v330_v8 = vmul.f32 0.03125, %v287_v50  ;;  %v377_v58 = vmul.f32 %v1589_v42, %v1589_v42  ;;  %v393_v36 = vmul.f32 %v1592_v20, %v1592_v20 }
  0xca   : > { %v1601_v37 = vsub.f32 %v1411_v40, %v314_v54  ;;  %v1604_v24 = vsub.f32 %v1414_v41, %v330_v8  ;;  %v427_v62 = vsel %vm206_vm0, %v377_v58, 0.0  ;;  %v475_v4 = vsel %vm206_vm0, %v393_v36, 0.0 }
  0xcb   : > { %473 = vadd.xlane.f32.xlu1 %v472_v51  ;;  %428 = vadd.xlane.f32.xlu0 %v427_v62  ;;  %v242_v63 = vpop.xlane.xlu0 %241  ;;  %v290_v3 = vpop.xlane.xlu1 %289 }
  0xcc   : > { %v315_v6 = vmul.f32 0.03125, %v242_v63  ;;  %v331_v12 = vmul.f32 0.03125, %v290_v3  ;;  %v378_v14 = vmul.f32 %v1601_v37, %v1601_v37  ;;  %v394_v40 = vmul.f32 %v1604_v24, %v1604_v24 }
  0xce   : > { %v1613_v28 = vsub.f32 %v1421_v44, %v315_v6  ;;  %v1616_v41 = vsub.f32 %v1424_v45, %v331_v12  ;;  %v430_v29 = vsel %vm206_vm0, %v378_v14, 0.0  ;;  %v478_v23 = vsel %vm206_vm0, %v394_v40, 0.0 }
  0xcf   : > { %476 = vadd.xlane.f32.xlu1 %v475_v4  ;;  %431 = vadd.xlane.f32.xlu0 %v430_v29  ;;  %v245_v15 = vpop.xlane.xlu0 %244  ;;  %v293_v18 = vpop.xlane.xlu1 %292 }
  0xd0   : > { %v316_v0 = vmul.f32 0.03125, %v245_v15  ;;  %v332_v16 = vmul.f32 0.03125, %v293_v18  ;;  %v379_v30 = vmul.f32 %v1613_v28, %v1613_v28  ;;  %v395_v44 = vmul.f32 %v1616_v41, %v1616_v41 }
  0xd2   : > { %v1625_v31 = vsub.f32 %v1431_v48, %v316_v0  ;;  %v1628_v45 = vsub.f32 %v1434_v49, %v332_v16  ;;  %v433_v34 = vsel %vm206_vm0, %v379_v30, 0.0  ;;  %v481_v33 = vsel %vm206_vm0, %v395_v44, 0.0 }
  0xd3   : > { %479 = vadd.xlane.f32.xlu1 %v478_v23  ;;  %434 = vadd.xlane.f32.xlu0 %v433_v34  ;;  %v248_v35 = vpop.xlane.xlu0 %247  ;;  %v296_v32 = vpop.xlane.xlu1 %295 }
  0xd4   : > { %v317_v38 = vmul.f32 0.03125, %v248_v35  ;;  %v333_v39 = vmul.f32 0.03125, %v296_v32  ;;  %v380_v46 = vmul.f32 %v1625_v31, %v1625_v31  ;;  %v396_v48 = vmul.f32 %v1628_v45, %v1628_v45 }
  0xd6   : > { %v1637_v47 = vsub.f32 %v1441_v52, %v317_v38  ;;  %v1640_v49 = vsub.f32 %v1444_v53, %v333_v39  ;;  %v436_v50 = vsel %vm206_vm0, %v380_v46, 0.0  ;;  %v484_v8 = vsel %vm206_vm0, %v396_v48, 0.0 }
  0xd7   : > { %482 = vadd.xlane.f32.xlu1 %v481_v33  ;;  %437 = vadd.xlane.f32.xlu0 %v436_v50  ;;  %v251_v51 = vpop.xlane.xlu0 %250  ;;  %v299_v54 = vpop.xlane.xlu1 %298 }
  0xd8   : > { %v318_v58 = vmul.f32 0.03125, %v251_v51  ;;  %v334_v36 = vmul.f32 0.03125, %v299_v54  ;;  %v381_v62 = vmul.f32 %v1637_v47, %v1637_v47  ;;  %v397_v52 = vmul.f32 %v1640_v49, %v1640_v49 }
  0xda   : > { %v1649_v63 = vsub.f32 %v1451_v56, %v318_v58  ;;  %v1652_v53 = vsub.f32 %v1454_v57, %v334_v36  ;;  %v439_v3 = vsel %vm206_vm0, %v381_v62, 0.0  ;;  %v487_v12 = vsel %vm206_vm0, %v397_v52, 0.0 }
  0xdb   : > { %485 = vadd.xlane.f32.xlu1 %v484_v8  ;;  %440 = vadd.xlane.f32.xlu0 %v439_v3  ;;  %v254_v4 = vpop.xlane.xlu0 %253  ;;  %v302_v6 = vpop.xlane.xlu1 %301 }
  0xdc   : > { %v319_v14 = vmul.f32 0.03125, %v254_v4  ;;  %v335_v40 = vmul.f32 0.03125, %v302_v6  ;;  %v382_v29 = vmul.f32 %v1649_v63, %v1649_v63  ;;  %v398_v56 = vmul.f32 %v1652_v53, %v1652_v53 }
  0xde   : > { %v1661_v15 = vsub.f32 %v1461_v60, %v319_v14  ;;  %v1664_v57 = vsub.f32 %v1464_v61, %v335_v40  ;;  %v442_v18 = vsel %vm206_vm0, %v382_v29, 0.0  ;;  %v490_v23 = vsel %vm206_vm0, %v398_v56, 0.0 }
  0xdf   : > { %488 = vadd.xlane.f32.xlu1 %v487_v12  ;;  %443 = vadd.xlane.f32.xlu0 %v442_v18 }
  0xe0   : > { %v383_v0 = vmul.f32 %v1661_v15, %v1661_v15  ;;  %v399_v16 = vmul.f32 %v1664_v57, %v1664_v57 }
  0xe2   : > { %v445_v30 = vsel %vm206_vm0, %v383_v0, 0.0  ;;  %v493_v60 = vsel %vm206_vm0, %v399_v16, 0.0 }
  0xe3   : > { %491 = vadd.xlane.f32.xlu1 %v490_v23  ;;  %446 = vadd.xlane.f32.xlu0 %v445_v30 }
  0xe7   : > { %494 = vadd.xlane.f32.xlu1 %v493_v60 }
 0x134   : > { %v402_v61 = vpop.xlane.xlu0 %401 }
 0x135   : > { %v496_v44 = vmul.f32 0.03125, %v402_v61 }
 0x137   : > { %v528_v34 = vadd.f32 1e-06, %v496_v44 }
 0x138   : > { %v450_v35 = vpop.xlane.xlu1 %449  ;;  %v405_v32 = vpop.xlane.xlu0 %404 }
 0x139   : > { %1200 = vrsqrt.f32 %v528_v34  ;;  %v512_v33 = vmul.f32 0.03125, %v450_v35  ;;  %v497_v38 = vmul.f32 0.03125, %v405_v32 }
 0x13b   : > { %v544_v39 = vadd.f32 1e-06, %v512_v33  ;;  %v529_v46 = vadd.f32 1e-06, %v497_v38 }
 0x13c   : > { %v453_v48 = vpop.xlane.xlu1 %452  ;;  %v408_v50 = vpop.xlane.xlu0 %407 }
 0x13d   : > { %1202 = vrsqrt.f32 %v544_v39  ;;  %v513_v51 = vmul.f32 0.03125, %v453_v48  ;;  %v498_v54 = vmul.f32 0.03125, %v408_v50 }
 0x13e   : > { %1204 = vrsqrt.f32 %v529_v46 }
 0x13f   : > { %v545_v8 = vadd.f32 1e-06, %v513_v51  ;;  %v530_v58 = vadd.f32 1e-06, %v498_v54 }
 0x140   : > { %v456_v36 = vpop.xlane.xlu1 %455  ;;  %v411_v62 = vpop.xlane.xlu0 %410 }
 0x141   : > { %1206 = vrsqrt.f32 %v545_v8  ;;  %v514_v52 = vmul.f32 0.03125, %v456_v36  ;;  %v499_v3 = vmul.f32 0.03125, %v411_v62 }
 0x142   : > { %1208 = vrsqrt.f32 %v530_v58 }
 0x143   : > { %v1201_v4 = vpop.eup %1200  ;;  %v546_v6 = vadd.f32 1e-06, %v514_v52  ;;  %v531_v12 = vadd.f32 1e-06, %v499_v3 }
 0x144   : > { %v459_v14 = vpop.xlane.xlu1 %458  ;;  %v414_v40 = vpop.xlane.xlu0 %413  ;;  %v592_v29 = vmul.f32 %v1201_v4, %v1471_v10 }
 0x145   : > { %1210 = vrsqrt.f32 %v546_v6  ;;  %v515_v56 = vmul.f32 0.03125, %v459_v14  ;;  %v500_v18 = vmul.f32 0.03125, %v414_v40 }
 0x146   : > { %1212 = vrsqrt.f32 %v531_v12  ;;  %1132 = vmatprep.mubr.msk.f32.mxu0 %vm206_vm0, %v592_v29 }
 0x147   : > { %v1203_v23 = vpop.eup %1202  ;;  %v547_v0 = vadd.f32 1e-06, %v515_v56  ;;  %v532_v16 = vadd.f32 1e-06, %v500_v18 }
 0x148   : > { %v1205_v30 = vpop.eup %1204  ;;  %v462_v60 = vpop.xlane.xlu1 %461  ;;  %v608_v44 = vmul.f32 %v1203_v23, %v1481_v26 }
 0x149   : > { %v417_v61 = vpop.xlane.xlu0 %416  ;;  %1214 = vrsqrt.f32 %v547_v0  ;;  %v516_v34 = vmul.f32 0.03125, %v462_v60  ;;  %v593_v32 = vmul.f32 %v1205_v30, %v1474_v11 }
 0x14a   : > { %v501_v35 = vmul.f32 0.03125, %v417_v61  ;;  %1216 = vrsqrt.f32 %v532_v16  ;;  %1156 = vmatprep.mubr.msk.f32.mxu1 %vm206_vm0, %v608_v44 }
 0x14b   : > { %v1207_v10 = vpop.eup %1206  ;;  %v548_v33 = vadd.f32 1e-06, %v516_v34  ;;  %1133 = vmatmul.mubr.msk.f32.vlgmr.msra.gmra.mrb[0].mxu0 %vm206_vm0, %v593_v32 }
 0x14c   : > { %v533_v38 = vadd.f32 1e-06, %v501_v35  ;;  %v1209_v39 = vpop.eup %1208  ;;  %v465_v46 = vpop.xlane.xlu1 %464  ;;  %v609_v50 = vmul.f32 %v1207_v10, %v1484_v27 }
 0x14d   : > { %v420_v48 = vpop.xlane.xlu0 %419  ;;  %1218 = vrsqrt.f32 %v548_v33  ;;  %v517_v26 = vmul.f32 0.03125, %v465_v46  ;;  %v594_v54 = vmul.f32 %v1209_v39, %v1493_v2 }
 0x14e   : > { %v502_v51 = vmul.f32 0.03125, %v420_v48  ;;  %1220 = vrsqrt.f32 %v533_v38  ;;  %1157 = vmatmul.mubr.msk.f32.vlgmr.msra.gmra.mrb[0].mxu1 %vm206_vm0, %v609_v50 }
 0x14f   : > { %v1211_v11 = vpop.eup %1210  ;;  %v549_v8 = vadd.f32 1e-06, %v517_v26  ;;  %1135 = vmatprep.mubr.msk.f32.mxu0 %vm206_vm0, %v594_v54 }
 0x150   : > { %v534_v58 = vadd.f32 1e-06, %v502_v51  ;;  %v1213_v36 = vpop.eup %1212  ;;  %v468_v62 = vpop.xlane.xlu1 %467  ;;  %v610_v3 = vmul.f32 %v1211_v11, %v1496_v5 }
 0x151   : > { %v423_v52 = vpop.xlane.xlu0 %422  ;;  %1222 = vrsqrt.f32 %v549_v8  ;;  %v518_v27 = vmul.f32 0.03125, %v468_v62  ;;  %v595_v6 = vmul.f32 %v1213_v36, %v1505_v55 }
 0x152   : > { %v503_v4 = vmul.f32 0.03125, %v423_v52  ;;  %1224 = vrsqrt.f32 %v534_v58  ;;  %1159 = vmatprep.mubr.msk.f32.mxu1 %vm206_vm0, %v610_v3 }
 0x153   : > { %v1215_v2 = vpop.eup %1214  ;;  %v550_v12 = vadd.f32 1e-06, %v518_v27  ;;  %1136 = vmatmul.mubr.msk.f32.gmra.mrb[2].mxu0 %vm206_vm0, %v595_v6 }
 0x154   : > { %v535_v14 = vadd.f32 1e-06, %v503_v4  ;;  %v1217_v40 = vpop.eup %1216  ;;  %v471_v29 = vpop.xlane.xlu1 %470  ;;  %v611_v18 = vmul.f32 %v1215_v2, %v1508_v9 }
 0x155   : > { %v426_v56 = vpop.xlane.xlu0 %425  ;;  %1226 = vrsqrt.f32 %v550_v12  ;;  %v519_v5 = vmul.f32 0.03125, %v471_v29  ;;  %v596_v0 = vmul.f32 %v1217_v40, %v1517_v7 }
 0x156   : > { %v504_v23 = vmul.f32 0.03125, %v426_v56  ;;  %1228 = vrsqrt.f32 %v535_v14  ;;  %1160 = vmatmul.mubr.msk.f32.gmra.mrb[2].mxu1 %vm206_vm0, %v611_v18 }
 0x157   : > { %v1219_v55 = vpop.eup %1218  ;;  %v551_v16 = vadd.f32 1e-06, %v519_v5  ;;  %1138 = vmatprep.mubr.msk.f32.mxu0 %vm206_vm0, %v596_v0 }
 0x158   : > { %v536_v30 = vadd.f32 1e-06, %v504_v23  ;;  %v1221_v60 = vpop.eup %1220  ;;  %v474_v61 = vpop.xlane.xlu1 %473  ;;  %v612_v34 = vmul.f32 %v1219_v55, %v1520_v13 }
 0x159   : > { %v429_v44 = vpop.xlane.xlu0 %428  ;;  %1230 = vrsqrt.f32 %v551_v16  ;;  %v520_v9 = vmul.f32 0.03125, %v474_v61  ;;  %v597_v32 = vmul.f32 %v1221_v60, %v1529_v1 }
 0x15a   : > { %v505_v35 = vmul.f32 0.03125, %v429_v44  ;;  %1232 = vrsqrt.f32 %v536_v30  ;;  %1162 = vmatprep.mubr.msk.f32.mxu1 %vm206_vm0, %v612_v34 }
 0x15b   : > { %v1223_v7 = vpop.eup %1222  ;;  %v552_v10 = vadd.f32 1e-06, %v520_v9  ;;  %1139 = vmatmul.mubr.msk.f32.gmra.mrb[4].mxu0 %vm206_vm0, %v597_v32 }
 0x15c   : > { %v537_v33 = vadd.f32 1e-06, %v505_v35  ;;  %v1225_v38 = vpop.eup %1224  ;;  %v477_v39 = vpop.xlane.xlu1 %476  ;;  %v613_v48 = vmul.f32 %v1223_v7, %v1532_v17 }
 0x15d   : > { %v432_v46 = vpop.xlane.xlu0 %431  ;;  %1234 = vrsqrt.f32 %v552_v10  ;;  %v521_v13 = vmul.f32 0.03125, %v477_v39  ;;  %v598_v26 = vmul.f32 %v1225_v38, %v1541_v43 }
 0x15e   : > { %v506_v50 = vmul.f32 0.03125, %v432_v46  ;;  %1236 = vrsqrt.f32 %v537_v33  ;;  %1163 = vmatmul.mubr.msk.f32.gmra.mrb[4].mxu1 %vm206_vm0, %v613_v48 }
 0x15f   : > { %v1227_v1 = vpop.eup %1226  ;;  %v553_v51 = vadd.f32 1e-06, %v521_v13  ;;  %1141 = vmatprep.mubr.msk.f32.mxu0 %vm206_vm0, %v598_v26 }
 0x160   : > { %v538_v54 = vadd.f32 1e-06, %v506_v50  ;;  %v1229_v11 = vpop.eup %1228  ;;  %v480_v8 = vpop.xlane.xlu1 %479  ;;  %v614_v36 = vmul.f32 %v1227_v1, %v1544_v21 }
 0x161   : > { %v435_v58 = vpop.xlane.xlu0 %434  ;;  %1238 = vrsqrt.f32 %v553_v51  ;;  %v522_v17 = vmul.f32 0.03125, %v480_v8  ;;  %v599_v52 = vmul.f32 %v1229_v11, %v1553_v59 }
 0x162   : > { %v507_v62 = vmul.f32 0.03125, %v435_v58  ;;  %1240 = vrsqrt.f32 %v538_v54  ;;  %1165 = vmatprep.mubr.msk.f32.mxu1 %vm206_vm0, %v614_v36 }
 0x163   : > { %v1231_v43 = vpop.eup %1230  ;;  %v554_v3 = vadd.f32 1e-06, %v522_v17  ;;  %1142 = vmatmul.mubr.msk.f32.gmra.mrb[6].mxu0 %vm206_vm0, %v599_v52 }
 0x164   : > { %v539_v27 = vadd.f32 1e-06, %v507_v62  ;;  %v1233_v4 = vpop.eup %1232  ;;  %v483_v6 = vpop.xlane.xlu1 %482  ;;  %v615_v12 = vmul.f32 %v1231_v43, %v1556_v25 }
 0x165   : > { %v438_v2 = vpop.xlane.xlu0 %437  ;;  %1242 = vrsqrt.f32 %v554_v3  ;;  %v523_v21 = vmul.f32 0.03125, %v483_v6  ;;  %v600_v40 = vmul.f32 %v1233_v4, %v1571_v19 }
 0x166   : > { %v508_v14 = vmul.f32 0.03125, %v438_v2  ;;  %1244 = vrsqrt.f32 %v539_v27  ;;  %1166 = vmatmul.mubr.msk.f32.gmra.mrb[6].mxu1 %vm206_vm0, %v615_v12 }
 0x167   : > { %v1235_v59 = vpop.eup %1234  ;;  %v555_v29 = vadd.f32 1e-06, %v523_v21  ;;  %1144 = vmatprep.mubr.msk.f32.mxu0 %vm206_vm0, %v600_v40 }
 0x168   : > { %v540_v56 = vadd.f32 1e-06, %v508_v14  ;;  %v1237_v18 = vpop.eup %1236  ;;  %v486_v5 = vpop.xlane.xlu1 %485  ;;  %v616_v0 = vmul.f32 %v1235_v59, %v1574_v22 }
 0x169   : > { %v441_v23 = vpop.xlane.xlu0 %440  ;;  %1246 = vrsqrt.f32 %v555_v29  ;;  %v524_v25 = vmul.f32 0.03125, %v486_v5  ;;  %v601_v16 = vmul.f32 %v1237_v18, %v1589_v42 }
 0x16a   : > { %v509_v55 = vmul.f32 0.03125, %v441_v23  ;;  %1248 = vrsqrt.f32 %v540_v56  ;;  %1168 = vmatprep.mubr.msk.f32.mxu1 %vm206_vm0, %v616_v0 }
 0x16b   : > { %v1239_v19 = vpop.eup %1238  ;;  %v556_v30 = vadd.f32 1e-06, %v524_v25  ;;  %1145 = vmatmul.mubr.msk.f32.gmra.mrb[8].mxu0 %vm206_vm0, %v601_v16 }
 0x16c   : > { %v541_v60 = vadd.f32 1e-06, %v509_v55  ;;  %v1241_v61 = vpop.eup %1240  ;;  %v489_v44 = vpop.xlane.xlu1 %488  ;;  %v617_v9 = vmul.f32 %v1239_v19, %v1592_v20 }
 0x16d   : > { %v444_v34 = vpop.xlane.xlu0 %443  ;;  %1250 = vrsqrt.f32 %v556_v30  ;;  %v525_v22 = vmul.f32 0.03125, %v489_v44  ;;  %v602_v32 = vmul.f32 %v1241_v61, %v1601_v37 }
 0x16e   : > { %v510_v35 = vmul.f32 0.03125, %v444_v34  ;;  %1252 = vrsqrt.f32 %v541_v60  ;;  %1169 = vmatmul.mubr.msk.f32.gmra.mrb[8].mxu1 %vm206_vm0, %v617_v9 }
 0x16f   : > { %v1243_v42 = vpop.eup %1242  ;;  %v557_v7 = vadd.f32 1e-06, %v525_v22  ;;  %1147 = vmatprep.mubr.msk.f32.mxu0 %vm206_vm0, %v602_v32 }
 0x170   : > { %v542_v10 = vadd.f32 1e-06, %v510_v35  ;;  %v1245_v33 = vpop.eup %1244  ;;  %v492_v38 = vpop.xlane.xlu1 %491  ;;  %v618_v46 = vmul.f32 %v1243_v42, %v1604_v24 }
 0x171   : > { %v447_v39 = vpop.xlane.xlu0 %446  ;;  %1254 = vrsqrt.f32 %v557_v7  ;;  %v526_v20 = vmul.f32 0.03125, %v492_v38  ;;  %v603_v13 = vmul.f32 %v1245_v33, %v1613_v28 }
 0x172   : > { %v511_v48 = vmul.f32 0.03125, %v447_v39  ;;  %1256 = vrsqrt.f32 %v542_v10  ;;  %1171 = vmatprep.mubr.msk.f32.mxu1 %vm206_vm0, %v618_v46 }
 0x173   : > { %v1247_v37 = vpop.eup %1246  ;;  %v558_v50 = vadd.f32 1e-06, %v526_v20  ;;  %1148 = vmatmul.mubr.msk.f32.gmra.mrb[10].mxu0 %vm206_vm0, %v603_v13 }
 0x174   : > { %v543_v26 = vadd.f32 1e-06, %v511_v48  ;;  %v1249_v1 = vpop.eup %1248  ;;  %v495_v51 = vpop.xlane.xlu1 %494  ;;  %v619_v54 = vmul.f32 %v1247_v37, %v1616_v41 }
 0x175   : > { %1258 = vrsqrt.f32 %v558_v50  ;;  %v527_v11 = vmul.f32 0.03125, %v495_v51  ;;  %v604_v24 = vmul.f32 %v1249_v1, %v1625_v31 }
 0x176   : > { %1260 = vrsqrt.f32 %v543_v26  ;;  %1172 = vmatmul.mubr.msk.f32.gmra.mrb[10].mxu1 %vm206_vm0, %v619_v54 }
 0x177   : > { %v1251_v28 = vpop.eup %1250  ;;  %v559_v8 = vadd.f32 1e-06, %v527_v11  ;;  %1150 = vmatprep.mubr.msk.f32.mxu0 %vm206_vm0, %v604_v24 }
 0x178   : > { %v1253_v58 = vpop.eup %1252  ;;  %v620_v36 = vmul.f32 %v1251_v28, %v1628_v45 }
 0x179   : > { %1262 = vrsqrt.f32 %v559_v8  ;;  %v605_v17 = vmul.f32 %v1253_v58, %v1637_v47 }
 0x17a   : > { %1174 = vmatprep.mubr.msk.f32.mxu1 %vm206_vm0, %v620_v36 }
 0x17b   : > { %v1255_v41 = vpop.eup %1254  ;;  %1151 = vmatmul.mubr.msk.f32.gmra.mrb[12].mxu0 %vm206_vm0, %v605_v17 }
 0x17c   : > { %v1257_v31 = vpop.eup %1256  ;;  %v621_v62 = vmul.f32 %v1255_v41, %v1640_v49  ;;  %v1741_v49 = vld [vmem:[%s1851_s2] ss:$0 sm:$0xff] }
 0x17d   : > { %v606_v52 = vmul.f32 %v1257_v31, %v1649_v63 }
 0x17e   : > { %1175 = vmatmul.mubr.msk.f32.gmra.mrb[12].mxu1 %vm206_vm0, %v621_v62 }
 0x17f   : > { %v1259_v43 = vpop.eup %1258  ;;  %1153 = vmatprep.mubr.msk.f32.mxu0 %vm206_vm0, %v606_v52 }
 0x180   : > { %v1261_v45 = vpop.eup %1260  ;;  %v622_v3 = vmul.f32 %v1259_v43, %v1652_v53 }
 0x181   : > { %v607_v47 = vmul.f32 %v1261_v45, %v1661_v15 }
 0x182   : > { %1177 = vmatprep.mubr.msk.f32.mxu1 %vm206_vm0, %v622_v3 }
 0x183   : > { %v1263_v27 = vpop.eup %1262  ;;  %1154 = vmatmul.mubr.msk.f32.gmra.mrb[14].mxu0 %vm206_vm0, %v607_v47 }
 0x184   : > { %v623_v4 = vmul.f32 %v1263_v27, %v1664_v57 }
 0x186   : > { %1178 = vmatmul.mubr.msk.f32.gmra.mrb[14].mxu1 %vm206_vm0, %v623_v4 }
 0x21e   : > { %v1134_v63 = vpop.f32.mrb[0].mxu0 }
 0x21f   : > { %v803_v53 = vadd.f32 %v1134_v63, %v1741_v49  ;;  %v797_v15 = vpop.f32.mrb[1].mxu0 }
 0x220   : > { %v798_v57 = vadd.f32 %v1741_v49, %v797_v15 }
 0x221   : > { %957 = vst.msk [vmem:[%s1748_s4 + $0x8] sm:$0xff] %vm206_vm0, %v803_v53  ;;  %v1158_v6 = vpop.f32.mrb[0].mxu1 }
 0x222   : > { %956 = vst.msk [vmem:[%s1748_s4] sm:$0xff] %vm206_vm0, %v798_v57  ;;  %v883_v2 = vadd.f32 %v1158_v6, %v1741_v49  ;;  %v877_v12 = vpop.f32.mrb[1].mxu1 }
 0x223   : > { %v878_v21 = vadd.f32 %v1741_v49, %v877_v12 }
 0x224   : > { %973 = vst.msk [vmem:[%s1748_s4 + $0x88] sm:$0xff] %vm206_vm0, %v883_v2 }
 0x225   : > { %972 = vst.msk [vmem:[%s1748_s4 + $0x80] sm:$0xff] %vm206_vm0, %v878_v21 }
 0x226   : > { %v1137_v14 = vpop.f32.mrb[2].mxu0 }
 0x227   : > { %v813_v40 = vadd.f32 %v1137_v14, %v1741_v49  ;;  %v807_v59 = vpop.f32.mrb[3].mxu0 }
 0x228   : > { %v808_v29 = vadd.f32 %v1741_v49, %v807_v59 }
 0x229   : > { %959 = vst.msk [vmem:[%s1748_s4 + $0x18] sm:$0xff] %vm206_vm0, %v813_v40  ;;  %v1161_v56 = vpop.f32.mrb[2].mxu1 }
 0x22a   : > { %958 = vst.msk [vmem:[%s1748_s4 + $0x10] sm:$0xff] %vm206_vm0, %v808_v29  ;;  %v893_v18 = vadd.f32 %v1161_v56, %v1741_v49  ;;  %v887_v5 = vpop.f32.mrb[3].mxu1 }
 0x22b   : > { %v888_v23 = vadd.f32 %v1741_v49, %v887_v5 }
 0x22c   : > { %975 = vst.msk [vmem:[%s1748_s4 + $0x98] sm:$0xff] %vm206_vm0, %v893_v18 }
 0x22d   : > { %974 = vst.msk [vmem:[%s1748_s4 + $0x90] sm:$0xff] %vm206_vm0, %v888_v23 }
 0x22e   : > { %v1140_v0 = vpop.f32.mrb[4].mxu0 }
 0x22f   : > { %v823_v25 = vadd.f32 %v1140_v0, %v1741_v49  ;;  %v817_v55 = vpop.f32.mrb[5].mxu0 }
 0x230   : > { %v818_v16 = vadd.f32 %v1741_v49, %v817_v55 }
 0x231   : > { %961 = vst.msk [vmem:[%s1748_s4 + $0x28] sm:$0xff] %vm206_vm0, %v823_v25  ;;  %v1164_v19 = vpop.f32.mrb[4].mxu1 }
 0x232   : > { %960 = vst.msk [vmem:[%s1748_s4 + $0x20] sm:$0xff] %vm206_vm0, %v818_v16  ;;  %v903_v30 = vadd.f32 %v1164_v19, %v1741_v49  ;;  %v897_v60 = vpop.f32.mrb[5].mxu1 }
 0x233   : > { %v898_v61 = vadd.f32 %v1741_v49, %v897_v60 }
 0x234   : > { %977 = vst.msk [vmem:[%s1748_s4 + $0xa8] sm:$0xff] %vm206_vm0, %v903_v30 }
 0x235   : > { %976 = vst.msk [vmem:[%s1748_s4 + $0xa0] sm:$0xff] %vm206_vm0, %v898_v61 }
 0x236   : > { %v1143_v44 = vpop.f32.mrb[6].mxu0 }
 0x237   : > { %v833_v34 = vadd.f32 %v1143_v44, %v1741_v49  ;;  %v827_v9 = vpop.f32.mrb[7].mxu0 }
 0x238   : > { %v828_v22 = vadd.f32 %v1741_v49, %v827_v9 }
 0x239   : > { %963 = vst.msk [vmem:[%s1748_s4 + $0x38] sm:$0xff] %vm206_vm0, %v833_v34  ;;  %v1167_v35 = vpop.f32.mrb[6].mxu1 }
 0x23a   : > { %962 = vst.msk [vmem:[%s1748_s4 + $0x30] sm:$0xff] %vm206_vm0, %v828_v22  ;;  %v913_v32 = vadd.f32 %v1167_v35, %v1741_v49  ;;  %v907_v42 = vpop.f32.mrb[7].mxu1 }
 0x23b   : > { %v908_v7 = vadd.f32 %v1741_v49, %v907_v42 }
 0x23c   : > { %979 = vst.msk [vmem:[%s1748_s4 + $0xb8] sm:$0xff] %vm206_vm0, %v913_v32 }
 0x23d   : > { %978 = vst.msk [vmem:[%s1748_s4 + $0xb0] sm:$0xff] %vm206_vm0, %v908_v7 }
 0x23e   : > { %v1146_v10 = vpop.f32.mrb[8].mxu0 }
 0x23f   : > { %v843_v33 = vadd.f32 %v1146_v10, %v1741_v49  ;;  %v837_v38 = vpop.f32.mrb[9].mxu0 }
 0x240   : > { %v838_v39 = vadd.f32 %v1741_v49, %v837_v38 }
 0x241   : > { %965 = vst.msk [vmem:[%s1748_s4 + $0x48] sm:$0xff] %vm206_vm0, %v843_v33  ;;  %v1170_v46 = vpop.f32.mrb[8].mxu1 }
 0x242   : > { %964 = vst.msk [vmem:[%s1748_s4 + $0x40] sm:$0xff] %vm206_vm0, %v838_v39  ;;  %v923_v20 = vadd.f32 %v1170_v46, %v1741_v49  ;;  %v917_v48 = vpop.f32.mrb[9].mxu1 }
 0x243   : > { %v918_v13 = vadd.f32 %v1741_v49, %v917_v48 }
 0x244   : > { %981 = vst.msk [vmem:[%s1748_s4 + $0xc8] sm:$0xff] %vm206_vm0, %v923_v20 }
 0x245   : > { %980 = vst.msk [vmem:[%s1748_s4 + $0xc0] sm:$0xff] %vm206_vm0, %v918_v13 }
 0x246   : > { %v1149_v37 = vpop.f32.mrb[10].mxu0 }
 0x247   : > { %v853_v50 = vadd.f32 %v1149_v37, %v1741_v49  ;;  %v847_v26 = vpop.f32.mrb[11].mxu0 }
 0x248   : > { %v848_v1 = vadd.f32 %v1741_v49, %v847_v26 }
 0x249   : > { %967 = vst.msk [vmem:[%s1748_s4 + $0x58] sm:$0xff] %vm206_vm0, %v853_v50  ;;  %v1173_v51 = vpop.f32.mrb[10].mxu1 }
 0x24a   : > { %966 = vst.msk [vmem:[%s1748_s4 + $0x50] sm:$0xff] %vm206_vm0, %v848_v1  ;;  %v933_v54 = vadd.f32 %v1173_v51, %v1741_v49  ;;  %v927_v11 = vpop.f32.mrb[11].mxu1 }
 0x24b   : > { %v928_v24 = vadd.f32 %v1741_v49, %v927_v11 }
 0x24c   : > { %983 = vst.msk [vmem:[%s1748_s4 + $0xd8] sm:$0xff] %vm206_vm0, %v933_v54 }
 0x24d   : > { %982 = vst.msk [vmem:[%s1748_s4 + $0xd0] sm:$0xff] %vm206_vm0, %v928_v24 }
 0x24e   : > { %v1152_v28 = vpop.f32.mrb[12].mxu0 }
 0x24f   : > { %v863_v8 = vadd.f32 %v1152_v28, %v1741_v49  ;;  %v857_v58 = vpop.f32.mrb[13].mxu0 }
 0x250   : > { %v858_v36 = vadd.f32 %v1741_v49, %v857_v58 }
 0x251   : > { %969 = vst.msk [vmem:[%s1748_s4 + $0x68] sm:$0xff] %vm206_vm0, %v863_v8  ;;  %v1176_v17 = vpop.f32.mrb[12].mxu1 }
 0x252   : > { %968 = vst.msk [vmem:[%s1748_s4 + $0x60] sm:$0xff] %vm206_vm0, %v858_v36  ;;  %v943_v41 = vadd.f32 %v1176_v17, %v1741_v49  ;;  %v937_v31 = vpop.f32.mrb[13].mxu1 }
 0x253   : > { %v938_v62 = vadd.f32 %v1741_v49, %v937_v31 }
 0x254   : > { %985 = vst.msk [vmem:[%s1748_s4 + $0xe8] sm:$0xff] %vm206_vm0, %v943_v41 }
 0x255   : > { %984 = vst.msk [vmem:[%s1748_s4 + $0xe0] sm:$0xff] %vm206_vm0, %v938_v62 }
 0x256   : > { %v1155_v52 = vpop.f32.mrb[14].mxu0 }
 0x257   : > { %v873_v43 = vadd.f32 %v1155_v52, %v1741_v49  ;;  %v867_v45 = vpop.f32.mrb[15].mxu0 }
 0x258   : > { %v868_v3 = vadd.f32 %v1741_v49, %v867_v45 }
 0x259   : > { %971 = vst.msk [vmem:[%s1748_s4 + $0x78] sm:$0xff] %vm206_vm0, %v873_v43  ;;  %v1179_v47 = vpop.f32.mrb[14].mxu1 }
 0x25a   : > { %970 = vst.msk [vmem:[%s1748_s4 + $0x70] sm:$0xff] %vm206_vm0, %v868_v3  ;;  %v953_v27 = vadd.f32 %v1179_v47, %v1741_v49  ;;  %v947_v4 = vpop.f32.mrb[15].mxu1 }
 0x25b   : > { %v948_v63 = vadd.f32 %v1741_v49, %v947_v4 }
 0x25c   : > { %987 = vst.msk [vmem:[%s1748_s4 + $0xf8] sm:$0xff] %vm206_vm0, %v953_v27 }
 0x25d   : > { %986 = vst.msk [vmem:[%s1748_s4 + $0xf0] sm:$0xff] %vm206_vm0, %v948_v63 }
 0x25e PF: > { %s13_s12 = sadd.s32 1, %s1270_s12  }
 0x25f   : > { %p10_p4 = scmp.ge.s32.totalorder %s13_s12, 4  }
 0x261   :  { %12 = sbr.rel (!%p10_p4) target bundleno = 1 (0x1), region = 62 }

// kernel: structure_enhancement_forward.8
= control target key start
LH: loop header
LB: loop body
LE: loop exit
PB: predicated region body
PF: predicated region fallthrough
CT: control target
= control target key end

     0   :  { %s2205_s12 = smov 0   ;;  %s3274_s0 = inlined_call_operand.vmem [shape: f32[1024,32], index: 0, kind: input, shape index: {}]   ;;  %s3275_s1 = inlined_call_operand.vmem [shape: f32[32,64], index: 1, kind: input, shape index: {}]   ;;  %s3276_s2 = inlined_call_operand.vmem [shape: f32[1,64], index: 2, kind: input, shape index: {}]   ;;  %s3277_s3 = inlined_call_operand.vmem [shape: f32[1024,64], index: 3, kind: output, shape index: {}]  }
   0x1 LB: > { %s1781_s13 = sadd.s32 4294967295, %s2183_s12   ;;  %p1785_p0 = scmp.ge.s32.totalorder %s2183_s12, 1  ;;  %s2183_s12 = sphi %s2205_s12, %s13_s12  }
   0x2   : > { %p138_p1 = scmp.lt.s32.totalorder %s2183_s12, 3 }
   0x4   : > { %p139_p2 = pnand %p1785_p0, %p138_p1 }
   0x6   : > { %142 = sbr.rel (%p139_p2) target bundleno = 673 (0x2a1), region = 32 }
   0xd   : > { %s1786_s14 = sshll.u32 %s1781_s13, 6  ;;  %vm238_vm0 = vcmask 261120   ;;  %vm1660_vm1 = vcmask 523264  }
   0xe   : > { %p163_p3 = scmp.lt.s32.totalorder %s1786_s14, 127 }
  0x10   : > { %s3375_s14 = smov (!%p163_p3, %s1786_s14), 127 }
  0x11   : > { %s1787_s15 = sshll.u32 %s3375_s14, 3 }
  0x12   : > { %s2221_s18 = scalar_lea.vmem %s3274_s0, %s1787_s15  ;;  %s3077_s4 = scalar_lea.vmem %s3277_s3, %s1787_s15 }
  0x13   : > { %v2224_v0 = vld [vmem:[%s2221_s18] sm:$0xff]  ;;  %v2227_v1 = vld [vmem:[%s2221_s18 + $0x8] sm:$0xff]  ;;  %v2244_v8 = vld [vmem:[%s2221_s18 + $0x10] sm:$0xff] }
  0x14   : > { %v2230_v2 = vld [vmem:[%s2221_s18 + $0x100] sm:$0xff]  ;;  %v239_v3 = vsel %vm238_vm0, %v2224_v0, 0.0  ;;  %v242_v4 = vsel %vm238_vm0, %v2227_v1, 0.0  ;;  %v2237_v5 = vld [vmem:[%s2221_s18 + $0x108] sm:$0xff]  ;;  %v2247_v9 = vld [vmem:[%s2221_s18 + $0x110] sm:$0xff]  ;;  %v245_v10 = vsel %vm238_vm0, %v2244_v8, 0.0 }
  0x15   : > { %240 = vadd.xlane.f32.xlu0 %v239_v3  ;;  %243 = vadd.xlane.f32.xlu1 %v242_v4  ;;  %v335_v6 = vsel %vm238_vm0, %v2230_v2, 0.0  ;;  %v338_v7 = vsel %vm238_vm0, %v2237_v5, 0.0  ;;  %v341_v11 = vsel %vm238_vm0, %v2247_v9, 0.0  ;;  %v2254_v12 = vld [vmem:[%s2221_s18 + $0x18] sm:$0xff]  ;;  %v2264_v16 = vld [vmem:[%s2221_s18 + $0x20] sm:$0xff]  ;;  %v2274_v20 = vld [vmem:[%s2221_s18 + $0x28] sm:$0xff] }
  0x16   : > { %v2257_v13 = vld [vmem:[%s2221_s18 + $0x118] sm:$0xff]  ;;  %v248_v14 = vsel %vm238_vm0, %v2254_v12, 0.0  ;;  %v2267_v17 = vld [vmem:[%s2221_s18 + $0x120] sm:$0xff]  ;;  %v251_v18 = vsel %vm238_vm0, %v2264_v16, 0.0  ;;  %v2277_v21 = vld [vmem:[%s2221_s18 + $0x128] sm:$0xff]  ;;  %v254_v22 = vsel %vm238_vm0, %v2274_v20, 0.0 }
  0x17   : > { %v344_v15 = vsel %vm238_vm0, %v2257_v13, 0.0  ;;  %v347_v19 = vsel %vm238_vm0, %v2267_v17, 0.0  ;;  %v350_v23 = vsel %vm238_vm0, %v2277_v21, 0.0  ;;  %v2284_v24 = vld [vmem:[%s2221_s18 + $0x30] sm:$0xff]  ;;  %v2294_v28 = vld [vmem:[%s2221_s18 + $0x38] sm:$0xff]  ;;  %v2304_v32 = vld [vmem:[%s2221_s18 + $0x40] sm:$0xff] }
  0x18   : > { %v2287_v25 = vld [vmem:[%s2221_s18 + $0x130] sm:$0xff]  ;;  %v257_v26 = vsel %vm238_vm0, %v2284_v24, 0.0  ;;  %v2297_v29 = vld [vmem:[%s2221_s18 + $0x138] sm:$0xff]  ;;  %v260_v30 = vsel %vm238_vm0, %v2294_v28, 0.0  ;;  %v2307_v33 = vld [vmem:[%s2221_s18 + $0x140] sm:$0xff]  ;;  %v263_v34 = vsel %vm238_vm0, %v2304_v32, 0.0 }
  0x19   : > { %336 = vadd.xlane.f32.xlu0 %v335_v6  ;;  %339 = vadd.xlane.f32.xlu1 %v338_v7  ;;  %v353_v27 = vsel %vm238_vm0, %v2287_v25, 0.0  ;;  %v356_v31 = vsel %vm238_vm0, %v2297_v29, 0.0  ;;  %v359_v35 = vsel %vm238_vm0, %v2307_v33, 0.0  ;;  %v2314_v36 = vld [vmem:[%s2221_s18 + $0x48] sm:$0xff]  ;;  %v2324_v40 = vld [vmem:[%s2221_s18 + $0x50] sm:$0xff]  ;;  %v2334_v44 = vld [vmem:[%s2221_s18 + $0x58] sm:$0xff] }
  0x1a   : > { %v2317_v37 = vld [vmem:[%s2221_s18 + $0x148] sm:$0xff]  ;;  %v266_v38 = vsel %vm238_vm0, %v2314_v36, 0.0  ;;  %v2327_v41 = vld [vmem:[%s2221_s18 + $0x150] sm:$0xff]  ;;  %v269_v42 = vsel %vm238_vm0, %v2324_v40, 0.0  ;;  %v2337_v45 = vld [vmem:[%s2221_s18 + $0x158] sm:$0xff]  ;;  %v272_v46 = vsel %vm238_vm0, %v2334_v44, 0.0 }
  0x1b   : > { %v362_v39 = vsel %vm238_vm0, %v2317_v37, 0.0  ;;  %v365_v43 = vsel %vm238_vm0, %v2327_v41, 0.0  ;;  %v368_v47 = vsel %vm238_vm0, %v2337_v45, 0.0  ;;  %v2344_v48 = vld [vmem:[%s2221_s18 + $0x60] sm:$0xff]  ;;  %v2354_v52 = vld [vmem:[%s2221_s18 + $0x68] sm:$0xff]  ;;  %v2364_v56 = vld [vmem:[%s2221_s18 + $0x70] sm:$0xff] }
  0x1c   : > { %v2347_v49 = vld [vmem:[%s2221_s18 + $0x160] sm:$0xff]  ;;  %v275_v50 = vsel %vm238_vm0, %v2344_v48, 0.0  ;;  %v2357_v53 = vld [vmem:[%s2221_s18 + $0x168] sm:$0xff]  ;;  %v278_v54 = vsel %vm238_vm0, %v2354_v52, 0.0  ;;  %v2367_v57 = vld [vmem:[%s2221_s18 + $0x170] sm:$0xff]  ;;  %v281_v58 = vsel %vm238_vm0, %v2364_v56, 0.0 }
  0x1d   : > { %246 = vadd.xlane.f32.xlu0 %v245_v10  ;;  %342 = vadd.xlane.f32.xlu1 %v341_v11  ;;  %v371_v51 = vsel %vm238_vm0, %v2347_v49, 0.0  ;;  %v374_v55 = vsel %vm238_vm0, %v2357_v53, 0.0  ;;  %v377_v59 = vsel %vm238_vm0, %v2367_v57, 0.0  ;;  %v2374_v60 = vld [vmem:[%s2221_s18 + $0x78] sm:$0xff]  ;;  %v2384_v3 = vld [vmem:[%s2221_s18 + $0x80] sm:$0xff]  ;;  %v2394_v10 = vld [vmem:[%s2221_s18 + $0x88] sm:$0xff] }
  0x1e   : > { %v2377_v61 = vld [vmem:[%s2221_s18 + $0x178] sm:$0xff]  ;;  %v284_v62 = vsel %vm238_vm0, %v2374_v60, 0.0  ;;  %v2387_v4 = vld [vmem:[%s2221_s18 + $0x180] sm:$0xff]  ;;  %v287_v6 = vsel %vm238_vm0, %v2384_v3, 0.0  ;;  %v2397_v11 = vld [vmem:[%s2221_s18 + $0x188] sm:$0xff] }
  0x1f   : > { %v380_v63 = vsel %vm238_vm0, %v2377_v61, 0.0  ;;  %v383_v7 = vsel %vm238_vm0, %v2387_v4, 0.0 }
  0x21   : > { %249 = vadd.xlane.f32.xlu0 %v248_v14  ;;  %345 = vadd.xlane.f32.xlu1 %v344_v15  ;;  %v290_v14 = vsel %vm238_vm0, %v2394_v10, 0.0  ;;  %v386_v15 = vsel %vm238_vm0, %v2397_v11, 0.0 }
  0x25   : > { %252 = vadd.xlane.f32.xlu0 %v251_v18  ;;  %348 = vadd.xlane.f32.xlu1 %v347_v19  ;;  %v2404_v18 = vld [vmem:[%s2221_s18 + $0x90] sm:$0xff] }
  0x26   : > { %v2407_v19 = vld [vmem:[%s2221_s18 + $0x190] sm:$0xff] }
  0x29   : > { %255 = vadd.xlane.f32.xlu0 %v254_v22  ;;  %351 = vadd.xlane.f32.xlu1 %v350_v23  ;;  %v293_v22 = vsel %vm238_vm0, %v2404_v18, 0.0  ;;  %v389_v23 = vsel %vm238_vm0, %v2407_v19, 0.0 }
  0x2d   : > { %258 = vadd.xlane.f32.xlu0 %v257_v26  ;;  %354 = vadd.xlane.f32.xlu1 %v353_v27  ;;  %v2414_v26 = vld [vmem:[%s2221_s18 + $0x98] sm:$0xff] }
  0x2e   : > { %v2417_v27 = vld [vmem:[%s2221_s18 + $0x198] sm:$0xff] }
  0x31   : > { %261 = vadd.xlane.f32.xlu0 %v260_v30  ;;  %357 = vadd.xlane.f32.xlu1 %v356_v31  ;;  %v296_v30 = vsel %vm238_vm0, %v2414_v26, 0.0  ;;  %v392_v31 = vsel %vm238_vm0, %v2417_v27, 0.0 }
  0x35   : > { %264 = vadd.xlane.f32.xlu0 %v263_v34  ;;  %360 = vadd.xlane.f32.xlu1 %v359_v35  ;;  %v2424_v34 = vld [vmem:[%s2221_s18 + $0xa0] sm:$0xff] }
  0x36   : > { %v2427_v35 = vld [vmem:[%s2221_s18 + $0x1a0] sm:$0xff] }
  0x39   : > { %267 = vadd.xlane.f32.xlu0 %v266_v38  ;;  %363 = vadd.xlane.f32.xlu1 %v362_v39  ;;  %v299_v38 = vsel %vm238_vm0, %v2424_v34, 0.0  ;;  %v395_v39 = vsel %vm238_vm0, %v2427_v35, 0.0 }
  0x3d   : > { %270 = vadd.xlane.f32.xlu0 %v269_v42  ;;  %366 = vadd.xlane.f32.xlu1 %v365_v43  ;;  %v2434_v42 = vld [vmem:[%s2221_s18 + $0xa8] sm:$0xff] }
  0x3e   : > { %v2437_v43 = vld [vmem:[%s2221_s18 + $0x1a8] sm:$0xff] }
  0x41   : > { %273 = vadd.xlane.f32.xlu0 %v272_v46  ;;  %369 = vadd.xlane.f32.xlu1 %v368_v47  ;;  %v302_v46 = vsel %vm238_vm0, %v2434_v42, 0.0  ;;  %v398_v47 = vsel %vm238_vm0, %v2437_v43, 0.0 }
  0x45   : > { %276 = vadd.xlane.f32.xlu0 %v275_v50  ;;  %372 = vadd.xlane.f32.xlu1 %v371_v51  ;;  %v2444_v50 = vld [vmem:[%s2221_s18 + $0xb0] sm:$0xff] }
  0x46   : > { %v2447_v51 = vld [vmem:[%s2221_s18 + $0x1b0] sm:$0xff] }
  0x49   : > { %279 = vadd.xlane.f32.xlu0 %v278_v54  ;;  %375 = vadd.xlane.f32.xlu1 %v374_v55  ;;  %v305_v54 = vsel %vm238_vm0, %v2444_v50, 0.0  ;;  %v401_v55 = vsel %vm238_vm0, %v2447_v51, 0.0 }
  0x4d   : > { %282 = vadd.xlane.f32.xlu0 %v281_v58  ;;  %378 = vadd.xlane.f32.xlu1 %v377_v59  ;;  %v2454_v58 = vld [vmem:[%s2221_s18 + $0xb8] sm:$0xff] }
  0x4e   : > { %v2457_v59 = vld [vmem:[%s2221_s18 + $0x1b8] sm:$0xff] }
  0x51   : > { %285 = vadd.xlane.f32.xlu0 %v284_v62  ;;  %381 = vadd.xlane.f32.xlu1 %v380_v63  ;;  %v308_v62 = vsel %vm238_vm0, %v2454_v58, 0.0  ;;  %v404_v63 = vsel %vm238_vm0, %v2457_v59, 0.0 }
  0x55   : > { %288 = vadd.xlane.f32.xlu0 %v287_v6  ;;  %384 = vadd.xlane.f32.xlu1 %v383_v7  ;;  %v2464_v6 = vld [vmem:[%s2221_s18 + $0xc0] sm:$0xff] }
  0x56   : > { %v2467_v7 = vld [vmem:[%s2221_s18 + $0x1c0] sm:$0xff] }
  0x59   : > { %291 = vadd.xlane.f32.xlu0 %v290_v14  ;;  %387 = vadd.xlane.f32.xlu1 %v386_v15  ;;  %v311_v14 = vsel %vm238_vm0, %v2464_v6, 0.0  ;;  %v407_v15 = vsel %vm238_vm0, %v2467_v7, 0.0 }
  0x5d   : > { %294 = vadd.xlane.f32.xlu0 %v293_v22  ;;  %390 = vadd.xlane.f32.xlu1 %v389_v23  ;;  %v2474_v22 = vld [vmem:[%s2221_s18 + $0xc8] sm:$0xff] }
  0x5e   : > { %3310 = vst [vmem:[#allocation2_spill] sm:$0xff] %v2474_v22  ;;  %v2477_v23 = vld [vmem:[%s2221_s18 + $0x1c8] sm:$0xff] }
  0x5f   : > { %3311 = vst [vmem:[#allocation3_spill] sm:$0xff] %v2477_v23 }
  0x61   : > { %297 = vadd.xlane.f32.xlu0 %v296_v30  ;;  %393 = vadd.xlane.f32.xlu1 %v392_v31  ;;  %v314_v30 = vsel %vm238_vm0, %v2474_v22, 0.0  ;;  %v410_v31 = vsel %vm238_vm0, %v2477_v23, 0.0 }
  0x65   : > { %300 = vadd.xlane.f32.xlu0 %v299_v38  ;;  %396 = vadd.xlane.f32.xlu1 %v395_v39  ;;  %v2484_v38 = vld [vmem:[%s2221_s18 + $0xd0] sm:$0xff] }
  0x66   : > { %3312 = vst [vmem:[#allocation4_spill] sm:$0xff] %v2484_v38  ;;  %v2487_v39 = vld [vmem:[%s2221_s18 + $0x1d0] sm:$0xff] }
  0x67   : > { %3313 = vst [vmem:[#allocation5_spill] sm:$0xff] %v2487_v39 }
  0x69   : > { %303 = vadd.xlane.f32.xlu0 %v302_v46  ;;  %399 = vadd.xlane.f32.xlu1 %v398_v47  ;;  %v317_v46 = vsel %vm238_vm0, %v2484_v38, 0.0  ;;  %v413_v47 = vsel %vm238_vm0, %v2487_v39, 0.0 }
  0x6d   : > { %306 = vadd.xlane.f32.xlu0 %v305_v54  ;;  %402 = vadd.xlane.f32.xlu1 %v401_v55  ;;  %v2494_v54 = vld [vmem:[%s2221_s18 + $0xd8] sm:$0xff] }
  0x6e   : > { %3314 = vst [vmem:[#allocation6_spill] sm:$0xff] %v2494_v54  ;;  %v2497_v55 = vld [vmem:[%s2221_s18 + $0x1d8] sm:$0xff] }
  0x6f   : > { %3315 = vst [vmem:[#allocation7_spill] sm:$0xff] %v2497_v55 }
  0x71   : > { %309 = vadd.xlane.f32.xlu0 %v308_v62  ;;  %405 = vadd.xlane.f32.xlu1 %v404_v63  ;;  %v320_v62 = vsel %vm238_vm0, %v2494_v54, 0.0  ;;  %v416_v63 = vsel %vm238_vm0, %v2497_v55, 0.0  ;;  %v2527_v54 = vld [vmem:[%s2221_s18 + $0x1f0] sm:$0xff] }
  0x72   : > { %3321 = vst [vmem:[#allocation13_spill] sm:$0xff] %v2527_v54 }
  0x75   : > { %312 = vadd.xlane.f32.xlu0 %v311_v14  ;;  %408 = vadd.xlane.f32.xlu1 %v407_v15  ;;  %v2504_v14 = vld [vmem:[%s2221_s18 + $0xe0] sm:$0xff] }
  0x76   : > { %3316 = vst [vmem:[#allocation8_spill] sm:$0xff] %v2504_v14  ;;  %v2507_v15 = vld [vmem:[%s2221_s18 + $0x1e0] sm:$0xff] }
  0x77   : > { %3317 = vst [vmem:[#allocation9_spill] sm:$0xff] %v2507_v15 }
  0x79   : > { %315 = vadd.xlane.f32.xlu0 %v314_v30  ;;  %411 = vadd.xlane.f32.xlu1 %v410_v31  ;;  %v323_v30 = vsel %vm238_vm0, %v2504_v14, 0.0  ;;  %v419_v31 = vsel %vm238_vm0, %v2507_v15, 0.0  ;;  %v425_v14 = vsel %vm238_vm0, %v2527_v54, 0.0 }
  0x7d   : > { %318 = vadd.xlane.f32.xlu0 %v317_v46  ;;  %414 = vadd.xlane.f32.xlu1 %v413_v47  ;;  %v2514_v46 = vld [vmem:[%s2221_s18 + $0xe8] sm:$0xff] }
  0x7e   : > { %3318 = vst [vmem:[#allocation10_spill] sm:$0xff] %v2514_v46  ;;  %v2517_v47 = vld [vmem:[%s2221_s18 + $0x1e8] sm:$0xff]  ;;  %v326_v55 = vsel %vm238_vm0, %v2514_v46, 0.0 }
  0x7f   : > { %3319 = vst [vmem:[#allocation11_spill] sm:$0xff] %v2517_v47 }
  0x81   : > { %321 = vadd.xlane.f32.xlu0 %v320_v62  ;;  %417 = vadd.xlane.f32.xlu1 %v416_v63  ;;  %v422_v62 = vsel %vm238_vm0, %v2517_v47, 0.0  ;;  %v2524_v63 = vld [vmem:[%s2221_s18 + $0xf0] sm:$0xff] }
  0x82   : > { %3320 = vst [vmem:[#allocation12_spill] sm:$0xff] %v2524_v63  ;;  %v329_v15 = vsel %vm238_vm0, %v2524_v63, 0.0 }
  0x85   : > { %324 = vadd.xlane.f32.xlu0 %v323_v30  ;;  %420 = vadd.xlane.f32.xlu1 %v419_v31  ;;  %v2534_v30 = vld [vmem:[%s2221_s18 + $0xf8] sm:$0xff] }
  0x86   : > { %3322 = vst [vmem:[#allocation14_spill] sm:$0xff] %v2534_v30  ;;  %v2537_v31 = vld [vmem:[%s2221_s18 + $0x1f8] sm:$0xff]  ;;  %v332_v47 = vsel %vm238_vm0, %v2534_v30, 0.0 }
  0x87   : > { %v428_v46 = vsel %vm238_vm0, %v2537_v31, 0.0 }
  0x89   : > { %327 = vadd.xlane.f32.xlu0 %v326_v55  ;;  %423 = vadd.xlane.f32.xlu1 %v422_v62 }
  0x8d   : > { %330 = vadd.xlane.f32.xlu0 %v329_v15  ;;  %426 = vadd.xlane.f32.xlu1 %v425_v14 }
  0x91   : > { %333 = vadd.xlane.f32.xlu0 %v332_v47  ;;  %429 = vadd.xlane.f32.xlu1 %v428_v46 }
  0xa2   : > { %v241_v55 = vpop.xlane.xlu0 %240  ;;  %v244_v62 = vpop.xlane.xlu1 %243 }
  0xa3   : > { %v432_v63 = vmul.f32 0.03125, %v241_v55  ;;  %v433_v39 = vmul.f32 0.03125, %v244_v62 }
  0xa5   : > { %v2544_v54 = vsub.f32 %v2224_v0, %v432_v63  ;;  %v2547_v38 = vsub.f32 %v2227_v1, %v433_v39 }
  0xa6   : > { %v337_v15 = vpop.xlane.xlu0 %336  ;;  %v340_v14 = vpop.xlane.xlu1 %339 }
  0xa7   : > { %3323 = vst [vmem:[#allocation15_spill] sm:$0xff] %v2547_v38  ;;  %v464_v23 = vmul.f32 0.03125, %v337_v15  ;;  %v465_v22 = vmul.f32 0.03125, %v340_v14  ;;  %v560_v30 = vmul.f32 %v2544_v54, %v2544_v54  ;;  %v561_v46 = vmul.f32 %v2547_v38, %v2547_v38 }
  0xa9   : > { %v2554_v47 = vsub.f32 %v2230_v2, %v464_v23  ;;  %v2557_v55 = vsub.f32 %v2237_v5, %v465_v22  ;;  %v624_v0 = vsel %vm238_vm0, %v560_v30, 0.0  ;;  %v627_v63 = vsel %vm238_vm0, %v561_v46, 0.0 }
  0xaa   : > { %625 = vadd.xlane.f32.xlu0 %v624_v0  ;;  %v247_v1 = vpop.xlane.xlu0 %246  ;;  %v343_v39 = vpop.xlane.xlu1 %342 }
  0xab   : > { %v434_v62 = vmul.f32 0.03125, %v247_v1  ;;  %v466_v15 = vmul.f32 0.03125, %v343_v39  ;;  %v592_v14 = vmul.f32 %v2554_v47, %v2554_v47  ;;  %v593_v38 = vmul.f32 %v2557_v55, %v2557_v55 }
  0xad   : > { %v2566_v2 = vsub.f32 %v2244_v8, %v434_v62  ;;  %v2569_v5 = vsub.f32 %v2247_v9, %v466_v15  ;;  %v720_v22 = vsel %vm238_vm0, %v592_v14, 0.0  ;;  %v723_v46 = vsel %vm238_vm0, %v593_v38, 0.0 }
  0xae   : > { %628 = vadd.xlane.f32.xlu0 %v627_v63  ;;  %721 = vadd.xlane.f32.xlu1 %v720_v22  ;;  %v250_v23 = vpop.xlane.xlu0 %249  ;;  %v346_v30 = vpop.xlane.xlu1 %345 }
  0xaf   : > { %v435_v0 = vmul.f32 0.03125, %v250_v23  ;;  %v467_v1 = vmul.f32 0.03125, %v346_v30  ;;  %v562_v39 = vmul.f32 %v2566_v2, %v2566_v2  ;;  %v594_v8 = vmul.f32 %v2569_v5, %v2569_v5 }
  0xb1   : > { %v2578_v62 = vsub.f32 %v2254_v12, %v435_v0  ;;  %v2581_v9 = vsub.f32 %v2257_v13, %v467_v1  ;;  %v630_v63 = vsel %vm238_vm0, %v562_v39, 0.0  ;;  %v726_v14 = vsel %vm238_vm0, %v594_v8, 0.0 }
  0xb2   : > { %724 = vadd.xlane.f32.xlu1 %v723_v46  ;;  %631 = vadd.xlane.f32.xlu0 %v630_v63  ;;  %v253_v15 = vpop.xlane.xlu0 %252  ;;  %v349_v38 = vpop.xlane.xlu1 %348 }
  0xb3   : > { %v436_v22 = vmul.f32 0.03125, %v253_v15  ;;  %v468_v23 = vmul.f32 0.03125, %v349_v38  ;;  %v563_v30 = vmul.f32 %v2578_v62, %v2578_v62  ;;  %v595_v12 = vmul.f32 %v2581_v9, %v2581_v9 }
  0xb5   : > { %v2590_v0 = vsub.f32 %v2264_v16, %v436_v22  ;;  %v2593_v13 = vsub.f32 %v2267_v17, %v468_v23  ;;  %v633_v46 = vsel %vm238_vm0, %v563_v30, 0.0  ;;  %v729_v8 = vsel %vm238_vm0, %v595_v12, 0.0 }
  0xb6   : > { %727 = vadd.xlane.f32.xlu1 %v726_v14  ;;  %634 = vadd.xlane.f32.xlu0 %v633_v46  ;;  %v256_v1 = vpop.xlane.xlu0 %255  ;;  %v352_v39 = vpop.xlane.xlu1 %351 }
  0xb7   : > { %v437_v63 = vmul.f32 0.03125, %v256_v1  ;;  %v469_v15 = vmul.f32 0.03125, %v352_v39  ;;  %v564_v38 = vmul.f32 %v2590_v0, %v2590_v0  ;;  %v596_v16 = vmul.f32 %v2593_v13, %v2593_v13 }
  0xb9   : > { %v2602_v22 = vsub.f32 %v2274_v20, %v437_v63  ;;  %v2605_v17 = vsub.f32 %v2277_v21, %v469_v15  ;;  %v636_v14 = vsel %vm238_vm0, %v564_v38, 0.0  ;;  %v732_v12 = vsel %vm238_vm0, %v596_v16, 0.0 }
  0xba   : > { %730 = vadd.xlane.f32.xlu1 %v729_v8  ;;  %637 = vadd.xlane.f32.xlu0 %v636_v14  ;;  %v259_v23 = vpop.xlane.xlu0 %258  ;;  %v355_v30 = vpop.xlane.xlu1 %354 }
  0xbb   : > { %v438_v46 = vmul.f32 0.03125, %v259_v23  ;;  %v470_v1 = vmul.f32 0.03125, %v355_v30  ;;  %v565_v39 = vmul.f32 %v2602_v22, %v2602_v22  ;;  %v597_v20 = vmul.f32 %v2605_v17, %v2605_v17 }
  0xbd   : > { %v2614_v63 = vsub.f32 %v2284_v24, %v438_v46  ;;  %v2617_v21 = vsub.f32 %v2287_v25, %v470_v1  ;;  %v639_v8 = vsel %vm238_vm0, %v565_v39, 0.0  ;;  %v735_v16 = vsel %vm238_vm0, %v597_v20, 0.0 }
  0xbe   : > { %733 = vadd.xlane.f32.xlu1 %v732_v12  ;;  %640 = vadd.xlane.f32.xlu0 %v639_v8  ;;  %v262_v15 = vpop.xlane.xlu0 %261  ;;  %v358_v38 = vpop.xlane.xlu1 %357 }
  0xbf   : > { %3324 = vst [vmem:[#allocation16_spill] sm:$0xff] %v2617_v21  ;;  %v439_v14 = vmul.f32 0.03125, %v262_v15  ;;  %v471_v23 = vmul.f32 0.03125, %v358_v38  ;;  %v566_v30 = vmul.f32 %v2614_v63, %v2614_v63  ;;  %v598_v24 = vmul.f32 %v2617_v21, %v2617_v21 }
  0xc1   : > { %v2626_v46 = vsub.f32 %v2294_v28, %v439_v14  ;;  %v2629_v25 = vsub.f32 %v2297_v29, %v471_v23  ;;  %v642_v12 = vsel %vm238_vm0, %v566_v30, 0.0  ;;  %v738_v20 = vsel %vm238_vm0, %v598_v24, 0.0  ;;  %v1072_v29 = vld [vmem:[%s3275_s1] sm:$0xff] }
  0xc2   : > { %736 = vadd.xlane.f32.xlu1 %v735_v16  ;;  %643 = vadd.xlane.f32.xlu0 %v642_v12  ;;  %v265_v1 = vpop.xlane.xlu0 %264  ;;  %v361_v39 = vpop.xlane.xlu1 %360  ;;  %v1073_v16 = vld [vmem:[%s3275_s1 + $0x8] sm:$0xff] }
  0xc3   : > { %3325 = vst [vmem:[#allocation17_spill] sm:$0xff] %v2626_v46  ;;  %3326 = vst [vmem:[#allocation18_spill] sm:$0xff] %v2629_v25  ;;  %v440_v8 = vmul.f32 0.03125, %v265_v1  ;;  %v472_v15 = vmul.f32 0.03125, %v361_v39  ;;  %v567_v38 = vmul.f32 %v2626_v46, %v2626_v46  ;;  %v599_v28 = vmul.f32 %v2629_v25, %v2629_v25 }
  0xc4   : > { %v2029_v14 = vpack.c.bf16 %v1073_v16, %v1072_v29 }
  0xc5   : > { %v2644_v23 = vsub.f32 %v2304_v32, %v440_v8  ;;  %v2647_v30 = vsub.f32 %v2307_v33, %v472_v15  ;;  %v645_v24 = vsel %vm238_vm0, %v567_v38, 0.0  ;;  %v741_v39 = vsel %vm238_vm0, %v599_v28, 0.0  ;;  %v1074_v33 = vld [vmem:[%s3275_s1 + $0x10] sm:$0xff] }
  0xc6   : > { %739 = vadd.xlane.f32.xlu1 %v738_v20  ;;  %646 = vadd.xlane.f32.xlu0 %v645_v24  ;;  %v268_v12 = vpop.xlane.xlu0 %267  ;;  %v364_v1 = vpop.xlane.xlu1 %363  ;;  %v1075_v20 = vld [vmem:[%s3275_s1 + $0x18] sm:$0xff] }
  0xc7   : > { %v441_v25 = vmul.f32 0.03125, %v268_v12  ;;  %v473_v46 = vmul.f32 0.03125, %v364_v1  ;;  %v568_v21 = vmul.f32 %v2644_v23, %v2644_v23  ;;  %v600_v32 = vmul.f32 %v2647_v30, %v2647_v30  ;;  %2030 = vmatprep.subr.bf16.mxu0 %v2029_v14  ;;  %2037 = vmatprep.subr.bf16.mxu1 %v2029_v14 }
  0xc8   : > { %2032 = vmatpush3.bf16.msra.mxu0 %v2029_v14  ;;  %v2033_v8 = vpack.c.bf16 %v1075_v20, %v1074_v33  ;;  %2039 = vmatpush3.bf16.msra.mxu1 %v2029_v14 }
  0xc9   : > { %v2662_v15 = vsub.f32 %v2314_v36, %v441_v25  ;;  %v2665_v38 = vsub.f32 %v2317_v37, %v473_v46  ;;  %v648_v28 = vsel %vm238_vm0, %v568_v21, 0.0  ;;  %v744_v24 = vsel %vm238_vm0, %v600_v32, 0.0 }
  0xca   : > { %742 = vadd.xlane.f32.xlu1 %v741_v39  ;;  %649 = vadd.xlane.f32.xlu0 %v648_v28  ;;  %v271_v29 = vpop.xlane.xlu0 %270  ;;  %v367_v16 = vpop.xlane.xlu1 %366 }
  0xcb   : > { %v442_v12 = vmul.f32 0.03125, %v271_v29  ;;  %v474_v1 = vmul.f32 0.03125, %v367_v16  ;;  %v569_v33 = vmul.f32 %v2662_v15, %v2662_v15  ;;  %v601_v36 = vmul.f32 %v2665_v38, %v2665_v38  ;;  %2034 = vmatprep.subr.bf16.mxu0 %v2033_v8  ;;  %2038 = vmatprep.subr.bf16.mxu1 %v2033_v8 }
  0xcc   : > { %2036 = vmatpush3.bf16.msra.mxu0 %v2033_v8  ;;  %2040 = vmatpush3.bf16.msra.mxu1 %v2033_v8 }
  0xcd   : > { %v2674_v37 = vsub.f32 %v2324_v40, %v442_v12  ;;  %v2677_v21 = vsub.f32 %v2327_v41, %v474_v1  ;;  %v651_v46 = vsel %vm238_vm0, %v569_v33, 0.0  ;;  %v747_v39 = vsel %vm238_vm0, %v601_v36, 0.0 }
  0xce   : > { %745 = vadd.xlane.f32.xlu1 %v744_v24  ;;  %652 = vadd.xlane.f32.xlu0 %v651_v46  ;;  %v274_v25 = vpop.xlane.xlu0 %273  ;;  %v370_v14 = vpop.xlane.xlu1 %369 }
  0xcf   : > { %v443_v32 = vmul.f32 0.03125, %v274_v25  ;;  %v475_v20 = vmul.f32 0.03125, %v370_v14  ;;  %v570_v28 = vmul.f32 %v2674_v37, %v2674_v37  ;;  %v602_v40 = vmul.f32 %v2677_v21, %v2677_v21 }
  0xd1   : > { %v2686_v8 = vsub.f32 %v2334_v44, %v443_v32  ;;  %v2689_v41 = vsub.f32 %v2337_v45, %v475_v20  ;;  %v654_v29 = vsel %vm238_vm0, %v570_v28, 0.0  ;;  %v750_v12 = vsel %vm238_vm0, %v602_v40, 0.0 }
  0xd2   : > { %748 = vadd.xlane.f32.xlu1 %v747_v39  ;;  %655 = vadd.xlane.f32.xlu0 %v654_v29  ;;  %v277_v16 = vpop.xlane.xlu0 %276  ;;  %v373_v24 = vpop.xlane.xlu1 %372 }
  0xd3   : > { %v444_v1 = vmul.f32 0.03125, %v277_v16  ;;  %v476_v33 = vmul.f32 0.03125, %v373_v24  ;;  %v571_v36 = vmul.f32 %v2686_v8, %v2686_v8  ;;  %v603_v44 = vmul.f32 %v2689_v41, %v2689_v41 }
  0xd5   : > { %v2698_v46 = vsub.f32 %v2344_v48, %v444_v1  ;;  %v2701_v45 = vsub.f32 %v2347_v49, %v476_v33  ;;  %v657_v25 = vsel %vm238_vm0, %v571_v36, 0.0  ;;  %v753_v32 = vsel %vm238_vm0, %v603_v44, 0.0 }
  0xd6   : > { %751 = vadd.xlane.f32.xlu1 %v750_v12  ;;  %658 = vadd.xlane.f32.xlu0 %v657_v25  ;;  %v280_v14 = vpop.xlane.xlu0 %279  ;;  %v376_v39 = vpop.xlane.xlu1 %375 }
  0xd7   : > { %v445_v20 = vmul.f32 0.03125, %v280_v14  ;;  %v477_v28 = vmul.f32 0.03125, %v376_v39  ;;  %v572_v40 = vmul.f32 %v2698_v46, %v2698_v46  ;;  %v604_v48 = vmul.f32 %v2701_v45, %v2701_v45 }
  0xd9   : > { %v2710_v29 = vsub.f32 %v2354_v52, %v445_v20  ;;  %v2713_v49 = vsub.f32 %v2357_v53, %v477_v28  ;;  %v660_v16 = vsel %vm238_vm0, %v572_v40, 0.0  ;;  %v756_v1 = vsel %vm238_vm0, %v604_v48, 0.0 }
  0xda   : > { %754 = vadd.xlane.f32.xlu1 %v753_v32  ;;  %661 = vadd.xlane.f32.xlu0 %v660_v16  ;;  %v283_v24 = vpop.xlane.xlu0 %282  ;;  %v379_v12 = vpop.xlane.xlu1 %378 }
  0xdb   : > { %v446_v33 = vmul.f32 0.03125, %v283_v24  ;;  %v478_v36 = vmul.f32 0.03125, %v379_v12  ;;  %v573_v44 = vmul.f32 %v2710_v29, %v2710_v29  ;;  %v605_v52 = vmul.f32 %v2713_v49, %v2713_v49 }
  0xdd   : > { %v2722_v25 = vsub.f32 %v2364_v56, %v446_v33  ;;  %v2725_v53 = vsub.f32 %v2367_v57, %v478_v36  ;;  %v663_v14 = vsel %vm238_vm0, %v573_v44, 0.0  ;;  %v759_v20 = vsel %vm238_vm0, %v605_v52, 0.0 }
  0xde   : > { %757 = vadd.xlane.f32.xlu1 %v756_v1  ;;  %664 = vadd.xlane.f32.xlu0 %v663_v14  ;;  %v286_v39 = vpop.xlane.xlu0 %285  ;;  %v382_v32 = vpop.xlane.xlu1 %381 }
  0xdf   : > { %v447_v28 = vmul.f32 0.03125, %v286_v39  ;;  %v479_v40 = vmul.f32 0.03125, %v382_v32  ;;  %v574_v48 = vmul.f32 %v2722_v25, %v2722_v25  ;;  %v606_v56 = vmul.f32 %v2725_v53, %v2725_v53 }
  0xe1   : > { %v2734_v16 = vsub.f32 %v2374_v60, %v447_v28  ;;  %v2737_v57 = vsub.f32 %v2377_v61, %v479_v40  ;;  %v666_v24 = vsel %vm238_vm0, %v574_v48, 0.0  ;;  %v762_v33 = vsel %vm238_vm0, %v606_v56, 0.0 }
  0xe2   : > { %760 = vadd.xlane.f32.xlu1 %v759_v20  ;;  %667 = vadd.xlane.f32.xlu0 %v666_v24  ;;  %v289_v12 = vpop.xlane.xlu0 %288  ;;  %v385_v1 = vpop.xlane.xlu1 %384 }
  0xe3   : > { %v448_v36 = vmul.f32 0.03125, %v289_v12  ;;  %v480_v44 = vmul.f32 0.03125, %v385_v1  ;;  %v575_v52 = vmul.f32 %v2734_v16, %v2734_v16  ;;  %v607_v60 = vmul.f32 %v2737_v57, %v2737_v57 }
  0xe5   : > { %v2746_v14 = vsub.f32 %v2384_v3, %v448_v36  ;;  %v2749_v61 = vsub.f32 %v2387_v4, %v480_v44  ;;  %v669_v39 = vsel %vm238_vm0, %v575_v52, 0.0  ;;  %v765_v28 = vsel %vm238_vm0, %v607_v60, 0.0 }
  0xe6   : > { %763 = vadd.xlane.f32.xlu1 %v762_v33  ;;  %670 = vadd.xlane.f32.xlu0 %v669_v39  ;;  %v292_v32 = vpop.xlane.xlu0 %291  ;;  %v388_v20 = vpop.xlane.xlu1 %387 }
  0xe7   : > { %v449_v40 = vmul.f32 0.03125, %v292_v32  ;;  %v481_v48 = vmul.f32 0.03125, %v388_v20  ;;  %v576_v56 = vmul.f32 %v2746_v14, %v2746_v14  ;;  %v608_v3 = vmul.f32 %v2749_v61, %v2749_v61 }
  0xe9   : > { %v2758_v24 = vsub.f32 %v2394_v10, %v449_v40  ;;  %v2761_v4 = vsub.f32 %v2397_v11, %v481_v48  ;;  %v672_v12 = vsel %vm238_vm0, %v576_v56, 0.0  ;;  %v768_v36 = vsel %vm238_vm0, %v608_v3, 0.0 }
  0xea   : > { %766 = vadd.xlane.f32.xlu1 %v765_v28  ;;  %673 = vadd.xlane.f32.xlu0 %v672_v12  ;;  %v295_v1 = vpop.xlane.xlu0 %294  ;;  %v391_v33 = vpop.xlane.xlu1 %390 }
  0xeb   : > { %v450_v44 = vmul.f32 0.03125, %v295_v1  ;;  %v482_v52 = vmul.f32 0.03125, %v391_v33  ;;  %v577_v60 = vmul.f32 %v2758_v24, %v2758_v24  ;;  %v609_v10 = vmul.f32 %v2761_v4, %v2761_v4 }
  0xed   : > { %v2770_v39 = vsub.f32 %v2404_v18, %v450_v44  ;;  %v2773_v11 = vsub.f32 %v2407_v19, %v482_v52  ;;  %v675_v32 = vsel %vm238_vm0, %v577_v60, 0.0  ;;  %v771_v40 = vsel %vm238_vm0, %v609_v10, 0.0 }
  0xee   : > { %769 = vadd.xlane.f32.xlu1 %v768_v36  ;;  %676 = vadd.xlane.f32.xlu0 %v675_v32  ;;  %v298_v20 = vpop.xlane.xlu0 %297  ;;  %v394_v28 = vpop.xlane.xlu1 %393 }
  0xef   : > { %v451_v48 = vmul.f32 0.03125, %v298_v20  ;;  %v483_v56 = vmul.f32 0.03125, %v394_v28  ;;  %v578_v3 = vmul.f32 %v2770_v39, %v2770_v39  ;;  %v610_v18 = vmul.f32 %v2773_v11, %v2773_v11 }
  0xf1   : > { %v2782_v12 = vsub.f32 %v2414_v26, %v451_v48  ;;  %v2785_v19 = vsub.f32 %v2417_v27, %v483_v56  ;;  %v678_v1 = vsel %vm238_vm0, %v578_v3, 0.0  ;;  %v774_v44 = vsel %vm238_vm0, %v610_v18, 0.0 }
  0xf2   : > { %772 = vadd.xlane.f32.xlu1 %v771_v40  ;;  %679 = vadd.xlane.f32.xlu0 %v678_v1  ;;  %v301_v33 = vpop.xlane.xlu0 %300  ;;  %v397_v36 = vpop.xlane.xlu1 %396 }
  0xf3   : > { %v452_v52 = vmul.f32 0.03125, %v301_v33  ;;  %v484_v60 = vmul.f32 0.03125, %v397_v36  ;;  %v579_v10 = vmul.f32 %v2782_v12, %v2782_v12  ;;  %v611_v26 = vmul.f32 %v2785_v19, %v2785_v19 }
  0xf5   : > { %v2794_v32 = vsub.f32 %v2424_v34, %v452_v52  ;;  %v2797_v27 = vsub.f32 %v2427_v35, %v484_v60  ;;  %v681_v20 = vsel %vm238_vm0, %v579_v10, 0.0  ;;  %v777_v48 = vsel %vm238_vm0, %v611_v26, 0.0 }
  0xf6   : > { %775 = vadd.xlane.f32.xlu1 %v774_v44  ;;  %682 = vadd.xlane.f32.xlu0 %v681_v20  ;;  %v304_v28 = vpop.xlane.xlu0 %303  ;;  %v400_v40 = vpop.xlane.xlu1 %399 }
  0xf7   : > { %v453_v56 = vmul.f32 0.03125, %v304_v28  ;;  %v485_v3 = vmul.f32 0.03125, %v400_v40  ;;  %v580_v18 = vmul.f32 %v2794_v32, %v2794_v32  ;;  %v612_v34 = vmul.f32 %v2797_v27, %v2797_v27 }
  0xf9   : > { %v2806_v1 = vsub.f32 %v2434_v42, %v453_v56  ;;  %v2809_v35 = vsub.f32 %v2437_v43, %v485_v3  ;;  %v684_v33 = vsel %vm238_vm0, %v580_v18, 0.0  ;;  %v780_v52 = vsel %vm238_vm0, %v612_v34, 0.0 }
  0xfa   : > { %778 = vadd.xlane.f32.xlu1 %v777_v48  ;;  %685 = vadd.xlane.f32.xlu0 %v684_v33  ;;  %v307_v36 = vpop.xlane.xlu0 %306  ;;  %v403_v44 = vpop.xlane.xlu1 %402 }
  0xfb   : > { %v454_v60 = vmul.f32 0.03125, %v307_v36  ;;  %v486_v10 = vmul.f32 0.03125, %v403_v44  ;;  %v581_v26 = vmul.f32 %v2806_v1, %v2806_v1  ;;  %v613_v42 = vmul.f32 %v2809_v35, %v2809_v35 }
  0xfd   : > { %v2818_v20 = vsub.f32 %v2444_v50, %v454_v60  ;;  %v2821_v43 = vsub.f32 %v2447_v51, %v486_v10  ;;  %v687_v28 = vsel %vm238_vm0, %v581_v26, 0.0  ;;  %v783_v56 = vsel %vm238_vm0, %v613_v42, 0.0 }
  0xfe   : > { %781 = vadd.xlane.f32.xlu1 %v780_v52  ;;  %688 = vadd.xlane.f32.xlu0 %v687_v28  ;;  %v310_v40 = vpop.xlane.xlu0 %309  ;;  %v406_v48 = vpop.xlane.xlu1 %405 }
  0xff   : > { %v455_v3 = vmul.f32 0.03125, %v310_v40  ;;  %v487_v18 = vmul.f32 0.03125, %v406_v48  ;;  %v582_v34 = vmul.f32 %v2818_v20, %v2818_v20  ;;  %v614_v50 = vmul.f32 %v2821_v43, %v2821_v43 }
 0x101   : > { %v2830_v33 = vsub.f32 %v2454_v58, %v455_v3  ;;  %v2833_v51 = vsub.f32 %v2457_v59, %v487_v18  ;;  %v690_v36 = vsel %vm238_vm0, %v582_v34, 0.0  ;;  %v786_v60 = vsel %vm238_vm0, %v614_v50, 0.0 }
 0x102   : > { %784 = vadd.xlane.f32.xlu1 %v783_v56  ;;  %691 = vadd.xlane.f32.xlu0 %v690_v36  ;;  %v313_v44 = vpop.xlane.xlu0 %312  ;;  %v409_v52 = vpop.xlane.xlu1 %408  ;;  %v3328_v36 = vld [vmem:[#allocation2_spill] sm:$0xff] }
 0x103   : > { %v456_v10 = vmul.f32 0.03125, %v313_v44  ;;  %v488_v26 = vmul.f32 0.03125, %v409_v52  ;;  %v583_v42 = vmul.f32 %v2830_v33, %v2830_v33  ;;  %v615_v58 = vmul.f32 %v2833_v51, %v2833_v51 }
 0x105   : > { %v2842_v28 = vsub.f32 %v2464_v6, %v456_v10  ;;  %v2845_v59 = vsub.f32 %v2467_v7, %v488_v26  ;;  %v693_v40 = vsel %vm238_vm0, %v583_v42, 0.0  ;;  %v789_v3 = vsel %vm238_vm0, %v615_v58, 0.0  ;;  %v3330_v7 = vld [vmem:[#allocation3_spill] sm:$0xff] }
 0x106   : > { %787 = vadd.xlane.f32.xlu1 %v786_v60  ;;  %694 = vadd.xlane.f32.xlu0 %v693_v40  ;;  %v316_v48 = vpop.xlane.xlu0 %315  ;;  %v412_v56 = vpop.xlane.xlu1 %411 }
 0x107   : > { %3327 = vst [vmem:[#allocation19_spill] sm:$0xff] %v2845_v59  ;;  %v457_v18 = vmul.f32 0.03125, %v316_v48  ;;  %v489_v34 = vmul.f32 0.03125, %v412_v56  ;;  %v584_v50 = vmul.f32 %v2842_v28, %v2842_v28  ;;  %v616_v6 = vmul.f32 %v2845_v59, %v2845_v59 }
 0x109   : > { %v2854_v44 = vsub.f32 %v3328_v36, %v457_v18  ;;  %v2857_v52 = vsub.f32 %v3330_v7, %v489_v34  ;;  %v696_v60 = vsel %vm238_vm0, %v584_v50, 0.0  ;;  %v792_v42 = vsel %vm238_vm0, %v616_v6, 0.0  ;;  %v3332_v18 = vld [vmem:[#allocation4_spill] sm:$0xff]  ;;  %v3334_v34 = vld [vmem:[#allocation5_spill] sm:$0xff] }
 0x10a   : > { %790 = vadd.xlane.f32.xlu1 %v789_v3  ;;  %697 = vadd.xlane.f32.xlu0 %v696_v60  ;;  %v319_v10 = vpop.xlane.xlu0 %318  ;;  %v415_v26 = vpop.xlane.xlu1 %414 }
 0x10b   : > { %3329 = vst [vmem:[#allocation2_spill] sm:$0xff] %v2854_v44  ;;  %3331 = vst [vmem:[#allocation3_spill] sm:$0xff] %v2857_v52  ;;  %v458_v58 = vmul.f32 0.03125, %v319_v10  ;;  %v490_v40 = vmul.f32 0.03125, %v415_v26  ;;  %v585_v48 = vmul.f32 %v2854_v44, %v2854_v44  ;;  %v617_v56 = vmul.f32 %v2857_v52, %v2857_v52 }
 0x10d   : > { %v2866_v36 = vsub.f32 %v3332_v18, %v458_v58  ;;  %v2869_v7 = vsub.f32 %v3334_v34, %v490_v40  ;;  %v699_v3 = vsel %vm238_vm0, %v585_v48, 0.0  ;;  %v795_v60 = vsel %vm238_vm0, %v617_v56, 0.0  ;;  %v3336_v18 = vld [vmem:[#allocation6_spill] sm:$0xff]  ;;  %v3338_v40 = vld [vmem:[#allocation7_spill] sm:$0xff] }
 0x10e   : > { %793 = vadd.xlane.f32.xlu1 %v792_v42  ;;  %700 = vadd.xlane.f32.xlu0 %v699_v3  ;;  %v322_v50 = vpop.xlane.xlu0 %321  ;;  %v418_v6 = vpop.xlane.xlu1 %417 }
 0x10f   : > { %3333 = vst [vmem:[#allocation4_spill] sm:$0xff] %v2866_v36  ;;  %3335 = vst [vmem:[#allocation5_spill] sm:$0xff] %v2869_v7  ;;  %v459_v10 = vmul.f32 0.03125, %v322_v50  ;;  %v491_v26 = vmul.f32 0.03125, %v418_v6  ;;  %v586_v44 = vmul.f32 %v2866_v36, %v2866_v36  ;;  %v618_v58 = vmul.f32 %v2869_v7, %v2869_v7 }
 0x111   : > { %v2878_v52 = vsub.f32 %v3336_v18, %v459_v10  ;;  %v2881_v34 = vsub.f32 %v3338_v40, %v491_v26  ;;  %v702_v42 = vsel %vm238_vm0, %v586_v44, 0.0  ;;  %v798_v3 = vsel %vm238_vm0, %v618_v58, 0.0  ;;  %v3340_v18 = vld [vmem:[#allocation8_spill] sm:$0xff]  ;;  %v3342_v26 = vld [vmem:[#allocation9_spill] sm:$0xff] }
 0x112   : > { %796 = vadd.xlane.f32.xlu1 %v795_v60  ;;  %703 = vadd.xlane.f32.xlu0 %v702_v42  ;;  %v325_v48 = vpop.xlane.xlu0 %324  ;;  %v421_v56 = vpop.xlane.xlu1 %420 }
 0x113   : > { %3337 = vst [vmem:[#allocation6_spill] sm:$0xff] %v2878_v52  ;;  %3339 = vst [vmem:[#allocation7_spill] sm:$0xff] %v2881_v34  ;;  %v460_v50 = vmul.f32 0.03125, %v325_v48  ;;  %v492_v6 = vmul.f32 0.03125, %v421_v56  ;;  %v587_v36 = vmul.f32 %v2878_v52, %v2878_v52  ;;  %v619_v10 = vmul.f32 %v2881_v34, %v2881_v34 }
 0x115   : > { %v2890_v7 = vsub.f32 %v3340_v18, %v460_v50  ;;  %v2893_v40 = vsub.f32 %v3342_v26, %v492_v6  ;;  %v705_v44 = vsel %vm238_vm0, %v587_v36, 0.0  ;;  %v801_v42 = vsel %vm238_vm0, %v619_v10, 0.0  ;;  %v3344_v18 = vld [vmem:[#allocation10_spill] sm:$0xff]  ;;  %v3346_v6 = vld [vmem:[#allocation11_spill] sm:$0xff] }
 0x116   : > { %799 = vadd.xlane.f32.xlu1 %v798_v3  ;;  %706 = vadd.xlane.f32.xlu0 %v705_v44  ;;  %v328_v60 = vpop.xlane.xlu0 %327  ;;  %v424_v58 = vpop.xlane.xlu1 %423 }
 0x117   : > { %3341 = vst [vmem:[#allocation8_spill] sm:$0xff] %v2890_v7  ;;  %3343 = vst [vmem:[#allocation9_spill] sm:$0xff] %v2893_v40  ;;  %v461_v48 = vmul.f32 0.03125, %v328_v60  ;;  %v493_v56 = vmul.f32 0.03125, %v424_v58  ;;  %v588_v52 = vmul.f32 %v2890_v7, %v2890_v7  ;;  %v620_v50 = vmul.f32 %v2893_v40, %v2893_v40 }
 0x119   : > { %v2902_v34 = vsub.f32 %v3344_v18, %v461_v48  ;;  %v2905_v26 = vsub.f32 %v3346_v6, %v493_v56  ;;  %v708_v36 = vsel %vm238_vm0, %v588_v52, 0.0  ;;  %v804_v44 = vsel %vm238_vm0, %v620_v50, 0.0  ;;  %v3348_v18 = vld [vmem:[#allocation12_spill] sm:$0xff]  ;;  %v3350_v56 = vld [vmem:[#allocation13_spill] sm:$0xff] }
 0x11a   : > { %802 = vadd.xlane.f32.xlu1 %v801_v42  ;;  %709 = vadd.xlane.f32.xlu0 %v708_v36  ;;  %v331_v3 = vpop.xlane.xlu0 %330  ;;  %v427_v10 = vpop.xlane.xlu1 %426 }
 0x11b   : > { %3345 = vst [vmem:[#allocation10_spill] sm:$0xff] %v2902_v34  ;;  %3347 = vst [vmem:[#allocation11_spill] sm:$0xff] %v2905_v26  ;;  %v462_v60 = vmul.f32 0.03125, %v331_v3  ;;  %v494_v58 = vmul.f32 0.03125, %v427_v10  ;;  %v589_v7 = vmul.f32 %v2902_v34, %v2902_v34  ;;  %v621_v48 = vmul.f32 %v2905_v26, %v2905_v26 }
 0x11d   : > { %v2914_v40 = vsub.f32 %v3348_v18, %v462_v60  ;;  %v2917_v6 = vsub.f32 %v3350_v56, %v494_v58  ;;  %v711_v52 = vsel %vm238_vm0, %v589_v7, 0.0  ;;  %v807_v36 = vsel %vm238_vm0, %v621_v48, 0.0  ;;  %v3352_v18 = vld [vmem:[#allocation14_spill] sm:$0xff] }
 0x11e   : > { %805 = vadd.xlane.f32.xlu1 %v804_v44  ;;  %712 = vadd.xlane.f32.xlu0 %v711_v52  ;;  %v334_v42 = vpop.xlane.xlu0 %333  ;;  %v430_v50 = vpop.xlane.xlu1 %429 }
 0x11f   : > { %3349 = vst [vmem:[#allocation12_spill] sm:$0xff] %v2914_v40  ;;  %3351 = vst [vmem:[#allocation13_spill] sm:$0xff] %v2917_v6  ;;  %v463_v3 = vmul.f32 0.03125, %v334_v42  ;;  %v495_v10 = vmul.f32 0.03125, %v430_v50  ;;  %v590_v34 = vmul.f32 %v2914_v40, %v2914_v40  ;;  %v622_v60 = vmul.f32 %v2917_v6, %v2917_v6 }
 0x121   : > { %v2926_v26 = vsub.f32 %v3352_v18, %v463_v3  ;;  %v2929_v58 = vsub.f32 %v2537_v31, %v495_v10  ;;  %v714_v7 = vsel %vm238_vm0, %v590_v34, 0.0  ;;  %v810_v44 = vsel %vm238_vm0, %v622_v60, 0.0 }
 0x122   : > { %808 = vadd.xlane.f32.xlu1 %v807_v36  ;;  %715 = vadd.xlane.f32.xlu0 %v714_v7 }
 0x123   : > { %3353 = vst [vmem:[#allocation14_spill] sm:$0xff] %v2926_v26  ;;  %3354 = vst [vmem:[#allocation20_spill] sm:$0xff] %v2929_v58  ;;  %v591_v48 = vmul.f32 %v2926_v26, %v2926_v26  ;;  %v623_v56 = vmul.f32 %v2929_v58, %v2929_v58 }
 0x125   : > { %v717_v52 = vsel %vm238_vm0, %v591_v48, 0.0  ;;  %v813_v42 = vsel %vm238_vm0, %v623_v56, 0.0 }
 0x126   : > { %811 = vadd.xlane.f32.xlu1 %v810_v44  ;;  %718 = vadd.xlane.f32.xlu0 %v717_v52 }
 0x12a   : > { %814 = vadd.xlane.f32.xlu1 %v813_v42 }
 0x137   : > { %v626_v31 = vpop.xlane.xlu0 %625 }
 0x138   : > { %v816_v50 = vmul.f32 0.03125, %v626_v31 }
 0x13a   : > { %v880_v34 = vadd.f32 1e-06, %v816_v50 }
 0x13b   : > { %v722_v36 = vpop.xlane.xlu1 %721  ;;  %v629_v3 = vpop.xlane.xlu0 %628 }
 0x13c   : > { %2049 = vrsqrt.f32 %v880_v34  ;;  %v848_v10 = vmul.f32 0.03125, %v722_v36  ;;  %v817_v60 = vmul.f32 0.03125, %v629_v3 }
 0x13e   : > { %v912_v18 = vadd.f32 1e-06, %v848_v10  ;;  %v881_v7 = vadd.f32 1e-06, %v817_v60 }
 0x13f   : > { %v725_v26 = vpop.xlane.xlu1 %724  ;;  %v632_v6 = vpop.xlane.xlu0 %631 }
 0x140   : > { %2051 = vrsqrt.f32 %v912_v18  ;;  %v849_v58 = vmul.f32 0.03125, %v725_v26  ;;  %v818_v48 = vmul.f32 0.03125, %v632_v6 }
 0x141   : > { %2053 = vrsqrt.f32 %v881_v7 }
 0x142   : > { %v913_v44 = vadd.f32 1e-06, %v849_v58  ;;  %v882_v52 = vadd.f32 1e-06, %v818_v48 }
 0x143   : > { %v728_v56 = vpop.xlane.xlu1 %727  ;;  %v635_v42 = vpop.xlane.xlu0 %634 }
 0x144   : > { %2055 = vrsqrt.f32 %v913_v44  ;;  %v850_v31 = vmul.f32 0.03125, %v728_v56  ;;  %v819_v50 = vmul.f32 0.03125, %v635_v42 }
 0x145   : > { %2057 = vrsqrt.f32 %v882_v52 }
 0x146   : > { %v2050_v40 = vpop.eup %2049  ;;  %v914_v34 = vadd.f32 1e-06, %v850_v31  ;;  %v883_v36 = vadd.f32 1e-06, %v819_v50  ;;  %v3355_v50 = vld [vmem:[#allocation15_spill] sm:$0xff] }
 0x147   : > { %v731_v3 = vpop.xlane.xlu1 %730  ;;  %v638_v10 = vpop.xlane.xlu0 %637  ;;  %v1008_v60 = vmul.f32 %v2050_v40, %v2544_v54 }
 0x148   : > { %2059 = vrsqrt.f32 %v914_v34  ;;  %v851_v18 = vmul.f32 0.03125, %v731_v3  ;;  %v820_v26 = vmul.f32 0.03125, %v638_v10 }
 0x149   : > { %2061 = vrsqrt.f32 %v883_v36  ;;  %1933 = vmatprep.mubr.msk.f32.mxu0 %vm238_vm0, %v1008_v60 }
 0x14a   : > { %v2052_v6 = vpop.eup %2051  ;;  %v915_v58 = vadd.f32 1e-06, %v851_v18  ;;  %v884_v7 = vadd.f32 1e-06, %v820_v26 }
 0x14b   : > { %v2054_v48 = vpop.eup %2053  ;;  %v734_v44 = vpop.xlane.xlu1 %733  ;;  %v1040_v52 = vmul.f32 %v2052_v6, %v2554_v47 }
 0x14c   : > { %v641_v56 = vpop.xlane.xlu0 %640  ;;  %2063 = vrsqrt.f32 %v915_v58  ;;  %v852_v42 = vmul.f32 0.03125, %v734_v44  ;;  %v1009_v59 = vmul.f32 %v2054_v48, %v3355_v50 }
 0x14d   : > { %v821_v31 = vmul.f32 0.03125, %v641_v56  ;;  %2065 = vrsqrt.f32 %v884_v7  ;;  %1981 = vmatprep.mubr.msk.f32.mxu1 %vm238_vm0, %v1040_v52 }
 0x14e   : > { %v2056_v54 = vpop.eup %2055  ;;  %v916_v40 = vadd.f32 1e-06, %v852_v42  ;;  %1934 = vmatmul.mubr.msk.f32.vlgmr.msra.gmra.mrb[0].mxu0 %vm238_vm0, %v1009_v59 }
 0x14f   : > { %v885_v34 = vadd.f32 1e-06, %v821_v31  ;;  %v2058_v36 = vpop.eup %2057  ;;  %v737_v3 = vpop.xlane.xlu1 %736  ;;  %v1041_v60 = vmul.f32 %v2056_v54, %v2557_v55 }
 0x150   : > { %v644_v10 = vpop.xlane.xlu0 %643  ;;  %2067 = vrsqrt.f32 %v916_v40  ;;  %v853_v47 = vmul.f32 0.03125, %v737_v3  ;;  %v1010_v26 = vmul.f32 %v2058_v36, %v2566_v2 }
 0x151   : > { %v822_v18 = vmul.f32 0.03125, %v644_v10  ;;  %2069 = vrsqrt.f32 %v885_v34  ;;  %1982 = vmatmul.mubr.msk.f32.vlgmr.msra.gmra.mrb[0].mxu1 %vm238_vm0, %v1041_v60 }
 0x152   : > { %v2060_v6 = vpop.eup %2059  ;;  %v917_v58 = vadd.f32 1e-06, %v853_v47  ;;  %1936 = vmatprep.mubr.msk.f32.mxu0 %vm238_vm0, %v1010_v26 }
 0x153   : > { %v886_v7 = vadd.f32 1e-06, %v822_v18  ;;  %v2062_v48 = vpop.eup %2061  ;;  %v740_v59 = vpop.xlane.xlu1 %739  ;;  %v1042_v56 = vmul.f32 %v2060_v6, %v2569_v5 }
 0x154   : > { %v647_v44 = vpop.xlane.xlu0 %646  ;;  %2071 = vrsqrt.f32 %v917_v58  ;;  %v854_v55 = vmul.f32 0.03125, %v740_v59  ;;  %v1011_v42 = vmul.f32 %v2062_v48, %v2578_v62 }
 0x155   : > { %v823_v52 = vmul.f32 0.03125, %v647_v44  ;;  %2073 = vrsqrt.f32 %v886_v7  ;;  %1984 = vmatprep.mubr.msk.f32.mxu1 %vm238_vm0, %v1042_v56 }
 0x156   : > { %v2064_v2 = vpop.eup %2063  ;;  %v918_v31 = vadd.f32 1e-06, %v854_v55  ;;  %1937 = vmatmul.mubr.msk.f32.gmra.mrb[2].mxu0 %vm238_vm0, %v1011_v42 }
 0x157   : > { %v887_v50 = vadd.f32 1e-06, %v823_v52  ;;  %v2066_v54 = vpop.eup %2065  ;;  %v743_v40 = vpop.xlane.xlu1 %742  ;;  %v1043_v36 = vmul.f32 %v2064_v2, %v2581_v9 }
 0x158   : > { %v650_v34 = vpop.xlane.xlu0 %649  ;;  %2075 = vrsqrt.f32 %v918_v31  ;;  %v855_v5 = vmul.f32 0.03125, %v743_v40  ;;  %v1012_v10 = vmul.f32 %v2066_v54, %v2590_v0 }
 0x159   : > { %v824_v3 = vmul.f32 0.03125, %v650_v34  ;;  %2077 = vrsqrt.f32 %v887_v50  ;;  %1985 = vmatmul.mubr.msk.f32.gmra.mrb[2].mxu1 %vm238_vm0, %v1043_v36 }
 0x15a   : > { %v2068_v62 = vpop.eup %2067  ;;  %v919_v60 = vadd.f32 1e-06, %v855_v5  ;;  %1939 = vmatprep.mubr.msk.f32.mxu0 %vm238_vm0, %v1012_v10  ;;  %v3356_v5 = vld [vmem:[#allocation16_spill] sm:$0xff] }
 0x15b   : > { %v888_v47 = vadd.f32 1e-06, %v824_v3  ;;  %v2070_v18 = vpop.eup %2069  ;;  %v746_v26 = vpop.xlane.xlu1 %745  ;;  %v1044_v58 = vmul.f32 %v2068_v62, %v2593_v13  ;;  %v3357_v62 = vld [vmem:[#allocation17_spill] sm:$0xff] }
 0x15c   : > { %v653_v6 = vpop.xlane.xlu0 %652  ;;  %2079 = vrsqrt.f32 %v919_v60  ;;  %v856_v9 = vmul.f32 0.03125, %v746_v26  ;;  %v1013_v48 = vmul.f32 %v2070_v18, %v2602_v22 }
 0x15d   : > { %v825_v7 = vmul.f32 0.03125, %v653_v6  ;;  %2081 = vrsqrt.f32 %v888_v47  ;;  %1987 = vmatprep.mubr.msk.f32.mxu1 %vm238_vm0, %v1044_v58 }
 0x15e   : > { %v2072_v0 = vpop.eup %2071  ;;  %v920_v59 = vadd.f32 1e-06, %v856_v9  ;;  %1940 = vmatmul.mubr.msk.f32.gmra.mrb[4].mxu0 %vm238_vm0, %v1013_v48  ;;  %v3358_v9 = vld [vmem:[#allocation18_spill] sm:$0xff] }
 0x15f   : > { %v889_v44 = vadd.f32 1e-06, %v825_v7  ;;  %v2074_v56 = vpop.eup %2073  ;;  %v749_v55 = vpop.xlane.xlu1 %748  ;;  %v1045_v42 = vmul.f32 %v2072_v0, %v2605_v17 }
 0x160   : > { %v656_v52 = vpop.xlane.xlu0 %655  ;;  %2083 = vrsqrt.f32 %v920_v59  ;;  %v857_v13 = vmul.f32 0.03125, %v749_v55  ;;  %v1014_v31 = vmul.f32 %v2074_v56, %v2614_v63 }
 0x161   : > { %v826_v2 = vmul.f32 0.03125, %v656_v52  ;;  %2085 = vrsqrt.f32 %v889_v44  ;;  %1988 = vmatmul.mubr.msk.f32.gmra.mrb[4].mxu1 %vm238_vm0, %v1045_v42 }
 0x162   : > { %v2076_v22 = vpop.eup %2075  ;;  %v921_v50 = vadd.f32 1e-06, %v857_v13  ;;  %1942 = vmatprep.mubr.msk.f32.mxu0 %vm238_vm0, %v1014_v31 }
 0x163   : > { %v890_v54 = vadd.f32 1e-06, %v826_v2  ;;  %v2078_v40 = vpop.eup %2077  ;;  %v752_v34 = vpop.xlane.xlu1 %751  ;;  %v1046_v3 = vmul.f32 %v2076_v22, %v3356_v5 }
 0x164   : > { %v659_v36 = vpop.xlane.xlu0 %658  ;;  %2087 = vrsqrt.f32 %v921_v50  ;;  %v858_v17 = vmul.f32 0.03125, %v752_v34  ;;  %v1015_v60 = vmul.f32 %v2078_v40, %v3357_v62 }
 0x165   : > { %v827_v10 = vmul.f32 0.03125, %v659_v36  ;;  %2089 = vrsqrt.f32 %v890_v54  ;;  %1990 = vmatprep.mubr.msk.f32.mxu1 %vm238_vm0, %v1046_v3 }
 0x166   : > { %v2080_v63 = vpop.eup %2079  ;;  %v922_v47 = vadd.f32 1e-06, %v858_v17  ;;  %1943 = vmatmul.mubr.msk.f32.gmra.mrb[6].mxu0 %vm238_vm0, %v1015_v60 }
 0x167   : > { %v891_v18 = vadd.f32 1e-06, %v827_v10  ;;  %v2082_v26 = vpop.eup %2081  ;;  %v755_v6 = vpop.xlane.xlu1 %754  ;;  %v1047_v7 = vmul.f32 %v2080_v63, %v3358_v9 }
 0x168   : > { %v662_v58 = vpop.xlane.xlu0 %661  ;;  %2091 = vrsqrt.f32 %v922_v47  ;;  %v859_v48 = vmul.f32 0.03125, %v755_v6  ;;  %v1016_v59 = vmul.f32 %v2082_v26, %v2644_v23 }
 0x169   : > { %v828_v0 = vmul.f32 0.03125, %v662_v58  ;;  %2093 = vrsqrt.f32 %v891_v18  ;;  %1991 = vmatmul.mubr.msk.f32.gmra.mrb[6].mxu1 %vm238_vm0, %v1047_v7 }
 0x16a   : > { %v2084_v44 = vpop.eup %2083  ;;  %v923_v56 = vadd.f32 1e-06, %v859_v48  ;;  %1945 = vmatprep.mubr.msk.f32.mxu0 %vm238_vm0, %v1016_v59 }
 0x16b   : > { %v892_v55 = vadd.f32 1e-06, %v828_v0  ;;  %v2086_v52 = vpop.eup %2085  ;;  %v758_v42 = vpop.xlane.xlu1 %757  ;;  %v1048_v2 = vmul.f32 %v2084_v44, %v2647_v30 }
 0x16c   : > { %v665_v13 = vpop.xlane.xlu0 %664  ;;  %2095 = vrsqrt.f32 %v923_v56  ;;  %v860_v31 = vmul.f32 0.03125, %v758_v42  ;;  %v1017_v50 = vmul.f32 %v2086_v52, %v2662_v15 }
 0x16d   : > { %v829_v22 = vmul.f32 0.03125, %v665_v13  ;;  %2097 = vrsqrt.f32 %v892_v55  ;;  %1993 = vmatprep.mubr.msk.f32.mxu1 %vm238_vm0, %v1048_v2 }
 0x16e   : > { %v2088_v23 = vpop.eup %2087  ;;  %v924_v54 = vadd.f32 1e-06, %v860_v31  ;;  %1946 = vmatmul.mubr.msk.f32.gmra.mrb[8].mxu0 %vm238_vm0, %v1017_v50 }
 0x16f   : > { %v893_v40 = vadd.f32 1e-06, %v829_v22  ;;  %v2090_v34 = vpop.eup %2089  ;;  %v761_v36 = vpop.xlane.xlu1 %760  ;;  %v1049_v3 = vmul.f32 %v2088_v23, %v2665_v38 }
 0x170   : > { %v668_v5 = vpop.xlane.xlu0 %667  ;;  %2099 = vrsqrt.f32 %v924_v54  ;;  %v861_v30 = vmul.f32 0.03125, %v761_v36  ;;  %v1018_v10 = vmul.f32 %v2090_v34, %v2674_v37 }
 0x171   : > { %v830_v17 = vmul.f32 0.03125, %v668_v5  ;;  %2101 = vrsqrt.f32 %v893_v40  ;;  %1994 = vmatmul.mubr.msk.f32.gmra.mrb[8].mxu1 %vm238_vm0, %v1049_v3 }
 0x172   : > { %v2092_v15 = vpop.eup %2091  ;;  %v925_v62 = vadd.f32 1e-06, %v861_v30  ;;  %1948 = vmatprep.mubr.msk.f32.mxu0 %vm238_vm0, %v1018_v10 }
 0x173   : > { %v894_v60 = vadd.f32 1e-06, %v830_v17  ;;  %v2094_v63 = vpop.eup %2093  ;;  %v764_v47 = vpop.xlane.xlu1 %763  ;;  %v1050_v26 = vmul.f32 %v2092_v15, %v2677_v21 }
 0x174   : > { %v671_v18 = vpop.xlane.xlu0 %670  ;;  %2103 = vrsqrt.f32 %v925_v62  ;;  %v862_v38 = vmul.f32 0.03125, %v764_v47  ;;  %v1019_v58 = vmul.f32 %v2094_v63, %v2686_v8 }
 0x175   : > { %v831_v6 = vmul.f32 0.03125, %v671_v18  ;;  %2105 = vrsqrt.f32 %v894_v60  ;;  %1996 = vmatprep.mubr.msk.f32.mxu1 %vm238_vm0, %v1050_v26 }
 0x176   : > { %v2096_v37 = vpop.eup %2095  ;;  %v926_v9 = vadd.f32 1e-06, %v862_v38  ;;  %1949 = vmatmul.mubr.msk.f32.gmra.mrb[10].mxu0 %vm238_vm0, %v1019_v58 }
 0x177   : > { %v895_v7 = vadd.f32 1e-06, %v831_v6  ;;  %v2098_v48 = vpop.eup %2097  ;;  %v767_v0 = vpop.xlane.xlu1 %766  ;;  %v1051_v44 = vmul.f32 %v2096_v37, %v2689_v41 }
 0x178   : > { %v674_v59 = vpop.xlane.xlu0 %673  ;;  %2107 = vrsqrt.f32 %v926_v9  ;;  %v863_v21 = vmul.f32 0.03125, %v767_v0  ;;  %v1020_v55 = vmul.f32 %v2098_v48, %v2698_v46 }
 0x179   : > { %v832_v56 = vmul.f32 0.03125, %v674_v59  ;;  %2109 = vrsqrt.f32 %v895_v7  ;;  %1997 = vmatmul.mubr.msk.f32.gmra.mrb[10].mxu1 %vm238_vm0, %v1051_v44 }
 0x17a   : > { %v2100_v8 = vpop.eup %2099  ;;  %v927_v52 = vadd.f32 1e-06, %v863_v21  ;;  %1951 = vmatprep.mubr.msk.f32.mxu0 %vm238_vm0, %v1020_v55 }
 0x17b   : > { %v896_v42 = vadd.f32 1e-06, %v832_v56  ;;  %v2102_v13 = vpop.eup %2101  ;;  %v770_v2 = vpop.xlane.xlu1 %769  ;;  %v1052_v22 = vmul.f32 %v2100_v8, %v2701_v45 }
 0x17c   : > { %v677_v31 = vpop.xlane.xlu0 %676  ;;  %2111 = vrsqrt.f32 %v927_v52  ;;  %v864_v41 = vmul.f32 0.03125, %v770_v2  ;;  %v1021_v23 = vmul.f32 %v2102_v13, %v2710_v29 }
 0x17d   : > { %v833_v50 = vmul.f32 0.03125, %v677_v31  ;;  %2113 = vrsqrt.f32 %v896_v42  ;;  %1999 = vmatprep.mubr.msk.f32.mxu1 %vm238_vm0, %v1052_v22 }
 0x17e   : > { %v2104_v46 = vpop.eup %2103  ;;  %v928_v54 = vadd.f32 1e-06, %v864_v41  ;;  %1952 = vmatmul.mubr.msk.f32.gmra.mrb[12].mxu0 %vm238_vm0, %v1021_v23 }
 0x17f   : > { %v897_v40 = vadd.f32 1e-06, %v833_v50  ;;  %v2106_v34 = vpop.eup %2105  ;;  %v773_v36 = vpop.xlane.xlu1 %772  ;;  %v1053_v3 = vmul.f32 %v2104_v46, %v2713_v49 }
 0x180   : > { %v680_v5 = vpop.xlane.xlu0 %679  ;;  %2115 = vrsqrt.f32 %v928_v54  ;;  %v865_v45 = vmul.f32 0.03125, %v773_v36  ;;  %v1022_v17 = vmul.f32 %v2106_v34, %v2722_v25 }
 0x181   : > { %v834_v30 = vmul.f32 0.03125, %v680_v5  ;;  %2117 = vrsqrt.f32 %v897_v40  ;;  %2000 = vmatmul.mubr.msk.f32.gmra.mrb[12].mxu1 %vm238_vm0, %v1053_v3 }
 0x182   : > { %v2108_v29 = vpop.eup %2107  ;;  %v929_v10 = vadd.f32 1e-06, %v865_v45  ;;  %1954 = vmatprep.mubr.msk.f32.mxu0 %vm238_vm0, %v1022_v17 }
 0x183   : > { %v898_v15 = vadd.f32 1e-06, %v834_v30  ;;  %v2110_v62 = vpop.eup %2109  ;;  %v776_v60 = vpop.xlane.xlu1 %775  ;;  %v1054_v47 = vmul.f32 %v2108_v29, %v2725_v53 }
 0x184   : > { %v683_v63 = vpop.xlane.xlu0 %682  ;;  %2119 = vrsqrt.f32 %v929_v10  ;;  %v866_v49 = vmul.f32 0.03125, %v776_v60  ;;  %v1023_v26 = vmul.f32 %v2110_v62, %v2734_v16 }
 0x185   : > { %v835_v18 = vmul.f32 0.03125, %v683_v63  ;;  %2121 = vrsqrt.f32 %v898_v15  ;;  %2002 = vmatprep.mubr.msk.f32.mxu1 %vm238_vm0, %v1054_v47 }
 0x186   : > { %v2112_v25 = vpop.eup %2111  ;;  %v930_v38 = vadd.f32 1e-06, %v866_v49  ;;  %1955 = vmatmul.mubr.msk.f32.gmra.mrb[14].mxu0 %vm238_vm0, %v1023_v26 }
 0x187   : > { %v899_v6 = vadd.f32 1e-06, %v835_v18  ;;  %v2114_v58 = vpop.eup %2113  ;;  %v779_v37 = vpop.xlane.xlu1 %778  ;;  %v1055_v7 = vmul.f32 %v2112_v25, %v2737_v57 }
 0x188   : > { %v686_v9 = vpop.xlane.xlu0 %685  ;;  %2123 = vrsqrt.f32 %v930_v38  ;;  %v867_v53 = vmul.f32 0.03125, %v779_v37  ;;  %v1024_v0 = vmul.f32 %v2114_v58, %v2746_v14 }
 0x189   : > { %v836_v48 = vmul.f32 0.03125, %v686_v9  ;;  %2125 = vrsqrt.f32 %v899_v6  ;;  %2003 = vmatmul.mubr.msk.f32.gmra.mrb[14].mxu1 %vm238_vm0, %v1055_v7 }
 0x18a   : > { %v2116_v16 = vpop.eup %2115  ;;  %v931_v59 = vadd.f32 1e-06, %v867_v53  ;;  %1957 = vmatprep.mubr.msk.f32.mxu0 %vm238_vm0, %v1024_v0 }
 0x18b   : > { %v900_v44 = vadd.f32 1e-06, %v836_v48  ;;  %v2118_v21 = vpop.eup %2117  ;;  %v782_v56 = vpop.xlane.xlu1 %781  ;;  %v1056_v8 = vmul.f32 %v2116_v16, %v2749_v61 }
 0x18c   : > { %v689_v55 = vpop.xlane.xlu0 %688  ;;  %2127 = vrsqrt.f32 %v931_v59  ;;  %v868_v57 = vmul.f32 0.03125, %v782_v56  ;;  %v1025_v42 = vmul.f32 %v2118_v21, %v2758_v24 }
 0x18d   : > { %v837_v52 = vmul.f32 0.03125, %v689_v55  ;;  %2129 = vrsqrt.f32 %v900_v44  ;;  %2005 = vmatprep.mubr.msk.f32.mxu1 %vm238_vm0, %v1056_v8 }
 0x18e   : > { %v2120_v14 = vpop.eup %2119  ;;  %v932_v13 = vadd.f32 1e-06, %v868_v57  ;;  %1958 = vmatmul.mubr.msk.f32.gmra.mrb[16].mxu0 %vm238_vm0, %v1025_v42 }
 0x18f   : > { %v901_v2 = vadd.f32 1e-06, %v837_v52  ;;  %v2122_v31 = vpop.eup %2121  ;;  %v785_v22 = vpop.xlane.xlu1 %784  ;;  %v1057_v50 = vmul.f32 %v2120_v14, %v2761_v4 }
 0x190   : > { %v692_v41 = vpop.xlane.xlu0 %691  ;;  %2131 = vrsqrt.f32 %v932_v13  ;;  %v869_v61 = vmul.f32 0.03125, %v785_v22  ;;  %v1026_v46 = vmul.f32 %v2122_v31, %v2770_v39 }
 0x191   : > { %v838_v23 = vmul.f32 0.03125, %v692_v41  ;;  %2133 = vrsqrt.f32 %v901_v2  ;;  %2006 = vmatmul.mubr.msk.f32.gmra.mrb[16].mxu1 %vm238_vm0, %v1057_v50 }
 0x192   : > { %v2124_v24 = vpop.eup %2123  ;;  %v933_v54 = vadd.f32 1e-06, %v869_v61  ;;  %1960 = vmatprep.mubr.msk.f32.mxu0 %vm238_vm0, %v1026_v46 }
 0x193   : > { %v902_v40 = vadd.f32 1e-06, %v838_v23  ;;  %v2126_v34 = vpop.eup %2125  ;;  %v788_v36 = vpop.xlane.xlu1 %787  ;;  %v1058_v3 = vmul.f32 %v2124_v24, %v2773_v11 }
 0x194   : > { %v695_v5 = vpop.xlane.xlu0 %694  ;;  %2135 = vrsqrt.f32 %v933_v54  ;;  %v870_v4 = vmul.f32 0.03125, %v788_v36  ;;  %v1027_v30 = vmul.f32 %v2126_v34, %v2782_v12  ;;  %v3359_v36 = vld [vmem:[#allocation19_spill] sm:$0xff] }
 0x195   : > { %v839_v45 = vmul.f32 0.03125, %v695_v5  ;;  %2137 = vrsqrt.f32 %v902_v40  ;;  %2008 = vmatprep.mubr.msk.f32.mxu1 %vm238_vm0, %v1058_v3 }
 0x196   : > { %v2128_v39 = vpop.eup %2127  ;;  %v934_v17 = vadd.f32 1e-06, %v870_v4  ;;  %1961 = vmatmul.mubr.msk.f32.gmra.mrb[18].mxu0 %vm238_vm0, %v1027_v30  ;;  %v3360_v4 = vld [vmem:[#allocation2_spill] sm:$0xff] }
 0x197   : > { %v903_v29 = vadd.f32 1e-06, %v839_v45  ;;  %v2130_v10 = vpop.eup %2129  ;;  %v791_v15 = vpop.xlane.xlu1 %790  ;;  %v1059_v60 = vmul.f32 %v2128_v39, %v2785_v19 }
 0x198   : > { %v698_v62 = vpop.xlane.xlu0 %697  ;;  %2139 = vrsqrt.f32 %v934_v17  ;;  %v871_v11 = vmul.f32 0.03125, %v791_v15  ;;  %v1028_v47 = vmul.f32 %v2130_v10, %v2794_v32  ;;  %v3361_v15 = vld [vmem:[#allocation3_spill] sm:$0xff] }
 0x199   : > { %v840_v63 = vmul.f32 0.03125, %v698_v62  ;;  %2141 = vrsqrt.f32 %v903_v29  ;;  %2009 = vmatmul.mubr.msk.f32.gmra.mrb[18].mxu1 %vm238_vm0, %v1059_v60 }
 0x19a   : > { %v2132_v12 = vpop.eup %2131  ;;  %v935_v49 = vadd.f32 1e-06, %v871_v11  ;;  %1963 = vmatprep.mubr.msk.f32.mxu0 %vm238_vm0, %v1028_v47 }
 0x19b   : > { %v904_v18 = vadd.f32 1e-06, %v840_v63  ;;  %v2134_v26 = vpop.eup %2133  ;;  %v794_v25 = vpop.xlane.xlu1 %793  ;;  %v1060_v6 = vmul.f32 %v2132_v12, %v2797_v27  ;;  %v3362_v63 = vld [vmem:[#allocation4_spill] sm:$0xff] }
 0x19c   : > { %v701_v38 = vpop.xlane.xlu0 %700  ;;  %2143 = vrsqrt.f32 %v935_v49  ;;  %v872_v19 = vmul.f32 0.03125, %v794_v25  ;;  %v1029_v37 = vmul.f32 %v2134_v26, %v2806_v1 }
 0x19d   : > { %v841_v58 = vmul.f32 0.03125, %v701_v38  ;;  %2145 = vrsqrt.f32 %v904_v18  ;;  %2011 = vmatprep.mubr.msk.f32.mxu1 %vm238_vm0, %v1060_v6  ;;  %v3363_v6 = vld [vmem:[#allocation5_spill] sm:$0xff] }
 0x19e   : > { %v2136_v32 = vpop.eup %2135  ;;  %v936_v9 = vadd.f32 1e-06, %v872_v19  ;;  %1964 = vmatmul.mubr.msk.f32.gmra.mrb[20].mxu0 %vm238_vm0, %v1029_v37 }
 0x19f   : > { %v905_v7 = vadd.f32 1e-06, %v841_v58  ;;  %v2138_v53 = vpop.eup %2137  ;;  %v797_v48 = vpop.xlane.xlu1 %796  ;;  %v1061_v16 = vmul.f32 %v2136_v32, %v2809_v35  ;;  %v3364_v32 = vld [vmem:[#allocation6_spill] sm:$0xff] }
 0x1a0   : > { %v704_v0 = vpop.xlane.xlu0 %703  ;;  %2147 = vrsqrt.f32 %v936_v9  ;;  %v873_v27 = vmul.f32 0.03125, %v797_v48  ;;  %v1030_v44 = vmul.f32 %v2138_v53, %v2818_v20 }
 0x1a1   : > { %v842_v59 = vmul.f32 0.03125, %v704_v0  ;;  %2149 = vrsqrt.f32 %v905_v7  ;;  %2012 = vmatmul.mubr.msk.f32.gmra.mrb[20].mxu1 %vm238_vm0, %v1061_v16 }
 0x1a2   : > { %v2140_v1 = vpop.eup %2139  ;;  %v937_v21 = vadd.f32 1e-06, %v873_v27  ;;  %1966 = vmatprep.mubr.msk.f32.mxu0 %vm238_vm0, %v1030_v44  ;;  %v3365_v27 = vld [vmem:[#allocation7_spill] sm:$0xff] }
 0x1a3   : > { %v906_v56 = vadd.f32 1e-06, %v842_v59  ;;  %v2142_v55 = vpop.eup %2141  ;;  %v800_v8 = vpop.xlane.xlu1 %799  ;;  %v1062_v52 = vmul.f32 %v2140_v1, %v2821_v43  ;;  %v3366_v1 = vld [vmem:[#allocation8_spill] sm:$0xff] }
 0x1a4   : > { %v707_v57 = vpop.xlane.xlu0 %706  ;;  %2151 = vrsqrt.f32 %v937_v21  ;;  %v874_v35 = vmul.f32 0.03125, %v800_v8  ;;  %v1031_v14 = vmul.f32 %v2142_v55, %v2830_v33 }
 0x1a5   : > { %v843_v42 = vmul.f32 0.03125, %v707_v57  ;;  %2153 = vrsqrt.f32 %v906_v56  ;;  %2014 = vmatprep.mubr.msk.f32.mxu1 %vm238_vm0, %v1062_v52  ;;  %v3367_v57 = vld [vmem:[#allocation9_spill] sm:$0xff] }
 0x1a6   : > { %v2144_v20 = vpop.eup %2143  ;;  %v938_v13 = vadd.f32 1e-06, %v874_v35  ;;  %1967 = vmatmul.mubr.msk.f32.gmra.mrb[22].mxu0 %vm238_vm0, %v1031_v14  ;;  %v3368_v35 = vld [vmem:[#allocation10_spill] sm:$0xff] }
 0x1a7   : > { %v907_v2 = vadd.f32 1e-06, %v843_v42  ;;  %v2146_v31 = vpop.eup %2145  ;;  %v803_v22 = vpop.xlane.xlu1 %802  ;;  %v1063_v50 = vmul.f32 %v2144_v20, %v2833_v51 }
 0x1a8   : > { %v710_v41 = vpop.xlane.xlu0 %709  ;;  %2155 = vrsqrt.f32 %v938_v13  ;;  %v875_v43 = vmul.f32 0.03125, %v803_v22  ;;  %v1032_v23 = vmul.f32 %v2146_v31, %v2842_v28  ;;  %v3369_v13 = vld [vmem:[#allocation11_spill] sm:$0xff]  ;;  %v3370_v31 = vld [vmem:[#allocation12_spill] sm:$0xff] }
 0x1a9   : > { %v844_v61 = vmul.f32 0.03125, %v710_v41  ;;  %2157 = vrsqrt.f32 %v907_v2  ;;  %2015 = vmatmul.mubr.msk.f32.gmra.mrb[22].mxu1 %vm238_vm0, %v1063_v50 }
 0x1aa   : > { %v2148_v33 = vpop.eup %2147  ;;  %v939_v46 = vadd.f32 1e-06, %v875_v43  ;;  %1969 = vmatprep.mubr.msk.f32.mxu0 %vm238_vm0, %v1032_v23  ;;  %v3371_v43 = vld [vmem:[#allocation13_spill] sm:$0xff]  ;;  %v3372_v23 = vld [vmem:[#allocation14_spill] sm:$0xff] }
 0x1ab   : > { %v908_v24 = vadd.f32 1e-06, %v844_v61  ;;  %v2150_v54 = vpop.eup %2149  ;;  %v806_v40 = vpop.xlane.xlu1 %805  ;;  %v1064_v5 = vmul.f32 %v2148_v33, %v3359_v36 }
 0x1ac   : > { %v713_v34 = vpop.xlane.xlu0 %712  ;;  %2159 = vrsqrt.f32 %v939_v46  ;;  %v876_v51 = vmul.f32 0.03125, %v806_v40  ;;  %v1033_v45 = vmul.f32 %v2150_v54, %v3360_v4  ;;  %v3070_v40 = vld [vmem:[%s3276_s2] ss:$0 sm:$0xff] }
 0x1ad   : > { %v845_v3 = vmul.f32 0.03125, %v713_v34  ;;  %2161 = vrsqrt.f32 %v908_v24  ;;  %2017 = vmatprep.mubr.msk.f32.mxu1 %vm238_vm0, %v1064_v5  ;;  %v3373_v24 = vld [vmem:[#allocation20_spill] sm:$0xff] }
 0x1ae   : > { %v2152_v28 = vpop.eup %2151  ;;  %v940_v30 = vadd.f32 1e-06, %v876_v51  ;;  %1970 = vmatmul.mubr.msk.f32.gmra.mrb[24].mxu0 %vm238_vm0, %v1033_v45 }
 0x1af   : > { %v909_v39 = vadd.f32 1e-06, %v845_v3  ;;  %v2154_v17 = vpop.eup %2153  ;;  %v809_v29 = vpop.xlane.xlu1 %808  ;;  %v1065_v62 = vmul.f32 %v2152_v28, %v3361_v15 }
 0x1b0   : > { %v716_v10 = vpop.xlane.xlu0 %715  ;;  %2163 = vrsqrt.f32 %v940_v30  ;;  %v877_v60 = vmul.f32 0.03125, %v809_v29  ;;  %v1034_v47 = vmul.f32 %v2154_v17, %v3362_v63 }
 0x1b1   : > { %v846_v11 = vmul.f32 0.03125, %v716_v10  ;;  %2165 = vrsqrt.f32 %v909_v39  ;;  %2018 = vmatmul.mubr.msk.f32.gmra.mrb[24].mxu1 %vm238_vm0, %v1065_v62 }
 0x1b2   : > { %v2156_v12 = vpop.eup %2155  ;;  %v941_v49 = vadd.f32 1e-06, %v877_v60  ;;  %1972 = vmatprep.mubr.msk.f32.mxu0 %vm238_vm0, %v1034_v47 }
 0x1b3   : > { %v910_v18 = vadd.f32 1e-06, %v846_v11  ;;  %v2158_v26 = vpop.eup %2157  ;;  %v812_v25 = vpop.xlane.xlu1 %811  ;;  %v1066_v19 = vmul.f32 %v2156_v12, %v3363_v6 }
 0x1b4   : > { %v719_v38 = vpop.xlane.xlu0 %718  ;;  %2167 = vrsqrt.f32 %v941_v49  ;;  %v878_v58 = vmul.f32 0.03125, %v812_v25  ;;  %v1035_v9 = vmul.f32 %v2158_v26, %v3364_v32 }
 0x1b5   : > { %v847_v37 = vmul.f32 0.03125, %v719_v38  ;;  %2169 = vrsqrt.f32 %v910_v18  ;;  %2020 = vmatprep.mubr.msk.f32.mxu1 %vm238_vm0, %v1066_v19 }
 0x1b6   : > { %v2160_v7 = vpop.eup %2159  ;;  %v942_v53 = vadd.f32 1e-06, %v878_v58  ;;  %1973 = vmatmul.mubr.msk.f32.gmra.mrb[26].mxu0 %vm238_vm0, %v1035_v9 }
 0x1b7   : > { %v911_v48 = vadd.f32 1e-06, %v847_v37  ;;  %v2162_v0 = vpop.eup %2161  ;;  %v815_v16 = vpop.xlane.xlu1 %814  ;;  %v1067_v59 = vmul.f32 %v2160_v7, %v3365_v27 }
 0x1b8   : > { %2171 = vrsqrt.f32 %v942_v53  ;;  %v879_v44 = vmul.f32 0.03125, %v815_v16  ;;  %v1036_v21 = vmul.f32 %v2162_v0, %v3366_v1 }
 0x1b9   : > { %2173 = vrsqrt.f32 %v911_v48  ;;  %2021 = vmatmul.mubr.msk.f32.gmra.mrb[26].mxu1 %vm238_vm0, %v1067_v59 }
 0x1ba   : > { %v2164_v56 = vpop.eup %2163  ;;  %v943_v55 = vadd.f32 1e-06, %v879_v44  ;;  %1975 = vmatprep.mubr.msk.f32.mxu0 %vm238_vm0, %v1036_v21 }
 0x1bb   : > { %v2166_v8 = vpop.eup %2165  ;;  %v1068_v52 = vmul.f32 %v2164_v56, %v3367_v57 }
 0x1bc   : > { %2175 = vrsqrt.f32 %v943_v55  ;;  %v1037_v42 = vmul.f32 %v2166_v8, %v3368_v35 }
 0x1bd   : > { %2023 = vmatprep.mubr.msk.f32.mxu1 %vm238_vm0, %v1068_v52 }
 0x1be   : > { %v2168_v14 = vpop.eup %2167  ;;  %1976 = vmatmul.mubr.msk.f32.gmra.mrb[28].mxu0 %vm238_vm0, %v1037_v42 }
 0x1bf   : > { %v2170_v20 = vpop.eup %2169  ;;  %v1069_v2 = vmul.f32 %v2168_v14, %v3369_v13 }
 0x1c0   : > { %v1038_v22 = vmul.f32 %v2170_v20, %v3370_v31 }
 0x1c1   : > { %2024 = vmatmul.mubr.msk.f32.gmra.mrb[28].mxu1 %vm238_vm0, %v1069_v2 }
 0x1c2   : > { %v2172_v41 = vpop.eup %2171  ;;  %1978 = vmatprep.mubr.msk.f32.mxu0 %vm238_vm0, %v1038_v22 }
 0x1c3   : > { %v2174_v50 = vpop.eup %2173  ;;  %v1070_v61 = vmul.f32 %v2172_v41, %v3371_v43 }
 0x1c4   : > { %v1039_v33 = vmul.f32 %v2174_v50, %v3372_v23 }
 0x1c5   : > { %2026 = vmatprep.mubr.msk.f32.mxu1 %vm238_vm0, %v1070_v61 }
 0x1c6   : > { %v2176_v46 = vpop.eup %2175  ;;  %1979 = vmatmul.mubr.msk.f32.gmra.mrb[30].mxu0 %vm238_vm0, %v1039_v33 }
 0x1c7   : > { %v1071_v54 = vmul.f32 %v2176_v46, %v3373_v24 }
 0x1c9   : > { %2027 = vmatmul.mubr.msk.f32.gmra.mrb[30].mxu1 %vm238_vm0, %v1071_v54 }
 0x221   : > { %v1935_v34 = vpop.f32.mrb[0].mxu0 }
 0x222   : > { %v1347_v36 = vadd.f32 %v1935_v34, %v3070_v40  ;;  %v1341_v5 = vpop.f32.mrb[1].mxu0 }
 0x223   : > { %v1342_v51 = vadd.f32 %v3070_v40, %v1341_v5 }
 0x224   : > { %1662 = vst.msk [vmem:[%s3077_s4 + $0x8] sm:$0xff] %vm1660_vm1, %v1347_v36  ;;  %v1983_v3 = vpop.f32.mrb[0].mxu1 }
 0x225   : > { %1661 = vst.msk [vmem:[%s3077_s4] sm:$0xff] %vm1660_vm1, %v1342_v51  ;;  %v1507_v4 = vadd.f32 %v1983_v3, %v3070_v40  ;;  %v1501_v45 = vpop.f32.mrb[1].mxu1 }
 0x226   : > { %v1502_v28 = vadd.f32 %v3070_v40, %v1501_v45 }
 0x227   : > { %1694 = vst.msk [vmem:[%s3077_s4 + $0x108] sm:$0xff] %vm1660_vm1, %v1507_v4 }
 0x228   : > { %1693 = vst.msk [vmem:[%s3077_s4 + $0x100] sm:$0xff] %vm1660_vm1, %v1502_v28 }
 0x229   : > { %v1938_v30 = vpop.f32.mrb[2].mxu0 }
 0x22a   : > { %v1357_v39 = vadd.f32 %v1938_v30, %v3070_v40  ;;  %v1351_v17 = vpop.f32.mrb[3].mxu0 }
 0x22b   : > { %v1352_v29 = vadd.f32 %v3070_v40, %v1351_v17 }
 0x22c   : > { %1664 = vst.msk [vmem:[%s3077_s4 + $0x18] sm:$0xff] %vm1660_vm1, %v1357_v39  ;;  %v1986_v10 = vpop.f32.mrb[2].mxu1 }
 0x22d   : > { %1663 = vst.msk [vmem:[%s3077_s4 + $0x10] sm:$0xff] %vm1660_vm1, %v1352_v29  ;;  %v1517_v15 = vadd.f32 %v1986_v10, %v3070_v40  ;;  %v1511_v62 = vpop.f32.mrb[3].mxu1 }
 0x22e   : > { %v1512_v60 = vadd.f32 %v3070_v40, %v1511_v62 }
 0x22f   : > { %1696 = vst.msk [vmem:[%s3077_s4 + $0x118] sm:$0xff] %vm1660_vm1, %v1517_v15 }
 0x230   : > { %1695 = vst.msk [vmem:[%s3077_s4 + $0x110] sm:$0xff] %vm1660_vm1, %v1512_v60 }
 0x231   : > { %v1941_v11 = vpop.f32.mrb[4].mxu0 }
 0x232   : > { %v1367_v63 = vadd.f32 %v1941_v11, %v3070_v40  ;;  %v1361_v47 = vpop.f32.mrb[5].mxu0 }
 0x233   : > { %v1362_v12 = vadd.f32 %v3070_v40, %v1361_v47 }
 0x234   : > { %1666 = vst.msk [vmem:[%s3077_s4 + $0x28] sm:$0xff] %vm1660_vm1, %v1367_v63  ;;  %v1989_v49 = vpop.f32.mrb[4].mxu1 }
 0x235   : > { %1665 = vst.msk [vmem:[%s3077_s4 + $0x20] sm:$0xff] %vm1660_vm1, %v1362_v12  ;;  %v1527_v18 = vadd.f32 %v1989_v49, %v3070_v40  ;;  %v1521_v26 = vpop.f32.mrb[5].mxu1 }
 0x236   : > { %v1522_v25 = vadd.f32 %v3070_v40, %v1521_v26 }
 0x237   : > { %1698 = vst.msk [vmem:[%s3077_s4 + $0x128] sm:$0xff] %vm1660_vm1, %v1527_v18 }
 0x238   : > { %1697 = vst.msk [vmem:[%s3077_s4 + $0x120] sm:$0xff] %vm1660_vm1, %v1522_v25 }
 0x239   : > { %v1944_v38 = vpop.f32.mrb[6].mxu0 }
 0x23a   : > { %v1377_v6 = vadd.f32 %v1944_v38, %v3070_v40  ;;  %v1371_v19 = vpop.f32.mrb[7].mxu0 }
 0x23b   : > { %v1372_v58 = vadd.f32 %v3070_v40, %v1371_v19 }
 0x23c   : > { %1668 = vst.msk [vmem:[%s3077_s4 + $0x38] sm:$0xff] %vm1660_vm1, %v1377_v6  ;;  %v1992_v37 = vpop.f32.mrb[6].mxu1 }
 0x23d   : > { %1667 = vst.msk [vmem:[%s3077_s4 + $0x30] sm:$0xff] %vm1660_vm1, %v1372_v58  ;;  %v1537_v32 = vadd.f32 %v1992_v37, %v3070_v40  ;;  %v1531_v9 = vpop.f32.mrb[7].mxu1 }
 0x23e   : > { %v1532_v7 = vadd.f32 %v3070_v40, %v1531_v9 }
 0x23f   : > { %1700 = vst.msk [vmem:[%s3077_s4 + $0x138] sm:$0xff] %vm1660_vm1, %v1537_v32 }
 0x240   : > { %1699 = vst.msk [vmem:[%s3077_s4 + $0x130] sm:$0xff] %vm1660_vm1, %v1532_v7 }
 0x241   : > { %v1947_v53 = vpop.f32.mrb[8].mxu0 }
 0x242   : > { %v1387_v48 = vadd.f32 %v1947_v53, %v3070_v40  ;;  %v1381_v0 = vpop.f32.mrb[9].mxu0 }
 0x243   : > { %v1382_v16 = vadd.f32 %v3070_v40, %v1381_v0 }
 0x244   : > { %1670 = vst.msk [vmem:[%s3077_s4 + $0x48] sm:$0xff] %vm1660_vm1, %v1387_v48  ;;  %v1995_v27 = vpop.f32.mrb[8].mxu1 }
 0x245   : > { %1669 = vst.msk [vmem:[%s3077_s4 + $0x40] sm:$0xff] %vm1660_vm1, %v1382_v16  ;;  %v1547_v59 = vadd.f32 %v1995_v27, %v3070_v40  ;;  %v1541_v44 = vpop.f32.mrb[9].mxu1 }
 0x246   : > { %v1542_v1 = vadd.f32 %v3070_v40, %v1541_v44 }
 0x247   : > { %1702 = vst.msk [vmem:[%s3077_s4 + $0x148] sm:$0xff] %vm1660_vm1, %v1547_v59 }
 0x248   : > { %1701 = vst.msk [vmem:[%s3077_s4 + $0x140] sm:$0xff] %vm1660_vm1, %v1542_v1 }
 0x249   : > { %v1950_v21 = vpop.f32.mrb[10].mxu0 }
 0x24a   : > { %v1397_v56 = vadd.f32 %v1950_v21, %v3070_v40  ;;  %v1391_v55 = vpop.f32.mrb[11].mxu0 }
 0x24b   : > { %v1392_v8 = vadd.f32 %v3070_v40, %v1391_v55 }
 0x24c   : > { %1672 = vst.msk [vmem:[%s3077_s4 + $0x58] sm:$0xff] %vm1660_vm1, %v1397_v56  ;;  %v1998_v57 = vpop.f32.mrb[10].mxu1 }
 0x24d   : > { %1671 = vst.msk [vmem:[%s3077_s4 + $0x50] sm:$0xff] %vm1660_vm1, %v1392_v8  ;;  %v1557_v52 = vadd.f32 %v1998_v57, %v3070_v40  ;;  %v1551_v35 = vpop.f32.mrb[11].mxu1 }
 0x24e   : > { %v1552_v42 = vadd.f32 %v3070_v40, %v1551_v35 }
 0x24f   : > { %1704 = vst.msk [vmem:[%s3077_s4 + $0x158] sm:$0xff] %vm1660_vm1, %v1557_v52 }
 0x250   : > { %1703 = vst.msk [vmem:[%s3077_s4 + $0x150] sm:$0xff] %vm1660_vm1, %v1552_v42 }
 0x251   : > { %v1953_v14 = vpop.f32.mrb[12].mxu0 }
 0x252   : > { %v1407_v20 = vadd.f32 %v1953_v14, %v3070_v40  ;;  %v1401_v13 = vpop.f32.mrb[13].mxu0 }
 0x253   : > { %v1402_v2 = vadd.f32 %v3070_v40, %v1401_v13 }
 0x254   : > { %1674 = vst.msk [vmem:[%s3077_s4 + $0x68] sm:$0xff] %vm1660_vm1, %v1407_v20  ;;  %v2001_v31 = vpop.f32.mrb[12].mxu1 }
 0x255   : > { %1673 = vst.msk [vmem:[%s3077_s4 + $0x60] sm:$0xff] %vm1660_vm1, %v1402_v2  ;;  %v1567_v22 = vadd.f32 %v2001_v31, %v3070_v40  ;;  %v1561_v41 = vpop.f32.mrb[13].mxu1 }
 0x256   : > { %v1562_v50 = vadd.f32 %v3070_v40, %v1561_v41 }
 0x257   : > { %1706 = vst.msk [vmem:[%s3077_s4 + $0x168] sm:$0xff] %vm1660_vm1, %v1567_v22 }
 0x258   : > { %1705 = vst.msk [vmem:[%s3077_s4 + $0x160] sm:$0xff] %vm1660_vm1, %v1562_v50 }
 0x259   : > { %v1956_v43 = vpop.f32.mrb[14].mxu0 }
 0x25a   : > { %v1417_v61 = vadd.f32 %v1956_v43, %v3070_v40  ;;  %v1411_v23 = vpop.f32.mrb[15].mxu0 }
 0x25b   : > { %v1412_v33 = vadd.f32 %v3070_v40, %v1411_v23 }
 0x25c   : > { %1676 = vst.msk [vmem:[%s3077_s4 + $0x78] sm:$0xff] %vm1660_vm1, %v1417_v61  ;;  %v2004_v46 = vpop.f32.mrb[14].mxu1 }
 0x25d   : > { %1675 = vst.msk [vmem:[%s3077_s4 + $0x70] sm:$0xff] %vm1660_vm1, %v1412_v33  ;;  %v1577_v24 = vadd.f32 %v2004_v46, %v3070_v40  ;;  %v1571_v54 = vpop.f32.mrb[15].mxu1 }
 0x25e   : > { %v1572_v34 = vadd.f32 %v3070_v40, %v1571_v54 }
 0x25f   : > { %1708 = vst.msk [vmem:[%s3077_s4 + $0x178] sm:$0xff] %vm1660_vm1, %v1577_v24 }
 0x260   : > { %1707 = vst.msk [vmem:[%s3077_s4 + $0x170] sm:$0xff] %vm1660_vm1, %v1572_v34 }
 0x261   : > { %v1959_v36 = vpop.f32.mrb[16].mxu0 }
 0x262   : > { %v1427_v5 = vadd.f32 %v1959_v36, %v3070_v40  ;;  %v1421_v51 = vpop.f32.mrb[17].mxu0 }
 0x263   : > { %v1422_v3 = vadd.f32 %v3070_v40, %v1421_v51 }
 0x264   : > { %1678 = vst.msk [vmem:[%s3077_s4 + $0x88] sm:$0xff] %vm1660_vm1, %v1427_v5  ;;  %v2007_v4 = vpop.f32.mrb[16].mxu1 }
 0x265   : > { %1677 = vst.msk [vmem:[%s3077_s4 + $0x80] sm:$0xff] %vm1660_vm1, %v1422_v3  ;;  %v1587_v45 = vadd.f32 %v2007_v4, %v3070_v40  ;;  %v1581_v28 = vpop.f32.mrb[17].mxu1 }
 0x266   : > { %v1582_v30 = vadd.f32 %v3070_v40, %v1581_v28 }
 0x267   : > { %1710 = vst.msk [vmem:[%s3077_s4 + $0x188] sm:$0xff] %vm1660_vm1, %v1587_v45 }
 0x268   : > { %1709 = vst.msk [vmem:[%s3077_s4 + $0x180] sm:$0xff] %vm1660_vm1, %v1582_v30 }
 0x269   : > { %v1962_v39 = vpop.f32.mrb[18].mxu0 }
 0x26a   : > { %v1437_v17 = vadd.f32 %v1962_v39, %v3070_v40  ;;  %v1431_v29 = vpop.f32.mrb[19].mxu0 }
 0x26b   : > { %v1432_v10 = vadd.f32 %v3070_v40, %v1431_v29 }
 0x26c   : > { %1680 = vst.msk [vmem:[%s3077_s4 + $0x98] sm:$0xff] %vm1660_vm1, %v1437_v17  ;;  %v2010_v15 = vpop.f32.mrb[18].mxu1 }
 0x26d   : > { %1679 = vst.msk [vmem:[%s3077_s4 + $0x90] sm:$0xff] %vm1660_vm1, %v1432_v10  ;;  %v1597_v62 = vadd.f32 %v2010_v15, %v3070_v40  ;;  %v1591_v60 = vpop.f32.mrb[19].mxu1 }
 0x26e   : > { %v1592_v11 = vadd.f32 %v3070_v40, %v1591_v60 }
 0x26f   : > { %1712 = vst.msk [vmem:[%s3077_s4 + $0x198] sm:$0xff] %vm1660_vm1, %v1597_v62 }
 0x270   : > { %1711 = vst.msk [vmem:[%s3077_s4 + $0x190] sm:$0xff] %vm1660_vm1, %v1592_v11 }
 0x271   : > { %v1965_v63 = vpop.f32.mrb[20].mxu0 }
 0x272   : > { %v1447_v47 = vadd.f32 %v1965_v63, %v3070_v40  ;;  %v1441_v12 = vpop.f32.mrb[21].mxu0 }
 0x273   : > { %v1442_v49 = vadd.f32 %v3070_v40, %v1441_v12 }
 0x274   : > { %1682 = vst.msk [vmem:[%s3077_s4 + $0xa8] sm:$0xff] %vm1660_vm1, %v1447_v47  ;;  %v2013_v18 = vpop.f32.mrb[20].mxu1 }
 0x275   : > { %1681 = vst.msk [vmem:[%s3077_s4 + $0xa0] sm:$0xff] %vm1660_vm1, %v1442_v49  ;;  %v1607_v26 = vadd.f32 %v2013_v18, %v3070_v40  ;;  %v1601_v25 = vpop.f32.mrb[21].mxu1 }
 0x276   : > { %v1602_v38 = vadd.f32 %v3070_v40, %v1601_v25 }
 0x277   : > { %1714 = vst.msk [vmem:[%s3077_s4 + $0x1a8] sm:$0xff] %vm1660_vm1, %v1607_v26 }
 0x278   : > { %1713 = vst.msk [vmem:[%s3077_s4 + $0x1a0] sm:$0xff] %vm1660_vm1, %v1602_v38 }
 0x279   : > { %v1968_v6 = vpop.f32.mrb[22].mxu0 }
 0x27a   : > { %v1457_v19 = vadd.f32 %v1968_v6, %v3070_v40  ;;  %v1451_v58 = vpop.f32.mrb[23].mxu0 }
 0x27b   : > { %v1452_v37 = vadd.f32 %v3070_v40, %v1451_v58 }
 0x27c   : > { %1684 = vst.msk [vmem:[%s3077_s4 + $0xb8] sm:$0xff] %vm1660_vm1, %v1457_v19  ;;  %v2016_v32 = vpop.f32.mrb[22].mxu1 }
 0x27d   : > { %1683 = vst.msk [vmem:[%s3077_s4 + $0xb0] sm:$0xff] %vm1660_vm1, %v1452_v37  ;;  %v1617_v9 = vadd.f32 %v2016_v32, %v3070_v40  ;;  %v1611_v7 = vpop.f32.mrb[23].mxu1 }
 0x27e   : > { %v1612_v53 = vadd.f32 %v3070_v40, %v1611_v7 }
 0x27f   : > { %1716 = vst.msk [vmem:[%s3077_s4 + $0x1b8] sm:$0xff] %vm1660_vm1, %v1617_v9 }
 0x280   : > { %1715 = vst.msk [vmem:[%s3077_s4 + $0x1b0] sm:$0xff] %vm1660_vm1, %v1612_v53 }
 0x281   : > { %v1971_v48 = vpop.f32.mrb[24].mxu0 }
 0x282   : > { %v1467_v0 = vadd.f32 %v1971_v48, %v3070_v40  ;;  %v1461_v16 = vpop.f32.mrb[25].mxu0 }
 0x283   : > { %v1462_v27 = vadd.f32 %v3070_v40, %v1461_v16 }
 0x284   : > { %1686 = vst.msk [vmem:[%s3077_s4 + $0xc8] sm:$0xff] %vm1660_vm1, %v1467_v0  ;;  %v2019_v59 = vpop.f32.mrb[24].mxu1 }
 0x285   : > { %1685 = vst.msk [vmem:[%s3077_s4 + $0xc0] sm:$0xff] %vm1660_vm1, %v1462_v27  ;;  %v1627_v44 = vadd.f32 %v2019_v59, %v3070_v40  ;;  %v1621_v1 = vpop.f32.mrb[25].mxu1 }
 0x286   : > { %v1622_v21 = vadd.f32 %v3070_v40, %v1621_v1 }
 0x287   : > { %1718 = vst.msk [vmem:[%s3077_s4 + $0x1c8] sm:$0xff] %vm1660_vm1, %v1627_v44 }
 0x288   : > { %1717 = vst.msk [vmem:[%s3077_s4 + $0x1c0] sm:$0xff] %vm1660_vm1, %v1622_v21 }
 0x289   : > { %v1974_v56 = vpop.f32.mrb[26].mxu0 }
 0x28a   : > { %v1477_v55 = vadd.f32 %v1974_v56, %v3070_v40  ;;  %v1471_v8 = vpop.f32.mrb[27].mxu0 }
 0x28b   : > { %v1472_v57 = vadd.f32 %v3070_v40, %v1471_v8 }
 0x28c   : > { %1688 = vst.msk [vmem:[%s3077_s4 + $0xd8] sm:$0xff] %vm1660_vm1, %v1477_v55  ;;  %v2022_v52 = vpop.f32.mrb[26].mxu1 }
 0x28d   : > { %1687 = vst.msk [vmem:[%s3077_s4 + $0xd0] sm:$0xff] %vm1660_vm1, %v1472_v57  ;;  %v1637_v35 = vadd.f32 %v2022_v52, %v3070_v40  ;;  %v1631_v42 = vpop.f32.mrb[27].mxu1 }
 0x28e   : > { %v1632_v14 = vadd.f32 %v3070_v40, %v1631_v42 }
 0x28f   : > { %1720 = vst.msk [vmem:[%s3077_s4 + $0x1d8] sm:$0xff] %vm1660_vm1, %v1637_v35 }
 0x290   : > { %1719 = vst.msk [vmem:[%s3077_s4 + $0x1d0] sm:$0xff] %vm1660_vm1, %v1632_v14 }
 0x291   : > { %v1977_v20 = vpop.f32.mrb[28].mxu0 }
 0x292   : > { %v1487_v13 = vadd.f32 %v1977_v20, %v3070_v40  ;;  %v1481_v2 = vpop.f32.mrb[29].mxu0 }
 0x293   : > { %v1482_v31 = vadd.f32 %v3070_v40, %v1481_v2 }
 0x294   : > { %1690 = vst.msk [vmem:[%s3077_s4 + $0xe8] sm:$0xff] %vm1660_vm1, %v1487_v13  ;;  %v2025_v22 = vpop.f32.mrb[28].mxu1 }
 0x295   : > { %1689 = vst.msk [vmem:[%s3077_s4 + $0xe0] sm:$0xff] %vm1660_vm1, %v1482_v31  ;;  %v1647_v41 = vadd.f32 %v2025_v22, %v3070_v40  ;;  %v1641_v50 = vpop.f32.mrb[29].mxu1 }
 0x296   : > { %v1642_v43 = vadd.f32 %v3070_v40, %v1641_v50 }
 0x297   : > { %1722 = vst.msk [vmem:[%s3077_s4 + $0x1e8] sm:$0xff] %vm1660_vm1, %v1647_v41 }
 0x298   : > { %1721 = vst.msk [vmem:[%s3077_s4 + $0x1e0] sm:$0xff] %vm1660_vm1, %v1642_v43 }
 0x299   : > { %v1980_v61 = vpop.f32.mrb[30].mxu0 }
 0x29a   : > { %v1497_v23 = vadd.f32 %v1980_v61, %v3070_v40  ;;  %v1491_v33 = vpop.f32.mrb[31].mxu0 }
 0x29b   : > { %v1492_v46 = vadd.f32 %v3070_v40, %v1491_v33 }
 0x29c   : > { %1692 = vst.msk [vmem:[%s3077_s4 + $0xf8] sm:$0xff] %vm1660_vm1, %v1497_v23  ;;  %v2028_v24 = vpop.f32.mrb[30].mxu1 }
 0x29d   : > { %1691 = vst.msk [vmem:[%s3077_s4 + $0xf0] sm:$0xff] %vm1660_vm1, %v1492_v46  ;;  %v1657_v54 = vadd.f32 %v2028_v24, %v3070_v40  ;;  %v1651_v34 = vpop.f32.mrb[31].mxu1 }
 0x29e   : > { %v1652_v36 = vadd.f32 %v3070_v40, %v1651_v34 }
 0x29f   : > { %1724 = vst.msk [vmem:[%s3077_s4 + $0x1f8] sm:$0xff] %vm1660_vm1, %v1657_v54 }
 0x2a0   : > { %1723 = vst.msk [vmem:[%s3077_s4 + $0x1f0] sm:$0xff] %vm1660_vm1, %v1652_v36 }
 0x2a1 PF: > { %s13_s12 = sadd.s32 1, %s2183_s12  }
 0x2a2   : > { %p10_p4 = scmp.ge.s32.totalorder %s13_s12, 4  }
 0x2a4   :  { %12 = sbr.rel (!%p10_p4) target bundleno = 1 (0x1), region = 62 }

// kernel: structure_enhancement_forward.9
= control target key start
LH: loop header
LB: loop body
LE: loop exit
PB: predicated region body
PF: predicated region fallthrough
CT: control target
= control target key end

     0   :  { %s959_s21 = smov 0   ;;  %s1009_s0 = inlined_call_operand.vmem [shape: f32[8,8,256], index: 0, kind: input, shape index: {}]   ;;  %s1010_s1 = inlined_call_operand.vmem [shape: f32[8,8,256], index: 1, kind: input, shape index: {}]   ;;  %s1011_s2 = inlined_call_operand.vmem [shape: f32[8,8,256], index: 2, kind: input, shape index: {}]   ;;  %s1012_s3 = inlined_call_operand.vmem [shape: f32[8,8,256], index: 3, kind: input, shape index: {}]   ;;  %s1013_s4 = inlined_call_operand.vmem [shape: f32[8,8,256], index: 4, kind: input, shape index: {}]   ;;  %s1014_s5 = inlined_call_operand.vmem [shape: f32[8,1,1], index: 5, kind: input, shape index: {}]   ;;  %s1015_s6 = inlined_call_operand.vmem [shape: f32[8,8,256], index: 6, kind: output, shape index: {}]  }
   0x1 LB: > { %s855_s22 = sadd.s32 4294967295, %s920_s21   ;;  %p859_p0 = scmp.ge.s32.totalorder %s920_s21, 1  ;;  %s920_s21 = sphi %s959_s21, %s16_s21  }
   0x2   : > { %p260_p1 = scmp.lt.s32.totalorder %s920_s21, 9 }
   0x4   : > { %p261_p2 = pnand %p859_p0, %p260_p1 }
   0x5   : > { %p313_p3 = scmp.lt.s32.totalorder (!%p261_p2), %s855_s22, 7  ;;  %vm454_vm4 = vcmask (!%p261_p2), 64512   ;;  %v922_v52 = vmov (!%p261_p2), 0.0   ;;  %v923_v59 = vmov (!%p261_p2), 0  }
   0x6   : > { %264 = sbr.rel (%p261_p2) target bundleno = 1472 (0x5c0), region = 44  ;;  %533 = vmatprep.mubr.f32.mxu1 (!%p261_p2), %v922_v52  ;;  %892 = vset.pattern.permute.xlu1 (!%p261_p2), %v923_v59 }
   0x7   : > { %893 = vset.pattern.permute.xlu0 (!%p261_p2), %v923_v59 }
   0xd   : > { %s1017_s22 = smov (!%p313_p3, %s855_s22), 7 }
   0xe   : > { %s970_s23 = sshll.u32 %s1017_s22, 4  ;;  %s340_s14 = scalar_lea.vmem %s1014_s5, %s1017_s22 }
   0xf   : > { %s322_s26 = scalar_lea.vmem %s1010_s1, %s970_s23  ;;  %s317_s29 = scalar_lea.vmem %s1009_s0, %s970_s23 }
  0x10   : > { %v364_v0 = vld [vmem:[%s322_s26] sm:$0xff]  ;;  %v365_v1 = vld [vmem:[%s322_s26 + $0x8] sm:$0xff]  ;;  %s327_s8 = scalar_lea.vmem %s1011_s2, %s970_s23  ;;  %s332_s11 = scalar_lea.vmem %s1012_s3, %s970_s23 }
  0x11   : > { %v346_v2 = vld [vmem:[%s317_s29] sm:$0xff]  ;;  %v368_v3 = vmul.f32 %v364_v0, %v364_v0  ;;  %v369_v4 = vmul.f32 %v365_v1, %v365_v1  ;;  %v347_v5 = vld [vmem:[%s317_s29 + $0x8] sm:$0xff]  ;;  %s337_s17 = scalar_lea.vmem %s1013_s4, %s970_s23  ;;  %s345_s20 = scalar_lea.vmem %s1015_s6, %s970_s23 }
  0x12   : > { %v348_v6 = vmul.f32 %v346_v2, %v346_v2  ;;  %v349_v7 = vmul.f32 %v347_v5, %v347_v5  ;;  %v540_v30 = vld [vmem:[%s327_s8] sm:$0xff]  ;;  %v541_v31 = vld [vmem:[%s327_s8 + $0x8] sm:$0xff] }
  0x13   : > { %v370_v8 = vadd.f32 %v369_v4, %v368_v3  ;;  %v544_v32 = vmul.f32 %v540_v30, %v540_v30  ;;  %v545_v33 = vmul.f32 %v541_v31, %v541_v31  ;;  %v367_v38 = vld [vmem:[%s332_s11 + $0x8] sm:$0xff]  ;;  %v366_v39 = vld [vmem:[%s332_s11] sm:$0xff] }
  0x14   : > { %v350_v9 = vadd.f32 %v349_v7, %v348_v6  ;;  %469 = vmatprep.subr.mxu1 %v367_v38  ;;  %v715_v4 = vld [vmem:[%s340_s14] sm:$0x1] }
  0x15   : > { %371 = vadd.xlane.f32.xlu0 %v370_v8  ;;  %v546_v37 = vadd.f32 %v545_v33, %v544_v32  ;;  %470 = vmatpush1.msra.mxu1 %v366_v39 }
  0x19   : > { %351 = vadd.xlane.f32.xlu0 %v350_v9 }
  0xa2   : > { %v372_v10 = vpop.xlane.xlu0 %371 }
  0xa3   : > { %894 = vrsqrt.f32 %v372_v10  ;;  %vm375_vm0 = vcmp.eq.f32.partialorder %v372_v10, inf  ;;  %v378_v14 = vand.u32 2147483648, %v372_v10  ;;  %vm377_vm1 = vcmp.eq.f32.partialorder %v372_v10, 0.0 }
  0xa6   : > { %v352_v11 = vpop.xlane.xlu0 %351 }
  0xa7   : > { %896 = vrsqrt.f32 %v352_v11  ;;  %vm355_vm2 = vcmp.eq.f32.partialorder %v352_v11, inf  ;;  %v358_v20 = vand.u32 2147483648, %v352_v11  ;;  %vm357_vm3 = vcmp.eq.f32.partialorder %v352_v11, 0.0 }
  0xad   : > { %v895_v12 = vpop.eup %894 }
  0xae   : > { %v374_v13 = vmul.f32 %v895_v12, %v372_v10  ;;  %v542_v12 = vld [vmem:[%s337_s17] sm:$0xff] }
  0xb0   : > { %v376_v15 = vsel %vm375_vm0, %v372_v10, %v374_v13  ;;  %v727_v13 = vsub.f32 1.0, %v715_v4 }
  0xb1   : > { %v897_v16 = vpop.eup %896  ;;  %v379_v17 = vsel %vm377_vm1, %v378_v14, %v376_v15 }
  0xb2   : > { %v354_v18 = vmul.f32 %v897_v16, %v352_v11  ;;  %v380_v19 = vmax.f32 %v379_v17, 1e-12 }
  0xb4   : > { %v356_v21 = vsel %vm355_vm2, %v352_v11, %v354_v18  ;;  %898 = vrcp.f32 %v380_v19  ;;  %v543_v11 = vld [vmem:[%s337_s17 + $0x8] sm:$0xff] }
  0xb5   : > { %v359_v22 = vsel %vm357_vm3, %v358_v20, %v356_v21 }
  0xb6   : > { %v360_v23 = vmax.f32 %v359_v22, 1e-12 }
  0xb8   : > { %900 = vrcp.f32 %v360_v23 }
  0xbe   : > { %v899_v24 = vpop.eup %898 }
  0xbf   : > { %v383_v25 = vmul.f32 %v899_v24, %v365_v1  ;;  %v382_v26 = vmul.f32 %v899_v24, %v364_v0  ;;  %v717_v1 = vlaneseq }
  0xc1   : > { %384 = vmatprep.subr.mxu0 %v383_v25 }
  0xc2   : > { %v901_v27 = vpop.eup %900  ;;  %385 = vmatpush1.xpose.msra.mxu0 %v382_v26 }
  0xc3   : > { %v363_v28 = vmul.f32 %v901_v27, %v347_v5  ;;  %v362_v29 = vmul.f32 %v901_v27, %v346_v2  ;;  %v718_v2 = vshrl.u32 %v717_v1, 7  ;;  %644 = vmatprep.subr.mxu0 %v543_v11 }
  0xc5   : > { %448 = vmatprep.mubr.f32.mxu0 %v363_v28  ;;  %v719_v3 = vsub.s32 0, %v718_v2 }
  0xc6   : > { %449 = vmatmul.mubr.f32.vlgmr.msra.gmra.mrb[0].mxu0 %v362_v29 }
  0xc7   : > { %708 = vmatprep.mubr.f32.mxu0 %v922_v52  ;;  %v720_v5 = vrot.slane %v715_v4, %v719_v3  ;;  %645 = vmatpush1.msra.mxu0 %v542_v12  ;;  %v732_v14 = vrot.slane %v727_v13, %v719_v3 }
 0x199   : > { %v450_v34 = vpop.f32.mrb[0].mxu0 }
 0x19a   : > { %v452_v35 = vpop.f32.mrb[1].mxu0  ;;  %v455_v36 = vsel %vm454_vm4, %v450_v34, -inf }
 0x19b   : > { %456 = vmax.xlane.f32.xlu1 %v455_v36 }
 0x19f   : > { %547 = vadd.xlane.f32.xlu1 %v546_v37 }
 0x228   : > { %v457_v40 = vpop.xlane.xlu1 %456 }
 0x229   : > { %v458_v41 = vsub.f32 %v450_v34, %v457_v40 }
 0x22b   : > { %v459_v42 = vmul.f32 1.442695, %v458_v41 }
 0x22c   : > { %v548_v43 = vpop.xlane.xlu1 %547 }
 0x22d   : > { %902 = vpow2.f32 %v459_v42  ;;  %vm551_vm5 = vcmp.eq.f32.partialorder %v548_v43, inf  ;;  %v554_v47 = vand.u32 2147483648, %v548_v43  ;;  %vm553_vm6 = vcmp.eq.f32.partialorder %v548_v43, 0.0 }
 0x22e   : > { %904 = vrsqrt.f32 %v548_v43 }
 0x237   : > { %v903_v44 = vpop.eup %902 }
 0x238   : > { %v905_v45 = vpop.eup %904  ;;  %v461_v46 = vsel %vm454_vm4, %v903_v44, 0.0 }
 0x239   : > { %462 = vadd.xlane.f32.xlu0 %v461_v46  ;;  %v550_v48 = vmul.f32 %v905_v45, %v548_v43 }
 0x23b   : > { %v552_v49 = vsel %vm551_vm5, %v548_v43, %v550_v48 }
 0x23c   : > { %v555_v50 = vsel %vm553_vm6, %v554_v47, %v552_v49 }
 0x23d   : > { %v556_v51 = vmax.f32 %v555_v50, 1e-12 }
 0x23f   : > { %906 = vrcp.f32 %v556_v51 }
 0x249   : > { %v907_v53 = vpop.eup %906 }
 0x24a   : > { %v559_v54 = vmul.f32 %v907_v53, %v541_v31  ;;  %v558_v58 = vmul.f32 %v907_v53, %v540_v30 }
 0x24c   : > { %560 = vmatprep.subr.mxu1 %v559_v54 }
 0x2c6   : > { %v463_v55 = vpop.xlane.xlu0 %462 }
 0x2c7   : > { %908 = vrcp.f32 %v463_v55 }
 0x2d1   : > { %v909_v56 = vpop.eup %908 }
 0x2d2   : > { %v465_v57 = vmul.f32 %v909_v56, %v903_v44 }
 0x2d4   : > { %872 = vmatmul.mubr.msk.f32.vlgmr.msra.gmra.mrb[0].mxu1 %vm454_vm4, %v465_v57 }
 0x2d5   : > { %561 = vmatpush1.xpose.msra.mxu1 %v558_v58  ;;  %624 = vmatprep.mubr.f32.mxu1 %v363_v28 }
 0x2d8   : > { %625 = vmatmul.mubr.f32.vlgmr.msra.gmra.mrb[2].mxu1 %v362_v29 }
 0x3a7   : > { %v535_v60 = vpop.f32.mrb[0].mxu1 }
 0x3a8   : > { %v537_v61 = vpop.f32.mrb[1].mxu1 }
 0x3ab   : > { %v626_v62 = vpop.f32.mrb[2].mxu1 }
 0x3ac   : > { %v628_v63 = vpop.f32.mrb[3].mxu1  ;;  %v630_v0 = vsel %vm454_vm4, %v626_v62, -inf }
 0x3ad   : > { %631 = vmax.xlane.f32.xlu1 %v630_v0 }
 0x3be   : > { %722 = vperm.xlu1 %892, %v720_v5  }
 0x43a   : > { %v632_v6 = vpop.xlane.xlu1 %631 }
 0x43b   : > { %v633_v7 = vsub.f32 %v626_v62, %v632_v6 }
 0x43d   : > { %v634_v8 = vmul.f32 1.442695, %v633_v7 }
 0x43e   : > { %v723_v18 = vpop.permute.xlu1 %722 }
 0x43f   : > { %910 = vpow2.f32 %v634_v8  ;;  %v725_v21 = vmul.f32 %v723_v18, %v535_v60  ;;  %v726_v24 = vmul.f32 %v723_v18, %v537_v61 }
 0x449   : > { %v911_v9 = vpop.eup %910 }
 0x44a   : > { %v636_v10 = vsel %vm454_vm4, %v911_v9, 0.0 }
 0x44b   : > { %637 = vadd.xlane.f32.xlu0 %v636_v10 }
 0x461   : > { %734 = vperm.xlu0 %893, %v732_v14  }
 0x4d8   : > { %v638_v15 = vpop.xlane.xlu0 %637 }
 0x4d9   : > { %912 = vrcp.f32 %v638_v15 }
 0x4e0   : > { %v735_v19 = vpop.permute.xlu0 %734 }
 0x4e3   : > { %v913_v16 = vpop.eup %912 }
 0x4e4   : > { %v640_v17 = vmul.f32 %v913_v16, %v911_v9 }
 0x4e6   : > { %873 = vmatmul.mubr.msk.f32.vlgmr.msra.gmra.mrb[2].mxu0 %vm454_vm4, %v640_v17 }
 0x5b9   : > { %v710_v20 = vpop.f32.mrb[2].mxu0 }
 0x5ba   : > { %v737_v22 = vmul.f32 %v735_v19, %v710_v20  ;;  %v712_v23 = vpop.f32.mrb[3].mxu0 }
 0x5bb   : > { %v738_v25 = vmul.f32 %v735_v19, %v712_v23 }
 0x5bc   : > { %v739_v26 = vadd.f32 %v737_v22, %v725_v21 }
 0x5bd   : > { %v740_v27 = vadd.f32 %v738_v25, %v726_v24 }
 0x5be   : > { %741 = vst [vmem:[%s345_s20] sm:$0xff] %v739_v26 }
 0x5bf   : > { %742 = vst [vmem:[%s345_s20 + $0x8] sm:$0xff] %v740_v27 }
 0x5c0 PF: > { %s16_s21 = sadd.s32 1, %s920_s21  }
 0x5c1   : > { %p13_p4 = scmp.ge.s32.totalorder %s16_s21, 10  }
 0x5c3   :  { %15 = sbr.rel (!%p13_p4) target bundleno = 1 (0x1), region = 89 }

// kernel: structure_enhancement_forward.10
= control target key start
LH: loop header
LB: loop body
LE: loop exit
PB: predicated region body
PF: predicated region fallthrough
CT: control target
= control target key end

     0   :  { %s943_s15 = smov 0   ;;  %s1183_s0 = inlined_call_operand.vmem [shape: f32[512,32], index: 0, kind: input, shape index: {}]   ;;  %s1184_s1 = inlined_call_operand.vmem [shape: f32[32,32], index: 1, kind: input, shape index: {}]   ;;  %s1185_s2 = inlined_call_operand.vmem [shape: f32[1,32], index: 2, kind: input, shape index: {}]   ;;  %s1186_s3 = inlined_call_operand.vmem [shape: f32[512,32], index: 3, kind: input, shape index: {}]   ;;  %s1187_s4 = inlined_call_operand.vmem [shape: f32[512,32], index: 4, kind: output, shape index: {}]  }
   0x1 LB: > { %s752_s16 = sadd.s32 4294967295, %s916_s15   ;;  %p756_p0 = scmp.ge.s32.totalorder %s916_s15, 1  ;;  %s916_s15 = sphi %s943_s15, %s14_s15  }
   0x2   : > { %p174_p1 = scmp.lt.s32.totalorder %s916_s15, 3 }
   0x4   : > { %p175_p2 = pnand %p756_p0, %p174_p1 }
   0x5   : > { %v255_v0 = vld [vmem:[%s1184_s1] sm:$0xff] (!%p175_p2)  ;;  %v256_v1 = vld [vmem:[%s1184_s1 + $0x8] sm:$0xff] (!%p175_p2)  ;;  %v257_v2 = vld [vmem:[%s1184_s1 + $0x10] sm:$0xff] (!%p175_p2)  ;;  %s757_s23 = sshll.u32 (!%p175_p2), %s752_s16, 5  ;;  %vm266_vm0 = vcmask (!%p175_p2), 261120  }
   0x6   : > { %178 = sbr.rel (%p175_p2) target bundleno = 265 (0x109), region = 36  ;;  %v890_v3 = vpack.c.bf16 (!%p175_p2), %v256_v1, %v255_v0  ;;  %v258_v4 = vld [vmem:[%s1184_s1 + $0x18] sm:$0xff] (!%p175_p2)  ;;  %p206_p3 = scmp.lt.s32.totalorder (!%p175_p2), %s757_s23, 63  ;;  %v1044_v38 = vld [vmem:[%s1185_s2] ss:$0 sm:$0xff] (!%p175_p2) }
   0x7   : > { %v894_v5 = vpack.c.bf16 (!%p175_p2), %v258_v4, %v257_v2 }
   0x8   : > { %891 = vmatprep.subr.bf16.mxu0 (!%p175_p2), %v890_v3  ;;  %898 = vmatprep.subr.bf16.mxu1 (!%p175_p2), %v890_v3 }
   0x9   : > { %893 = vmatpush3.bf16.msra.mxu0 (!%p175_p2), %v890_v3  ;;  %900 = vmatpush3.bf16.msra.mxu1 (!%p175_p2), %v890_v3 }
   0xa   : > { %895 = vmatprep.subr.bf16.mxu0 (!%p175_p2), %v894_v5  ;;  %899 = vmatprep.subr.bf16.mxu1 (!%p175_p2), %v894_v5 }
   0xd   : > { %s1189_s23 = smov (!%p206_p3, %s757_s23), 63  ;;  %897 = vmatpush3.bf16.msra.mxu0 %v894_v5  ;;  %901 = vmatpush3.bf16.msra.mxu1 %v894_v5 }
   0xe   : > { %s963_s26 = sshll.u32 %s1189_s23, 3 }
   0xf   : > { %s969_s29 = scalar_lea.vmem %s1183_s0, %s963_s26  ;;  %s1039_s6 = scalar_lea.vmem %s1186_s3, %s963_s26 }
  0x10   : > { %v223_v6 = vld [vmem:[%s969_s29] sm:$0xff]  ;;  %v224_v8 = vld [vmem:[%s969_s29 + $0x8] sm:$0xff]  ;;  %v225_v10 = vld [vmem:[%s969_s29 + $0x10] sm:$0xff]  ;;  %s1056_s11 = scalar_lea.vmem %s1187_s4, %s963_s26 }
  0x11   : > { %v239_v7 = vld [vmem:[%s969_s29 + $0x80] sm:$0xff]  ;;  %v240_v9 = vld [vmem:[%s969_s29 + $0x88] sm:$0xff]  ;;  %842 = vmatprep.mubr.msk.f32.mxu0 %vm266_vm0, %v223_v6  ;;  %v241_v11 = vld [vmem:[%s969_s29 + $0x90] sm:$0xff] }
  0x12   : > { %866 = vmatprep.mubr.msk.f32.mxu1 %vm266_vm0, %v239_v7  ;;  %843 = vmatmul.mubr.msk.f32.vlgmr.msra.gmra.mrb[0].mxu0 %vm266_vm0, %v224_v8  ;;  %v226_v12 = vld [vmem:[%s969_s29 + $0x18] sm:$0xff]  ;;  %v227_v14 = vld [vmem:[%s969_s29 + $0x20] sm:$0xff]  ;;  %v228_v16 = vld [vmem:[%s969_s29 + $0x28] sm:$0xff] }
  0x13   : > { %867 = vmatmul.mubr.msk.f32.vlgmr.msra.gmra.mrb[0].mxu1 %vm266_vm0, %v240_v9  ;;  %845 = vmatprep.mubr.msk.f32.mxu0 %vm266_vm0, %v225_v10  ;;  %v242_v13 = vld [vmem:[%s969_s29 + $0x98] sm:$0xff]  ;;  %v243_v15 = vld [vmem:[%s969_s29 + $0xa0] sm:$0xff]  ;;  %v244_v17 = vld [vmem:[%s969_s29 + $0xa8] sm:$0xff] }
  0x14   : > { %869 = vmatprep.mubr.msk.f32.mxu1 %vm266_vm0, %v241_v11  ;;  %v229_v18 = vld [vmem:[%s969_s29 + $0x30] sm:$0xff]  ;;  %v230_v20 = vld [vmem:[%s969_s29 + $0x38] sm:$0xff]  ;;  %v231_v22 = vld [vmem:[%s969_s29 + $0x40] sm:$0xff] }
  0x15   : > { %v245_v19 = vld [vmem:[%s969_s29 + $0xb0] sm:$0xff]  ;;  %v246_v21 = vld [vmem:[%s969_s29 + $0xb8] sm:$0xff]  ;;  %v247_v23 = vld [vmem:[%s969_s29 + $0xc0] sm:$0xff] }
  0x16   : > { %846 = vmatmul.mubr.msk.f32.gmra.mrb[2].mxu0 %vm266_vm0, %v226_v12  ;;  %v232_v24 = vld [vmem:[%s969_s29 + $0x48] sm:$0xff]  ;;  %v233_v26 = vld [vmem:[%s969_s29 + $0x50] sm:$0xff]  ;;  %v234_v28 = vld [vmem:[%s969_s29 + $0x58] sm:$0xff] }
  0x17   : > { %870 = vmatmul.mubr.msk.f32.gmra.mrb[2].mxu1 %vm266_vm0, %v242_v13  ;;  %848 = vmatprep.mubr.msk.f32.mxu0 %vm266_vm0, %v227_v14  ;;  %v248_v25 = vld [vmem:[%s969_s29 + $0xc8] sm:$0xff]  ;;  %v249_v27 = vld [vmem:[%s969_s29 + $0xd0] sm:$0xff]  ;;  %v250_v29 = vld [vmem:[%s969_s29 + $0xd8] sm:$0xff] }
  0x18   : > { %872 = vmatprep.mubr.msk.f32.mxu1 %vm266_vm0, %v243_v15  ;;  %v235_v30 = vld [vmem:[%s969_s29 + $0x60] sm:$0xff]  ;;  %v236_v32 = vld [vmem:[%s969_s29 + $0x68] sm:$0xff]  ;;  %v237_v34 = vld [vmem:[%s969_s29 + $0x70] sm:$0xff] }
  0x19   : > { %v251_v31 = vld [vmem:[%s969_s29 + $0xe0] sm:$0xff]  ;;  %v252_v33 = vld [vmem:[%s969_s29 + $0xe8] sm:$0xff]  ;;  %v253_v35 = vld [vmem:[%s969_s29 + $0xf0] sm:$0xff] }
  0x1a   : > { %849 = vmatmul.mubr.msk.f32.gmra.mrb[4].mxu0 %vm266_vm0, %v228_v16  ;;  %v238_v36 = vld [vmem:[%s969_s29 + $0x78] sm:$0xff]  ;;  %v589_v40 = vld [vmem:[%s1039_s6 + $0x8] sm:$0xff]  ;;  %v588_v46 = vld [vmem:[%s1039_s6] sm:$0xff] }
  0x1b   : > { %873 = vmatmul.mubr.msk.f32.gmra.mrb[4].mxu1 %vm266_vm0, %v244_v17  ;;  %851 = vmatprep.mubr.msk.f32.mxu0 %vm266_vm0, %v229_v18  ;;  %v254_v37 = vld [vmem:[%s969_s29 + $0xf8] sm:$0xff]  ;;  %v605_v42 = vld [vmem:[%s1039_s6 + $0x88] sm:$0xff]  ;;  %v604_v48 = vld [vmem:[%s1039_s6 + $0x80] sm:$0xff] }
  0x1c   : > { %875 = vmatprep.mubr.msk.f32.mxu1 %vm266_vm0, %v245_v19  ;;  %v591_v56 = vld [vmem:[%s1039_s6 + $0x18] sm:$0xff]  ;;  %v590_v62 = vld [vmem:[%s1039_s6 + $0x10] sm:$0xff]  ;;  %v593_v8 = vld [vmem:[%s1039_s6 + $0x28] sm:$0xff] }
  0x1d   : > { %v607_v58 = vld [vmem:[%s1039_s6 + $0x98] sm:$0xff]  ;;  %v606_v0 = vld [vmem:[%s1039_s6 + $0x90] sm:$0xff]  ;;  %v609_v10 = vld [vmem:[%s1039_s6 + $0xa8] sm:$0xff] }
  0x1e   : > { %852 = vmatmul.mubr.msk.f32.gmra.mrb[6].mxu0 %vm266_vm0, %v230_v20  ;;  %v592_v14 = vld [vmem:[%s1039_s6 + $0x20] sm:$0xff] }
  0x1f   : > { %876 = vmatmul.mubr.msk.f32.gmra.mrb[6].mxu1 %vm266_vm0, %v246_v21  ;;  %854 = vmatprep.mubr.msk.f32.mxu0 %vm266_vm0, %v231_v22  ;;  %v608_v16 = vld [vmem:[%s1039_s6 + $0xa0] sm:$0xff] }
  0x20   : > { %878 = vmatprep.mubr.msk.f32.mxu1 %vm266_vm0, %v247_v23 }
  0x22   : > { %855 = vmatmul.mubr.msk.f32.gmra.mrb[8].mxu0 %vm266_vm0, %v232_v24  ;;  %v595_v24 = vld [vmem:[%s1039_s6 + $0x38] sm:$0xff] }
  0x23   : > { %879 = vmatmul.mubr.msk.f32.gmra.mrb[8].mxu1 %vm266_vm0, %v248_v25  ;;  %857 = vmatprep.mubr.msk.f32.mxu0 %vm266_vm0, %v233_v26  ;;  %v611_v26 = vld [vmem:[%s1039_s6 + $0xb8] sm:$0xff] }
  0x24   : > { %881 = vmatprep.mubr.msk.f32.mxu1 %vm266_vm0, %v249_v27 }
  0x26   : > { %858 = vmatmul.mubr.msk.f32.gmra.mrb[10].mxu0 %vm266_vm0, %v234_v28 }
  0x27   : > { %882 = vmatmul.mubr.msk.f32.gmra.mrb[10].mxu1 %vm266_vm0, %v250_v29  ;;  %860 = vmatprep.mubr.msk.f32.mxu0 %vm266_vm0, %v235_v30  ;;  %v594_v30 = vld [vmem:[%s1039_s6 + $0x30] sm:$0xff] }
  0x28   : > { %884 = vmatprep.mubr.msk.f32.mxu1 %vm266_vm0, %v251_v31 }
  0x2a   : > { %861 = vmatmul.mubr.msk.f32.gmra.mrb[12].mxu0 %vm266_vm0, %v236_v32  ;;  %v610_v32 = vld [vmem:[%s1039_s6 + $0xb0] sm:$0xff] }
  0x2b   : > { %885 = vmatmul.mubr.msk.f32.gmra.mrb[12].mxu1 %vm266_vm0, %v252_v33  ;;  %863 = vmatprep.mubr.msk.f32.mxu0 %vm266_vm0, %v237_v34 }
  0x2c   : > { %887 = vmatprep.mubr.msk.f32.mxu1 %vm266_vm0, %v253_v35 }
  0x2e   : > { %864 = vmatmul.mubr.msk.f32.gmra.mrb[14].mxu0 %vm266_vm0, %v238_v36 }
  0x2f   : > { %888 = vmatmul.mubr.msk.f32.gmra.mrb[14].mxu1 %vm266_vm0, %v254_v37 }
  0xe5   : > { %v844_v39 = vpop.f32.mrb[0].mxu0 }
  0xe6   : > { %v868_v41 = vpop.f32.mrb[0].mxu1  ;;  %v435_v43 = vadd.f32 %v844_v39, %v1044_v38  ;;  %v429_v45 = vpop.f32.mrb[1].mxu0 }
  0xe7   : > { %v515_v44 = vadd.f32 %v868_v41, %v1044_v38  ;;  %v509_v47 = vpop.f32.mrb[1].mxu1  ;;  %v430_v49 = vadd.f32 %v1044_v38, %v429_v45  ;;  %v597_v41 = vld [vmem:[%s1039_s6 + $0x48] sm:$0xff] }
  0xe8   : > { %v510_v50 = vadd.f32 %v1044_v38, %v509_v47  ;;  %v621_v51 = vadd.f32 %v589_v40, %v435_v43  ;;  %v613_v43 = vld [vmem:[%s1039_s6 + $0xc8] sm:$0xff]  ;;  %v596_v47 = vld [vmem:[%s1039_s6 + $0x40] sm:$0xff] }
  0xe9   : > { %v637_v52 = vadd.f32 %v605_v42, %v515_v44  ;;  %v620_v53 = vadd.f32 %v588_v46, %v430_v49  ;;  %v847_v55 = vpop.f32.mrb[2].mxu0  ;;  %v612_v49 = vld [vmem:[%s1039_s6 + $0xc0] sm:$0xff] }
  0xea   : > { %v636_v54 = vadd.f32 %v604_v48, %v510_v50  ;;  %v871_v57 = vpop.f32.mrb[2].mxu1  ;;  %653 = vst.msk [vmem:[%s1056_s11 + $0x8] sm:$0xff] %vm266_vm0, %v621_v51  ;;  %v445_v59 = vadd.f32 %v847_v55, %v1044_v38  ;;  %v439_v61 = vpop.f32.mrb[3].mxu0 }
  0xeb   : > { %669 = vst.msk [vmem:[%s1056_s11 + $0x88] sm:$0xff] %vm266_vm0, %v637_v52  ;;  %v525_v60 = vadd.f32 %v871_v57, %v1044_v38  ;;  %v519_v63 = vpop.f32.mrb[3].mxu1  ;;  %652 = vst.msk [vmem:[%s1056_s11] sm:$0xff] %vm266_vm0, %v620_v53  ;;  %v440_v1 = vadd.f32 %v1044_v38, %v439_v61  ;;  %v599_v57 = vld [vmem:[%s1039_s6 + $0x58] sm:$0xff] }
  0xec   : > { %668 = vst.msk [vmem:[%s1056_s11 + $0x80] sm:$0xff] %vm266_vm0, %v636_v54  ;;  %v520_v2 = vadd.f32 %v1044_v38, %v519_v63  ;;  %v623_v3 = vadd.f32 %v591_v56, %v445_v59  ;;  %v615_v59 = vld [vmem:[%s1039_s6 + $0xd8] sm:$0xff]  ;;  %v598_v63 = vld [vmem:[%s1039_s6 + $0x50] sm:$0xff] }
  0xed   : > { %v639_v4 = vadd.f32 %v607_v58, %v525_v60  ;;  %v622_v5 = vadd.f32 %v590_v62, %v440_v1  ;;  %v850_v7 = vpop.f32.mrb[4].mxu0  ;;  %v614_v1 = vld [vmem:[%s1039_s6 + $0xd0] sm:$0xff] }
  0xee   : > { %v638_v6 = vadd.f32 %v606_v0, %v520_v2  ;;  %v874_v9 = vpop.f32.mrb[4].mxu1  ;;  %655 = vst.msk [vmem:[%s1056_s11 + $0x18] sm:$0xff] %vm266_vm0, %v623_v3  ;;  %v455_v11 = vadd.f32 %v850_v7, %v1044_v38  ;;  %v449_v13 = vpop.f32.mrb[5].mxu0 }
  0xef   : > { %671 = vst.msk [vmem:[%s1056_s11 + $0x98] sm:$0xff] %vm266_vm0, %v639_v4  ;;  %v535_v12 = vadd.f32 %v874_v9, %v1044_v38  ;;  %v529_v15 = vpop.f32.mrb[5].mxu1  ;;  %654 = vst.msk [vmem:[%s1056_s11 + $0x10] sm:$0xff] %vm266_vm0, %v622_v5  ;;  %v450_v17 = vadd.f32 %v1044_v38, %v449_v13  ;;  %v601_v9 = vld [vmem:[%s1039_s6 + $0x68] sm:$0xff] }
  0xf0   : > { %670 = vst.msk [vmem:[%s1056_s11 + $0x90] sm:$0xff] %vm266_vm0, %v638_v6  ;;  %v530_v18 = vadd.f32 %v1044_v38, %v529_v15  ;;  %v625_v19 = vadd.f32 %v593_v8, %v455_v11  ;;  %v617_v11 = vld [vmem:[%s1039_s6 + $0xe8] sm:$0xff]  ;;  %v600_v15 = vld [vmem:[%s1039_s6 + $0x60] sm:$0xff] }
  0xf1   : > { %v641_v20 = vadd.f32 %v609_v10, %v535_v12  ;;  %v624_v21 = vadd.f32 %v592_v14, %v450_v17  ;;  %v853_v23 = vpop.f32.mrb[6].mxu0  ;;  %v616_v17 = vld [vmem:[%s1039_s6 + $0xe0] sm:$0xff] }
  0xf2   : > { %v640_v22 = vadd.f32 %v608_v16, %v530_v18  ;;  %v877_v25 = vpop.f32.mrb[6].mxu1  ;;  %657 = vst.msk [vmem:[%s1056_s11 + $0x28] sm:$0xff] %vm266_vm0, %v625_v19  ;;  %v465_v27 = vadd.f32 %v853_v23, %v1044_v38  ;;  %v459_v29 = vpop.f32.mrb[7].mxu0 }
  0xf3   : > { %673 = vst.msk [vmem:[%s1056_s11 + $0xa8] sm:$0xff] %vm266_vm0, %v641_v20  ;;  %v545_v28 = vadd.f32 %v877_v25, %v1044_v38  ;;  %v539_v31 = vpop.f32.mrb[7].mxu1  ;;  %656 = vst.msk [vmem:[%s1056_s11 + $0x20] sm:$0xff] %vm266_vm0, %v624_v21  ;;  %v460_v33 = vadd.f32 %v1044_v38, %v459_v29  ;;  %v603_v25 = vld [vmem:[%s1039_s6 + $0x78] sm:$0xff] }
  0xf4   : > { %672 = vst.msk [vmem:[%s1056_s11 + $0xa0] sm:$0xff] %vm266_vm0, %v640_v22  ;;  %v540_v34 = vadd.f32 %v1044_v38, %v539_v31  ;;  %v627_v35 = vadd.f32 %v595_v24, %v465_v27  ;;  %v619_v27 = vld [vmem:[%s1039_s6 + $0xf8] sm:$0xff]  ;;  %v602_v31 = vld [vmem:[%s1039_s6 + $0x70] sm:$0xff] }
  0xf5   : > { %v643_v36 = vadd.f32 %v611_v26, %v545_v28  ;;  %v626_v37 = vadd.f32 %v594_v30, %v460_v33  ;;  %v856_v40 = vpop.f32.mrb[8].mxu0  ;;  %v618_v33 = vld [vmem:[%s1039_s6 + $0xf0] sm:$0xff] }
  0xf6   : > { %v642_v39 = vadd.f32 %v610_v32, %v540_v34  ;;  %v880_v42 = vpop.f32.mrb[8].mxu1  ;;  %659 = vst.msk [vmem:[%s1056_s11 + $0x38] sm:$0xff] %vm266_vm0, %v627_v35  ;;  %v475_v44 = vadd.f32 %v856_v40, %v1044_v38  ;;  %v469_v46 = vpop.f32.mrb[9].mxu0 }
  0xf7   : > { %675 = vst.msk [vmem:[%s1056_s11 + $0xb8] sm:$0xff] %vm266_vm0, %v643_v36  ;;  %v555_v45 = vadd.f32 %v880_v42, %v1044_v38  ;;  %v549_v48 = vpop.f32.mrb[9].mxu1  ;;  %658 = vst.msk [vmem:[%s1056_s11 + $0x30] sm:$0xff] %vm266_vm0, %v626_v37  ;;  %v470_v50 = vadd.f32 %v1044_v38, %v469_v46 }
  0xf8   : > { %674 = vst.msk [vmem:[%s1056_s11 + $0xb0] sm:$0xff] %vm266_vm0, %v642_v39  ;;  %v550_v51 = vadd.f32 %v1044_v38, %v549_v48  ;;  %v629_v52 = vadd.f32 %v597_v41, %v475_v44 }
  0xf9   : > { %v645_v53 = vadd.f32 %v613_v43, %v555_v45  ;;  %v628_v54 = vadd.f32 %v596_v47, %v470_v50  ;;  %v859_v56 = vpop.f32.mrb[10].mxu0 }
  0xfa   : > { %v644_v55 = vadd.f32 %v612_v49, %v550_v51  ;;  %v883_v58 = vpop.f32.mrb[10].mxu1  ;;  %661 = vst.msk [vmem:[%s1056_s11 + $0x48] sm:$0xff] %vm266_vm0, %v629_v52  ;;  %v485_v60 = vadd.f32 %v859_v56, %v1044_v38  ;;  %v479_v62 = vpop.f32.mrb[11].mxu0 }
  0xfb   : > { %677 = vst.msk [vmem:[%s1056_s11 + $0xc8] sm:$0xff] %vm266_vm0, %v645_v53  ;;  %v565_v61 = vadd.f32 %v883_v58, %v1044_v38  ;;  %v559_v0 = vpop.f32.mrb[11].mxu1  ;;  %660 = vst.msk [vmem:[%s1056_s11 + $0x40] sm:$0xff] %vm266_vm0, %v628_v54  ;;  %v480_v2 = vadd.f32 %v1044_v38, %v479_v62 }
  0xfc   : > { %676 = vst.msk [vmem:[%s1056_s11 + $0xc0] sm:$0xff] %vm266_vm0, %v644_v55  ;;  %v560_v3 = vadd.f32 %v1044_v38, %v559_v0  ;;  %v631_v4 = vadd.f32 %v599_v57, %v485_v60 }
  0xfd   : > { %v647_v5 = vadd.f32 %v615_v59, %v565_v61  ;;  %v630_v6 = vadd.f32 %v598_v63, %v480_v2  ;;  %v862_v8 = vpop.f32.mrb[12].mxu0 }
  0xfe   : > { %v646_v7 = vadd.f32 %v614_v1, %v560_v3  ;;  %v886_v10 = vpop.f32.mrb[12].mxu1  ;;  %663 = vst.msk [vmem:[%s1056_s11 + $0x58] sm:$0xff] %vm266_vm0, %v631_v4  ;;  %v495_v12 = vadd.f32 %v862_v8, %v1044_v38  ;;  %v489_v14 = vpop.f32.mrb[13].mxu0 }
  0xff   : > { %679 = vst.msk [vmem:[%s1056_s11 + $0xd8] sm:$0xff] %vm266_vm0, %v647_v5  ;;  %v575_v13 = vadd.f32 %v886_v10, %v1044_v38  ;;  %v569_v16 = vpop.f32.mrb[13].mxu1  ;;  %662 = vst.msk [vmem:[%s1056_s11 + $0x50] sm:$0xff] %vm266_vm0, %v630_v6  ;;  %v490_v18 = vadd.f32 %v1044_v38, %v489_v14 }
 0x100   : > { %678 = vst.msk [vmem:[%s1056_s11 + $0xd0] sm:$0xff] %vm266_vm0, %v646_v7  ;;  %v570_v19 = vadd.f32 %v1044_v38, %v569_v16  ;;  %v633_v20 = vadd.f32 %v601_v9, %v495_v12 }
 0x101   : > { %v649_v21 = vadd.f32 %v617_v11, %v575_v13  ;;  %v632_v22 = vadd.f32 %v600_v15, %v490_v18  ;;  %v865_v24 = vpop.f32.mrb[14].mxu0 }
 0x102   : > { %v648_v23 = vadd.f32 %v616_v17, %v570_v19  ;;  %v889_v26 = vpop.f32.mrb[14].mxu1  ;;  %665 = vst.msk [vmem:[%s1056_s11 + $0x68] sm:$0xff] %vm266_vm0, %v633_v20  ;;  %v505_v28 = vadd.f32 %v865_v24, %v1044_v38  ;;  %v499_v30 = vpop.f32.mrb[15].mxu0 }
 0x103   : > { %681 = vst.msk [vmem:[%s1056_s11 + $0xe8] sm:$0xff] %vm266_vm0, %v649_v21  ;;  %v585_v29 = vadd.f32 %v889_v26, %v1044_v38  ;;  %v579_v32 = vpop.f32.mrb[15].mxu1  ;;  %664 = vst.msk [vmem:[%s1056_s11 + $0x60] sm:$0xff] %vm266_vm0, %v632_v22  ;;  %v500_v34 = vadd.f32 %v1044_v38, %v499_v30 }
 0x104   : > { %680 = vst.msk [vmem:[%s1056_s11 + $0xe0] sm:$0xff] %vm266_vm0, %v648_v23  ;;  %v580_v35 = vadd.f32 %v1044_v38, %v579_v32  ;;  %v635_v36 = vadd.f32 %v603_v25, %v505_v28 }
 0x105   : > { %v651_v37 = vadd.f32 %v619_v27, %v585_v29  ;;  %v634_v39 = vadd.f32 %v602_v31, %v500_v34 }
 0x106   : > { %v650_v40 = vadd.f32 %v618_v33, %v580_v35  ;;  %667 = vst.msk [vmem:[%s1056_s11 + $0x78] sm:$0xff] %vm266_vm0, %v635_v36 }
 0x107   : > { %683 = vst.msk [vmem:[%s1056_s11 + $0xf8] sm:$0xff] %vm266_vm0, %v651_v37  ;;  %666 = vst.msk [vmem:[%s1056_s11 + $0x70] sm:$0xff] %vm266_vm0, %v634_v39 }
 0x108   : > { %682 = vst.msk [vmem:[%s1056_s11 + $0xf0] sm:$0xff] %vm266_vm0, %v650_v40 }
 0x109 PF: > { %s14_s15 = sadd.s32 1, %s916_s15  }
 0x10a   : > { %p11_p4 = scmp.ge.s32.totalorder %s14_s15, 4  }
 0x10c   :  { %13 = sbr.rel (!%p11_p4) target bundleno = 1 (0x1), region = 69 }

// kernel: structure_enhancement_forward.13
= control target key start
LH: loop header
LB: loop body
LE: loop exit
PB: predicated region body
PF: predicated region fallthrough
CT: control target
= control target key end

     0   :  { %8 = vsyncpa [#allocation3], 0  ;;  %s1278_s0 = inlined_call_operand.vmem [shape: f32[512,32], index: 0, kind: input, shape index: {}]   ;;  %s1279_s1 = inlined_call_operand.vmem [shape: f32[32,32], index: 1, kind: input, shape index: {}]   ;;  %s1280_s2 = inlined_call_operand.vmem [shape: f32[512,32], index: 2, kind: input, shape index: {}]   ;;  %s1281_s3 = inlined_call_operand.hbm [shape: f32[512,32], index: 3, kind: output, shape index: {}]  }
   0x1   :  { %10 = vsyncpa [#allocation3 + $0x1], 0  ;;  %s983_s12 = smov 0   ;;  %s985_s13 = smov 0  }
   0x2   :  { %s987_s14 = smov 0   ;;  %s989_s15 = smov 0  }
   0x3 LB: > { %s1004_s16 = sadd.s32 4294967295, %s958_s15   ;;  %s704_s17 = sadd.s32 4294967294, %s958_s15   ;;  %s958_s15 = sphi %s989_s15, %s1287_s15   ;;  %s954_s14 = sphi %s987_s14, %s1286_s14   ;;  %s950_s13 = sphi %s985_s13, %s1285_s13   ;;  %s946_s12 = sphi %s983_s12, %s1284_s12  }
   0x4   : > { %s1008_s18 = sadd.s32 1, %s958_s15   ;;  %s96_s19 = sadd.s32 1, %s954_s14 }
   0x5   : > { %s93_s20 = ssub.s32 %s958_s15, %s1008_s18  ;;  %p106_p0 = scmp.ne.s32.totalorder %s954_s14, %s950_s13 }
   0x6   : > { %p94_p1 = scmp.eq.s32.totalorder %s93_s20, 0  ;;  %p107_p2 = scmp.eq.s32.totalorder %s1004_s16, 1 }
   0x7   : > { %p112_p3 = scmp.ne.s32.totalorder %s950_s13, %s946_s12  ;;  %p113_p4 = scmp.eq.s32.totalorder %s704_s17, 1 }
   0x8   : > { %s1019_s21 = scalar_select %p94_p1, %s954_s14, %s96_s19  }
   0x9   : > { %p1021_p5 = por %p107_p2, %p106_p0  ;;  %p1025_p6 = por %p113_p4, %p112_p3 }
   0xa   : > { %p707_p7 = scmp.ge.s32.totalorder %s958_s15, 1  ;;  %p152_p8 = scmp.lt.s32.totalorder %s958_s15, 3 }
   0xc   : > { %p153_p9 = pnand %p707_p7, %p152_p8 }
   0xd   : > { %v226_v0 = vld [vmem:[%s1279_s1] sm:$0xff] (!%p153_p9)  ;;  %v227_v1 = vld [vmem:[%s1279_s1 + $0x8] sm:$0xff] (!%p153_p9)  ;;  %v228_v2 = vld [vmem:[%s1279_s1 + $0x10] sm:$0xff] (!%p153_p9)  ;;  %s709_s30 = sshll.u32 (!%p153_p9), %s1004_s16, 5  ;;  %vm262_vm0 = vcmask (!%p153_p9), 261120   ;;  %s178_s10 = sand.u32 (!%p153_p9), 1, %s950_s13  }
   0xe   : > { %156 = sbr.rel (%p153_p9) target bundleno = 285 (0x11d), region = 32  ;;  %v843_v3 = vpack.c.bf16 (!%p153_p9), %v227_v1, %v226_v0  ;;  %v229_v4 = vld [vmem:[%s1279_s1 + $0x18] sm:$0xff] (!%p153_p9)  ;;  %p182_p10 = scmp.lt.s32.totalorder (!%p153_p9), %s709_s30, 63 }
   0xf   : > { %v847_v5 = vpack.c.bf16 (!%p153_p9), %v229_v4, %v228_v2  ;;  %s708_s20 = sshll.u32 (!%p153_p9), %s178_s10, 8  ;;  %s750_s25 = sshll.u32 (!%p153_p9), %s1004_s16, 12 }
  0x10   : > { %844 = vmatprep.subr.bf16.mxu0 (!%p153_p9), %v843_v3  ;;  %851 = vmatprep.subr.bf16.mxu1 (!%p153_p9), %v843_v3  ;;  %s1134_s24 = scalar_lea.vmem (!%p153_p9), [#allocation2], %s708_s20  ;;  %s1223_s28 = scalar_lea.hbm (!%p153_p9), %s1281_s3, %s750_s25 }
  0x11   : > { %846 = vmatpush3.bf16.msra.mxu0 (!%p153_p9), %v843_v3  ;;  %853 = vmatpush3.bf16.msra.mxu1 (!%p153_p9), %v843_v3  ;;  %s630_s26 = sshll.u32 (!%p153_p9), %s1134_s24, 4  ;;  %s1237_s29 = scalar_lea.sflag (!%p153_p9), [#allocation3], %s178_s10  ;;  %s1225_s26 = int_to_ptr.vmem [resolvable:$true] %s630_s26 }
  0x12   : > { %848 = vmatprep.subr.bf16.mxu0 (!%p153_p9), %v847_v5  ;;  %852 = vmatprep.subr.bf16.mxu1 (!%p153_p9), %v847_v5  ;;  %s960_s4 = smov (!%p153_p9), [#allocation2]  }
  0x13   : > { %s900_s5 = sshll.u32 (!%p153_p9), %s960_s4, 4  ;;  %s901_s5 = int_to_ptr.vmem [resolvable:$false] %s900_s5 }
  0x14   : > { %p903_p0 = scmp.lt.s32.totalorder (!%p153_p9), %s1225_s26, %s901_s5 }
  0x15   : > { %s1289_s30 = smov (!%p182_p10, %s709_s30), 63  ;;  %850 = vmatpush3.bf16.msra.mxu0 %v847_v5  ;;  %854 = vmatpush3.bf16.msra.mxu1 %v847_v5 }
  0x16   : > { %s710_s6 = sshll.u32 %s1289_s30, 3  ;;  %s896_s30 = scalar_lea.vmem %s1225_s26, 4096 }
  0x17   : > { %s1052_s9 = scalar_lea.vmem %s1278_s0, %s710_s6  ;;  %s1124_s19 = scalar_lea.vmem %s1280_s2, %s710_s6 }
  0x18   : > { %v194_v6 = vld [vmem:[%s1052_s9] sm:$0xff]  ;;  %v195_v8 = vld [vmem:[%s1052_s9 + $0x8] sm:$0xff]  ;;  %v196_v10 = vld [vmem:[%s1052_s9 + $0x10] sm:$0xff]  ;;  %p897_p11 = scmp.ne.s32.totalorder %s1225_s26, %s896_s30  ;;  %s902_s6 = scalar_lea.vmem %s901_s5, 8192 }
  0x19   : > { %v210_v7 = vld [vmem:[%s1052_s9 + $0x80] sm:$0xff]  ;;  %v211_v9 = vld [vmem:[%s1052_s9 + $0x88] sm:$0xff]  ;;  %795 = vmatprep.mubr.msk.f32.mxu0 %vm262_vm0, %v194_v6  ;;  %v212_v11 = vld [vmem:[%s1052_s9 + $0x90] sm:$0xff]  ;;  %p904_p1 = scmp.lt.s32.totalorder %s902_s6, %s896_s30 }
  0x1a   : > { %819 = vmatprep.mubr.msk.f32.mxu1 %vm262_vm0, %v210_v7  ;;  %796 = vmatmul.mubr.msk.f32.vlgmr.msra.gmra.mrb[0].mxu0 %vm262_vm0, %v195_v8  ;;  %v197_v12 = vld [vmem:[%s1052_s9 + $0x18] sm:$0xff]  ;;  %v198_v14 = vld [vmem:[%s1052_s9 + $0x20] sm:$0xff]  ;;  %v199_v16 = vld [vmem:[%s1052_s9 + $0x28] sm:$0xff]  ;;  %p898_p12 = pnand %p897_p11, %p1021_p5 }
  0x1b   : > { %820 = vmatmul.mubr.msk.f32.vlgmr.msra.gmra.mrb[0].mxu1 %vm262_vm0, %v211_v9  ;;  %798 = vmatprep.mubr.msk.f32.mxu0 %vm262_vm0, %v196_v10  ;;  %v213_v13 = vld [vmem:[%s1052_s9 + $0x98] sm:$0xff]  ;;  %v214_v15 = vld [vmem:[%s1052_s9 + $0xa0] sm:$0xff]  ;;  %v215_v17 = vld [vmem:[%s1052_s9 + $0xa8] sm:$0xff]  ;;  %p905_p2 = por %p904_p1, %p903_p0 }
  0x1c   : > { %822 = vmatprep.mubr.msk.f32.mxu1 %vm262_vm0, %v212_v11  ;;  %v200_v18 = vld [vmem:[%s1052_s9 + $0x30] sm:$0xff]  ;;  %v201_v20 = vld [vmem:[%s1052_s9 + $0x38] sm:$0xff]  ;;  %v202_v22 = vld [vmem:[%s1052_s9 + $0x40] sm:$0xff]  ;;  %p899_p13 = pneg %p898_p12 }
  0x1d   : > { %v216_v19 = vld [vmem:[%s1052_s9 + $0xb0] sm:$0xff]  ;;  %v217_v21 = vld [vmem:[%s1052_s9 + $0xb8] sm:$0xff]  ;;  %v218_v23 = vld [vmem:[%s1052_s9 + $0xc0] sm:$0xff] }
  0x1e   : > { %799 = vmatmul.mubr.msk.f32.gmra.mrb[2].mxu0 %vm262_vm0, %v197_v12  ;;  %v203_v24 = vld [vmem:[%s1052_s9 + $0x48] sm:$0xff]  ;;  %v204_v26 = vld [vmem:[%s1052_s9 + $0x50] sm:$0xff]  ;;  %v205_v28 = vld [vmem:[%s1052_s9 + $0x58] sm:$0xff]  ;;  %p906_p3 = pnand %p905_p2, %p899_p13 }
  0x1f   : > { %823 = vmatmul.mubr.msk.f32.gmra.mrb[2].mxu1 %vm262_vm0, %v213_v13  ;;  %801 = vmatprep.mubr.msk.f32.mxu0 %vm262_vm0, %v198_v14  ;;  %v219_v25 = vld [vmem:[%s1052_s9 + $0xc8] sm:$0xff]  ;;  %v220_v27 = vld [vmem:[%s1052_s9 + $0xd0] sm:$0xff]  ;;  %v221_v29 = vld [vmem:[%s1052_s9 + $0xd8] sm:$0xff] }
  0x20   : > { %825 = vmatprep.mubr.msk.f32.mxu1 %vm262_vm0, %v214_v15  ;;  %v206_v30 = vld [vmem:[%s1052_s9 + $0x60] sm:$0xff]  ;;  %v207_v32 = vld [vmem:[%s1052_s9 + $0x68] sm:$0xff]  ;;  %v208_v34 = vld [vmem:[%s1052_s9 + $0x70] sm:$0xff] }
  0x21   : > { %v222_v31 = vld [vmem:[%s1052_s9 + $0xe0] sm:$0xff]  ;;  %v223_v33 = vld [vmem:[%s1052_s9 + $0xe8] sm:$0xff]  ;;  %v224_v35 = vld [vmem:[%s1052_s9 + $0xf0] sm:$0xff] }
  0x22   : > { %802 = vmatmul.mubr.msk.f32.gmra.mrb[4].mxu0 %vm262_vm0, %v199_v16  ;;  %v209_v36 = vld [vmem:[%s1052_s9 + $0x78] sm:$0xff]  ;;  %v231_v38 = vld [vmem:[%s1124_s19 + $0x8] sm:$0xff]  ;;  %v230_v40 = vld [vmem:[%s1124_s19] sm:$0xff] }
  0x23   : > { %826 = vmatmul.mubr.msk.f32.gmra.mrb[4].mxu1 %vm262_vm0, %v215_v17  ;;  %804 = vmatprep.mubr.msk.f32.mxu0 %vm262_vm0, %v200_v18  ;;  %v225_v37 = vld [vmem:[%s1052_s9 + $0xf8] sm:$0xff]  ;;  %v247_v39 = vld [vmem:[%s1124_s19 + $0x88] sm:$0xff]  ;;  %v246_v41 = vld [vmem:[%s1124_s19 + $0x80] sm:$0xff] }
  0x24   : > { %828 = vmatprep.mubr.msk.f32.mxu1 %vm262_vm0, %v216_v19  ;;  %v233_v50 = vld [vmem:[%s1124_s19 + $0x18] sm:$0xff]  ;;  %v232_v52 = vld [vmem:[%s1124_s19 + $0x10] sm:$0xff]  ;;  %v235_v62 = vld [vmem:[%s1124_s19 + $0x28] sm:$0xff] }
  0x25   : > { %v249_v51 = vld [vmem:[%s1124_s19 + $0x98] sm:$0xff]  ;;  %v248_v53 = vld [vmem:[%s1124_s19 + $0x90] sm:$0xff]  ;;  %v251_v63 = vld [vmem:[%s1124_s19 + $0xa8] sm:$0xff] }
  0x26   : > { %805 = vmatmul.mubr.msk.f32.gmra.mrb[6].mxu0 %vm262_vm0, %v201_v20  ;;  %v234_v0 = vld [vmem:[%s1124_s19 + $0x20] sm:$0xff]  ;;  %v237_v10 = vld [vmem:[%s1124_s19 + $0x38] sm:$0xff]  ;;  %v236_v12 = vld [vmem:[%s1124_s19 + $0x30] sm:$0xff] }
  0x27   : > { %829 = vmatmul.mubr.msk.f32.gmra.mrb[6].mxu1 %vm262_vm0, %v217_v21  ;;  %807 = vmatprep.mubr.msk.f32.mxu0 %vm262_vm0, %v202_v22  ;;  %v250_v1 = vld [vmem:[%s1124_s19 + $0xa0] sm:$0xff]  ;;  %v253_v11 = vld [vmem:[%s1124_s19 + $0xb8] sm:$0xff]  ;;  %v252_v13 = vld [vmem:[%s1124_s19 + $0xb0] sm:$0xff] }
  0x28   : > { %831 = vmatprep.mubr.msk.f32.mxu1 %vm262_vm0, %v218_v23  ;;  %v239_v22 = vld [vmem:[%s1124_s19 + $0x48] sm:$0xff] }
  0x29   : > { %v255_v23 = vld [vmem:[%s1124_s19 + $0xc8] sm:$0xff] }
  0x2a   : > { %808 = vmatmul.mubr.msk.f32.gmra.mrb[8].mxu0 %vm262_vm0, %v203_v24  ;;  %v238_v24 = vld [vmem:[%s1124_s19 + $0x40] sm:$0xff] }
  0x2b   : > { %832 = vmatmul.mubr.msk.f32.gmra.mrb[8].mxu1 %vm262_vm0, %v219_v25  ;;  %810 = vmatprep.mubr.msk.f32.mxu0 %vm262_vm0, %v204_v26  ;;  %v254_v25 = vld [vmem:[%s1124_s19 + $0xc0] sm:$0xff] }
  0x2c   : > { %834 = vmatprep.mubr.msk.f32.mxu1 %vm262_vm0, %v220_v27 }
  0x2e   : > { %811 = vmatmul.mubr.msk.f32.gmra.mrb[10].mxu0 %vm262_vm0, %v205_v28 }
  0x2f   : > { %835 = vmatmul.mubr.msk.f32.gmra.mrb[10].mxu1 %vm262_vm0, %v221_v29  ;;  %813 = vmatprep.mubr.msk.f32.mxu0 %vm262_vm0, %v206_v30 }
  0x30   : > { %837 = vmatprep.mubr.msk.f32.mxu1 %vm262_vm0, %v222_v31 }
  0x32   : > { %814 = vmatmul.mubr.msk.f32.gmra.mrb[12].mxu0 %vm262_vm0, %v207_v32 }
  0x33   : > { %838 = vmatmul.mubr.msk.f32.gmra.mrb[12].mxu1 %vm262_vm0, %v223_v33  ;;  %816 = vmatprep.mubr.msk.f32.mxu0 %vm262_vm0, %v208_v34  ;;  %v241_v34 = vld [vmem:[%s1124_s19 + $0x58] sm:$0xff] }
  0x34   : > { %840 = vmatprep.mubr.msk.f32.mxu1 %vm262_vm0, %v224_v35  ;;  %v257_v35 = vld [vmem:[%s1124_s19 + $0xd8] sm:$0xff] }
  0x36   : > { %817 = vmatmul.mubr.msk.f32.gmra.mrb[14].mxu0 %vm262_vm0, %v209_v36  ;;  %v240_v36 = vld [vmem:[%s1124_s19 + $0x50] sm:$0xff] }
  0x37   : > { %841 = vmatmul.mubr.msk.f32.gmra.mrb[14].mxu1 %vm262_vm0, %v225_v37  ;;  %v256_v37 = vld [vmem:[%s1124_s19 + $0xd0] sm:$0xff] }
  0xed   : > { %v797_v42 = vpop.f32.mrb[0].mxu0 }
  0xee   : > { %v821_v43 = vpop.f32.mrb[0].mxu1  ;;  %v431_v44 = vadd.f32 %v797_v42, %v231_v38  ;;  %v425_v46 = vpop.f32.mrb[1].mxu0 }
  0xef   : > { %v511_v45 = vadd.f32 %v821_v43, %v247_v39  ;;  %v505_v47 = vpop.f32.mrb[1].mxu1  ;;  %v426_v48 = vadd.f32 %v425_v46, %v230_v40  ;;  %v243_v46 = vld [vmem:[%s1124_s19 + $0x68] sm:$0xff] }
  0xf0   : > { %v506_v49 = vadd.f32 %v505_v47, %v246_v41  ;;  %585 = vst.msk [vmem:[%s1134_s24 + $0x8] sm:$0xff] %vm262_vm0, %v431_v44  ;;  %v259_v47 = vld [vmem:[%s1124_s19 + $0xe8] sm:$0xff] }
  0xf1   : > { %601 = vst.msk [vmem:[%s1134_s24 + $0x88] sm:$0xff] %vm262_vm0, %v511_v45  ;;  %584 = vst.msk [vmem:[%s1134_s24] sm:$0xff] %vm262_vm0, %v426_v48  ;;  %v800_v54 = vpop.f32.mrb[2].mxu0  ;;  %v242_v48 = vld [vmem:[%s1124_s19 + $0x60] sm:$0xff] }
  0xf2   : > { %600 = vst.msk [vmem:[%s1134_s24 + $0x80] sm:$0xff] %vm262_vm0, %v506_v49  ;;  %v824_v55 = vpop.f32.mrb[2].mxu1  ;;  %v441_v56 = vadd.f32 %v800_v54, %v233_v50  ;;  %v435_v58 = vpop.f32.mrb[3].mxu0  ;;  %v258_v49 = vld [vmem:[%s1124_s19 + $0xe0] sm:$0xff] }
  0xf3   : > { %v521_v57 = vadd.f32 %v824_v55, %v249_v51  ;;  %v515_v59 = vpop.f32.mrb[3].mxu1  ;;  %v436_v60 = vadd.f32 %v435_v58, %v232_v52  ;;  %v245_v58 = vld [vmem:[%s1124_s19 + $0x78] sm:$0xff] }
  0xf4   : > { %v516_v61 = vadd.f32 %v515_v59, %v248_v53  ;;  %587 = vst.msk [vmem:[%s1134_s24 + $0x18] sm:$0xff] %vm262_vm0, %v441_v56  ;;  %v261_v59 = vld [vmem:[%s1124_s19 + $0xf8] sm:$0xff] }
  0xf5   : > { %603 = vst.msk [vmem:[%s1134_s24 + $0x98] sm:$0xff] %vm262_vm0, %v521_v57  ;;  %586 = vst.msk [vmem:[%s1134_s24 + $0x10] sm:$0xff] %vm262_vm0, %v436_v60  ;;  %v803_v2 = vpop.f32.mrb[4].mxu0  ;;  %v244_v60 = vld [vmem:[%s1124_s19 + $0x70] sm:$0xff] }
  0xf6   : > { %602 = vst.msk [vmem:[%s1134_s24 + $0x90] sm:$0xff] %vm262_vm0, %v516_v61  ;;  %v827_v3 = vpop.f32.mrb[4].mxu1  ;;  %v451_v4 = vadd.f32 %v803_v2, %v235_v62  ;;  %v445_v6 = vpop.f32.mrb[5].mxu0  ;;  %v260_v61 = vld [vmem:[%s1124_s19 + $0xf0] sm:$0xff] }
  0xf7   : > { %v531_v5 = vadd.f32 %v827_v3, %v251_v63  ;;  %v525_v7 = vpop.f32.mrb[5].mxu1  ;;  %v446_v8 = vadd.f32 %v445_v6, %v234_v0 }
  0xf8   : > { %v526_v9 = vadd.f32 %v525_v7, %v250_v1  ;;  %589 = vst.msk [vmem:[%s1134_s24 + $0x28] sm:$0xff] %vm262_vm0, %v451_v4 }
  0xf9   : > { %605 = vst.msk [vmem:[%s1134_s24 + $0xa8] sm:$0xff] %vm262_vm0, %v531_v5  ;;  %588 = vst.msk [vmem:[%s1134_s24 + $0x20] sm:$0xff] %vm262_vm0, %v446_v8  ;;  %v806_v14 = vpop.f32.mrb[6].mxu0 }
  0xfa   : > { %604 = vst.msk [vmem:[%s1134_s24 + $0xa0] sm:$0xff] %vm262_vm0, %v526_v9  ;;  %v830_v15 = vpop.f32.mrb[6].mxu1  ;;  %v461_v16 = vadd.f32 %v806_v14, %v237_v10  ;;  %v455_v18 = vpop.f32.mrb[7].mxu0 }
  0xfb   : > { %v541_v17 = vadd.f32 %v830_v15, %v253_v11  ;;  %v535_v19 = vpop.f32.mrb[7].mxu1  ;;  %v456_v20 = vadd.f32 %v455_v18, %v236_v12 }
  0xfc   : > { %v536_v21 = vadd.f32 %v535_v19, %v252_v13  ;;  %591 = vst.msk [vmem:[%s1134_s24 + $0x38] sm:$0xff] %vm262_vm0, %v461_v16 }
  0xfd   : > { %607 = vst.msk [vmem:[%s1134_s24 + $0xb8] sm:$0xff] %vm262_vm0, %v541_v17  ;;  %590 = vst.msk [vmem:[%s1134_s24 + $0x30] sm:$0xff] %vm262_vm0, %v456_v20  ;;  %v809_v26 = vpop.f32.mrb[8].mxu0 }
  0xfe   : > { %606 = vst.msk [vmem:[%s1134_s24 + $0xb0] sm:$0xff] %vm262_vm0, %v536_v21  ;;  %v833_v27 = vpop.f32.mrb[8].mxu1  ;;  %v471_v28 = vadd.f32 %v809_v26, %v239_v22  ;;  %v465_v30 = vpop.f32.mrb[9].mxu0 }
  0xff   : > { %v551_v29 = vadd.f32 %v833_v27, %v255_v23  ;;  %v545_v31 = vpop.f32.mrb[9].mxu1  ;;  %v466_v32 = vadd.f32 %v465_v30, %v238_v24 }
 0x100   : > { %v546_v33 = vadd.f32 %v545_v31, %v254_v25  ;;  %593 = vst.msk [vmem:[%s1134_s24 + $0x48] sm:$0xff] %vm262_vm0, %v471_v28 }
 0x101   : > { %609 = vst.msk [vmem:[%s1134_s24 + $0xc8] sm:$0xff] %vm262_vm0, %v551_v29  ;;  %592 = vst.msk [vmem:[%s1134_s24 + $0x40] sm:$0xff] %vm262_vm0, %v466_v32  ;;  %v812_v38 = vpop.f32.mrb[10].mxu0 }
 0x102   : > { %608 = vst.msk [vmem:[%s1134_s24 + $0xc0] sm:$0xff] %vm262_vm0, %v546_v33  ;;  %v836_v39 = vpop.f32.mrb[10].mxu1  ;;  %v481_v40 = vadd.f32 %v812_v38, %v241_v34  ;;  %v475_v42 = vpop.f32.mrb[11].mxu0 }
 0x103   : > { %v561_v41 = vadd.f32 %v836_v39, %v257_v35  ;;  %v555_v43 = vpop.f32.mrb[11].mxu1  ;;  %v476_v44 = vadd.f32 %v475_v42, %v240_v36 }
 0x104   : > { %v556_v45 = vadd.f32 %v555_v43, %v256_v37  ;;  %595 = vst.msk [vmem:[%s1134_s24 + $0x58] sm:$0xff] %vm262_vm0, %v481_v40 }
 0x105   : > { %611 = vst.msk [vmem:[%s1134_s24 + $0xd8] sm:$0xff] %vm262_vm0, %v561_v41  ;;  %594 = vst.msk [vmem:[%s1134_s24 + $0x50] sm:$0xff] %vm262_vm0, %v476_v44  ;;  %v815_v50 = vpop.f32.mrb[12].mxu0 }
 0x106   : > { %610 = vst.msk [vmem:[%s1134_s24 + $0xd0] sm:$0xff] %vm262_vm0, %v556_v45  ;;  %v839_v51 = vpop.f32.mrb[12].mxu1  ;;  %v491_v52 = vadd.f32 %v815_v50, %v243_v46  ;;  %v485_v54 = vpop.f32.mrb[13].mxu0 }
 0x107   : > { %v571_v53 = vadd.f32 %v839_v51, %v259_v47  ;;  %v565_v55 = vpop.f32.mrb[13].mxu1  ;;  %v486_v56 = vadd.f32 %v485_v54, %v242_v48 }
 0x108   : > { %v566_v57 = vadd.f32 %v565_v55, %v258_v49  ;;  %597 = vst.msk [vmem:[%s1134_s24 + $0x68] sm:$0xff] %vm262_vm0, %v491_v52 }
 0x109   : > { %613 = vst.msk [vmem:[%s1134_s24 + $0xe8] sm:$0xff] %vm262_vm0, %v571_v53  ;;  %596 = vst.msk [vmem:[%s1134_s24 + $0x60] sm:$0xff] %vm262_vm0, %v486_v56  ;;  %v818_v62 = vpop.f32.mrb[14].mxu0 }
 0x10a   : > { %612 = vst.msk [vmem:[%s1134_s24 + $0xe0] sm:$0xff] %vm262_vm0, %v566_v57  ;;  %v842_v63 = vpop.f32.mrb[14].mxu1  ;;  %v501_v0 = vadd.f32 %v818_v62, %v245_v58  ;;  %v495_v2 = vpop.f32.mrb[15].mxu0 }
 0x10b   : > { %v581_v1 = vadd.f32 %v842_v63, %v261_v59  ;;  %v575_v3 = vpop.f32.mrb[15].mxu1  ;;  %v496_v4 = vadd.f32 %v495_v2, %v244_v60 }
 0x10c   : > { %v576_v5 = vadd.f32 %v575_v3, %v260_v61  ;;  %599 = vst.msk [vmem:[%s1134_s24 + $0x78] sm:$0xff] %vm262_vm0, %v501_v0 }
 0x10d   : > { %615 = vst.msk [vmem:[%s1134_s24 + $0xf8] sm:$0xff] %vm262_vm0, %v581_v1  ;;  %598 = vst.msk [vmem:[%s1134_s24 + $0x70] sm:$0xff] %vm262_vm0, %v496_v4 }
 0x10e   : > { %614 = vst.msk [vmem:[%s1134_s24 + $0xf0] sm:$0xff] %vm262_vm0, %v576_v5 }
 0x10f   : > { %909 = shalt.err (!%p906_p3)
}
 0x110   : > { %s910_s7 = scalar_lea.hbm %s1223_s28, 4096  ;;  %s914_s10 = scalar_lea.hbm %s1281_s3, 8192 }
 0x111   : > { %p911_p4 = scmp.ne.s32.totalorder %s1223_s28, %s910_s7  ;;  %p915_p9 = scmp.lt.u32.totalorder %s1223_s28, %s1281_s3 }
 0x112   : > { %p916_p10 = scmp.lt.u32.totalorder %s914_s10, %s910_s7  ;;  %p918_p12 = scmp.lt.u32.totalorder %s910_s7, %s1223_s28 }
 0x113   : > { %p912_p7 = pnand %p911_p4, %p1021_p5 }
 0x114   : > { %p917_p11 = por %p916_p10, %p915_p9 }
 0x115   : > { %p913_p8 = pneg %p912_p7 }
 0x116   : > { %p919_p13 = por %p918_p12, %p917_p11 }
 0x118   : > { %p920_p0 = pnand %p919_p13, %p913_p8 }
 0x11a   : > { %923 = shalt.err (!%p920_p0)
}
 0x11b   : > { %s961_s19 = smov 128   ;;  %s962_s20 = smov 8  }
 0x11c   : > { %855 = dma.vmem_to_hbm [thread:$0]  (%p1021_p5), %s1225_s26, 4096, %s1223_s28, %s1237_s29, %s961_s19, %s961_s19, %s962_s20  }
 0x11d PF: > { %p861_p1 = scmp.ge.s32.totalorder %s958_s15, 2  ;;  %s645_s24 = sand.u32 1, %s946_s12  }
 0x11e   : > { %s646_s25 = scalar_lea.sflag [#allocation3], %s645_s24 }
 0x11f   : > { %p858_p2 = pnand %p861_p1, %p1025_p6 }
 0x121   : > { %941 = dma.done.wait (!%p858_p2), %s646_s25, 4096  }
 0x122   : > { %943 = vsyncadd (!%p858_p2), %s646_s25, 4294963200  ;;  %p13_p3 = scmp.ge.s32.totalorder %s1008_s18, 4   ;;  %s1284_s12 = smov %s950_s13 }
 0x123   : > { %s1285_s13 = smov %s954_s14  ;;  %s1286_s14 = smov %s1019_s21 }
 0x124   : > { %s1287_s15 = smov %s1008_s18  ;;  %15 = sbr.rel (!%p13_p3) target bundleno = 3 (0x3), region = 70 }
 0x12b   :  { %651 = vsyncpa [#allocation3], 1 }
 0x12c   :  { %653 = vsyncpa [#allocation3 + $0x1], 1 }

// kernel: structure_enhancement_forward.12
= control target key start
LH: loop header
LB: loop body
LE: loop exit
PB: predicated region body
PF: predicated region fallthrough
CT: control target
= control target key end

     0   :  { %s2356_s9 = smov 0   ;;  %s4016_s0 = inlined_call_operand.vmem [shape: f32[2,18,18,32], index: 0, kind: input, shape index: {}]   ;;  %s4017_s1 = inlined_call_operand.vmem [shape: f32[9,32], index: 1, kind: input, shape index: {}]   ;;  %s4018_s2 = inlined_call_operand.vmem [shape: f32[2,16,16,32], index: 2, kind: output, shape index: {}]  }
   0x1 LB: > { %s2246_s10 = sadd.s32 4294967295, %s2339_s9   ;;  %p2250_p0 = scmp.ge.s32.totalorder %s2339_s9, 1  ;;  %s2339_s9 = sphi %s2356_s9, %s12_s9  }
   0x2   : > { %p112_p1 = scmp.lt.s32.totalorder %s2339_s9, 3 }
   0x4   : > { %p113_p2 = pnand %p2250_p0, %p112_p1 }
   0x5   : > { %p134_p3 = scmp.lt.s32.totalorder (!%p113_p2), %s2246_s10, 1  ;;  %v200_v0 = vlaneseq (!%p113_p2)  ;;  %v198_v2 = vld [vmem:[%s4017_s1] sm:$0xff] (!%p113_p2)  ;;  %vm368_vm0 = vcmask (!%p113_p2), 1046528   ;;  %vm613_vm1 = vcmask (!%p113_p2), 1045504   ;;  %v2416_v35 = vld [vmem:[%s4017_s1 + $0x8] ss:$0 sm:$0xff] (!%p113_p2) }
   0x6   : > { %116 = sbr.rel (%p113_p2) target bundleno = 400 (0x190), region = 28  ;;  %vm2158_vm2 = vcmask (!%p113_p2), 261120  }
   0x7   : > { %v201_v1 = vshrl.u32 (!%p113_p2), %v200_v0, 7 }
   0x9   : > { %v202_v3 = vsub.s32 (!%p113_p2), 0, %v201_v1  ;;  %v270_v4 = vsub.s32 (!%p113_p2), 1, %v201_v1  ;;  %v515_v5 = vsub.s32 (!%p113_p2), 2, %v201_v1  ;;  %v760_v6 = vsub.s32 (!%p113_p2), 3, %v201_v1 }
   0xa   : > { %v828_v7 = vsub.s32 (!%p113_p2), 4, %v201_v1  ;;  %v1072_v8 = vsub.s32 (!%p113_p2), 5, %v201_v1  ;;  %v1316_v9 = vsub.s32 (!%p113_p2), 6, %v201_v1  ;;  %v1384_v10 = vsub.s32 (!%p113_p2), 7, %v201_v1 }
   0xb   : > { %v2375_v11 = vrot.slane (!%p113_p2), %v198_v2, %v202_v3  ;;  %v2377_v12 = vrot.slane (!%p113_p2), %v198_v2, %v270_v4  ;;  %v2379_v13 = vrot.slane (!%p113_p2), %v198_v2, %v515_v5  ;;  %v2383_v16 = vrot.slane (!%p113_p2), %v198_v2, %v760_v6 }
   0xc   : > { %v2385_v17 = vrot.slane (!%p113_p2), %v198_v2, %v828_v7  ;;  %v2387_v18 = vrot.slane (!%p113_p2), %v198_v2, %v1072_v8  ;;  %v2389_v19 = vrot.slane (!%p113_p2), %v198_v2, %v1316_v9  ;;  %v2400_v25 = vrot.slane (!%p113_p2), %v198_v2, %v1384_v10 }
   0xd   : > { %s4020_s10 = smov (!%p134_p3, %s2246_s10), 1 }
   0xe   : > { %s2258_s13 = smul.u32 432, %s4020_s10  ;;  %s2257_s19 = sshll.u32 %s4020_s10, 8 }
   0xf   : > { %s2594_s22 = scalar_lea.vmem %s4018_s2, %s2257_s19 }
  0x10   : > { %s2373_s16 = scalar_lea.vmem %s4016_s0, %s2258_s13 }
  0x11   : > { %v144_v14 = vld [vmem:[%s2373_s16] sm:$0xff]  ;;  %v145_v15 = vld [vmem:[%s2373_s16 + $0x8] sm:$0xff]  ;;  %v2392_v20 = vld [vmem:[%s2373_s16 + $0x18] sm:$0xff] }
  0x12   : > { %v2395_v21 = vld [vmem:[%s2373_s16 + $0x20] sm:$0xff]  ;;  %v272_v22 = vmul.f32 %v2377_v12, %v144_v14  ;;  %v273_v23 = vmul.f32 %v2377_v12, %v145_v15  ;;  %v517_v24 = vmul.f32 %v2379_v13, %v144_v14  ;;  %v204_v26 = vmul.f32 %v2375_v11, %v144_v14  ;;  %v2411_v34 = vld [vmem:[%s2373_s16 + $0x30] sm:$0xff]  ;;  %v2427_v45 = vld [vmem:[%s2373_s16 + $0x38] sm:$0xff] }
  0x13   : > { %v518_v27 = vmul.f32 %v2379_v13, %v145_v15  ;;  %v830_v28 = vmul.f32 %v2385_v17, %v2392_v20  ;;  %v831_v29 = vmul.f32 %v2385_v17, %v2395_v21  ;;  %v1074_v33 = vmul.f32 %v2387_v18, %v2392_v20  ;;  %v146_v44 = vld [vmem:[%s2373_s16 + $0x10] sm:$0x3]  ;;  %v2442_v61 = vld [vmem:[%s2373_s16 + $0x28] sm:$0x3]  ;;  %v2455_v9 = vld [vmem:[%s2373_s16 + $0x40] sm:$0x3] }
  0x14   : > { %v369_v30 = vrot.slane %v272_v22, 1  ;;  %v370_v31 = vrot.slane %v273_v23, 1  ;;  %v614_v32 = vrot.slane %v517_v24, 2  ;;  %v1075_v39 = vmul.f32 %v2387_v18, %v2395_v21 }
  0x15   : > { %v615_v36 = vrot.slane %v518_v27, 2  ;;  %v926_v37 = vrot.slane %v830_v28, 1  ;;  %v927_v38 = vrot.slane %v831_v29, 1  ;;  %v762_v41 = vmul.f32 %v2383_v16, %v2392_v20 }
  0x16   : > { %v371_v40 = vsel %vm368_vm0, %v369_v30, %v370_v31  ;;  %v1170_v42 = vrot.slane %v1074_v33, 2  ;;  %v1386_v43 = vmul.f32 %v2400_v25, %v2411_v34  ;;  %v1171_v48 = vrot.slane %v1075_v39, 2 }
  0x17   : > { %v481_v46 = vadd.f32 %v371_v40, %v204_v26  ;;  %v616_v47 = vsel %vm613_vm1, %v614_v32, %v615_v36  ;;  %v1318_v49 = vmul.f32 %v2389_v19, %v2411_v34  ;;  %v1387_v50 = vmul.f32 %v2400_v25, %v2427_v45 }
  0x18   : > { %v1482_v51 = vrot.slane %v1386_v43, 1  ;;  %v1630_v52 = vmul.f32 %v2416_v35, %v2411_v34  ;;  %v1631_v53 = vmul.f32 %v2416_v35, %v2427_v45  ;;  %v928_v55 = vsel %vm368_vm0, %v926_v37, %v927_v38 }
  0x19   : > { %v726_v54 = vadd.f32 %v616_v47, %v481_v46  ;;  %v205_v56 = vmul.f32 %v2375_v11, %v145_v15  ;;  %v274_v57 = vmul.f32 %v2377_v12, %v146_v44  ;;  %v1483_v58 = vrot.slane %v1387_v50, 1 }
  0x1a   : > { %v1726_v59 = vrot.slane %v1630_v52, 2  ;;  %v1727_v60 = vrot.slane %v1631_v53, 2  ;;  %v519_v62 = vmul.f32 %v2379_v13, %v146_v44  ;;  %v1172_v0 = vsel %vm613_vm1, %v1170_v42, %v1171_v48 }
  0x1b   : > { %v794_v63 = vadd.f32 %v762_v41, %v726_v54  ;;  %v372_v1 = vrot.slane %v274_v57, 1  ;;  %v832_v2 = vmul.f32 %v2385_v17, %v2442_v61  ;;  %v1484_v3 = vsel %vm368_vm0, %v1482_v51, %v1483_v58 }
  0x1c   : > { %v617_v4 = vrot.slane %v519_v62, 2  ;;  %v763_v5 = vmul.f32 %v2383_v16, %v2395_v21  ;;  %v1076_v6 = vmul.f32 %v2387_v18, %v2442_v61  ;;  %v1728_v8 = vsel %vm613_vm1, %v1726_v59, %v1727_v60 }
  0x1d   : > { %v1038_v7 = vadd.f32 %v928_v55, %v794_v63  ;;  %v373_v10 = vsel %vm368_vm0, %v370_v31, %v372_v1  ;;  %v929_v14 = vrot.slane %v832_v2, 1  ;;  %v1388_v24 = vmul.f32 %v2400_v25, %v2455_v9 }
  0x1e   : > { %v482_v15 = vadd.f32 %v373_v10, %v205_v56  ;;  %v618_v22 = vsel %vm613_vm1, %v615_v36, %v617_v4  ;;  %v1173_v23 = vrot.slane %v1076_v6, 2  ;;  %v1319_v28 = vmul.f32 %v2389_v19, %v2427_v45 }
  0x1f   : > { %v1282_v26 = vadd.f32 %v1172_v0, %v1038_v7  ;;  %v930_v27 = vsel %vm368_vm0, %v927_v38, %v929_v14  ;;  %v1632_v29 = vmul.f32 %v2416_v35, %v2455_v9  ;;  %v1485_v32 = vrot.slane %v1388_v24, 1  ;;  %v2500_v0 = vld [vmem:[%s2373_s16 + $0x48] sm:$0xff] }
  0x20   : > { %v727_v30 = vadd.f32 %v618_v22, %v482_v15  ;;  %v206_v31 = vmul.f32 %v2375_v11, %v2392_v20  ;;  %v275_v33 = vmul.f32 %v2377_v12, %v2392_v20  ;;  %v1174_v37 = vsel %vm613_vm1, %v1171_v48, %v1173_v23 }
  0x21   : > { %v1350_v36 = vadd.f32 %v1318_v49, %v1282_v26  ;;  %v2473_v38 = vmul.f32 %v2377_v12, %v2395_v21  ;;  %v520_v39 = vmul.f32 %v2379_v13, %v2392_v20  ;;  %v1729_v41 = vrot.slane %v1632_v29, 2 }
  0x22   : > { %v795_v40 = vadd.f32 %v763_v5, %v727_v30  ;;  %v374_v42 = vrot.slane %v275_v33, 1  ;;  %v2479_v43 = vmul.f32 %v2379_v13, %v2395_v21  ;;  %v1486_v46 = vsel %vm368_vm0, %v1483_v58, %v1485_v32 }
  0x23   : > { %v1594_v44 = vadd.f32 %v1484_v3, %v1350_v36  ;;  %v375_v47 = vrot.slane %v2473_v38, 1  ;;  %v619_v48 = vrot.slane %v520_v39, 2  ;;  %v764_v20 = vmul.f32 %v2383_v16, %v2411_v34 }
  0x24   : > { %v1039_v49 = vadd.f32 %v930_v27, %v795_v40  ;;  %v620_v50 = vrot.slane %v2479_v43, 2  ;;  %v833_v51 = vmul.f32 %v2385_v17, %v2411_v34  ;;  %v2491_v54 = vmul.f32 %v2385_v17, %v2427_v45 }
  0x25   : > { %v1838_v52 = vadd.f32 %v1728_v8, %v1594_v44  ;;  %v376_v53 = vsel %vm368_vm0, %v374_v42, %v375_v47  ;;  %v1077_v55 = vmul.f32 %v2387_v18, %v2411_v34  ;;  %v1730_v63 = vsel %vm613_vm1, %v1727_v60, %v1729_v41  ;;  %v2508_v8 = vld [vmem:[%s2373_s16 + $0x50] sm:$0xff] }
  0x26   : > { %v1283_v56 = vadd.f32 %v1174_v37, %v1039_v49  ;;  %v483_v57 = vadd.f32 %v376_v53, %v206_v31  ;;  %v621_v58 = vsel %vm613_vm1, %v619_v48, %v620_v50  ;;  %v931_v59 = vrot.slane %v833_v51, 1 }
  0x27   : > { %v1902_v62 = vmul.f32 0.044715, %v1838_v52  ;;  %v932_v1 = vrot.slane %v2491_v54, 1  ;;  %v1078_v2 = vmul.f32 %v2387_v18, %v2427_v45  ;;  %v1175_v5 = vrot.slane %v1077_v55, 2 }
  0x28   : > { %v1351_v3 = vadd.f32 %v1319_v28, %v1283_v56  ;;  %v728_v4 = vadd.f32 %v621_v58, %v483_v57  ;;  %v1320_v6 = vmul.f32 %v2389_v19, %v2500_v0  ;;  %v1389_v60 = vmul.f32 %v2400_v25, %v2500_v0 }
  0x29   : > { %v1934_v7 = vmul.f32 %v1902_v62, %v1838_v52  ;;  %v933_v10 = vsel %vm368_vm0, %v931_v59, %v932_v1  ;;  %v1176_v14 = vrot.slane %v1078_v2, 2  ;;  %v1390_v23 = vmul.f32 %v2400_v25, %v2508_v8 }
  0x2a   : > { %v1595_v15 = vadd.f32 %v1486_v46, %v1351_v3  ;;  %v796_v22 = vadd.f32 %v764_v20, %v728_v4  ;;  %v1633_v24 = vmul.f32 %v2416_v35, %v2500_v0  ;;  %v1487_v28 = vrot.slane %v1389_v60, 1 }
  0x2b   : > { %v1966_v26 = vmul.f32 %v1934_v7, %v1838_v52  ;;  %v1177_v27 = vsel %vm613_vm1, %v1175_v5, %v1176_v14  ;;  %v1634_v29 = vmul.f32 %v2416_v35, %v2508_v8  ;;  %v1488_v31 = vrot.slane %v1390_v23, 1 }
  0x2c   : > { %v2520_v30 = vadd.f32 %v1730_v63, %v1595_v15  ;;  %v1040_v32 = vadd.f32 %v933_v10, %v796_v22  ;;  %v1731_v33 = vrot.slane %v1633_v24, 2  ;;  %v277_v38 = vmul.f32 %v2377_v12, %v2442_v61 }
  0x2d   : > { %v1998_v36 = vadd.f32 %v1966_v26, %v1838_v52  ;;  %v1732_v37 = vrot.slane %v1634_v29, 2  ;;  %v1489_v41 = vsel %vm368_vm0, %v1487_v28, %v1488_v31  ;;  %v207_v42 = vmul.f32 %v2375_v11, %v2395_v21 }
  0x2e   : > { %v1903_v39 = vmul.f32 0.044715, %v2520_v30  ;;  %v1284_v40 = vadd.f32 %v1177_v27, %v1040_v32  ;;  %v377_v48 = vrot.slane %v277_v38, 1  ;;  %v522_v49 = vmul.f32 %v2379_v13, %v2442_v61  ;;  %v2541_v61 = vld [vmem:[%s2373_s16 + $0x58] sm:$0x3] }
  0x2f   : > { %v2030_v44 = vmul.f32 0.7978846, %v1998_v36  ;;  %v1733_v46 = vsel %vm613_vm1, %v1731_v33, %v1732_v37  ;;  %v765_v53 = vmul.f32 %v2383_v16, %v2427_v45  ;;  %v835_v54 = vmul.f32 %v2385_v17, %v2455_v9 }
  0x30   : > { %v1935_v20 = vmul.f32 %v1903_v39, %v2520_v30  ;;  %v1352_v51 = vadd.f32 %v1320_v6, %v1284_v40  ;;  %v378_v55 = vsel %vm368_vm0, %v375_v47, %v377_v48  ;;  %v622_v21 = vrot.slane %v522_v49, 2 }
  0x31   : > { %2267 = vtanh.f32 %v2030_v44  ;;  %v1079_v56 = vmul.f32 %v2387_v18, %v2455_v9  ;;  %v484_v59 = vadd.f32 %v378_v55, %v207_v42  ;;  %v934_v62 = vrot.slane %v835_v54, 1 }
  0x32   : > { %v1967_v57 = vmul.f32 %v1935_v20, %v2520_v30  ;;  %v1596_v58 = vadd.f32 %v1489_v41, %v1352_v51  ;;  %v1870_v63 = vmul.f32 0.5, %v1838_v52  ;;  %v623_v2 = vsel %vm613_vm1, %v620_v50, %v622_v21 }
  0x33   : > { %v1178_v3 = vrot.slane %v1079_v56, 2  ;;  %v1391_v47 = vmul.f32 %v2400_v25, %v2541_v61  ;;  %v729_v6 = vadd.f32 %v623_v2, %v484_v59  ;;  %v1321_v7 = vmul.f32 %v2389_v19, %v2508_v8  ;;  %v2604_v2 = vld [vmem:[%s2373_s16 + $0x60] sm:$0xff] }
  0x34   : > { %v1999_v4 = vadd.f32 %v1967_v57, %v2520_v30  ;;  %v2549_v5 = vadd.f32 %v1733_v46, %v1596_v58  ;;  %v935_v10 = vsel %vm368_vm0, %v932_v1, %v934_v62  ;;  %v1635_v50 = vmul.f32 %v2416_v35, %v2541_v61 }
  0x35   : > { %v1179_v52 = vsel %vm613_vm1, %v1176_v14, %v1178_v3  ;;  %v1490_v43 = vrot.slane %v1391_v47, 1  ;;  %v797_v22 = vadd.f32 %v765_v53, %v729_v6  ;;  %v208_v23 = vmul.f32 %v2375_v11, %v2411_v34  ;;  %v2616_v6 = vld [vmem:[%s2373_s16 + $0x68] sm:$0xff] }
  0x36   : > { %v2031_v60 = vmul.f32 0.7978846, %v1999_v4  ;;  %v1904_v15 = vmul.f32 0.044715, %v2549_v5  ;;  %v1734_v26 = vrot.slane %v1635_v50, 2  ;;  %v278_v1 = vmul.f32 %v2377_v12, %v2411_v34 }
  0x37   : > { %v1491_v24 = vsel %vm368_vm0, %v1488_v31, %v1490_v43  ;;  %v2565_v14 = vmul.f32 %v2377_v12, %v2427_v45  ;;  %v1041_v28 = vadd.f32 %v935_v10, %v797_v22  ;;  %v523_v29 = vmul.f32 %v2379_v13, %v2411_v34 }
  0x38   : > { %2269 = vtanh.f32 %v2031_v60  ;;  %v1936_v27 = vmul.f32 %v1904_v15, %v2549_v5  ;;  %v1735_v32 = vsel %vm613_vm1, %v1732_v37, %v1734_v26  ;;  %v379_v33 = vrot.slane %v278_v1, 1 }
  0x39   : > { %v380_v31 = vrot.slane %v2565_v14, 1  ;;  %v2574_v36 = vmul.f32 %v2379_v13, %v2427_v45  ;;  %v1285_v39 = vadd.f32 %v1179_v52, %v1041_v28  ;;  %v624_v40 = vrot.slane %v523_v29, 2 }
  0x3a   : > { %v1968_v38 = vmul.f32 %v1936_v27, %v2549_v5  ;;  %v766_v41 = vmul.f32 %v2383_v16, %v2500_v0  ;;  %v836_v44 = vmul.f32 %v2385_v17, %v2500_v0  ;;  %v2588_v46 = vmul.f32 %v2385_v17, %v2508_v8 }
  0x3b   : > { %v2268_v42 = vpop.eup %2267  ;;  %v381_v34 = vsel %vm368_vm0, %v379_v33, %v380_v31  ;;  %v625_v37 = vrot.slane %v2574_v36, 2  ;;  %v1353_v20 = vadd.f32 %v1321_v7, %v1285_v39  ;;  %v1080_v21 = vmul.f32 %v2387_v18, %v2500_v0 }
  0x3c   : > { %v2094_v48 = vadd.f32 1.0, %v2268_v42  ;;  %v2000_v49 = vadd.f32 %v1968_v38, %v2549_v5  ;;  %v485_v51 = vadd.f32 %v381_v34, %v208_v23  ;;  %v936_v54 = vrot.slane %v836_v44, 1 }
  0x3d   : > { %v626_v53 = vsel %vm613_vm1, %v624_v40, %v625_v37  ;;  %v937_v55 = vrot.slane %v2588_v46, 1  ;;  %v1597_v58 = vadd.f32 %v1491_v24, %v1353_v20  ;;  %v1871_v62 = vmul.f32 0.5, %v2520_v30 }
  0x3e   : > { %v2126_v56 = vmul.f32 %v2094_v48, %v1870_v63  ;;  %v2032_v57 = vmul.f32 0.7978846, %v2000_v49  ;;  %v730_v59 = vadd.f32 %v626_v53, %v485_v51  ;;  %v2611_v47 = vmul.f32 %v2387_v18, %v2508_v8  ;;  %v2647_v49 = vld [vmem:[%s2373_s16 + $0x70] sm:$0x3] }
  0x3f   : > { %v938_v3 = vsel %vm368_vm0, %v936_v54, %v937_v55  ;;  %v1180_v4 = vrot.slane %v1080_v21, 2  ;;  %v1841_v63 = vadd.f32 %v1735_v32, %v1597_v58  ;;  %v1392_v30 = vmul.f32 %v2400_v25, %v2604_v2 }
  0x40   : > { %2159 = vst.msk [vmem:[%s2594_s22] sm:$0xff] %vm2158_vm2, %v2126_v56  ;;  %2271 = vtanh.f32 %v2032_v57  ;;  %v798_v7 = vadd.f32 %v766_v41, %v730_v59  ;;  %v1181_v10 = vrot.slane %v2611_v47, 2  ;;  %v1393_v52 = vmul.f32 %v2400_v25, %v2616_v6 }
  0x41   : > { %v1636_v43 = vmul.f32 %v2416_v35, %v2604_v2  ;;  %v2627_v50 = vmul.f32 %v2416_v35, %v2616_v6  ;;  %v1905_v15 = vmul.f32 0.044715, %v1841_v63  ;;  %v1322_v23 = vmul.f32 %v2389_v19, %v2604_v2 }
  0x42   : > { %v2270_v60 = vpop.eup %2269  ;;  %v1042_v22 = vadd.f32 %v938_v3, %v798_v7  ;;  %v1492_v24 = vrot.slane %v1392_v30, 1  ;;  %v1182_v1 = vsel %vm613_vm1, %v1180_v4, %v1181_v10  ;;  %v1493_v27 = vrot.slane %v1393_v52, 1 }
  0x43   : > { %v2095_v26 = vadd.f32 1.0, %v2270_v60  ;;  %v1736_v28 = vrot.slane %v1636_v43, 2  ;;  %v1872_v29 = vmul.f32 0.5, %v2549_v5  ;;  %v1937_v32 = vmul.f32 %v1905_v15, %v1841_v63 }
  0x44   : > { %v1286_v33 = vadd.f32 %v1182_v1, %v1042_v22  ;;  %v1737_v38 = vrot.slane %v2627_v50, 2  ;;  %v1494_v40 = vsel %vm368_vm0, %v1492_v24, %v1493_v27  ;;  %v280_v41 = vmul.f32 %v2377_v12, %v2455_v9 }
  0x45   : > { %v2127_v39 = vmul.f32 %v2095_v26, %v1871_v62  ;;  %v525_v42 = vmul.f32 %v2379_v13, %v2455_v9  ;;  %v1969_v34 = vmul.f32 %v1937_v32, %v1841_v63  ;;  %v209_v5 = vmul.f32 %v2375_v11, %v2427_v45 }
  0x46   : > { %v1354_v44 = vadd.f32 %v1322_v23, %v1286_v33  ;;  %v1738_v48 = vsel %vm613_vm1, %v1736_v28, %v1737_v38  ;;  %v382_v20 = vrot.slane %v280_v41, 1  ;;  %v838_v53 = vmul.f32 %v2385_v17, %v2541_v61 }
  0x47   : > { %2160 = vst.msk [vmem:[%s2594_s22 + $0x8] sm:$0xff] %vm2158_vm2, %v2127_v39  ;;  %v627_v51 = vrot.slane %v525_v42, 2  ;;  %v1082_v9 = vmul.f32 %v2387_v18, %v2541_v61  ;;  %v2001_v54 = vadd.f32 %v1969_v34, %v1841_v63  ;;  %v767_v56 = vmul.f32 %v2383_v16, %v2508_v8 }
  0x48   : > { %v1598_v21 = vadd.f32 %v1494_v40, %v1354_v44  ;;  %v1394_v45 = vmul.f32 %v2400_v25, %v2647_v49  ;;  %v383_v57 = vsel %vm368_vm0, %v380_v31, %v382_v20  ;;  %v939_v59 = vrot.slane %v838_v53, 1 }
  0x49   : > { %v628_v58 = vsel %vm613_vm1, %v625_v37, %v627_v51  ;;  %v1183_v62 = vrot.slane %v1082_v9, 2  ;;  %v2033_v47 = vmul.f32 0.7978846, %v2001_v54  ;;  %v486_v7 = vadd.f32 %v383_v57, %v209_v5 }
  0x4a   : > { %v2272_v3 = vpop.eup %2271  ;;  %v2663_v4 = vadd.f32 %v1738_v48, %v1598_v21  ;;  %v1495_v30 = vrot.slane %v1394_v45, 1  ;;  %v1873_v43 = vmul.f32 0.5, %v1841_v63  ;;  %v1323_v14 = vmul.f32 %v2389_v19, %v2616_v6 }
  0x4b   : > { %v2096_v52 = vadd.f32 1.0, %v2272_v3  ;;  %v1638_v31 = vmul.f32 %v2416_v35, %v2647_v49  ;;  %2273 = vtanh.f32 %v2033_v47  ;;  %v731_v37 = vadd.f32 %v628_v58, %v486_v7 }
  0x4c   : > { %v1906_v36 = vmul.f32 0.044715, %v2663_v4  ;;  %v940_v60 = vsel %vm368_vm0, %v937_v55, %v939_v59  ;;  %v1184_v22 = vsel %vm613_vm1, %v1181_v10, %v1183_v62  ;;  %v1496_v23 = vsel %vm368_vm0, %v1493_v27, %v1495_v30  ;;  %v2724_v59 = vld [vmem:[%s2373_s16 + $0x80] sm:$0xff] }
  0x4d   : > { %v2128_v15 = vmul.f32 %v2096_v52, %v1872_v29  ;;  %v1739_v63 = vrot.slane %v1638_v31, 2  ;;  %v799_v26 = vadd.f32 %v767_v56, %v731_v37  ;;  %v281_v1 = vmul.f32 %v2377_v12, %v2500_v0  ;;  %v2714_v56 = vld [vmem:[%s2373_s16 + $0x78] sm:$0xff] }
  0x4e   : > { %v1938_v24 = vmul.f32 %v1906_v36, %v2663_v4  ;;  %v2680_v28 = vmul.f32 %v2377_v12, %v2508_v8  ;;  %v210_v46 = vmul.f32 %v2375_v11, %v2500_v0  ;;  %v526_v55 = vmul.f32 %v2379_v13, %v2500_v0 }
  0x4f   : > { %2161 = vst.msk [vmem:[%s2594_s22 + $0x10] sm:$0xff] %vm2158_vm2, %v2128_v15  ;;  %v2690_v10 = vmul.f32 %v2379_v13, %v2508_v8  ;;  %v768_v27 = vmul.f32 %v2383_v16, %v2604_v2  ;;  %v1043_v32 = vadd.f32 %v940_v60, %v799_v26  ;;  %v384_v33 = vrot.slane %v281_v1, 1 }
  0x50   : > { %v1970_v29 = vmul.f32 %v1938_v24, %v2663_v4  ;;  %v385_v39 = vrot.slane %v2680_v28, 1  ;;  %v629_v40 = vrot.slane %v526_v55, 2  ;;  %v839_v0 = vmul.f32 %v2385_v17, %v2604_v2 }
  0x51   : > { %v630_v41 = vrot.slane %v2690_v10, 2  ;;  %v2701_v42 = vmul.f32 %v2385_v17, %v2616_v6  ;;  %v1287_v44 = vadd.f32 %v1184_v22, %v1043_v32  ;;  %v1083_v5 = vmul.f32 %v2387_v18, %v2604_v2 }
  0x52   : > { %v2002_v34 = vadd.f32 %v1970_v29, %v2663_v4  ;;  %v386_v48 = vsel %vm368_vm0, %v384_v33, %v385_v39  ;;  %v941_v53 = vrot.slane %v839_v0, 1  ;;  %v2718_v45 = vmul.f32 %v2387_v18, %v2616_v6 }
  0x53   : > { %v487_v20 = vadd.f32 %v386_v48, %v210_v46  ;;  %v631_v51 = vsel %vm613_vm1, %v629_v40, %v630_v41  ;;  %v942_v9 = vrot.slane %v2701_v42, 1  ;;  %v1355_v21 = vadd.f32 %v1323_v14, %v1287_v44  ;;  %v2762_v44 = vld [vmem:[%s2373_s16 + $0x88] sm:$0x3] }
  0x54   : > { %v2034_v54 = vmul.f32 0.7978846, %v2002_v34  ;;  %v1185_v57 = vrot.slane %v1083_v5, 2  ;;  %v1740_v58 = vsel %vm613_vm1, %v1737_v38, %v1739_v63  ;;  %v1395_v47 = vmul.f32 %v2400_v25, %v2714_v56 }
  0x55   : > { %v732_v62 = vadd.f32 %v631_v51, %v487_v20  ;;  %v943_v3 = vsel %vm368_vm0, %v941_v53, %v942_v9  ;;  %v2274_v7 = vpop.eup %2273  ;;  %v1599_v30 = vadd.f32 %v1496_v23, %v1355_v21  ;;  %v1186_v52 = vrot.slane %v2718_v45, 2 }
  0x56   : > { %2275 = vtanh.f32 %v2034_v54  ;;  %v1396_v14 = vmul.f32 %v2400_v25, %v2724_v59  ;;  %v2097_v31 = vadd.f32 1.0, %v2274_v7  ;;  %v1497_v38 = vrot.slane %v1395_v47, 1 }
  0x57   : > { %v800_v50 = vadd.f32 %v768_v27, %v732_v62  ;;  %v1639_v36 = vmul.f32 %v2416_v35, %v2714_v56  ;;  %v1843_v37 = vadd.f32 %v1740_v58, %v1599_v30  ;;  %v1187_v60 = vsel %vm613_vm1, %v1185_v57, %v1186_v52 }
  0x58   : > { %v1498_v15 = vrot.slane %v1396_v14, 1  ;;  %v2737_v22 = vmul.f32 %v2416_v35, %v2724_v59  ;;  %v2129_v23 = vmul.f32 %v2097_v31, %v1873_v43  ;;  %v1324_v24 = vmul.f32 %v2389_v19, %v2714_v56 }
  0x59   : > { %v1044_v63 = vadd.f32 %v943_v3, %v800_v50  ;;  %v1741_v26 = vrot.slane %v1639_v36, 2  ;;  %v1874_v1 = vmul.f32 0.5, %v2663_v4  ;;  %v1907_v46 = vmul.f32 0.044715, %v1843_v37 }
  0x5a   : > { %v1742_v55 = vrot.slane %v2737_v22, 2  ;;  %v211_v27 = vmul.f32 %v2375_v11, %v2508_v8  ;;  %2162 = vst.msk [vmem:[%s2594_s22 + $0x18] sm:$0xff] %vm2158_vm2, %v2129_v23  ;;  %v2747_v29 = vmul.f32 0.5, %v1843_v37  ;;  %v283_v43 = vmul.f32 %v2377_v12, %v2541_v61 }
  0x5b   : > { %v1288_v32 = vadd.f32 %v1187_v60, %v1044_v63  ;;  %v528_v33 = vmul.f32 %v2379_v13, %v2541_v61  ;;  %v1939_v40 = vmul.f32 %v1907_v46, %v1843_v37  ;;  %v1499_v4 = vsel %vm368_vm0, %v1497_v38, %v1498_v15 }
  0x5c   : > { %v841_v0 = vmul.f32 %v2385_v17, %v2647_v49  ;;  %v1085_v8 = vmul.f32 %v2387_v18, %v2647_v49  ;;  %v1743_v34 = vsel %vm613_vm1, %v1741_v26, %v1742_v55  ;;  %v387_v48 = vrot.slane %v283_v43, 1 }
  0x5d   : > { %v1356_v42 = vadd.f32 %v1324_v24, %v1288_v32  ;;  %v632_v5 = vrot.slane %v528_v33, 2  ;;  %v1971_v20 = vmul.f32 %v1939_v40, %v1843_v37  ;;  %v1397_v53 = vmul.f32 %v2400_v25, %v2762_v44 }
  0x5e   : > { %v944_v61 = vrot.slane %v841_v0, 1  ;;  %v1188_v51 = vrot.slane %v1085_v8, 2  ;;  %v388_v21 = vsel %vm368_vm0, %v385_v39, %v387_v48  ;;  %v1641_v57 = vmul.f32 %v2416_v35, %v2762_v44 }
  0x5f   : > { %v1600_v54 = vadd.f32 %v1499_v4, %v1356_v42  ;;  %v633_v45 = vsel %vm613_vm1, %v630_v41, %v632_v5  ;;  %v2003_v62 = vadd.f32 %v1971_v20, %v1843_v37  ;;  %v488_v3 = vadd.f32 %v388_v21, %v211_v27 }
  0x60   : > { %v2276_v58 = vpop.eup %2275  ;;  %v769_v47 = vmul.f32 %v2383_v16, %v2616_v6  ;;  %v1325_v7 = vmul.f32 %v2389_v19, %v2724_v59  ;;  %v945_v39 = vsel %vm368_vm0, %v942_v9, %v944_v61  ;;  %v1500_v10 = vrot.slane %v1397_v53, 1  ;;  %v2816_v53 = vld [vmem:[%s2373_s16 + $0x90] sm:$0xff] }
  0x61   : > { %v2098_v30 = vadd.f32 1.0, %v2276_v58  ;;  %v1844_v28 = vadd.f32 %v1743_v34, %v1600_v54  ;;  %v2035_v14 = vmul.f32 0.7978846, %v2003_v62  ;;  %v733_v41 = vadd.f32 %v633_v45, %v488_v3 }
  0x62   : > { %v1189_v31 = vsel %vm613_vm1, %v1186_v52, %v1188_v51  ;;  %v284_v50 = vmul.f32 %v2377_v12, %v2604_v2  ;;  %v1744_v37 = vrot.slane %v1641_v57, 2  ;;  %v212_v60 = vmul.f32 %v2375_v11, %v2604_v2  ;;  %v2823_v57 = vld [vmem:[%s2373_s16 + $0x98] sm:$0xff] }
  0x63   : > { %v2130_v38 = vmul.f32 %v2098_v30, %v1874_v1  ;;  %v1908_v36 = vmul.f32 0.044715, %v1844_v28  ;;  %2277 = vtanh.f32 %v2035_v14  ;;  %v801_v23 = vadd.f32 %v769_v47, %v733_v41 }
  0x64   : > { %v1501_v63 = vsel %vm368_vm0, %v1498_v15, %v1500_v10  ;;  %v2787_v9 = vmul.f32 %v2377_v12, %v2616_v6  ;;  %v389_v24 = vrot.slane %v284_v50, 1  ;;  %v529_v26 = vmul.f32 %v2379_v13, %v2604_v2 }
  0x65   : > { %2163 = vst.msk [vmem:[%s2594_s22 + $0x20] sm:$0xff] %vm2158_vm2, %v2130_v38  ;;  %v1940_v52 = vmul.f32 %v1908_v36, %v1844_v28  ;;  %v2795_v1 = vmul.f32 %v2379_v13, %v2616_v6  ;;  %v1045_v46 = vadd.f32 %v945_v39, %v801_v23  ;;  %v770_v15 = vmul.f32 %v2383_v16, %v2714_v56 }
  0x66   : > { %v390_v27 = vrot.slane %v2787_v9, 1  ;;  %v842_v32 = vmul.f32 %v2385_v17, %v2714_v56  ;;  %v634_v33 = vrot.slane %v529_v26, 2  ;;  %v2805_v2 = vmul.f32 %v2385_v17, %v2724_v59 }
  0x67   : > { %v1972_v43 = vmul.f32 %v1940_v52, %v1844_v28  ;;  %v635_v40 = vrot.slane %v2795_v1, 2  ;;  %v1289_v4 = vadd.f32 %v1189_v31, %v1045_v46  ;;  %v1086_v42 = vmul.f32 %v2387_v18, %v2714_v56 }
  0x68   : > { %v391_v0 = vsel %vm368_vm0, %v389_v24, %v390_v27  ;;  %v946_v8 = vrot.slane %v842_v32, 1  ;;  %v947_v20 = vrot.slane %v2805_v2, 1  ;;  %v1745_v51 = vsel %vm613_vm1, %v1742_v55, %v1744_v37  ;;  %v2857_v2 = vld [vmem:[%s2373_s16 + $0xa0] sm:$0x3] }
  0x69   : > { %v2004_v34 = vadd.f32 %v1972_v43, %v1844_v28  ;;  %v489_v48 = vadd.f32 %v391_v0, %v212_v60  ;;  %v636_v5 = vsel %vm613_vm1, %v634_v33, %v635_v40  ;;  %v1357_v61 = vadd.f32 %v1325_v7, %v1289_v4 }
  0x6a   : > { %v2820_v54 = vmul.f32 %v2387_v18, %v2724_v59  ;;  %v1190_v21 = vrot.slane %v1086_v42, 2  ;;  %v948_v62 = vsel %vm368_vm0, %v946_v8, %v947_v20  ;;  %v1398_v3 = vmul.f32 %v2400_v25, %v2816_v53 }
  0x6b   : > { %v2036_v45 = vmul.f32 0.7978846, %v2004_v34  ;;  %v734_v58 = vadd.f32 %v636_v5, %v489_v48  ;;  %v1601_v47 = vadd.f32 %v1501_v63, %v1357_v61  ;;  %v1399_v55 = vmul.f32 %v2400_v25, %v2823_v57 }
  0x6c   : > { %v1191_v22 = vrot.slane %v2820_v54, 2  ;;  %v1642_v7 = vmul.f32 %v2416_v35, %v2816_v53  ;;  %v1502_v39 = vrot.slane %v1398_v3, 1  ;;  %v2835_v10 = vmul.f32 %v2416_v35, %v2823_v57 }
  0x6d   : > { %2279 = vtanh.f32 %v2036_v45  ;;  %v802_v30 = vadd.f32 %v770_v15, %v734_v58  ;;  %v2278_v14 = vpop.eup %2277  ;;  %v1845_v41 = vadd.f32 %v1745_v51, %v1601_v47  ;;  %v1503_v50 = vrot.slane %v1399_v55, 1 }
  0x6e   : > { %v1192_v31 = vsel %vm613_vm1, %v1190_v21, %v1191_v22  ;;  %v1746_v38 = vrot.slane %v1642_v7, 2  ;;  %v2099_v36 = vadd.f32 1.0, %v2278_v14  ;;  %v1326_v60 = vmul.f32 %v2389_v19, %v2816_v53 }
  0x6f   : > { %v1046_v37 = vadd.f32 %v948_v62, %v802_v30  ;;  %v1747_v23 = vrot.slane %v2835_v10, 2  ;;  %v1876_v63 = vmul.f32 0.5, %v1844_v28  ;;  %v1909_v9 = vmul.f32 0.044715, %v1845_v41 }
  0x70   : > { %v213_v52 = vmul.f32 %v2375_v11, %v2616_v6  ;;  %v286_v24 = vmul.f32 %v2377_v12, %v2647_v49  ;;  %v2131_v26 = vmul.f32 %v2099_v36, %v2747_v29  ;;  %v1504_v46 = vsel %vm368_vm0, %v1502_v39, %v1503_v50 }
  0x71   : > { %v1290_v1 = vadd.f32 %v1192_v31, %v1046_v37  ;;  %v531_v15 = vmul.f32 %v2379_v13, %v2647_v49  ;;  %v1941_v32 = vmul.f32 %v1909_v9, %v1845_v41  ;;  %v1748_v28 = vsel %vm613_vm1, %v1746_v38, %v1747_v23 }
  0x72   : > { %v392_v43 = vrot.slane %v286_v24, 1  ;;  %v844_v6 = vmul.f32 %v2385_v17, %v2762_v44  ;;  %2164 = vst.msk [vmem:[%s2594_s22 + $0x28] sm:$0xff] %vm2158_vm2, %v2131_v26  ;;  %v771_v4 = vmul.f32 %v2383_v16, %v2724_v59  ;;  %v1088_v49 = vmul.f32 %v2387_v18, %v2762_v44 }
  0x73   : > { %v1358_v33 = vadd.f32 %v1326_v60, %v1290_v1  ;;  %v637_v29 = vrot.slane %v531_v15, 2  ;;  %v1973_v0 = vmul.f32 %v1941_v32, %v1845_v41  ;;  %v1400_v34 = vmul.f32 %v2400_v25, %v2857_v2 }
  0x74   : > { %v393_v8 = vsel %vm368_vm0, %v390_v27, %v392_v43  ;;  %v949_v42 = vrot.slane %v844_v6, 1  ;;  %v1193_v51 = vrot.slane %v1088_v49, 2  ;;  %v2867_v54 = vmul.f32 0.5, %v1845_v41 }
  0x75   : > { %v1602_v48 = vadd.f32 %v1504_v46, %v1358_v33  ;;  %v490_v5 = vadd.f32 %v393_v8, %v213_v52  ;;  %v638_v61 = vsel %vm613_vm1, %v635_v40, %v637_v29  ;;  %v2005_v21 = vadd.f32 %v1973_v0, %v1845_v41 }
  0x76   : > { %v1505_v45 = vrot.slane %v1400_v34, 1  ;;  %v1644_v58 = vmul.f32 %v2416_v35, %v2857_v2  ;;  %v950_v47 = vsel %vm368_vm0, %v947_v20, %v949_v42  ;;  %v1327_v55 = vmul.f32 %v2389_v19, %v2823_v57 }
  0x77   : > { %v2280_v62 = vpop.eup %2279  ;;  %v2871_v3 = vadd.f32 %v1748_v28, %v1602_v48  ;;  %v735_v27 = vadd.f32 %v638_v61, %v490_v5  ;;  %v2037_v40 = vmul.f32 0.7978846, %v2005_v21  ;;  %v1194_v30 = vsel %vm613_vm1, %v1191_v22, %v1193_v51  ;;  %v2921_v61 = vld [vmem:[%s2373_s16 + $0xa8] sm:$0xff]  ;;  %v2924_v51 = vld [vmem:[%s2373_s16 + $0xb0] sm:$0xff] }
  0x78   : > { %v2100_v7 = vadd.f32 1.0, %v2280_v62  ;;  %v214_v39 = vmul.f32 %v2375_v11, %v2714_v56  ;;  %v1506_v31 = vsel %vm368_vm0, %v1503_v50, %v1505_v45  ;;  %v287_v38 = vmul.f32 %v2377_v12, %v2714_v56 }
  0x79   : > { %v1910_v14 = vmul.f32 0.044715, %v2871_v3  ;;  %v803_v41 = vadd.f32 %v771_v4, %v735_v27  ;;  %2281 = vtanh.f32 %v2037_v40  ;;  %v1749_v36 = vrot.slane %v1644_v58, 2 }
  0x7a   : > { %v2132_v20 = vmul.f32 %v2100_v7, %v1876_v63  ;;  %v2885_v37 = vmul.f32 %v2377_v12, %v2724_v59  ;;  %v394_v9 = vrot.slane %v287_v38, 1  ;;  %v532_v52 = vmul.f32 %v2379_v13, %v2714_v56 }
  0x7b   : > { %v1942_v22 = vmul.f32 %v1910_v14, %v2871_v3  ;;  %v1047_v60 = vadd.f32 %v950_v47, %v803_v41  ;;  %v2895_v63 = vmul.f32 %v2379_v13, %v2724_v59  ;;  %v772_v24 = vmul.f32 %v2383_v16, %v2816_v53 }
  0x7c   : > { %2165 = vst.msk [vmem:[%s2594_s22 + $0x30] sm:$0xff] %vm2158_vm2, %v2132_v20  ;;  %v395_v50 = vrot.slane %v2885_v37, 1  ;;  %v845_v26 = vmul.f32 %v2385_v17, %v2816_v53  ;;  %v639_v15 = vrot.slane %v532_v52, 2  ;;  %v2904_v56 = vmul.f32 %v2385_v17, %v2823_v57 }
  0x7d   : > { %v1974_v1 = vmul.f32 %v1942_v22, %v2871_v3  ;;  %v1291_v46 = vadd.f32 %v1194_v30, %v1047_v60  ;;  %v640_v28 = vrot.slane %v2895_v63, 2  ;;  %v1089_v6 = vmul.f32 %v2387_v18, %v2816_v53 }
  0x7e   : > { %v396_v32 = vsel %vm368_vm0, %v394_v9, %v395_v50  ;;  %v951_v43 = vrot.slane %v845_v26, 1  ;;  %v952_v49 = vrot.slane %v2904_v56, 1  ;;  %v1750_v0 = vsel %vm613_vm1, %v1747_v23, %v1749_v36 }
  0x7f   : > { %v2006_v33 = vadd.f32 %v1974_v1, %v2871_v3  ;;  %v1359_v29 = vadd.f32 %v1327_v55, %v1291_v46  ;;  %v491_v4 = vadd.f32 %v396_v32, %v214_v39  ;;  %v641_v8 = vsel %vm613_vm1, %v639_v15, %v640_v28 }
  0x80   : > { %v2918_v42 = vmul.f32 %v2387_v18, %v2823_v57  ;;  %v1195_v34 = vrot.slane %v1089_v6, 2  ;;  %v953_v10 = vsel %vm368_vm0, %v951_v43, %v952_v49  ;;  %v1401_v45 = vmul.f32 %v2400_v25, %v2921_v61 }
  0x81   : > { %v2038_v48 = vmul.f32 0.7978846, %v2006_v33  ;;  %v1603_v5 = vadd.f32 %v1506_v31, %v1359_v29  ;;  %v736_v21 = vadd.f32 %v641_v8, %v491_v4  ;;  %v1402_v58 = vmul.f32 %v2400_v25, %v2924_v51 }
  0x82   : > { %v1196_v23 = vrot.slane %v2918_v42, 2  ;;  %v1645_v62 = vmul.f32 %v2416_v35, %v2921_v61  ;;  %v2938_v55 = vmul.f32 %v2416_v35, %v2924_v51  ;;  %v1507_v30 = vrot.slane %v1401_v45, 1 }
  0x83   : > { %2283 = vtanh.f32 %v2038_v48  ;;  %v1847_v27 = vadd.f32 %v1750_v0, %v1603_v5  ;;  %v804_v47 = vadd.f32 %v772_v24, %v736_v21  ;;  %v2282_v7 = vpop.eup %2281  ;;  %v1508_v39 = vrot.slane %v1402_v58, 1 }
  0x84   : > { %v1197_v40 = vsel %vm613_vm1, %v1195_v34, %v1196_v23  ;;  %v1751_v14 = vrot.slane %v1645_v62, 2  ;;  %v2101_v41 = vadd.f32 1.0, %v2282_v7  ;;  %v1328_v20 = vmul.f32 %v2389_v19, %v2921_v61 }
  0x85   : > { %v1911_v31 = vmul.f32 0.044715, %v1847_v27  ;;  %v1048_v38 = vadd.f32 %v953_v10, %v804_v47  ;;  %v1878_v36 = vmul.f32 0.5, %v2871_v3  ;;  %v1752_v37 = vrot.slane %v2938_v55, 2 }
  0x86   : > { %v215_v35 = vmul.f32 %v2375_v11, %v2724_v59  ;;  %v289_v22 = vmul.f32 %v2377_v12, %v2762_v44  ;;  %v2133_v60 = vmul.f32 %v2101_v41, %v2867_v54  ;;  %v534_v63 = vmul.f32 %v2379_v13, %v2762_v44  ;;  %v2961_v54 = vld [vmem:[%s2373_s16 + $0xb8] sm:$0x3] }
  0x87   : > { %v1943_v9 = vmul.f32 %v1911_v31, %v1847_v27  ;;  %v1292_v52 = vadd.f32 %v1197_v40, %v1048_v38  ;;  %v1509_v24 = vsel %vm368_vm0, %v1507_v30, %v1508_v39  ;;  %v1753_v3 = vsel %vm613_vm1, %v1751_v14, %v1752_v37 }
  0x88   : > { %v397_v26 = vrot.slane %v289_v22, 1  ;;  %v847_v59 = vmul.f32 %v2385_v17, %v2857_v2  ;;  %2166 = vst.msk [vmem:[%s2594_s22 + $0x38] sm:$0xff] %vm2158_vm2, %v2133_v60  ;;  %v642_v15 = vrot.slane %v534_v63, 2  ;;  %v1091_v44 = vmul.f32 %v2387_v18, %v2857_v2 }
  0x89   : > { %v1975_v1 = vmul.f32 %v1943_v9, %v1847_v27  ;;  %v1360_v46 = vadd.f32 %v1328_v20, %v1292_v52  ;;  %v773_v43 = vmul.f32 %v2383_v16, %v2823_v57  ;;  %v1403_v33 = vmul.f32 %v2400_v25, %v2961_v54 }
  0x8a   : > { %v398_v32 = vsel %vm368_vm0, %v395_v50, %v397_v26  ;;  %v954_v6 = vrot.slane %v847_v59, 1  ;;  %v643_v8 = vsel %vm613_vm1, %v640_v28, %v642_v15  ;;  %v2971_v42 = vmul.f32 0.5, %v1847_v27  ;;  %v2976_v50 = vld [vmem:[%s4017_s1 + $0x8] ss:$0 sm:$0xff] }
  0x8b   : > { %v2007_v29 = vadd.f32 %v1975_v1, %v1847_v27  ;;  %v1604_v4 = vadd.f32 %v1509_v24, %v1360_v46  ;;  %v492_v0 = vadd.f32 %v398_v32, %v215_v35  ;;  %v1198_v34 = vrot.slane %v1091_v44, 2 }
  0x8c   : > { %v1510_v48 = vrot.slane %v1403_v33, 1  ;;  %v1647_v5 = vmul.f32 %v2976_v50, %v2961_v54  ;;  %v1329_v62 = vmul.f32 %v2389_v19, %v2924_v51  ;;  %v955_v27 = vsel %vm368_vm0, %v952_v49, %v954_v6 }
  0x8d   : > { %v2284_v21 = vpop.eup %2283  ;;  %v2039_v10 = vmul.f32 0.7978846, %v2007_v29  ;;  %v1848_v45 = vadd.f32 %v1753_v3, %v1604_v4  ;;  %v737_v58 = vadd.f32 %v643_v8, %v492_v0  ;;  %v1199_v47 = vsel %vm613_vm1, %v1196_v23, %v1198_v34  ;;  %v3031_v8 = vld [vmem:[%s2373_s16 + $0xc8] sm:$0xff] }
  0x8e   : > { %v2102_v28 = vadd.f32 1.0, %v2284_v21  ;;  %v216_v7 = vmul.f32 %v2375_v11, %v2816_v53  ;;  %v1511_v14 = vsel %vm368_vm0, %v1508_v39, %v1510_v48  ;;  %v1754_v31 = vrot.slane %v1647_v5, 2 }
  0x8f   : > { %2285 = vtanh.f32 %v2039_v10  ;;  %v1912_v40 = vmul.f32 0.044715, %v1848_v45  ;;  %v805_v30 = vadd.f32 %v773_v43, %v737_v58  ;;  %v290_v38 = vmul.f32 %v2377_v12, %v2816_v53  ;;  %v3023_v43 = vld [vmem:[%s2373_s16 + $0xc0] sm:$0xff] }
  0x90   : > { %v2134_v41 = vmul.f32 %v2102_v28, %v1878_v36  ;;  %v2993_v56 = vmul.f32 %v2377_v12, %v2823_v57  ;;  %v535_v23 = vmul.f32 %v2379_v13, %v2816_v53  ;;  %v2999_v35 = vmul.f32 %v2379_v13, %v2823_v57 }
  0x91   : > { %v1944_v49 = vmul.f32 %v1912_v40, %v1848_v45  ;;  %v1049_v20 = vadd.f32 %v955_v27, %v805_v30  ;;  %v399_v39 = vrot.slane %v290_v38, 1  ;;  %v774_v22 = vmul.f32 %v2383_v16, %v2921_v61 }
  0x92   : > { %2167 = vst.msk [vmem:[%s2594_s22 + $0x40] sm:$0xff] %vm2158_vm2, %v2134_v41  ;;  %v400_v36 = vrot.slane %v2993_v56, 1  ;;  %v848_v60 = vmul.f32 %v2385_v17, %v2921_v61  ;;  %v644_v63 = vrot.slane %v535_v23, 2  ;;  %v645_v53 = vrot.slane %v2999_v35, 2 }
  0x93   : > { %v1976_v9 = vmul.f32 %v1944_v49, %v1848_v45  ;;  %v1293_v52 = vadd.f32 %v1199_v47, %v1049_v20  ;;  %v3014_v3 = vmul.f32 %v2385_v17, %v2924_v51  ;;  %v1092_v59 = vmul.f32 %v2387_v18, %v2921_v61 }
  0x94   : > { %v401_v24 = vsel %vm368_vm0, %v399_v39, %v400_v36  ;;  %v956_v26 = vrot.slane %v848_v60, 1  ;;  %v646_v44 = vsel %vm613_vm1, %v644_v63, %v645_v53  ;;  %v1755_v32 = vsel %vm613_vm1, %v1752_v37, %v1754_v31 }
  0x95   : > { %v2008_v1 = vadd.f32 %v1976_v9, %v1848_v45  ;;  %v1361_v46 = vadd.f32 %v1329_v62, %v1293_v52  ;;  %v493_v15 = vadd.f32 %v401_v24, %v216_v7  ;;  %v957_v6 = vrot.slane %v3014_v3, 1  ;;  %v3066_v3 = vld [vmem:[%s2373_s16 + $0xd0] sm:$0x3] }
  0x96   : > { %v3028_v33 = vmul.f32 %v2387_v18, %v2924_v51  ;;  %v1200_v29 = vrot.slane %v1092_v59, 2  ;;  %v1404_v48 = vmul.f32 %v2400_v25, %v3023_v43  ;;  %v1405_v5 = vmul.f32 %v2400_v25, %v3031_v8 }
  0x97   : > { %v2040_v4 = vmul.f32 0.7978846, %v2008_v1  ;;  %v1605_v0 = vadd.f32 %v1511_v14, %v1361_v46  ;;  %v738_v34 = vadd.f32 %v646_v44, %v493_v15  ;;  %v958_v55 = vsel %vm368_vm0, %v956_v26, %v957_v6 }
  0x98   : > { %v1201_v37 = vrot.slane %v3028_v33, 2  ;;  %v1648_v21 = vmul.f32 %v2976_v50, %v3023_v43  ;;  %v1512_v28 = vrot.slane %v1404_v48, 1  ;;  %v1513_v7 = vrot.slane %v1405_v5, 1 }
  0x99   : > { %v2286_v10 = vpop.eup %2285  ;;  %2287 = vtanh.f32 %v2040_v4  ;;  %v1849_v58 = vadd.f32 %v1755_v32, %v1605_v0  ;;  %v806_v62 = vadd.f32 %v774_v22, %v738_v34  ;;  %v3044_v40 = vmul.f32 %v2976_v50, %v3031_v8 }
  0x9a   : > { %v2103_v27 = vadd.f32 1.0, %v2286_v10  ;;  %v1202_v47 = vsel %vm613_vm1, %v1200_v29, %v1201_v37  ;;  %v1880_v30 = vmul.f32 0.5, %v1848_v45  ;;  %v1330_v31 = vmul.f32 %v2389_v19, %v3023_v43 }
  0x9b   : > { %v1913_v14 = vmul.f32 0.044715, %v1849_v58  ;;  %v1050_v41 = vadd.f32 %v958_v55, %v806_v62  ;;  %v3049_v49 = vmul.f32 0.5, %v1849_v58  ;;  %v1756_v20 = vrot.slane %v1648_v21, 2 }
  0x9c   : > { %v2135_v38 = vmul.f32 %v2103_v27, %v2971_v42  ;;  %v1757_v23 = vrot.slane %v3044_v40, 2  ;;  %v292_v22 = vmul.f32 %v2377_v12, %v2857_v2  ;;  %v537_v45 = vmul.f32 %v2379_v13, %v2857_v2 }
  0x9d   : > { %v1945_v35 = vmul.f32 %v1913_v14, %v1849_v58  ;;  %v1294_v39 = vadd.f32 %v1202_v47, %v1050_v41  ;;  %v1514_v60 = vsel %vm368_vm0, %v1512_v28, %v1513_v7  ;;  %v217_v42 = vmul.f32 %v2375_v11, %v2823_v57 }
  0x9e   : > { %2168 = vst.msk [vmem:[%s2594_s22 + $0x48] sm:$0xff] %vm2158_vm2, %v2135_v38  ;;  %v850_v9 = vmul.f32 %v2385_v17, %v2961_v54  ;;  %v1094_v52 = vmul.f32 %v2387_v18, %v2961_v54  ;;  %v402_v26 = vrot.slane %v292_v22, 1  ;;  %v647_v59 = vrot.slane %v537_v45, 2 }
  0x9f   : > { %v1977_v63 = vmul.f32 %v1945_v35, %v1849_v58  ;;  %v1362_v24 = vadd.f32 %v1330_v31, %v1294_v39  ;;  %v1758_v2 = vsel %vm613_vm1, %v1756_v20, %v1757_v23  ;;  %v1406_v57 = vmul.f32 %v2400_v25, %v3066_v3 }
  0xa0   : > { %v959_v1 = vrot.slane %v850_v9, 1  ;;  %v1203_v46 = vrot.slane %v1094_v52, 2  ;;  %v403_v32 = vsel %vm368_vm0, %v400_v36, %v402_v26  ;;  %v648_v33 = vsel %vm613_vm1, %v645_v53, %v647_v59 }
  0xa1   : > { %v2009_v15 = vadd.f32 %v1977_v63, %v1849_v58  ;;  %v1606_v44 = vadd.f32 %v1514_v60, %v1362_v24  ;;  %v494_v29 = vadd.f32 %v403_v32, %v217_v42  ;;  %v775_v4 = vmul.f32 %v2383_v16, %v2924_v51 }
  0xa2   : > { %v1331_v0 = vmul.f32 %v2389_v19, %v3031_v8  ;;  %v1515_v34 = vrot.slane %v1406_v57, 1  ;;  %v960_v21 = vsel %vm368_vm0, %v957_v6, %v959_v1  ;;  %v1650_v56 = vmul.f32 %v2976_v50, %v3066_v3  ;;  %v3129_v57 = vld [vmem:[%s2373_s16 + $0xd8] sm:$0xff] }
  0xa3   : > { %v2288_v48 = vpop.eup %2287  ;;  %v2041_v55 = vmul.f32 0.7978846, %v2009_v15  ;;  %v3081_v5 = vadd.f32 %v1758_v2, %v1606_v44  ;;  %v739_v53 = vadd.f32 %v648_v33, %v494_v29  ;;  %v1204_v10 = vsel %vm613_vm1, %v1201_v37, %v1203_v46  ;;  %v3134_v33 = vld [vmem:[%s2373_s16 + $0xe0] sm:$0xff] }
  0xa4   : > { %v2104_v36 = vadd.f32 1.0, %v2288_v48  ;;  %v293_v58 = vmul.f32 %v2377_v12, %v2921_v61  ;;  %v1516_v28 = vsel %vm368_vm0, %v1513_v7, %v1515_v34  ;;  %v218_v27 = vmul.f32 %v2375_v11, %v2921_v61 }
  0xa5   : > { %2289 = vtanh.f32 %v2041_v55  ;;  %v1914_v62 = vmul.f32 0.044715, %v3081_v5  ;;  %v807_v47 = vadd.f32 %v775_v4, %v739_v53  ;;  %v3095_v14 = vmul.f32 %v2377_v12, %v2924_v51 }
  0xa6   : > { %v2136_v6 = vmul.f32 %v2104_v36, %v1880_v30  ;;  %v404_v41 = vrot.slane %v293_v58, 1  ;;  %v1759_v31 = vrot.slane %v1650_v56, 2  ;;  %v538_v38 = vmul.f32 %v2379_v13, %v2921_v61 }
  0xa7   : > { %v1946_v37 = vmul.f32 %v1914_v62, %v3081_v5  ;;  %v3102_v20 = vmul.f32 %v2379_v13, %v2924_v51  ;;  %v1051_v7 = vadd.f32 %v960_v21, %v807_v47  ;;  %v405_v30 = vrot.slane %v3095_v14, 1 }
  0xa8   : > { %2169 = vst.msk [vmem:[%s2594_s22 + $0x50] sm:$0xff] %vm2158_vm2, %v2136_v6  ;;  %v776_v35 = vmul.f32 %v2383_v16, %v3023_v43  ;;  %v851_v39 = vmul.f32 %v2385_v17, %v3023_v43  ;;  %v649_v45 = vrot.slane %v538_v38, 2  ;;  %v3115_v60 = vmul.f32 %v2385_v17, %v3031_v8 }
  0xa9   : > { %v1978_v22 = vmul.f32 %v1946_v37, %v3081_v5  ;;  %v650_v61 = vrot.slane %v3102_v20, 2  ;;  %v1295_v42 = vadd.f32 %v1204_v10, %v1051_v7  ;;  %v406_v9 = vsel %vm368_vm0, %v404_v41, %v405_v30 }
  0xaa   : > { %v961_v52 = vrot.slane %v851_v39, 1  ;;  %v1095_v63 = vmul.f32 %v2387_v18, %v3023_v43  ;;  %v495_v26 = vadd.f32 %v406_v9, %v218_v27  ;;  %v962_v2 = vrot.slane %v3115_v60, 1 }
  0xab   : > { %v2010_v24 = vadd.f32 %v1978_v22, %v3081_v5  ;;  %v651_v59 = vsel %vm613_vm1, %v649_v45, %v650_v61  ;;  %v1363_v1 = vadd.f32 %v1331_v0, %v1295_v42  ;;  %v1760_v46 = vsel %vm613_vm1, %v1757_v23, %v1759_v31  ;;  %v3172_v42 = vld [vmem:[%s2373_s16 + $0xe8] sm:$0x3] }
  0xac   : > { %v1096_v15 = vmul.f32 %v2387_v18, %v3031_v8  ;;  %v1205_v44 = vrot.slane %v1095_v63, 2  ;;  %v740_v29 = vadd.f32 %v651_v59, %v495_v26  ;;  %v963_v4 = vsel %vm368_vm0, %v961_v52, %v962_v2 }
  0xad   : > { %v2042_v32 = vmul.f32 0.7978846, %v2010_v24  ;;  %v1407_v34 = vmul.f32 %v2400_v25, %v3129_v57  ;;  %v1607_v0 = vadd.f32 %v1516_v28, %v1363_v1  ;;  %v1408_v40 = vmul.f32 %v2400_v25, %v3134_v33 }
  0xae   : > { %v1206_v48 = vrot.slane %v1096_v15, 2  ;;  %v1651_v23 = vmul.f32 %v2976_v50, %v3129_v57  ;;  %v808_v21 = vadd.f32 %v776_v35, %v740_v29  ;;  %v3145_v36 = vmul.f32 %v2976_v50, %v3134_v33 }
  0xaf   : > { %v2290_v55 = vpop.eup %2289  ;;  %2291 = vtanh.f32 %v2042_v32  ;;  %v1517_v56 = vrot.slane %v1407_v34, 1  ;;  %v1851_v10 = vadd.f32 %v1760_v46, %v1607_v0  ;;  %v1518_v62 = vrot.slane %v1408_v40, 1 }
  0xb0   : > { %v2105_v53 = vadd.f32 1.0, %v2290_v55  ;;  %v1207_v58 = vsel %vm613_vm1, %v1205_v44, %v1206_v48  ;;  %v1052_v28 = vadd.f32 %v963_v4, %v808_v21  ;;  %v1332_v27 = vmul.f32 %v2389_v19, %v3129_v57 }
  0xb1   : > { %v1761_v6 = vrot.slane %v1651_v23, 2  ;;  %v1762_v47 = vrot.slane %v3145_v36, 2  ;;  %v1882_v37 = vmul.f32 0.5, %v3081_v5  ;;  %v1915_v31 = vmul.f32 0.044715, %v1851_v10 }
  0xb2   : > { %v2137_v41 = vmul.f32 %v2105_v53, %v3049_v49  ;;  %v219_v38 = vmul.f32 %v2375_v11, %v2924_v51  ;;  %v3155_v20 = vmul.f32 0.5, %v1851_v10  ;;  %v1296_v7 = vadd.f32 %v1207_v58, %v1052_v28 }
  0xb3   : > { %v295_v35 = vmul.f32 %v2377_v12, %v2961_v54  ;;  %v540_v39 = vmul.f32 %v2379_v13, %v2961_v54  ;;  %v1947_v22 = vmul.f32 %v1915_v31, %v1851_v10  ;;  %v1519_v49 = vsel %vm368_vm0, %v1517_v56, %v1518_v62 }
  0xb4   : > { %2170 = vst.msk [vmem:[%s2594_s22 + $0x58] sm:$0xff] %vm2158_vm2, %v2137_v41  ;;  %v853_v5 = vmul.f32 %v2385_v17, %v3066_v3  ;;  %v1097_v51 = vmul.f32 %v2387_v18, %v3066_v3  ;;  %v1364_v45 = vadd.f32 %v1332_v27, %v1296_v7  ;;  %v1763_v60 = vsel %vm613_vm1, %v1761_v6, %v1762_v47 }
  0xb5   : > { %v407_v9 = vrot.slane %v295_v35, 1  ;;  %v652_v54 = vrot.slane %v540_v39, 2  ;;  %v1979_v52 = vmul.f32 %v1947_v22, %v1851_v10  ;;  %v1409_v26 = vmul.f32 %v2400_v25, %v3172_v42 }
  0xb6   : > { %v964_v63 = vrot.slane %v853_v5, 1  ;;  %v1208_v24 = vrot.slane %v1097_v51, 2  ;;  %v1608_v59 = vadd.f32 %v1519_v49, %v1364_v45  ;;  %v1653_v15 = vmul.f32 %v2976_v50, %v3172_v42 }
  0xb7   : > { %v408_v1 = vsel %vm368_vm0, %v405_v30, %v407_v9  ;;  %v653_v46 = vsel %vm613_vm1, %v650_v61, %v652_v54  ;;  %v2011_v44 = vadd.f32 %v1979_v52, %v1851_v10  ;;  %v777_v29 = vmul.f32 %v2383_v16, %v3031_v8 }
  0xb8   : > { %v496_v32 = vadd.f32 %v408_v1, %v219_v38  ;;  %v1333_v4 = vmul.f32 %v2389_v19, %v3134_v33  ;;  %v3186_v0 = vadd.f32 %v1763_v60, %v1608_v59  ;;  %v965_v14 = vsel %vm368_vm0, %v962_v2, %v964_v63 }
  0xb9   : > { %v2292_v34 = vpop.eup %2291  ;;  %v1209_v30 = vsel %vm613_vm1, %v1206_v48, %v1208_v24  ;;  %v1520_v40 = vrot.slane %v1409_v26, 1  ;;  %v2043_v23 = vmul.f32 0.7978846, %v2011_v44  ;;  %v296_v21 = vmul.f32 %v2377_v12, %v3023_v43  ;;  %v3230_v26 = vld [vmem:[%s2373_s16 + $0xf0] sm:$0xff] }
  0xba   : > { %v2106_v61 = vadd.f32 1.0, %v2292_v34  ;;  %v741_v55 = vadd.f32 %v653_v46, %v496_v32  ;;  %v1916_v56 = vmul.f32 0.044715, %v3186_v0  ;;  %v1764_v10 = vrot.slane %v1653_v15, 2  ;;  %v3237_v15 = vld [vmem:[%s2373_s16 + $0xf8] sm:$0xff] }
  0xbb   : > { %v1521_v53 = vsel %vm368_vm0, %v1518_v62, %v1520_v40  ;;  %v220_v58 = vmul.f32 %v2375_v11, %v3023_v43  ;;  %2293 = vtanh.f32 %v2043_v23  ;;  %v3198_v48 = vmul.f32 %v2377_v12, %v3031_v8 }
  0xbc   : > { %v2138_v28 = vmul.f32 %v2106_v61, %v1882_v37  ;;  %v809_v2 = vadd.f32 %v777_v29, %v741_v55  ;;  %v1948_v27 = vmul.f32 %v1916_v56, %v3186_v0  ;;  %v409_v6 = vrot.slane %v296_v21, 1 }
  0xbd   : > { %v541_v41 = vmul.f32 %v2379_v13, %v3023_v43  ;;  %v3205_v62 = vmul.f32 %v2379_v13, %v3031_v8  ;;  %v410_v37 = vrot.slane %v3198_v48, 1  ;;  %v778_v38 = vmul.f32 %v2383_v16, %v3129_v57 }
  0xbe   : > { %2171 = vst.msk [vmem:[%s2594_s22 + $0x60] sm:$0xff] %vm2158_vm2, %v2138_v28  ;;  %v1053_v31 = vadd.f32 %v965_v14, %v809_v2  ;;  %v854_v7 = vmul.f32 %v2385_v17, %v3129_v57  ;;  %v1980_v35 = vmul.f32 %v1948_v27, %v3186_v0  ;;  %v3218_v22 = vmul.f32 %v2385_v17, %v3134_v33 }
  0xbf   : > { %v654_v39 = vrot.slane %v541_v41, 2  ;;  %v655_v43 = vrot.slane %v3205_v62, 2  ;;  %v411_v5 = vsel %vm368_vm0, %v409_v6, %v410_v37  ;;  %v1098_v45 = vmul.f32 %v2387_v18, %v3129_v57 }
  0xc0   : > { %v1297_v49 = vadd.f32 %v1209_v30, %v1053_v31  ;;  %v966_v51 = vrot.slane %v854_v7, 1  ;;  %v2012_v60 = vadd.f32 %v1980_v35, %v3186_v0  ;;  %v497_v9 = vadd.f32 %v411_v5, %v220_v58 }
  0xc1   : > { %v656_v54 = vsel %vm613_vm1, %v654_v39, %v655_v43  ;;  %v967_v52 = vrot.slane %v3218_v22, 1  ;;  %v1765_v24 = vsel %vm613_vm1, %v1762_v47, %v1764_v10  ;;  %v3234_v59 = vmul.f32 %v2387_v18, %v3134_v33  ;;  %v3272_v22 = vld [vmem:[%s2373_s16 + $0x100] sm:$0x3] }
  0xc2   : > { %v1365_v63 = vadd.f32 %v1333_v4, %v1297_v49  ;;  %v1210_v1 = vrot.slane %v1098_v45, 2  ;;  %v2044_v46 = vmul.f32 0.7978846, %v2012_v60  ;;  %v742_v44 = vadd.f32 %v656_v54, %v497_v9 }
  0xc3   : > { %v968_v32 = vsel %vm368_vm0, %v966_v51, %v967_v52  ;;  %v1410_v29 = vmul.f32 %v2400_v25, %v3230_v26  ;;  %v1211_v36 = vrot.slane %v3234_v59, 2  ;;  %v1411_v47 = vmul.f32 %v2400_v25, %v3237_v15 }
  0xc4   : > { %v1609_v4 = vadd.f32 %v1521_v53, %v1365_v63  ;;  %v1654_v34 = vmul.f32 %v2976_v50, %v3230_v26  ;;  %2295 = vtanh.f32 %v2044_v46  ;;  %v810_v14 = vadd.f32 %v778_v38, %v742_v44 }
  0xc5   : > { %v1522_v30 = vrot.slane %v1410_v29, 1  ;;  %v3249_v40 = vmul.f32 %v2976_v50, %v3237_v15  ;;  %v2294_v61 = vpop.eup %2293  ;;  %v1212_v55 = vsel %vm613_vm1, %v1210_v1, %v1211_v36  ;;  %v1523_v21 = vrot.slane %v1411_v47, 1 }
  0xc6   : > { %v1853_v23 = vadd.f32 %v1765_v24, %v1609_v4  ;;  %v1766_v56 = vrot.slane %v1654_v34, 2  ;;  %v2107_v53 = vadd.f32 1.0, %v2294_v61  ;;  %v1054_v10 = vadd.f32 %v968_v32, %v810_v14 }
  0xc7   : > { %v1334_v58 = vmul.f32 %v2389_v19, %v3230_v26  ;;  %v1767_v28 = vrot.slane %v3249_v40, 2  ;;  %v1884_v2 = vmul.f32 0.5, %v3186_v0  ;;  %v221_v27 = vmul.f32 %v2375_v11, %v3031_v8 }
  0xc8   : > { %v1917_v48 = vmul.f32 0.044715, %v1853_v23  ;;  %v298_v6 = vmul.f32 %v2377_v12, %v3066_v3  ;;  %v2139_v41 = vmul.f32 %v2107_v53, %v3155_v20  ;;  %v1298_v62 = vadd.f32 %v1212_v55, %v1054_v10 }
  0xc9   : > { %v1524_v31 = vsel %vm368_vm0, %v1522_v30, %v1523_v21  ;;  %v543_v38 = vmul.f32 %v2379_v13, %v3066_v3  ;;  %v1768_v0 = vsel %vm613_vm1, %v1766_v56, %v1767_v28  ;;  %v856_v8 = vmul.f32 %v2385_v17, %v3172_v42 }
  0xca   : > { %v1949_v7 = vmul.f32 %v1917_v48, %v1853_v23  ;;  %v412_v35 = vrot.slane %v298_v6, 1  ;;  %2172 = vst.msk [vmem:[%s2594_s22 + $0x68] sm:$0xff] %vm2158_vm2, %v2139_v41  ;;  %v1366_v39 = vadd.f32 %v1334_v58, %v1298_v62  ;;  %v779_v49 = vmul.f32 %v2383_v16, %v3134_v33 }
  0xcb   : > { %v657_v20 = vrot.slane %v543_v38, 2  ;;  %v1100_v3 = vmul.f32 %v2387_v18, %v3172_v42  ;;  %v969_v45 = vrot.slane %v856_v8, 1  ;;  %v1412_v60 = vmul.f32 %v2400_v25, %v3272_v22 }
  0xcc   : > { %v1981_v5 = vmul.f32 %v1949_v7, %v1853_v23  ;;  %v413_v51 = vsel %vm368_vm0, %v410_v37, %v412_v35  ;;  %v1610_v9 = vadd.f32 %v1524_v31, %v1366_v39  ;;  %v3282_v59 = vmul.f32 0.5, %v1853_v23 }
  0xcd   : > { %v498_v54 = vadd.f32 %v413_v51, %v221_v27  ;;  %v658_v63 = vsel %vm613_vm1, %v655_v43, %v657_v20  ;;  %v1213_v24 = vrot.slane %v1100_v3, 2  ;;  %v1525_v46 = vrot.slane %v1412_v60, 1 }
  0xce   : > { %v2013_v1 = vadd.f32 %v1981_v5, %v1853_v23  ;;  %v1656_v44 = vmul.f32 %v2976_v50, %v3272_v22  ;;  %v2296_v32 = vpop.eup %2295  ;;  %v3286_v29 = vadd.f32 %v1768_v0, %v1610_v9  ;;  %v970_v4 = vsel %vm368_vm0, %v967_v52, %v969_v45 }
  0xcf   : > { %v743_v37 = vadd.f32 %v658_v63, %v498_v54  ;;  %v1335_v47 = vmul.f32 %v2389_v19, %v3237_v15  ;;  %v2108_v34 = vadd.f32 1.0, %v2296_v32  ;;  %v1214_v14 = vsel %vm613_vm1, %v1211_v36, %v1213_v24  ;;  %v3336_v63 = vld [vmem:[%s2373_s16 + $0x108] sm:$0xff]  ;;  %v3339_v24 = vld [vmem:[%s2373_s16 + $0x110] sm:$0xff] }
  0xd0   : > { %v2045_v43 = vmul.f32 0.7978846, %v2013_v1  ;;  %v222_v30 = vmul.f32 %v2375_v11, %v3129_v57  ;;  %v1918_v61 = vmul.f32 0.044715, %v3286_v29  ;;  %v1526_v55 = vsel %vm368_vm0, %v1523_v21, %v1525_v46 }
  0xd1   : > { %v811_v23 = vadd.f32 %v779_v49, %v743_v37  ;;  %v299_v56 = vmul.f32 %v2377_v12, %v3129_v57  ;;  %v2140_v52 = vmul.f32 %v2108_v34, %v1884_v2  ;;  %v1769_v53 = vrot.slane %v1656_v44, 2 }
  0xd2   : > { %2297 = vtanh.f32 %v2045_v43  ;;  %v3300_v10 = vmul.f32 %v2377_v12, %v3134_v33  ;;  %v1950_v36 = vmul.f32 %v1918_v61, %v3286_v29  ;;  %v544_v27 = vmul.f32 %v2379_v13, %v3129_v57 }
  0xd3   : > { %v1055_v58 = vadd.f32 %v970_v4, %v811_v23  ;;  %v414_v48 = vrot.slane %v299_v56, 1  ;;  %2173 = vst.msk [vmem:[%s2594_s22 + $0x70] sm:$0xff] %vm2158_vm2, %v2140_v52  ;;  %v3310_v2 = vmul.f32 %v2379_v13, %v3134_v33  ;;  %v780_v6 = vmul.f32 %v2383_v16, %v3230_v26 }
  0xd4   : > { %v415_v21 = vrot.slane %v3300_v10, 1  ;;  %v857_v41 = vmul.f32 %v2385_v17, %v3230_v26  ;;  %v1982_v62 = vmul.f32 %v1950_v36, %v3286_v29  ;;  %v659_v38 = vrot.slane %v544_v27, 2 }
  0xd5   : > { %v1299_v31 = vadd.f32 %v1214_v14, %v1055_v58  ;;  %v3319_v57 = vmul.f32 %v2385_v17, %v3237_v15  ;;  %v660_v0 = vrot.slane %v3310_v2, 2  ;;  %v1101_v8 = vmul.f32 %v2387_v18, %v3230_v26 }
  0xd6   : > { %v416_v7 = vsel %vm368_vm0, %v414_v48, %v415_v21  ;;  %v971_v35 = vrot.slane %v857_v41, 1  ;;  %v2014_v39 = vadd.f32 %v1982_v62, %v3286_v29  ;;  %v1770_v5 = vsel %vm613_vm1, %v1767_v28, %v1769_v53 }
  0xd7   : > { %v1367_v20 = vadd.f32 %v1335_v47, %v1299_v31  ;;  %v499_v49 = vadd.f32 %v416_v7, %v222_v30  ;;  %v972_v3 = vrot.slane %v3319_v57, 1  ;;  %v661_v51 = vsel %vm613_vm1, %v659_v38, %v660_v0 }
  0xd8   : > { %v3333_v45 = vmul.f32 %v2387_v18, %v3237_v15  ;;  %v1215_v60 = vrot.slane %v1101_v8, 2  ;;  %v2046_v9 = vmul.f32 0.7978846, %v2014_v39  ;;  %v1413_v46 = vmul.f32 %v2400_v25, %v3336_v63 }
  0xd9   : > { %v1611_v54 = vadd.f32 %v1526_v55, %v1367_v20  ;;  %v744_v1 = vadd.f32 %v661_v51, %v499_v49  ;;  %v973_v40 = vsel %vm368_vm0, %v971_v35, %v972_v3  ;;  %v1414_v44 = vmul.f32 %v2400_v25, %v3339_v24 }
  0xda   : > { %v1216_v28 = vrot.slane %v3333_v45, 2  ;;  %v1657_v32 = vmul.f32 %v2976_v50, %v3336_v63  ;;  %2299 = vtanh.f32 %v2046_v9  ;;  %v3353_v47 = vmul.f32 %v2976_v50, %v3339_v24 }
  0xdb   : > { %v1855_v37 = vadd.f32 %v1770_v5, %v1611_v54  ;;  %v812_v4 = vadd.f32 %v780_v6, %v744_v1  ;;  %v1527_v14 = vrot.slane %v1413_v46, 1  ;;  %v1528_v30 = vrot.slane %v1414_v44, 1 }
  0xdc   : > { %v2298_v34 = vpop.eup %2297  ;;  %v1217_v43 = vsel %vm613_vm1, %v1215_v60, %v1216_v28  ;;  %v1771_v61 = vrot.slane %v1657_v32, 2  ;;  %v1336_v52 = vmul.f32 %v2389_v19, %v3336_v63  ;;  %v1886_v53 = vmul.f32 0.5, %v3286_v29 }
  0xdd   : > { %v2109_v23 = vadd.f32 1.0, %v2298_v34  ;;  %v1919_v55 = vmul.f32 0.044715, %v1855_v37  ;;  %v1056_v56 = vadd.f32 %v973_v40, %v812_v4  ;;  %v1772_v10 = vrot.slane %v3353_v47, 2 }
  0xde   : > { %v223_v36 = vmul.f32 %v2375_v11, %v3134_v33  ;;  %v301_v58 = vmul.f32 %v2377_v12, %v3172_v42  ;;  %v546_v6 = vmul.f32 %v2379_v13, %v3172_v42  ;;  %v1529_v41 = vsel %vm368_vm0, %v1527_v14, %v1528_v30 }
  0xdf   : > { %v2141_v48 = vmul.f32 %v2109_v23, %v3282_v59  ;;  %v1951_v27 = vmul.f32 %v1919_v55, %v1855_v37  ;;  %v1300_v2 = vadd.f32 %v1217_v43, %v1056_v56  ;;  %v1773_v29 = vsel %vm613_vm1, %v1771_v61, %v1772_v10  ;;  %v3376_v59 = vld [vmem:[%s2373_s16 + $0x118] sm:$0x3] }
  0xe0   : > { %v417_v62 = vrot.slane %v301_v58, 1  ;;  %v859_v33 = vmul.f32 %v2385_v17, %v3272_v22  ;;  %v662_v7 = vrot.slane %v546_v6, 2  ;;  %v1103_v42 = vmul.f32 %v2387_v18, %v3272_v22 }
  0xe1   : > { %2174 = vst.msk [vmem:[%s2594_s22 + $0x78] sm:$0xff] %vm2158_vm2, %v2141_v48  ;;  %v1983_v31 = vmul.f32 %v1951_v27, %v1855_v37  ;;  %v1368_v38 = vadd.f32 %v1336_v52, %v1300_v2  ;;  %v781_v8 = vmul.f32 %v2383_v16, %v3237_v15  ;;  %v1415_v20 = vmul.f32 %v2400_v25, %v3376_v59 }
  0xe2   : > { %v418_v35 = vsel %vm368_vm0, %v415_v21, %v417_v62  ;;  %v974_v39 = vrot.slane %v859_v33, 1  ;;  %v663_v45 = vsel %vm613_vm1, %v660_v0, %v662_v7  ;;  %v3386_v60 = vmul.f32 0.5, %v1855_v37 }
  0xe3   : > { %v2015_v49 = vadd.f32 %v1983_v31, %v1855_v37  ;;  %v1612_v5 = vadd.f32 %v1529_v41, %v1368_v38  ;;  %v500_v51 = vadd.f32 %v418_v35, %v223_v36  ;;  %v1218_v9 = vrot.slane %v1103_v42, 2 }
  0xe4   : > { %v1530_v54 = vrot.slane %v1415_v20, 1  ;;  %v1659_v1 = vmul.f32 %v2976_v50, %v3376_v59  ;;  %v2300_v21 = vpop.eup %2299  ;;  %v1337_v32 = vmul.f32 %v2389_v19, %v3339_v24  ;;  %v975_v0 = vsel %vm368_vm0, %v972_v3, %v974_v39 }
  0xe5   : > { %v2047_v40 = vmul.f32 0.7978846, %v2015_v49  ;;  %v1856_v46 = vadd.f32 %v1773_v29, %v1612_v5  ;;  %v745_v44 = vadd.f32 %v663_v45, %v500_v51  ;;  %v2110_v4 = vadd.f32 1.0, %v2300_v21  ;;  %v3441_v45 = vld [vmem:[%s2373_s16 + $0x128] sm:$0xff] }
  0xe6   : > { %v1219_v37 = vsel %vm613_vm1, %v1216_v28, %v1218_v9  ;;  %v224_v34 = vmul.f32 %v2375_v11, %v3230_v26  ;;  %v1531_v61 = vsel %vm368_vm0, %v1528_v30, %v1530_v54  ;;  %v1774_v55 = vrot.slane %v1659_v1, 2 }
  0xe7   : > { %2301 = vtanh.f32 %v2047_v40  ;;  %v1920_v43 = vmul.f32 0.044715, %v1856_v46  ;;  %v813_v14 = vadd.f32 %v781_v8, %v745_v44  ;;  %v2142_v23 = vmul.f32 %v2110_v4, %v1886_v53  ;;  %v3433_v8 = vld [vmem:[%s2373_s16 + $0x120] sm:$0xff] }
  0xe8   : > { %v302_v56 = vmul.f32 %v2377_v12, %v3230_v26  ;;  %v3403_v57 = vmul.f32 %v2377_v12, %v3237_v15  ;;  %v547_v28 = vmul.f32 %v2379_v13, %v3230_v26  ;;  %v3409_v36 = vmul.f32 %v2379_v13, %v3237_v15 }
  0xe9   : > { %v1952_v3 = vmul.f32 %v1920_v43, %v1856_v46  ;;  %v1057_v52 = vadd.f32 %v975_v0, %v813_v14  ;;  %2175 = vst.msk [vmem:[%s2594_s22 + $0x80] sm:$0xff] %vm2158_vm2, %v2142_v23  ;;  %v782_v58 = vmul.f32 %v2383_v16, %v3336_v63  ;;  %v860_v48 = vmul.f32 %v2385_v17, %v3336_v63 }
  0xea   : > { %v419_v30 = vrot.slane %v302_v56, 1  ;;  %v420_v53 = vrot.slane %v3403_v57, 1  ;;  %v664_v6 = vrot.slane %v547_v28, 2  ;;  %v665_v26 = vrot.slane %v3409_v36, 2 }
  0xeb   : > { %v1984_v27 = vmul.f32 %v1952_v3, %v1856_v46  ;;  %v1301_v2 = vadd.f32 %v1219_v37, %v1057_v52  ;;  %v3424_v29 = vmul.f32 %v2385_v17, %v3339_v24  ;;  %v976_v62 = vrot.slane %v860_v48, 1 }
  0xec   : > { %v421_v41 = vsel %vm368_vm0, %v419_v30, %v420_v53  ;;  %v1104_v33 = vmul.f32 %v2387_v18, %v3336_v63  ;;  %v666_v42 = vsel %vm613_vm1, %v664_v6, %v665_v26  ;;  %v1775_v35 = vsel %vm613_vm1, %v1772_v10, %v1774_v55 }
  0xed   : > { %v2016_v31 = vadd.f32 %v1984_v27, %v1856_v46  ;;  %v1369_v38 = vadd.f32 %v1337_v32, %v1301_v2  ;;  %v501_v7 = vadd.f32 %v421_v41, %v224_v34  ;;  %v977_v39 = vrot.slane %v3424_v29, 1  ;;  %v3476_v29 = vld [vmem:[%s2373_s16 + $0x130] sm:$0x3] }
  0xee   : > { %v3438_v20 = vmul.f32 %v2387_v18, %v3339_v24  ;;  %v1220_v49 = vrot.slane %v1104_v33, 2  ;;  %v1416_v54 = vmul.f32 %v2400_v25, %v3433_v8  ;;  %v1417_v1 = vmul.f32 %v2400_v25, %v3441_v45 }
  0xef   : > { %v2048_v5 = vmul.f32 0.7978846, %v2016_v31  ;;  %v1613_v51 = vadd.f32 %v1531_v61, %v1369_v38  ;;  %v746_v9 = vadd.f32 %v666_v42, %v501_v7  ;;  %v978_v47 = vsel %vm368_vm0, %v976_v62, %v977_v39 }
  0xf0   : > { %v1221_v10 = vrot.slane %v3438_v20, 2  ;;  %v1660_v21 = vmul.f32 %v2976_v50, %v3433_v8  ;;  %v1532_v4 = vrot.slane %v1416_v54, 1  ;;  %v1533_v34 = vrot.slane %v1417_v1, 1 }
  0xf1   : > { %v2302_v40 = vpop.eup %2301  ;;  %2303 = vtanh.f32 %v2048_v5  ;;  %v1857_v44 = vadd.f32 %v1775_v35, %v1613_v51  ;;  %v814_v32 = vadd.f32 %v782_v58, %v746_v9  ;;  %v3454_v43 = vmul.f32 %v2976_v50, %v3441_v45 }
  0xf2   : > { %v2111_v0 = vadd.f32 1.0, %v2302_v40  ;;  %v1222_v37 = vsel %vm613_vm1, %v1220_v49, %v1221_v10  ;;  %v1888_v14 = vmul.f32 0.5, %v1856_v46  ;;  %v1338_v55 = vmul.f32 %v2389_v19, %v3433_v8 }
  0xf3   : > { %v1921_v61 = vmul.f32 0.044715, %v1857_v44  ;;  %v1058_v23 = vadd.f32 %v978_v47, %v814_v32  ;;  %v3459_v3 = vmul.f32 0.5, %v1857_v44  ;;  %v1776_v52 = vrot.slane %v1660_v21, 2 }
  0xf4   : > { %v2143_v56 = vmul.f32 %v2111_v0, %v3386_v60  ;;  %v1777_v28 = vrot.slane %v3454_v43, 2  ;;  %v304_v58 = vmul.f32 %v2377_v12, %v3272_v22  ;;  %v549_v46 = vmul.f32 %v2379_v13, %v3272_v22 }
  0xf5   : > { %v1953_v36 = vmul.f32 %v1921_v61, %v1857_v44  ;;  %v1302_v30 = vadd.f32 %v1222_v37, %v1058_v23  ;;  %v1534_v48 = vsel %vm368_vm0, %v1532_v4, %v1533_v34  ;;  %v225_v60 = vmul.f32 %v2375_v11, %v3237_v15 }
  0xf6   : > { %2176 = vst.msk [vmem:[%s2594_s22 + $0x88] sm:$0xff] %vm2158_vm2, %v2143_v56  ;;  %v862_v27 = vmul.f32 %v2385_v17, %v3376_v59  ;;  %v1106_v2 = vmul.f32 %v2387_v18, %v3376_v59  ;;  %v422_v62 = vrot.slane %v304_v58, 1  ;;  %v667_v33 = vrot.slane %v549_v46, 2 }
  0xf7   : > { %v1985_v6 = vmul.f32 %v1953_v36, %v1857_v44  ;;  %v1370_v41 = vadd.f32 %v1338_v55, %v1302_v30  ;;  %v1778_v22 = vsel %vm613_vm1, %v1776_v52, %v1777_v28  ;;  %v1418_v15 = vmul.f32 %v2400_v25, %v3476_v29 }
  0xf8   : > { %v979_v31 = vrot.slane %v862_v27, 1  ;;  %v1223_v38 = vrot.slane %v1106_v2, 2  ;;  %v423_v35 = vsel %vm368_vm0, %v420_v53, %v422_v62  ;;  %v668_v20 = vsel %vm613_vm1, %v665_v26, %v667_v33 }
  0xf9   : > { %v2017_v7 = vadd.f32 %v1985_v6, %v1857_v44  ;;  %v1614_v42 = vadd.f32 %v1534_v48, %v1370_v41  ;;  %v502_v49 = vadd.f32 %v423_v35, %v225_v60  ;;  %v783_v5 = vmul.f32 %v2383_v16, %v3339_v24  ;;  %v3546_v35 = vld [vmem:[%s2373_s16 + $0x140] sm:$0xff] }
  0xfa   : > { %v1339_v51 = vmul.f32 %v2389_v19, %v3441_v45  ;;  %v1535_v9 = vrot.slane %v1418_v15, 1  ;;  %v980_v21 = vsel %vm368_vm0, %v977_v39, %v979_v31  ;;  %v1662_v57 = vmul.f32 %v2976_v50, %v3476_v29 }
  0xfb   : > { %v2304_v54 = vpop.eup %2303  ;;  %v2049_v47 = vmul.f32 0.7978846, %v2017_v7  ;;  %v3491_v1 = vadd.f32 %v1778_v22, %v1614_v42  ;;  %v747_v26 = vadd.f32 %v668_v20, %v502_v49  ;;  %v1224_v40 = vsel %vm613_vm1, %v1221_v10, %v1223_v38  ;;  %v3541_v38 = vld [vmem:[%s2373_s16 + $0x138] sm:$0xff] }
  0xfc   : > { %v2112_v53 = vadd.f32 1.0, %v2304_v54  ;;  %v305_v44 = vmul.f32 %v2377_v12, %v3336_v63  ;;  %v1536_v4 = vsel %vm368_vm0, %v1533_v34, %v1535_v9  ;;  %v226_v0 = vmul.f32 %v2375_v11, %v3336_v63 }
  0xfd   : > { %2305 = vtanh.f32 %v2049_v47  ;;  %v1922_v32 = vmul.f32 0.044715, %v3491_v1  ;;  %v815_v37 = vadd.f32 %v783_v5, %v747_v26  ;;  %v3505_v50 = vmul.f32 %v2377_v12, %v3339_v24 }
  0xfe   : > { %v2144_v39 = vmul.f32 %v2112_v53, %v1888_v14  ;;  %v424_v61 = vrot.slane %v305_v44, 1  ;;  %v1779_v23 = vrot.slane %v1662_v57, 2  ;;  %v550_v55 = vmul.f32 %v2379_v13, %v3336_v63 }
  0xff   : > { %v1954_v10 = vmul.f32 %v1922_v32, %v3491_v1  ;;  %v3512_v56 = vmul.f32 %v2379_v13, %v3339_v24  ;;  %v1059_v34 = vadd.f32 %v980_v21, %v815_v37  ;;  %v425_v14 = vrot.slane %v3505_v50, 1 }
 0x100   : > { %2177 = vst.msk [vmem:[%s2594_s22 + $0x90] sm:$0xff] %vm2158_vm2, %v2144_v39  ;;  %v784_v52 = vmul.f32 %v2383_v16, %v3433_v8  ;;  %v863_v36 = vmul.f32 %v2385_v17, %v3433_v8  ;;  %v669_v58 = vrot.slane %v550_v55, 2  ;;  %v3525_v46 = vmul.f32 %v2385_v17, %v3441_v45 }
 0x101   : > { %v1986_v30 = vmul.f32 %v1954_v10, %v3491_v1  ;;  %v670_v63 = vrot.slane %v3512_v56, 2  ;;  %v1303_v48 = vadd.f32 %v1224_v40, %v1059_v34  ;;  %v426_v60 = vsel %vm368_vm0, %v424_v61, %v425_v14 }
 0x102   : > { %v981_v27 = vrot.slane %v863_v36, 1  ;;  %v1107_v2 = vmul.f32 %v2387_v18, %v3433_v8  ;;  %v503_v41 = vadd.f32 %v426_v60, %v226_v0  ;;  %v982_v33 = vrot.slane %v3525_v46, 1  ;;  %v3589_v60 = vld [vmem:[%s2373_s16 + $0x148] sm:$0x3] }
 0x103   : > { %v2018_v6 = vadd.f32 %v1986_v30, %v3491_v1  ;;  %v671_v62 = vsel %vm613_vm1, %v669_v58, %v670_v63  ;;  %v1371_v22 = vadd.f32 %v1339_v51, %v1303_v48  ;;  %v1780_v31 = vsel %vm613_vm1, %v1777_v28, %v1779_v23  ;;  %v3556_v28 = vld [vmem:[%s4017_s1 + $0x8] ss:$0 sm:$0xff] }
 0x104   : > { %v1108_v15 = vmul.f32 %v2387_v18, %v3441_v45  ;;  %v1225_v7 = vrot.slane %v1107_v2, 2  ;;  %v748_v20 = vadd.f32 %v671_v62, %v503_v41  ;;  %v983_v49 = vsel %vm368_vm0, %v981_v27, %v982_v33 }
 0x105   : > { %v2050_v42 = vmul.f32 0.7978846, %v2018_v6  ;;  %v1419_v5 = vmul.f32 %v2400_v25, %v3541_v38  ;;  %v1615_v51 = vadd.f32 %v1536_v4, %v1371_v22  ;;  %v1420_v43 = vmul.f32 %v2400_v25, %v3546_v35 }
 0x106   : > { %v1226_v9 = vrot.slane %v1108_v15, 2  ;;  %v1663_v54 = vmul.f32 %v3556_v28, %v3541_v38  ;;  %v816_v21 = vadd.f32 %v784_v52, %v748_v20  ;;  %v3562_v53 = vmul.f32 %v3556_v28, %v3546_v35 }
 0x107   : > { %v2306_v47 = vpop.eup %2305  ;;  %2307 = vtanh.f32 %v2050_v42  ;;  %v1537_v57 = vrot.slane %v1419_v5, 1  ;;  %v1859_v40 = vadd.f32 %v1780_v31, %v1615_v51  ;;  %v1538_v32 = vrot.slane %v1420_v43, 1 }
 0x108   : > { %v2113_v26 = vadd.f32 1.0, %v2306_v47  ;;  %v1227_v44 = vsel %vm613_vm1, %v1225_v7, %v1226_v9  ;;  %v1060_v4 = vadd.f32 %v983_v49, %v816_v21  ;;  %v1340_v0 = vmul.f32 %v2389_v19, %v3541_v38 }
 0x109   : > { %v1781_v39 = vrot.slane %v1663_v54, 2  ;;  %v1782_v37 = vrot.slane %v3562_v53, 2  ;;  %v1890_v10 = vmul.f32 0.5, %v3491_v1  ;;  %v1923_v23 = vmul.f32 0.044715, %v1859_v40 }
 0x10a   : > { %v2145_v61 = vmul.f32 %v2113_v26, %v3459_v3  ;;  %v227_v55 = vmul.f32 %v2375_v11, %v3339_v24  ;;  %v3572_v34 = vmul.f32 0.5, %v1859_v40  ;;  %v1304_v52 = vadd.f32 %v1227_v44, %v1060_v4 }
 0x10b   : > { %v307_v36 = vmul.f32 %v2377_v12, %v3376_v59  ;;  %v552_v30 = vmul.f32 %v2379_v13, %v3376_v59  ;;  %v1955_v58 = vmul.f32 %v1923_v23, %v1859_v40  ;;  %v1539_v3 = vsel %vm368_vm0, %v1537_v57, %v1538_v32 }
 0x10c   : > { %2178 = vst.msk [vmem:[%s2594_s22 + $0x98] sm:$0xff] %vm2158_vm2, %v2145_v61  ;;  %v865_v1 = vmul.f32 %v2385_v17, %v3476_v29  ;;  %v1109_v24 = vmul.f32 %v2387_v18, %v3476_v29  ;;  %v1372_v46 = vadd.f32 %v1340_v0, %v1304_v52  ;;  %v1783_v48 = vsel %vm613_vm1, %v1781_v39, %v1782_v37 }
 0x10d   : > { %v427_v27 = vrot.slane %v307_v36, 1  ;;  %v672_v59 = vrot.slane %v552_v30, 2  ;;  %v1987_v2 = vmul.f32 %v1955_v58, %v1859_v40  ;;  %v1421_v62 = vmul.f32 %v2400_v25, %v3589_v60 }
 0x10e   : > { %v984_v6 = vrot.slane %v865_v1, 1  ;;  %v1228_v41 = vrot.slane %v1109_v24, 2  ;;  %v1616_v22 = vadd.f32 %v1539_v3, %v1372_v46  ;;  %v1665_v7 = vmul.f32 %v3556_v28, %v3589_v60 }
 0x10f   : > { %v428_v31 = vsel %vm368_vm0, %v425_v14, %v427_v27  ;;  %v673_v15 = vsel %vm613_vm1, %v670_v63, %v672_v59  ;;  %v2019_v42 = vadd.f32 %v1987_v2, %v1859_v40  ;;  %v785_v49 = vmul.f32 %v2383_v16, %v3441_v45 }
 0x110   : > { %v504_v20 = vadd.f32 %v428_v31, %v227_v55  ;;  %v1341_v5 = vmul.f32 %v2389_v19, %v3546_v35  ;;  %v3605_v43 = vadd.f32 %v1783_v48, %v1616_v22  ;;  %v985_v50 = vsel %vm368_vm0, %v982_v33, %v984_v6 }
 0x111   : > { %v2308_v51 = vpop.eup %2307  ;;  %v1229_v56 = vsel %vm613_vm1, %v1226_v9, %v1228_v41  ;;  %v1540_v14 = vrot.slane %v1421_v62, 1  ;;  %v2051_v54 = vmul.f32 0.7978846, %v2019_v42  ;;  %v308_v21 = vmul.f32 %v2377_v12, %v3433_v8  ;;  %v3649_v62 = vld [vmem:[%s2373_s16 + $0x150] sm:$0xff] }
 0x112   : > { %v2114_v63 = vadd.f32 1.0, %v2308_v51  ;;  %v749_v47 = vadd.f32 %v673_v15, %v504_v20  ;;  %v1924_v57 = vmul.f32 0.044715, %v3605_v43  ;;  %v1784_v40 = vrot.slane %v1665_v7, 2  ;;  %v3656_v7 = vld [vmem:[%s2373_s16 + $0x158] sm:$0xff] }
 0x113   : > { %v1541_v26 = vsel %vm368_vm0, %v1538_v32, %v1540_v14  ;;  %v228_v44 = vmul.f32 %v2375_v11, %v3433_v8  ;;  %2309 = vtanh.f32 %v2051_v54  ;;  %v3617_v9 = vmul.f32 %v2377_v12, %v3441_v45 }
 0x114   : > { %v2146_v4 = vmul.f32 %v2114_v63, %v1890_v10  ;;  %v817_v33 = vadd.f32 %v785_v49, %v749_v47  ;;  %v1956_v0 = vmul.f32 %v1924_v57, %v3605_v43  ;;  %v429_v39 = vrot.slane %v308_v21, 1 }
 0x115   : > { %v553_v61 = vmul.f32 %v2379_v13, %v3433_v8  ;;  %v3624_v32 = vmul.f32 %v2379_v13, %v3441_v45  ;;  %v430_v10 = vrot.slane %v3617_v9, 1  ;;  %v786_v55 = vmul.f32 %v2383_v16, %v3541_v38 }
 0x116   : > { %2179 = vst.msk [vmem:[%s2594_s22 + $0xa0] sm:$0xff] %vm2158_vm2, %v2146_v4  ;;  %v1061_v23 = vadd.f32 %v985_v50, %v817_v33  ;;  %v866_v52 = vmul.f32 %v2385_v17, %v3541_v38  ;;  %v1988_v36 = vmul.f32 %v1956_v0, %v3605_v43  ;;  %v3637_v58 = vmul.f32 %v2385_v17, %v3546_v35 }
 0x117   : > { %v674_v30 = vrot.slane %v553_v61, 2  ;;  %v675_v8 = vrot.slane %v3624_v32, 2  ;;  %v431_v1 = vsel %vm368_vm0, %v429_v39, %v430_v10  ;;  %v1110_v46 = vmul.f32 %v2387_v18, %v3541_v38 }
 0x118   : > { %v1305_v3 = vadd.f32 %v1229_v56, %v1061_v23  ;;  %v986_v24 = vrot.slane %v866_v52, 1  ;;  %v2020_v48 = vadd.f32 %v1988_v36, %v3605_v43  ;;  %v505_v27 = vadd.f32 %v431_v1, %v228_v44 }
 0x119   : > { %v676_v59 = vsel %vm613_vm1, %v674_v30, %v675_v8  ;;  %v987_v2 = vrot.slane %v3637_v58, 1  ;;  %v1785_v41 = vsel %vm613_vm1, %v1782_v37, %v1784_v40  ;;  %v3653_v22 = vmul.f32 %v2387_v18, %v3546_v35  ;;  %v3691_v58 = vld [vmem:[%s2373_s16 + $0x160] sm:$0x3] }
 0x11a   : > { %v1373_v6 = vadd.f32 %v1341_v5, %v1305_v3  ;;  %v1230_v31 = vrot.slane %v1110_v46, 2  ;;  %v2052_v15 = vmul.f32 0.7978846, %v2020_v48  ;;  %v750_v42 = vadd.f32 %v676_v59, %v505_v27 }
 0x11b   : > { %v988_v20 = vsel %vm368_vm0, %v986_v24, %v987_v2  ;;  %v1422_v49 = vmul.f32 %v2400_v25, %v3649_v62  ;;  %v1231_v53 = vrot.slane %v3653_v22, 2  ;;  %v1423_v37 = vmul.f32 %v2400_v25, %v3656_v7 }
 0x11c   : > { %v1617_v5 = vadd.f32 %v1541_v26, %v1373_v6  ;;  %v1666_v51 = vmul.f32 %v3556_v28, %v3649_v62  ;;  %2311 = vtanh.f32 %v2052_v15  ;;  %v818_v50 = vadd.f32 %v786_v55, %v750_v42 }
 0x11d   : > { %v1542_v56 = vrot.slane %v1422_v49, 1  ;;  %v3668_v14 = vmul.f32 %v3556_v28, %v3656_v7  ;;  %v2310_v63 = vpop.eup %2309  ;;  %v1232_v47 = vsel %vm613_vm1, %v1230_v31, %v1231_v53  ;;  %v1543_v21 = vrot.slane %v1423_v37, 1 }
 0x11e   : > { %v1861_v54 = vadd.f32 %v1785_v41, %v1617_v5  ;;  %v1786_v57 = vrot.slane %v1666_v51, 2  ;;  %v2115_v26 = vadd.f32 1.0, %v2310_v63  ;;  %v1062_v40 = vadd.f32 %v988_v20, %v818_v50 }
 0x11f   : > { %v1342_v44 = vmul.f32 %v2389_v19, %v3649_v62  ;;  %v1787_v4 = vrot.slane %v3668_v14, 2  ;;  %v1892_v33 = vmul.f32 0.5, %v3605_v43  ;;  %v229_v0 = vmul.f32 %v2375_v11, %v3441_v45 }
 0x120   : > { %v1925_v9 = vmul.f32 0.044715, %v1861_v54  ;;  %v310_v39 = vmul.f32 %v2377_v12, %v3476_v29  ;;  %v2147_v61 = vmul.f32 %v2115_v26, %v3572_v34  ;;  %v1306_v32 = vadd.f32 %v1232_v47, %v1062_v40 }
 0x121   : > { %v1544_v23 = vsel %vm368_vm0, %v1542_v56, %v1543_v21  ;;  %v555_v55 = vmul.f32 %v2379_v13, %v3476_v29  ;;  %v1788_v43 = vsel %vm613_vm1, %v1786_v57, %v1787_v4  ;;  %v868_v45 = vmul.f32 %v2385_v17, %v3589_v60 }
 0x122   : > { %v1957_v52 = vmul.f32 %v1925_v9, %v1861_v54  ;;  %v432_v36 = vrot.slane %v310_v39, 1  ;;  %2180 = vst.msk [vmem:[%s2594_s22 + $0xa8] sm:$0xff] %vm2158_vm2, %v2147_v61  ;;  %v1374_v30 = vadd.f32 %v1342_v44, %v1306_v32  ;;  %v787_v3 = vmul.f32 %v2383_v16, %v3546_v35 }
 0x123   : > { %v677_v34 = vrot.slane %v555_v55, 2  ;;  %v1112_v29 = vmul.f32 %v2387_v18, %v3589_v60  ;;  %v989_v46 = vrot.slane %v868_v45, 1  ;;  %v1424_v48 = vmul.f32 %v2400_v25, %v3691_v58 }
 0x124   : > { %v1989_v1 = vmul.f32 %v1957_v52, %v1861_v54  ;;  %v433_v24 = vsel %vm368_vm0, %v430_v10, %v432_v36  ;;  %v1618_v27 = vadd.f32 %v1544_v23, %v1374_v30  ;;  %v3701_v22 = vmul.f32 0.5, %v1861_v54 }
 0x125   : > { %v506_v59 = vadd.f32 %v433_v24, %v229_v0  ;;  %v678_v6 = vsel %vm613_vm1, %v675_v8, %v677_v34  ;;  %v1233_v41 = vrot.slane %v1112_v29, 2  ;;  %v1545_v15 = vrot.slane %v1424_v48, 1 }
 0x126   : > { %v2021_v31 = vadd.f32 %v1989_v1, %v1861_v54  ;;  %v1668_v42 = vmul.f32 %v3556_v28, %v3691_v58  ;;  %v2312_v20 = vpop.eup %2311  ;;  %v3705_v49 = vadd.f32 %v1788_v43, %v1618_v27  ;;  %v990_v5 = vsel %vm368_vm0, %v987_v2, %v989_v46 }
 0x127   : > { %v751_v10 = vadd.f32 %v678_v6, %v506_v59  ;;  %v1343_v37 = vmul.f32 %v2389_v19, %v3656_v7  ;;  %v2116_v51 = vadd.f32 1.0, %v2312_v20  ;;  %v1234_v50 = vsel %vm613_vm1, %v1231_v53, %v1233_v41  ;;  %v3755_v6 = vld [vmem:[%s2373_s16 + $0x168] sm:$0xff]  ;;  %v3758_v41 = vld [vmem:[%s2373_s16 + $0x170] sm:$0xff] }
 0x128   : > { %v2053_v8 = vmul.f32 0.7978846, %v2021_v31  ;;  %v230_v56 = vmul.f32 %v2375_v11, %v3541_v38  ;;  %v1926_v63 = vmul.f32 0.044715, %v3705_v49  ;;  %v1546_v47 = vsel %vm368_vm0, %v1543_v21, %v1545_v15 }
 0x129   : > { %v819_v54 = vadd.f32 %v787_v3, %v751_v10  ;;  %v311_v57 = vmul.f32 %v2377_v12, %v3541_v38  ;;  %v2148_v2 = vmul.f32 %v2116_v51, %v1892_v33  ;;  %v1789_v26 = vrot.slane %v1668_v42, 2 }
 0x12a   : > { %2313 = vtanh.f32 %v2053_v8  ;;  %v3719_v40 = vmul.f32 %v2377_v12, %v3546_v35  ;;  %v1958_v53 = vmul.f32 %v1926_v63, %v3705_v49  ;;  %v556_v0 = vmul.f32 %v2379_v13, %v3541_v38 }
 0x12b   : > { %v1063_v44 = vadd.f32 %v990_v5, %v819_v54  ;;  %v434_v9 = vrot.slane %v311_v57, 1  ;;  %2181 = vst.msk [vmem:[%s2594_s22 + $0xb0] sm:$0xff] %vm2158_vm2, %v2148_v2  ;;  %v3729_v33 = vmul.f32 %v2379_v13, %v3546_v35  ;;  %v788_v39 = vmul.f32 %v2383_v16, %v3649_v62 }
 0x12c   : > { %v435_v21 = vrot.slane %v3719_v40, 1  ;;  %v869_v61 = vmul.f32 %v2385_v17, %v3649_v62  ;;  %v1990_v32 = vmul.f32 %v1958_v53, %v3705_v49  ;;  %v679_v55 = vrot.slane %v556_v0, 2 }
 0x12d   : > { %v1307_v23 = vadd.f32 %v1234_v50, %v1063_v44  ;;  %v3738_v38 = vmul.f32 %v2385_v17, %v3656_v7  ;;  %v680_v43 = vrot.slane %v3729_v33, 2  ;;  %v1113_v45 = vmul.f32 %v2387_v18, %v3649_v62 }
 0x12e   : > { %v436_v52 = vsel %vm368_vm0, %v434_v9, %v435_v21  ;;  %v991_v36 = vrot.slane %v869_v61, 1  ;;  %v2022_v30 = vadd.f32 %v1990_v32, %v3705_v49  ;;  %v1790_v1 = vsel %vm613_vm1, %v1787_v4, %v1789_v26 }
 0x12f   : > { %v1375_v34 = vadd.f32 %v1343_v37, %v1307_v23  ;;  %v507_v3 = vadd.f32 %v436_v52, %v230_v56  ;;  %v992_v29 = vrot.slane %v3738_v38, 1  ;;  %v681_v24 = vsel %vm613_vm1, %v679_v55, %v680_v43 }
 0x130   : > { %v3752_v46 = vmul.f32 %v2387_v18, %v3656_v7  ;;  %v1235_v48 = vrot.slane %v1113_v45, 2  ;;  %v2054_v27 = vmul.f32 0.7978846, %v2022_v30  ;;  %v1425_v15 = vmul.f32 %v2400_v25, %v3755_v6 }
 0x131   : > { %v1619_v59 = vadd.f32 %v1546_v47, %v1375_v34  ;;  %v752_v31 = vadd.f32 %v681_v24, %v507_v3  ;;  %v993_v14 = vsel %vm368_vm0, %v991_v36, %v992_v29  ;;  %v1426_v42 = vmul.f32 %v2400_v25, %v3758_v41 }
 0x132   : > { %v1236_v4 = vrot.slane %v3752_v46, 2  ;;  %v1669_v20 = vmul.f32 %v3556_v28, %v3755_v6  ;;  %2315 = vtanh.f32 %v2054_v27  ;;  %v3772_v37 = vmul.f32 %v3556_v28, %v3758_v41 }
 0x133   : > { %v1863_v10 = vadd.f32 %v1790_v1, %v1619_v59  ;;  %v820_v5 = vadd.f32 %v788_v39, %v752_v31  ;;  %v1547_v50 = vrot.slane %v1425_v15, 1  ;;  %v1548_v56 = vrot.slane %v1426_v42, 1 }
 0x134   : > { %v2314_v51 = vpop.eup %2313  ;;  %v1237_v8 = vsel %vm613_vm1, %v1235_v48, %v1236_v4  ;;  %v1791_v63 = vrot.slane %v1669_v20, 2  ;;  %v1344_v2 = vmul.f32 %v2389_v19, %v3755_v6  ;;  %v1894_v26 = vmul.f32 0.5, %v3705_v49 }
 0x135   : > { %v2117_v54 = vadd.f32 1.0, %v2314_v51  ;;  %v1927_v47 = vmul.f32 0.044715, %v1863_v10  ;;  %v1064_v57 = vadd.f32 %v993_v14, %v820_v5  ;;  %v1792_v40 = vrot.slane %v3772_v37, 2 }
 0x136   : > { %v231_v53 = vmul.f32 %v2375_v11, %v3546_v35  ;;  %v313_v44 = vmul.f32 %v2377_v12, %v3589_v60  ;;  %v558_v39 = vmul.f32 %v2379_v13, %v3589_v60  ;;  %v1549_v61 = vsel %vm368_vm0, %v1547_v50, %v1548_v56 }
 0x137   : > { %v2149_v9 = vmul.f32 %v2117_v54, %v3701_v22  ;;  %v1959_v0 = vmul.f32 %v1927_v47, %v1863_v10  ;;  %v1308_v33 = vadd.f32 %v1237_v8, %v1064_v57  ;;  %v1793_v49 = vsel %vm613_vm1, %v1791_v63, %v1792_v40  ;;  %v3795_v22 = vld [vmem:[%s2373_s16 + $0x178] sm:$0x3] }
 0x138   : > { %v437_v32 = vrot.slane %v313_v44, 1  ;;  %v871_v35 = vmul.f32 %v2385_v17, %v3691_v58  ;;  %v682_v52 = vrot.slane %v558_v39, 2  ;;  %v1115_v60 = vmul.f32 %v2387_v18, %v3691_v58 }
 0x139   : > { %2182 = vst.msk [vmem:[%s2594_s22 + $0xb8] sm:$0xff] %vm2158_vm2, %v2149_v9  ;;  %v1991_v23 = vmul.f32 %v1959_v0, %v1863_v10  ;;  %v1376_v55 = vadd.f32 %v1344_v2, %v1308_v33  ;;  %v789_v45 = vmul.f32 %v2383_v16, %v3656_v7  ;;  %v1427_v34 = vmul.f32 %v2400_v25, %v3795_v22 }
 0x13a   : > { %v438_v36 = vsel %vm368_vm0, %v435_v21, %v437_v32  ;;  %v994_v30 = vrot.slane %v871_v35, 1  ;;  %v683_v46 = vsel %vm613_vm1, %v680_v43, %v682_v52  ;;  %v3805_v48 = vmul.f32 0.5, %v1863_v10 }
 0x13b   : > { %v2023_v3 = vadd.f32 %v1991_v23, %v1863_v10  ;;  %v1620_v1 = vadd.f32 %v1549_v61, %v1376_v55  ;;  %v508_v24 = vadd.f32 %v438_v36, %v231_v53  ;;  %v1238_v27 = vrot.slane %v1115_v60, 2 }
 0x13c   : > { %v1550_v59 = vrot.slane %v1427_v34, 1  ;;  %v1671_v31 = vmul.f32 %v3556_v28, %v3795_v22  ;;  %v2316_v21 = vpop.eup %2315  ;;  %v1345_v20 = vmul.f32 %v2389_v19, %v3758_v41  ;;  %v995_v43 = vsel %vm368_vm0, %v992_v29, %v994_v30 }
 0x13d   : > { %v2055_v14 = vmul.f32 0.7978846, %v2023_v3  ;;  %v1864_v15 = vadd.f32 %v1793_v49, %v1620_v1  ;;  %v753_v42 = vadd.f32 %v683_v46, %v508_v24  ;;  %v2118_v5 = vadd.f32 1.0, %v2316_v21  ;;  %v3860_v46 = vld [vmem:[%s2373_s16 + $0x188] sm:$0xff] }
 0x13e   : > { %v1239_v10 = vsel %vm613_vm1, %v1236_v4, %v1238_v27  ;;  %v232_v51 = vmul.f32 %v2375_v11, %v3649_v62  ;;  %v1551_v63 = vsel %vm368_vm0, %v1548_v56, %v1550_v59  ;;  %v1794_v47 = vrot.slane %v1671_v31, 2 }
 0x13f   : > { %2317 = vtanh.f32 %v2055_v14  ;;  %v1928_v8 = vmul.f32 0.044715, %v1864_v15  ;;  %v821_v50 = vadd.f32 %v789_v45, %v753_v42  ;;  %v2150_v54 = vmul.f32 %v2118_v5, %v1894_v26  ;;  %v3852_v45 = vld [vmem:[%s2373_s16 + $0x180] sm:$0xff] }
 0x140   : > { %v314_v57 = vmul.f32 %v2377_v12, %v3649_v62  ;;  %v3822_v38 = vmul.f32 %v2377_v12, %v3656_v7  ;;  %v559_v4 = vmul.f32 %v2379_v13, %v3649_v62  ;;  %v3828_v53 = vmul.f32 %v2379_v13, %v3656_v7 }
 0x141   : > { %v1960_v29 = vmul.f32 %v1928_v8, %v1864_v15  ;;  %v1065_v2 = vadd.f32 %v995_v43, %v821_v50  ;;  %2183 = vst.msk [vmem:[%s2594_s22 + $0xc0] sm:$0xff] %vm2158_vm2, %v2150_v54  ;;  %v790_v44 = vmul.f32 %v2383_v16, %v3755_v6  ;;  %v872_v9 = vmul.f32 %v2385_v17, %v3755_v6 }
 0x142   : > { %v439_v56 = vrot.slane %v314_v57, 1  ;;  %v440_v26 = vrot.slane %v3822_v38, 1  ;;  %v684_v39 = vrot.slane %v559_v4, 2  ;;  %v685_v62 = vrot.slane %v3828_v53, 2 }
 0x143   : > { %v1992_v0 = vmul.f32 %v1960_v29, %v1864_v15  ;;  %v1309_v33 = vadd.f32 %v1239_v10, %v1065_v2  ;;  %v3843_v49 = vmul.f32 %v2385_v17, %v3758_v41  ;;  %v996_v32 = vrot.slane %v872_v9, 1 }
 0x144   : > { %v441_v61 = vsel %vm368_vm0, %v439_v56, %v440_v26  ;;  %v1116_v35 = vmul.f32 %v2387_v18, %v3755_v6  ;;  %v686_v60 = vsel %vm613_vm1, %v684_v39, %v685_v62  ;;  %v1795_v36 = vsel %vm613_vm1, %v1792_v40, %v1794_v47 }
 0x145   : > { %v2024_v23 = vadd.f32 %v1992_v0, %v1864_v15  ;;  %v1377_v55 = vadd.f32 %v1345_v20, %v1309_v33  ;;  %v509_v52 = vadd.f32 %v441_v61, %v232_v51  ;;  %v997_v30 = vrot.slane %v3843_v49, 1  ;;  %v3895_v49 = vld [vmem:[%s2373_s16 + $0x190] sm:$0x3] }
 0x146   : > { %v3857_v34 = vmul.f32 %v2387_v18, %v3758_v41  ;;  %v1240_v3 = vrot.slane %v1116_v35, 2  ;;  %v1428_v59 = vmul.f32 %v2400_v25, %v3852_v45  ;;  %v1429_v31 = vmul.f32 %v2400_v25, %v3860_v46 }
 0x147   : > { %v2056_v1 = vmul.f32 0.7978846, %v2024_v23  ;;  %v1621_v24 = vadd.f32 %v1551_v63, %v1377_v55  ;;  %v754_v27 = vadd.f32 %v686_v60, %v509_v52  ;;  %v998_v37 = vsel %vm368_vm0, %v996_v32, %v997_v30 }
 0x148   : > { %v1241_v40 = vrot.slane %v3857_v34, 2  ;;  %v1672_v21 = vmul.f32 %v3556_v28, %v3852_v45  ;;  %v1552_v5 = vrot.slane %v1428_v59, 1  ;;  %v1553_v51 = vrot.slane %v1429_v31, 1 }
 0x149   : > { %v2318_v14 = vpop.eup %2317  ;;  %2319 = vtanh.f32 %v2056_v1  ;;  %v1865_v42 = vadd.f32 %v1795_v36, %v1621_v24  ;;  %v822_v20 = vadd.f32 %v790_v44, %v754_v27  ;;  %v3873_v8 = vmul.f32 %v3556_v28, %v3860_v46 }
 0x14a   : > { %v2119_v43 = vadd.f32 1.0, %v2318_v14  ;;  %v1242_v10 = vsel %vm613_vm1, %v1240_v3, %v1241_v40  ;;  %v1896_v50 = vmul.f32 0.5, %v1864_v15  ;;  %v1346_v47 = vmul.f32 %v2389_v19, %v3852_v45 }
 0x14b   : > { %v1929_v63 = vmul.f32 0.044715, %v1865_v42  ;;  %v1066_v54 = vadd.f32 %v998_v37, %v822_v20  ;;  %v3878_v29 = vmul.f32 0.5, %v1865_v42  ;;  %v1796_v2 = vrot.slane %v1672_v21, 2 }
 0x14c   : > { %v2151_v57 = vmul.f32 %v2119_v43, %v3805_v48  ;;  %v1797_v4 = vrot.slane %v3873_v8, 2  ;;  %v316_v44 = vmul.f32 %v2377_v12, %v3691_v58  ;;  %v561_v15 = vmul.f32 %v2379_v13, %v3691_v58 }
 0x14d   : > { %v1961_v53 = vmul.f32 %v1929_v63, %v1865_v42  ;;  %v1310_v56 = vadd.f32 %v1242_v10, %v1066_v54  ;;  %v1554_v9 = vsel %vm368_vm0, %v1552_v5, %v1553_v51  ;;  %v233_v48 = vmul.f32 %v2375_v11, %v3656_v7 }
 0x14e   : > { %2184 = vst.msk [vmem:[%s2594_s22 + $0xc8] sm:$0xff] %vm2158_vm2, %v2151_v57  ;;  %v874_v0 = vmul.f32 %v2385_v17, %v3795_v22  ;;  %v1118_v33 = vmul.f32 %v2387_v18, %v3795_v22  ;;  %v442_v32 = vrot.slane %v316_v44, 1  ;;  %v687_v35 = vrot.slane %v561_v15, 2 }
 0x14f   : > { %v1993_v39 = vmul.f32 %v1961_v53, %v1865_v42  ;;  %v1378_v61 = vadd.f32 %v1346_v47, %v1310_v56  ;;  %v1798_v58 = vsel %vm613_vm1, %v1796_v2, %v1797_v4  ;;  %v1430_v7 = vmul.f32 %v2400_v25, %v3895_v49 }
 0x150   : > { %v999_v23 = vrot.slane %v874_v0, 1  ;;  %v1243_v55 = vrot.slane %v1118_v33, 2  ;;  %v443_v36 = vsel %vm368_vm0, %v440_v26, %v442_v32  ;;  %v688_v34 = vsel %vm613_vm1, %v685_v62, %v687_v35  ;;  %v195_v0 = vld [vmem:[%s2373_s16 + $0x198] sm:$0xff]  ;;  %v3952_v35 = vld [vmem:[%s2373_s16 + $0x1a0] sm:$0xff] }
 0x151   : > { %v2025_v52 = vadd.f32 %v1993_v39, %v1865_v42  ;;  %v1622_v60 = vadd.f32 %v1554_v9, %v1378_v61  ;;  %v510_v3 = vadd.f32 %v443_v36, %v233_v48  ;;  %v791_v1 = vmul.f32 %v2383_v16, %v3758_v41 }
 0x152   : > { %v1347_v24 = vmul.f32 %v2389_v19, %v3860_v46  ;;  %v1555_v27 = vrot.slane %v1430_v7, 1  ;;  %v1000_v21 = vsel %vm368_vm0, %v997_v30, %v999_v23  ;;  %v1674_v38 = vmul.f32 %v3556_v28, %v3895_v49 }
 0x153   : > { %v2320_v59 = vpop.eup %2319  ;;  %v2057_v37 = vmul.f32 0.7978846, %v2025_v52  ;;  %v3910_v31 = vadd.f32 %v1798_v58, %v1622_v60  ;;  %v755_v62 = vadd.f32 %v688_v34, %v510_v3  ;;  %v1244_v14 = vsel %vm613_vm1, %v1241_v40, %v1243_v55 }
 0x154   : > { %v2120_v26 = vadd.f32 1.0, %v2320_v59  ;;  %v317_v42 = vmul.f32 %v2377_v12, %v3755_v6  ;;  %v1556_v5 = vsel %vm368_vm0, %v1553_v51, %v1555_v27  ;;  %v234_v43 = vmul.f32 %v2375_v11, %v3755_v6 }
 0x155   : > { %2321 = vtanh.f32 %v2057_v37  ;;  %v1930_v20 = vmul.f32 0.044715, %v3910_v31  ;;  %v823_v10 = vadd.f32 %v791_v1, %v755_v62  ;;  %v3924_v63 = vmul.f32 %v2377_v12, %v3758_v41 }
 0x156   : > { %v2152_v30 = vmul.f32 %v2120_v26, %v1896_v50  ;;  %v444_v54 = vrot.slane %v317_v42, 1  ;;  %v1799_v47 = vrot.slane %v1674_v38, 2  ;;  %v562_v57 = vmul.f32 %v2379_v13, %v3755_v6 }
 0x157   : > { %v1962_v40 = vmul.f32 %v1930_v20, %v3910_v31  ;;  %v3931_v51 = vmul.f32 %v2379_v13, %v3758_v41  ;;  %v1067_v50 = vadd.f32 %v1000_v21, %v823_v10  ;;  %v445_v2 = vrot.slane %v3924_v63, 1 }
 0x158   : > { %2185 = vst.msk [vmem:[%s2594_s22 + $0xd0] sm:$0xff] %vm2158_vm2, %v2152_v30  ;;  %v792_v53 = vmul.f32 %v2383_v16, %v3852_v45  ;;  %v875_v56 = vmul.f32 %v2385_v17, %v3852_v45  ;;  %v689_v15 = vrot.slane %v562_v57, 2  ;;  %v3944_v9 = vmul.f32 %v2385_v17, %v3860_v46 }
 0x159   : > { %v1994_v44 = vmul.f32 %v1962_v40, %v3910_v31  ;;  %v690_v6 = vrot.slane %v3931_v51, 2  ;;  %v1311_v48 = vadd.f32 %v1244_v14, %v1067_v50  ;;  %v446_v33 = vsel %vm368_vm0, %v444_v54, %v445_v2 }
 0x15a   : > { %v1001_v39 = vrot.slane %v875_v56, 1  ;;  %v1119_v61 = vmul.f32 %v2387_v18, %v3852_v45  ;;  %v511_v58 = vadd.f32 %v446_v33, %v234_v43  ;;  %v1002_v55 = vrot.slane %v3944_v9, 1 }
 0x15b   : > { %v2026_v32 = vadd.f32 %v1994_v44, %v3910_v31  ;;  %v691_v23 = vsel %vm613_vm1, %v689_v15, %v690_v6  ;;  %v1379_v7 = vadd.f32 %v1347_v24, %v1311_v48  ;;  %v1800_v52 = vsel %vm613_vm1, %v1797_v4, %v1799_v47 }
 0x15c   : > { %v3961_v60 = vmul.f32 %v2387_v18, %v3860_v46  ;;  %v1245_v36 = vrot.slane %v1119_v61, 2  ;;  %v756_v34 = vadd.f32 %v691_v23, %v511_v58  ;;  %v1003_v3 = vsel %vm368_vm0, %v1001_v39, %v1002_v55 }
 0x15d   : > { %v2058_v45 = vmul.f32 0.7978846, %v2026_v32  ;;  %v1431_v1 = vmul.f32 %v2400_v25, %v195_v0  ;;  %v1623_v27 = vadd.f32 %v1556_v5, %v1379_v7  ;;  %v3968_v24 = vmul.f32 %v2400_v25, %v3952_v35 }
 0x15e   : > { %v1246_v59 = vrot.slane %v3961_v60, 2  ;;  %v1675_v8 = vmul.f32 %v3556_v28, %v195_v0  ;;  %v824_v37 = vadd.f32 %v792_v53, %v756_v34  ;;  %v1676_v38 = vmul.f32 %v3556_v28, %v3952_v35 }
 0x15f   : > { %v2322_v4 = vpop.eup %2321  ;;  %2323 = vtanh.f32 %v2058_v45  ;;  %v1557_v21 = vrot.slane %v1431_v1, 1  ;;  %v1867_v62 = vadd.f32 %v1800_v52, %v1623_v27  ;;  %v1558_v42 = vrot.slane %v3968_v24, 1 }
 0x160   : > { %v2121_v26 = vadd.f32 1.0, %v2322_v4  ;;  %v1247_v14 = vsel %vm613_vm1, %v1245_v36, %v1246_v59  ;;  %v1068_v20 = vadd.f32 %v1003_v3, %v824_v37  ;;  %v1348_v5 = vmul.f32 %v2389_v19, %v195_v0 }
 0x161   : > { %v1931_v30 = vmul.f32 0.044715, %v1867_v62  ;;  %v1801_v10 = vrot.slane %v1675_v8, 2  ;;  %v1802_v63 = vrot.slane %v1676_v38, 2  ;;  %v319_v40 = vmul.f32 %v2377_v12, %v3795_v22 }
 0x162   : > { %v2153_v43 = vmul.f32 %v2121_v26, %v3878_v29  ;;  %v1312_v54 = vadd.f32 %v1247_v14, %v1068_v20  ;;  %v564_v47 = vmul.f32 %v2379_v13, %v3795_v22  ;;  %v1559_v51 = vsel %vm368_vm0, %v1557_v21, %v1558_v42  ;;  %v197_v22 = vld [vmem:[%s2373_s16 + $0x1a8] sm:$0x3] }
 0x163   : > { %v1963_v57 = vmul.f32 %v1931_v30, %v1867_v62  ;;  %v235_v50 = vmul.f32 %v2375_v11, %v3758_v41  ;;  %v877_v29 = vmul.f32 %v2385_v17, %v3895_v49  ;;  %v447_v56 = vrot.slane %v319_v40, 1 }
 0x164   : > { %2186 = vst.msk [vmem:[%s2594_s22 + $0xd8] sm:$0xff] %vm2158_vm2, %v2153_v43  ;;  %v1380_v53 = vadd.f32 %v1348_v5, %v1312_v54  ;;  %v692_v44 = vrot.slane %v564_v47, 2  ;;  %v1121_v12 = vmul.f32 %v2387_v18, %v3895_v49  ;;  %v1803_v13 = vsel %vm613_vm1, %v1801_v10, %v1802_v63 }
 0x165   : > { %v1995_v15 = vmul.f32 %v1963_v57, %v1867_v62  ;;  %v448_v48 = vsel %vm368_vm0, %v445_v2, %v447_v56  ;;  %v1004_v33 = vrot.slane %v877_v29, 1  ;;  %v1898_v11 = vmul.f32 0.5, %v3910_v31 }
 0x166   : > { %v1624_v9 = vadd.f32 %v1559_v51, %v1380_v53  ;;  %v693_v0 = vsel %vm613_vm1, %v690_v6, %v692_v44  ;;  %v512_v17 = vadd.f32 %v448_v48, %v235_v50  ;;  %v793_v39 = vmul.f32 %v2383_v16, %v3860_v46 }
 0x167   : > { %v2027_v41 = vadd.f32 %v1995_v15, %v1867_v62  ;;  %v1248_v49 = vrot.slane %v1121_v12, 2  ;;  %v1433_v32 = vmul.f32 %v2400_v25, %v197_v22  ;;  %v1005_v6 = vsel %vm368_vm0, %v1002_v55, %v1004_v33 }
 0x168   : > { %v1868_v18 = vadd.f32 %v1803_v13, %v1624_v9  ;;  %v757_v7 = vadd.f32 %v693_v0, %v512_v17  ;;  %v1677_v52 = vmul.f32 %v3556_v28, %v197_v22  ;;  %v1349_v25 = vmul.f32 %v2389_v19, %v3952_v35 }
 0x169   : > { %v2324_v61 = vpop.eup %2323  ;;  %v2059_v23 = vmul.f32 0.7978846, %v2027_v41  ;;  %v1249_v16 = vsel %vm613_vm1, %v1246_v59, %v1248_v49  ;;  %v1560_v46 = vrot.slane %v1433_v32, 1  ;;  %v1899_v59 = vmul.f32 0.5, %v1867_v62 }
 0x16a   : > { %v2122_v58 = vadd.f32 1.0, %v2324_v61  ;;  %v1932_v2 = vmul.f32 0.044715, %v1868_v18  ;;  %v825_v60 = vadd.f32 %v793_v39, %v757_v7  ;;  %v1804_v3 = vrot.slane %v1677_v52, 2 }
 0x16b   : > { %2325 = vtanh.f32 %v2059_v23  ;;  %v1561_v28 = vsel %vm368_vm0, %v1558_v42, %v1560_v46  ;;  %v1900_v20 = vmul.f32 0.5, %v1868_v18 }
 0x16c   : > { %v2154_v31 = vmul.f32 %v2122_v58, %v1898_v11  ;;  %v1964_v36 = vmul.f32 %v1932_v2, %v1868_v18  ;;  %v1069_v45 = vadd.f32 %v1005_v6, %v825_v60  ;;  %v1805_v8 = vsel %vm613_vm1, %v1802_v63, %v1804_v3 }
 0x16e   : > { %2187 = vst.msk [vmem:[%s2594_s22 + $0xe0] sm:$0xff] %vm2158_vm2, %v2154_v31  ;;  %v1996_v34 = vmul.f32 %v1964_v36, %v1868_v18  ;;  %v1313_v1 = vadd.f32 %v1249_v16, %v1069_v45 }
 0x170   : > { %v2028_v55 = vadd.f32 %v1996_v34, %v1868_v18  ;;  %v1381_v27 = vadd.f32 %v1349_v25, %v1313_v1 }
 0x172   : > { %v2060_v24 = vmul.f32 0.7978846, %v2028_v55  ;;  %v1625_v4 = vadd.f32 %v1561_v28, %v1381_v27 }
 0x174   : > { %2327 = vtanh.f32 %v2060_v24  ;;  %v1869_v21 = vadd.f32 %v1805_v8, %v1625_v4 }
 0x175   : > { %v2326_v37 = vpop.eup %2325 }
 0x176   : > { %v2123_v38 = vadd.f32 1.0, %v2326_v37  ;;  %v1933_v26 = vmul.f32 0.044715, %v1869_v21  ;;  %v1901_v62 = vmul.f32 0.5, %v1869_v21 }
 0x178   : > { %v2155_v19 = vmul.f32 %v2123_v38, %v1899_v59  ;;  %v1965_v35 = vmul.f32 %v1933_v26, %v1869_v21 }
 0x17a   : > { %2188 = vst.msk [vmem:[%s2594_s22 + $0xe8] sm:$0xff] %vm2158_vm2, %v2155_v19  ;;  %v1997_v14 = vmul.f32 %v1965_v35, %v1869_v21 }
 0x17c   : > { %v2029_v42 = vadd.f32 %v1997_v14, %v1869_v21 }
 0x17e   : > { %v2328_v5 = vpop.eup %2327  ;;  %v2061_v30 = vmul.f32 0.7978846, %v2029_v42 }
 0x17f   : > { %v2124_v43 = vadd.f32 1.0, %v2328_v5 }
 0x180   : > { %2329 = vtanh.f32 %v2061_v30 }
 0x181   : > { %v2156_v10 = vmul.f32 %v2124_v43, %v1900_v20 }
 0x183   : > { %2189 = vst.msk [vmem:[%s2594_s22 + $0xf0] sm:$0xff] %vm2158_vm2, %v2156_v10 }
 0x18a   : > { %v2330_v63 = vpop.eup %2329 }
 0x18b   : > { %v2125_v54 = vadd.f32 1.0, %v2330_v63 }
 0x18d   : > { %v2157_v40 = vmul.f32 %v2125_v54, %v1901_v62 }
 0x18f   : > { %2190 = vst.msk [vmem:[%s2594_s22 + $0xf8] sm:$0xff] %vm2158_vm2, %v2157_v40 }
 0x190 PF: > { %s12_s9 = sadd.s32 1, %s2339_s9  }
 0x191   : > { %p9_p4 = scmp.ge.s32.totalorder %s12_s9, 4  }
 0x193   :  { %11 = sbr.rel (!%p9_p4) target bundleno = 1 (0x1), region = 58 }

</bundles_post_ra>
